<compile_context>
chip_gen: v5e
topology: v5e:2x2
jax: 0.10.0
libtpu: 0.0.40
codegen_flags: <defaults>
</compile_context>

<pallas_src>
import functools

import jax
import jax.numpy as jnp
from jax.experimental import pallas as pl
from jax.experimental.pallas import tpu as pltpu

C_HALF = 128   # channels of x (and y)
C_IN = 256     # channels after concat
C_QKV = 384    # 3 * 128
C_HEAD = 128   # per-Q/K/V channel dim


def _pick_row_tile(h, w):
    """Largest even divisor TH of h with TH*w <= 1024 and TH <= 64.

    TH*w <= 1024 keeps the per-step pixel count big enough to fill the MXU M dim on
    the 1x1-conv matmul and amortize per-step overhead; TH <= 64 bounds the per-row
    softmax intermediates (TH, 128, 128) so the whole step stays well under the 32 MiB
    VMEM limit on every chip generation (v5e/v6e/v7x)."""
    cands = [t for t in range(2, h + 1, 2) if h % t == 0]
    ok = [t for t in cands if t * w <= 1024 and t <= 64]
    return max(ok) if ok else min(cands)


def _self_attention_kernel(xm_ref, xt_ref, ym_ref, yt_ref, wdw_ref, wpw_ref, pwb_ref,
                           out_ref, xslab, yslab, *, TH, W):
    # xm/ym: (1, TH, W+2, 128) rows [r0, r0+TH) of the zero-padded half-input
    # xt/yt: (1, 2,  W+2, 128) rows [r0+TH, r0+TH+2)   (bottom halo)
    # wdw:   (9, 256)   depthwise 3x3 taps, BN scale folded in
    # wpw:   (256, 384) bf16 pointwise 1x1 conv weights
    # pwb:   (1, 384)   folded BN bias pushed through the 1x1 conv
    # out:   (1, TH, W, 128) lane-dense attention output

    # Assemble the (TH+2, W+2, 128) halo slab per 128-channel half in VMEM scratch
    # (single copy; the 3x3 taps then read it with static offsets).
    xslab[0:TH, :, :] = xm_ref[0]
    xslab[TH:TH + 2, :, :] = xt_ref[0]
    yslab[0:TH, :, :] = ym_ref[0]
    yslab[TH:TH + 2, :, :] = yt_ref[0]

    wdw = wdw_ref[...]                       # (9, 256)
    wdw_x = wdw[:, :C_HALF]                  # (9, 128)
    wdw_y = wdw[:, C_HALF:]

    def depthwise(slab, wtaps):
        # 3x3 depthwise conv (stride 1, pad 1) as 9 shifted multiply-adds on the VPU.
        # Channels sit on the lane dim (exactly 128), so each tap is a full-lane FMA.
        # TODO(synk): the kx shifts could use pltpu.roll (XLU slot) instead of
        # sublane-offset slices; kept as slices for lowering robustness.
        acc = jnp.zeros((TH, W, C_HALF), jnp.float32)
        for ky in range(3):
            rows = slab[ky:ky + TH]                          # (TH, W+2, 128)
            for kx in range(3):
                acc = acc + rows[:, kx:kx + W, :] * wtaps[3 * ky + kx]
        return acc

    acc_x = depthwise(xslab[...], wdw_x)     # (TH, W, 128) f32
    acc_y = depthwise(yslab[...], wdw_y)

    # Pointwise 1x1 conv on the MXU: bf16 operands, f32 accumulation.  The concat of
    # the x/y halves is realized as a sum of two half-contractions.  BN bias enters
    # as the precomputed (bias @ W_pw) vector.  SiLU stays in f32.
    wpw = wpw_ref[...]                       # (256, 384) bf16
    fm = (jnp.dot(acc_x.reshape(TH * W, C_HALF).astype(jnp.bfloat16), wpw[:C_HALF, :],
                  preferred_element_type=jnp.float32)
          + jnp.dot(acc_y.reshape(TH * W, C_HALF).astype(jnp.bfloat16), wpw[C_HALF:, :],
                    preferred_element_type=jnp.float32)
          + pwb_ref[...])                    # (TH*W, 384) f32
    fm = fm * jax.nn.sigmoid(fm)             # SiLU
    fm = fm.reshape(TH, W, C_QKV).astype(jnp.bfloat16)

    q = fm[:, :, 0:C_HEAD]                   # (TH, W, 128) bf16
    k = fm[:, :, C_HEAD:2 * C_HEAD]
    v = fm[:, :, 2 * C_HEAD:3 * C_HEAD]

    # Per spatial row h: dots = Q @ K^T -> (128, 128); softmax over the last axis.
    dots = jnp.einsum('hwc,hwd->hcd', q, k, preferred_element_type=jnp.float32)
    dots = dots - jnp.max(dots, axis=-1, keepdims=True)
    e = jnp.exp(dots)                                           # EUP
    inv = pl.reciprocal(jnp.sum(e, axis=-1, keepdims=True), approx=True)
    attn = (e * inv).astype(jnp.bfloat16)    # (TH, 128, 128)

    # Lane-dense result: out[h, w, c] = sum_d attn[h, c, d] * V[h, d, w]
    out = jnp.einsum('hwd,hcd->hwc', v, attn, preferred_element_type=jnp.float32)
    out_ref[0] = out.astype(out_ref.dtype)


def self_attention_pallas(x, y, w_dw, bn_scale, bn_bias, w_pw):
    """x, y: NCHW (b, 128, h, w) float32; eval-mode BN affine.  Returns (b, 128, h, w)."""
    b, c, h, w = x.shape
    assert c == C_HALF and y.shape == x.shape
    assert h % 2 == 0, "spatial height must be even"

    TH = _pick_row_tile(h, w)
    n_t = h // TH

    # Fold eval-mode BatchNorm: per-channel scale into the depthwise taps, bias pushed
    # through the (linear) 1x1 conv as a single (384,) vector.
    # TODO(synk): training-mode BatchNorm (batch statistics) is not modeled here.
    w_dw_f = (w_dw * bn_scale[None, None, :]).reshape(9, C_IN).astype(jnp.float32)
    pw_bias = (bn_bias @ w_pw).reshape(1, C_QKV).astype(jnp.float32)
    w_pw_bf = w_pw.astype(jnp.bfloat16)

    def prep(t):  # NCHW -> NHWC with a 1-pixel zero halo on H and W (conv padding=1)
        t = jnp.transpose(t, (0, 2, 3, 1))
        return jnp.pad(t, ((0, 0), (1, 1), (1, 1), (0, 0)))

    xz = prep(x)                             # (b, h+2, w+2, 128)
    yz = prep(y)

    # Row-tile j needs padded rows [j*TH, j*TH + TH + 2):
    #   main block  = padded rows [j*TH, j*TH + TH)          (blocked by TH)
    #   tail block  = padded rows [(j+1)*TH, (j+1)*TH + 2)   (blocked by 2)
    main_spec = pl.BlockSpec((1, TH, w + 2, C_HALF), lambda i, j: (i, j, 0, 0))
    tail_spec = pl.BlockSpec((1, 2, w + 2, C_HALF),
                             lambda i, j: (i, (j + 1) * (TH // 2), 0, 0))

    kernel = functools.partial(_self_attention_kernel, TH=TH, W=w)
    out = pl.pallas_call(
        kernel,
        out_shape=jax.ShapeDtypeStruct((b, h, w, C_HEAD), jnp.float32),
        grid_spec=pltpu.PrefetchScalarGridSpec(
            num_scalar_prefetch=0,
            grid=(b, n_t),
            in_specs=[
                main_spec, tail_spec,        # x half (same padded array, two views)
                main_spec, tail_spec,        # y half
                pl.BlockSpec((9, C_IN), lambda i, j: (0, 0)),
                pl.BlockSpec((C_IN, C_QKV), lambda i, j: (0, 0)),
                pl.BlockSpec((1, C_QKV), lambda i, j: (0, 0)),
            ],
            out_specs=pl.BlockSpec((1, TH, w, C_HEAD), lambda i, j: (i, j, 0, 0)),
            scratch_shapes=[pltpu.VMEM((TH + 2, w + 2, C_HALF), jnp.float32),
                            pltpu.VMEM((TH + 2, w + 2, C_HALF), jnp.float32)],
        ),
        compiler_params=pltpu.CompilerParams(
            dimension_semantics=("parallel", "parallel"),
            vmem_limit_bytes=32 * 1024 * 1024),
    )(xz, xz, yz, yz, w_dw_f, w_pw_bf, pw_bias)

    # Kernel output is (b, h, w, 128) lane-dense.  PyTorch builds a contiguous
    # (b, h, 128, w) tensor and reinterprets it as (b, 128, h, w) via .view().
    return jnp.transpose(out, (0, 1, 3, 2)).reshape(b, C_HALF, h, w)


def self_attention_reference(x, y, w_dw, bn_scale, bn_bias, w_pw):
    """Plain-JAX f32 reference mirroring the PyTorch forward (eval-mode BN)."""
    b, c, h, w = x.shape
    xy = jnp.concatenate([x, y], axis=1)                       # NCHW
    dw_oihw = jnp.transpose(w_dw, (2, 0, 1))[:, None, :, :]    # (256, 1, 3, 3)
    z = jax.lax.conv_general_dilated(
        xy, dw_oihw, window_strides=(1, 1), padding=((1, 1), (1, 1)),
        dimension_numbers=('NCHW', 'OIHW', 'NCHW'), feature_group_count=C_IN)
    z = z * bn_scale[None, :, None, None] + bn_bias[None, :, None, None]
    pw_oihw = jnp.transpose(w_pw, (1, 0))[:, :, None, None]    # (384, 256, 1, 1)
    fm = jax.lax.conv_general_dilated(
        z, pw_oihw, (1, 1), ((0, 0), (0, 0)),
        dimension_numbers=('NCHW', 'OIHW', 'NCHW'))
    fm = fm * jax.nn.sigmoid(fm)                               # SiLU
    qkv = fm.reshape(b, 3, C_HEAD, h, w)
    Q = jnp.transpose(qkv[:, 0], (0, 2, 1, 3))                 # (b, h, 128, w)
    K = jnp.transpose(qkv[:, 1], (0, 2, 1, 3))
    V = jnp.transpose(qkv[:, 2], (0, 2, 1, 3))
    dots = jnp.einsum('bhcw,bhdw->bhcd', Q, K)
    attn = jax.nn.softmax(dots, axis=-1)
    out = jnp.einsum('bhcd,bhdw->bhcw', attn, V)               # (b, h, 128, w)
    return out.reshape(b, C_HALF, h, w)                        # == .view(b, c, h, w)


if __name__ == "__main__":
    B, H, W = 2, 8, 8
    key = jax.random.PRNGKey(0)
    ks = jax.random.split(key, 9)

    x = jax.random.normal(ks[0], (B, C_HALF, H, W), jnp.float32)
    y = jax.random.normal(ks[1], (B, C_HALF, H, W), jnp.float32)

    # Deterministic synthetic parameters (shapes from SeparableConvBNReLU(256, 384, 3)).
    w_dw = jax.random.normal(ks[2], (3, 3, C_IN), jnp.float32) * 0.1         # depthwise 3x3, no bias
    gamma = jax.random.uniform(ks[3], (C_IN,), minval=0.5, maxval=1.5)       # BN weight
    beta = jax.random.normal(ks[4], (C_IN,)) * 0.1                           # BN bias
    run_mean = jax.random.normal(ks[5], (C_IN,)) * 0.1                       # BN running_mean
    run_var = jax.random.uniform(ks[6], (C_IN,), minval=0.5, maxval=1.5)     # BN running_var
    eps = 1e-5
    bn_scale = gamma / jnp.sqrt(run_var + eps)
    bn_bias = beta - run_mean * bn_scale
    w_pw = jax.random.normal(ks[7], (C_IN, C_QKV), jnp.float32) / jnp.sqrt(C_IN)  # 1x1 conv, no bias

    out = self_attention_pallas(x, y, w_dw, bn_scale, bn_bias, w_pw)
    out = jax.block_until_ready(out)

    ref = jax.block_until_ready(self_attention_reference(x, y, w_dw, bn_scale, bn_bias, w_pw))
    assert out.shape == (B, C_HALF, H, W)
    err = float(jnp.max(jnp.abs(out - ref)))
    # bf16 MXU operands -> looser tolerance than the all-f32 version.
    assert jnp.allclose(out, ref, rtol=3e-2, atol=3e-2), err

    print("KERNEL_OK")
</pallas_src>

<mosaic_0001>
module attributes {stable_mosaic.version = 11 : i64} {
  func.func @_self_attention_kernel(%arg0: i32, %arg1: i32, %arg2: memref<1x8x10x128xf32, #tpu.memory_space<vmem>>, %arg3: memref<1x2x10x128xf32, #tpu.memory_space<vmem>>, %arg4: memref<1x8x10x128xf32, #tpu.memory_space<vmem>>, %arg5: memref<1x2x10x128xf32, #tpu.memory_space<vmem>>, %arg6: memref<9x256xf32, #tpu.memory_space<vmem>>, %arg7: memref<256x384xbf16, #tpu.memory_space<vmem>>, %arg8: memref<1x384xf32, #tpu.memory_space<vmem>>, %arg9: memref<1x8x8x128xf32, #tpu.memory_space<vmem>>, %arg10: memref<10x10x128xf32, #tpu.memory_space<vmem>>, %arg11: memref<10x10x128xf32, #tpu.memory_space<vmem>>) attributes {dimension_semantics = [#tpu.dimension_semantics<parallel>, #tpu.dimension_semantics<parallel>], iteration_bounds = array<i64: 2, 1>, scalar_prefetch = 0 : i64, scratch_operands = 2 : i64, tpu.core_type = #tpu.core_type<tc>, window_params = [{transform_indices = @transform_0, window_bounds = array<i64: 1, 8, 10, 128>}, {transform_indices = @transform_1, window_bounds = array<i64: 1, 2, 10, 128>}, {transform_indices = @transform_2, window_bounds = array<i64: 1, 8, 10, 128>}, {transform_indices = @transform_3, window_bounds = array<i64: 1, 2, 10, 128>}, {pipeline_mode = #tpu.pipeline_mode<synchronous>, transform_indices = @transform_4, window_bounds = array<i64: 9, 256>}, {pipeline_mode = #tpu.pipeline_mode<synchronous>, transform_indices = @transform_5, window_bounds = array<i64: 256, 384>}, {pipeline_mode = #tpu.pipeline_mode<synchronous>, transform_indices = @transform_6, window_bounds = array<i64: 1, 384>}, {transform_indices = @transform_7, window_bounds = array<i64: 1, 8, 8, 128>}]} {
    %c0 = arith.constant 0 : index
    %c0_0 = arith.constant 0 : index
    %c0_1 = arith.constant 0 : index
    %c0_2 = arith.constant 0 : index
    %0 = vector.load %arg2[%c0, %c0_0, %c0_1, %c0_2] : memref<1x8x10x128xf32, #tpu.memory_space<vmem>>, vector<1x8x10x128xf32>
    %1 = vector.shape_cast %0 : vector<1x8x10x128xf32> to vector<8x10x128xf32>
    %c0_3 = arith.constant 0 : index
    %c0_4 = arith.constant 0 : index
    %c0_5 = arith.constant 0 : index
    %2 = vector.load %arg10[%c0_3, %c0_4, %c0_5] : memref<10x10x128xf32, #tpu.memory_space<vmem>>, vector<8x10x128xf32>
    tpu.vector_store %arg10[%c0_3, %c0_4, %c0_5], %1 {strides = array<i32>} : memref<10x10x128xf32, #tpu.memory_space<vmem>>, vector<8x10x128xf32>,
    %c0_6 = arith.constant 0 : index
    %c0_7 = arith.constant 0 : index
    %c0_8 = arith.constant 0 : index
    %c0_9 = arith.constant 0 : index
    %3 = vector.load %arg3[%c0_6, %c0_7, %c0_8, %c0_9] : memref<1x2x10x128xf32, #tpu.memory_space<vmem>>, vector<1x2x10x128xf32>
    %4 = vector.shape_cast %3 : vector<1x2x10x128xf32> to vector<2x10x128xf32>
    %c8 = arith.constant 8 : index
    %c0_10 = arith.constant 0 : index
    %c0_11 = arith.constant 0 : index
    %5 = vector.load %arg10[%c8, %c0_10, %c0_11] : memref<10x10x128xf32, #tpu.memory_space<vmem>>, vector<2x10x128xf32>
    tpu.vector_store %arg10[%c8, %c0_10, %c0_11], %4 {strides = array<i32>} : memref<10x10x128xf32, #tpu.memory_space<vmem>>, vector<2x10x128xf32>,
    %c0_12 = arith.constant 0 : index
    %c0_13 = arith.constant 0 : index
    %c0_14 = arith.constant 0 : index
    %c0_15 = arith.constant 0 : index
    %6 = vector.load %arg4[%c0_12, %c0_13, %c0_14, %c0_15] : memref<1x8x10x128xf32, #tpu.memory_space<vmem>>, vector<1x8x10x128xf32>
    %7 = vector.shape_cast %6 : vector<1x8x10x128xf32> to vector<8x10x128xf32>
    %c0_16 = arith.constant 0 : index
    %c0_17 = arith.constant 0 : index
    %c0_18 = arith.constant 0 : index
    %8 = vector.load %arg11[%c0_16, %c0_17, %c0_18] : memref<10x10x128xf32, #tpu.memory_space<vmem>>, vector<8x10x128xf32>
    tpu.vector_store %arg11[%c0_16, %c0_17, %c0_18], %7 {strides = array<i32>} : memref<10x10x128xf32, #tpu.memory_space<vmem>>, vector<8x10x128xf32>,
    %c0_19 = arith.constant 0 : index
    %c0_20 = arith.constant 0 : index
    %c0_21 = arith.constant 0 : index
    %c0_22 = arith.constant 0 : index
    %9 = vector.load %arg5[%c0_19, %c0_20, %c0_21, %c0_22] : memref<1x2x10x128xf32, #tpu.memory_space<vmem>>, vector<1x2x10x128xf32>
    %10 = vector.shape_cast %9 : vector<1x2x10x128xf32> to vector<2x10x128xf32>
    %c8_23 = arith.constant 8 : index
    %c0_24 = arith.constant 0 : index
    %c0_25 = arith.constant 0 : index
    %11 = vector.load %arg11[%c8_23, %c0_24, %c0_25] : memref<10x10x128xf32, #tpu.memory_space<vmem>>, vector<2x10x128xf32>
    tpu.vector_store %arg11[%c8_23, %c0_24, %c0_25], %10 {strides = array<i32>} : memref<10x10x128xf32, #tpu.memory_space<vmem>>, vector<2x10x128xf32>,
    %c0_26 = arith.constant 0 : index
    %c0_27 = arith.constant 0 : index
    %12 = vector.load %arg6[%c0_26, %c0_27] : memref<9x256xf32, #tpu.memory_space<vmem>>, vector<9x256xf32>
    %13 = vector.extract_strided_slice %12 {offsets = [0, 0], sizes = [9, 128], strides = [1, 1]} : vector<9x256xf32> to vector<9x128xf32>
    %14 = vector.extract_strided_slice %12 {offsets = [0, 128], sizes = [9, 128], strides = [1, 1]} : vector<9x256xf32> to vector<9x128xf32>
    %c0_28 = arith.constant 0 : index
    %c0_29 = arith.constant 0 : index
    %c0_30 = arith.constant 0 : index
    %15 = vector.load %arg10[%c0_28, %c0_29, %c0_30] : memref<10x10x128xf32, #tpu.memory_space<vmem>>, vector<10x10x128xf32>
    %cst = arith.constant 0.000000e+00 : f32
    %16 = vector.broadcast %cst : f32 to vector<8x8x128xf32>
    %17 = vector.extract_strided_slice %15 {offsets = [0, 0, 0], sizes = [8, 10, 128], strides = [1, 1, 1]} : vector<10x10x128xf32> to vector<8x10x128xf32>
    %18 = vector.extract_strided_slice %17 {offsets = [0, 0, 0], sizes = [8, 8, 128], strides = [1, 1, 1]} : vector<8x10x128xf32> to vector<8x8x128xf32>
    %19 = vector.extract_strided_slice %13 {offsets = [0, 0], sizes = [1, 128], strides = [1, 1]} : vector<9x128xf32> to vector<1x128xf32>
    %20 = vector.shape_cast %19 : vector<1x128xf32> to vector<128xf32>
    %21 = vector.shape_cast %20 : vector<128xf32> to vector<1x1x128xf32>
    %22 = vector.broadcast %21 : vector<1x1x128xf32> to vector<8x8x128xf32>
    %23 = arith.mulf %18, %22 : vector<8x8x128xf32>
    %24 = arith.addf %16, %23 : vector<8x8x128xf32>
    %25 = vector.extract_strided_slice %17 {offsets = [0, 1, 0], sizes = [8, 8, 128], strides = [1, 1, 1]} : vector<8x10x128xf32> to vector<8x8x128xf32>
    %26 = vector.extract_strided_slice %13 {offsets = [1, 0], sizes = [1, 128], strides = [1, 1]} : vector<9x128xf32> to vector<1x128xf32>
    %27 = vector.shape_cast %26 : vector<1x128xf32> to vector<128xf32>
    %28 = vector.shape_cast %27 : vector<128xf32> to vector<1x1x128xf32>
    %29 = vector.broadcast %28 : vector<1x1x128xf32> to vector<8x8x128xf32>
    %30 = arith.mulf %25, %29 : vector<8x8x128xf32>
    %31 = arith.addf %24, %30 : vector<8x8x128xf32>
    %32 = vector.extract_strided_slice %17 {offsets = [0, 2, 0], sizes = [8, 8, 128], strides = [1, 1, 1]} : vector<8x10x128xf32> to vector<8x8x128xf32>
    %33 = vector.extract_strided_slice %13 {offsets = [2, 0], sizes = [1, 128], strides = [1, 1]} : vector<9x128xf32> to vector<1x128xf32>
    %34 = vector.shape_cast %33 : vector<1x128xf32> to vector<128xf32>
    %35 = vector.shape_cast %34 : vector<128xf32> to vector<1x1x128xf32>
    %36 = vector.broadcast %35 : vector<1x1x128xf32> to vector<8x8x128xf32>
    %37 = arith.mulf %32, %36 : vector<8x8x128xf32>
    %38 = arith.addf %31, %37 : vector<8x8x128xf32>
    %39 = vector.extract_strided_slice %15 {offsets = [1, 0, 0], sizes = [8, 10, 128], strides = [1, 1, 1]} : vector<10x10x128xf32> to vector<8x10x128xf32>
    %40 = vector.extract_strided_slice %39 {offsets = [0, 0, 0], sizes = [8, 8, 128], strides = [1, 1, 1]} : vector<8x10x128xf32> to vector<8x8x128xf32>
    %41 = vector.extract_strided_slice %13 {offsets = [3, 0], sizes = [1, 128], strides = [1, 1]} : vector<9x128xf32> to vector<1x128xf32>
    %42 = vector.shape_cast %41 : vector<1x128xf32> to vector<128xf32>
    %43 = vector.shape_cast %42 : vector<128xf32> to vector<1x1x128xf32>
    %44 = vector.broadcast %43 : vector<1x1x128xf32> to vector<8x8x128xf32>
    %45 = arith.mulf %40, %44 : vector<8x8x128xf32>
    %46 = arith.addf %38, %45 : vector<8x8x128xf32>
    %47 = vector.extract_strided_slice %39 {offsets = [0, 1, 0], sizes = [8, 8, 128], strides = [1, 1, 1]} : vector<8x10x128xf32> to vector<8x8x128xf32>
    %48 = vector.extract_strided_slice %13 {offsets = [4, 0], sizes = [1, 128], strides = [1, 1]} : vector<9x128xf32> to vector<1x128xf32>
    %49 = vector.shape_cast %48 : vector<1x128xf32> to vector<128xf32>
    %50 = vector.shape_cast %49 : vector<128xf32> to vector<1x1x128xf32>
    %51 = vector.broadcast %50 : vector<1x1x128xf32> to vector<8x8x128xf32>
    %52 = arith.mulf %47, %51 : vector<8x8x128xf32>
    %53 = arith.addf %46, %52 : vector<8x8x128xf32>
    %54 = vector.extract_strided_slice %39 {offsets = [0, 2, 0], sizes = [8, 8, 128], strides = [1, 1, 1]} : vector<8x10x128xf32> to vector<8x8x128xf32>
    %55 = vector.extract_strided_slice %13 {offsets = [5, 0], sizes = [1, 128], strides = [1, 1]} : vector<9x128xf32> to vector<1x128xf32>
    %56 = vector.shape_cast %55 : vector<1x128xf32> to vector<128xf32>
    %57 = vector.shape_cast %56 : vector<128xf32> to vector<1x1x128xf32>
    %58 = vector.broadcast %57 : vector<1x1x128xf32> to vector<8x8x128xf32>
    %59 = arith.mulf %54, %58 : vector<8x8x128xf32>
    %60 = arith.addf %53, %59 : vector<8x8x128xf32>
    %61 = vector.extract_strided_slice %15 {offsets = [2, 0, 0], sizes = [8, 10, 128], strides = [1, 1, 1]} : vector<10x10x128xf32> to vector<8x10x128xf32>
    %62 = vector.extract_strided_slice %61 {offsets = [0, 0, 0], sizes = [8, 8, 128], strides = [1, 1, 1]} : vector<8x10x128xf32> to vector<8x8x128xf32>
    %63 = vector.extract_strided_slice %13 {offsets = [6, 0], sizes = [1, 128], strides = [1, 1]} : vector<9x128xf32> to vector<1x128xf32>
    %64 = vector.shape_cast %63 : vector<1x128xf32> to vector<128xf32>
    %65 = vector.shape_cast %64 : vector<128xf32> to vector<1x1x128xf32>
    %66 = vector.broadcast %65 : vector<1x1x128xf32> to vector<8x8x128xf32>
    %67 = arith.mulf %62, %66 : vector<8x8x128xf32>
    %68 = arith.addf %60, %67 : vector<8x8x128xf32>
    %69 = vector.extract_strided_slice %61 {offsets = [0, 1, 0], sizes = [8, 8, 128], strides = [1, 1, 1]} : vector<8x10x128xf32> to vector<8x8x128xf32>
    %70 = vector.extract_strided_slice %13 {offsets = [7, 0], sizes = [1, 128], strides = [1, 1]} : vector<9x128xf32> to vector<1x128xf32>
    %71 = vector.shape_cast %70 : vector<1x128xf32> to vector<128xf32>
    %72 = vector.shape_cast %71 : vector<128xf32> to vector<1x1x128xf32>
    %73 = vector.broadcast %72 : vector<1x1x128xf32> to vector<8x8x128xf32>
    %74 = arith.mulf %69, %73 : vector<8x8x128xf32>
    %75 = arith.addf %68, %74 : vector<8x8x128xf32>
    %76 = vector.extract_strided_slice %61 {offsets = [0, 2, 0], sizes = [8, 8, 128], strides = [1, 1, 1]} : vector<8x10x128xf32> to vector<8x8x128xf32>
    %77 = vector.extract_strided_slice %13 {offsets = [8, 0], sizes = [1, 128], strides = [1, 1]} : vector<9x128xf32> to vector<1x128xf32>
    %78 = vector.shape_cast %77 : vector<1x128xf32> to vector<128xf32>
    %79 = vector.shape_cast %78 : vector<128xf32> to vector<1x1x128xf32>
    %80 = vector.broadcast %79 : vector<1x1x128xf32> to vector<8x8x128xf32>
    %81 = arith.mulf %76, %80 : vector<8x8x128xf32>
    %82 = arith.addf %75, %81 : vector<8x8x128xf32>
    %c0_31 = arith.constant 0 : index
    %c0_32 = arith.constant 0 : index
    %c0_33 = arith.constant 0 : index
    %83 = vector.load %arg11[%c0_31, %c0_32, %c0_33] : memref<10x10x128xf32, #tpu.memory_space<vmem>>, vector<10x10x128xf32>
    %cst_34 = arith.constant 0.000000e+00 : f32
    %84 = vector.broadcast %cst_34 : f32 to vector<8x8x128xf32>
    %85 = vector.extract_strided_slice %83 {offsets = [0, 0, 0], sizes = [8, 10, 128], strides = [1, 1, 1]} : vector<10x10x128xf32> to vector<8x10x128xf32>
    %86 = vector.extract_strided_slice %85 {offsets = [0, 0, 0], sizes = [8, 8, 128], strides = [1, 1, 1]} : vector<8x10x128xf32> to vector<8x8x128xf32>
    %87 = vector.extract_strided_slice %14 {offsets = [0, 0], sizes = [1, 128], strides = [1, 1]} : vector<9x128xf32> to vector<1x128xf32>
    %88 = vector.shape_cast %87 : vector<1x128xf32> to vector<128xf32>
    %89 = vector.shape_cast %88 : vector<128xf32> to vector<1x1x128xf32>
    %90 = vector.broadcast %89 : vector<1x1x128xf32> to vector<8x8x128xf32>
    %91 = arith.mulf %86, %90 : vector<8x8x128xf32>
    %92 = arith.addf %84, %91 : vector<8x8x128xf32>
    %93 = vector.extract_strided_slice %85 {offsets = [0, 1, 0], sizes = [8, 8, 128], strides = [1, 1, 1]} : vector<8x10x128xf32> to vector<8x8x128xf32>
    %94 = vector.extract_strided_slice %14 {offsets = [1, 0], sizes = [1, 128], strides = [1, 1]} : vector<9x128xf32> to vector<1x128xf32>
    %95 = vector.shape_cast %94 : vector<1x128xf32> to vector<128xf32>
    %96 = vector.shape_cast %95 : vector<128xf32> to vector<1x1x128xf32>
    %97 = vector.broadcast %96 : vector<1x1x128xf32> to vector<8x8x128xf32>
    %98 = arith.mulf %93, %97 : vector<8x8x128xf32>
    %99 = arith.addf %92, %98 : vector<8x8x128xf32>
    %100 = vector.extract_strided_slice %85 {offsets = [0, 2, 0], sizes = [8, 8, 128], strides = [1, 1, 1]} : vector<8x10x128xf32> to vector<8x8x128xf32>
    %101 = vector.extract_strided_slice %14 {offsets = [2, 0], sizes = [1, 128], strides = [1, 1]} : vector<9x128xf32> to vector<1x128xf32>
    %102 = vector.shape_cast %101 : vector<1x128xf32> to vector<128xf32>
    %103 = vector.shape_cast %102 : vector<128xf32> to vector<1x1x128xf32>
    %104 = vector.broadcast %103 : vector<1x1x128xf32> to vector<8x8x128xf32>
    %105 = arith.mulf %100, %104 : vector<8x8x128xf32>
    %106 = arith.addf %99, %105 : vector<8x8x128xf32>
    %107 = vector.extract_strided_slice %83 {offsets = [1, 0, 0], sizes = [8, 10, 128], strides = [1, 1, 1]} : vector<10x10x128xf32> to vector<8x10x128xf32>
    %108 = vector.extract_strided_slice %107 {offsets = [0, 0, 0], sizes = [8, 8, 128], strides = [1, 1, 1]} : vector<8x10x128xf32> to vector<8x8x128xf32>
    %109 = vector.extract_strided_slice %14 {offsets = [3, 0], sizes = [1, 128], strides = [1, 1]} : vector<9x128xf32> to vector<1x128xf32>
    %110 = vector.shape_cast %109 : vector<1x128xf32> to vector<128xf32>
    %111 = vector.shape_cast %110 : vector<128xf32> to vector<1x1x128xf32>
    %112 = vector.broadcast %111 : vector<1x1x128xf32> to vector<8x8x128xf32>
    %113 = arith.mulf %108, %112 : vector<8x8x128xf32>
    %114 = arith.addf %106, %113 : vector<8x8x128xf32>
    %115 = vector.extract_strided_slice %107 {offsets = [0, 1, 0], sizes = [8, 8, 128], strides = [1, 1, 1]} : vector<8x10x128xf32> to vector<8x8x128xf32>
    %116 = vector.extract_strided_slice %14 {offsets = [4, 0], sizes = [1, 128], strides = [1, 1]} : vector<9x128xf32> to vector<1x128xf32>
    %117 = vector.shape_cast %116 : vector<1x128xf32> to vector<128xf32>
    %118 = vector.shape_cast %117 : vector<128xf32> to vector<1x1x128xf32>
    %119 = vector.broadcast %118 : vector<1x1x128xf32> to vector<8x8x128xf32>
    %120 = arith.mulf %115, %119 : vector<8x8x128xf32>
    %121 = arith.addf %114, %120 : vector<8x8x128xf32>
    %122 = vector.extract_strided_slice %107 {offsets = [0, 2, 0], sizes = [8, 8, 128], strides = [1, 1, 1]} : vector<8x10x128xf32> to vector<8x8x128xf32>
    %123 = vector.extract_strided_slice %14 {offsets = [5, 0], sizes = [1, 128], strides = [1, 1]} : vector<9x128xf32> to vector<1x128xf32>
    %124 = vector.shape_cast %123 : vector<1x128xf32> to vector<128xf32>
    %125 = vector.shape_cast %124 : vector<128xf32> to vector<1x1x128xf32>
    %126 = vector.broadcast %125 : vector<1x1x128xf32> to vector<8x8x128xf32>
    %127 = arith.mulf %122, %126 : vector<8x8x128xf32>
    %128 = arith.addf %121, %127 : vector<8x8x128xf32>
    %129 = vector.extract_strided_slice %83 {offsets = [2, 0, 0], sizes = [8, 10, 128], strides = [1, 1, 1]} : vector<10x10x128xf32> to vector<8x10x128xf32>
    %130 = vector.extract_strided_slice %129 {offsets = [0, 0, 0], sizes = [8, 8, 128], strides = [1, 1, 1]} : vector<8x10x128xf32> to vector<8x8x128xf32>
    %131 = vector.extract_strided_slice %14 {offsets = [6, 0], sizes = [1, 128], strides = [1, 1]} : vector<9x128xf32> to vector<1x128xf32>
    %132 = vector.shape_cast %131 : vector<1x128xf32> to vector<128xf32>
    %133 = vector.shape_cast %132 : vector<128xf32> to vector<1x1x128xf32>
    %134 = vector.broadcast %133 : vector<1x1x128xf32> to vector<8x8x128xf32>
    %135 = arith.mulf %130, %134 : vector<8x8x128xf32>
    %136 = arith.addf %128, %135 : vector<8x8x128xf32>
    %137 = vector.extract_strided_slice %129 {offsets = [0, 1, 0], sizes = [8, 8, 128], strides = [1, 1, 1]} : vector<8x10x128xf32> to vector<8x8x128xf32>
    %138 = vector.extract_strided_slice %14 {offsets = [7, 0], sizes = [1, 128], strides = [1, 1]} : vector<9x128xf32> to vector<1x128xf32>
    %139 = vector.shape_cast %138 : vector<1x128xf32> to vector<128xf32>
    %140 = vector.shape_cast %139 : vector<128xf32> to vector<1x1x128xf32>
    %141 = vector.broadcast %140 : vector<1x1x128xf32> to vector<8x8x128xf32>
    %142 = arith.mulf %137, %141 : vector<8x8x128xf32>
    %143 = arith.addf %136, %142 : vector<8x8x128xf32>
    %144 = vector.extract_strided_slice %129 {offsets = [0, 2, 0], sizes = [8, 8, 128], strides = [1, 1, 1]} : vector<8x10x128xf32> to vector<8x8x128xf32>
    %145 = vector.extract_strided_slice %14 {offsets = [8, 0], sizes = [1, 128], strides = [1, 1]} : vector<9x128xf32> to vector<1x128xf32>
    %146 = vector.shape_cast %145 : vector<1x128xf32> to vector<128xf32>
    %147 = vector.shape_cast %146 : vector<128xf32> to vector<1x1x128xf32>
    %148 = vector.broadcast %147 : vector<1x1x128xf32> to vector<8x8x128xf32>
    %149 = arith.mulf %144, %148 : vector<8x8x128xf32>
    %150 = arith.addf %143, %149 : vector<8x8x128xf32>
    %c0_35 = arith.constant 0 : index
    %c0_36 = arith.constant 0 : index
    %151 = vector.load %arg7[%c0_35, %c0_36] : memref<256x384xbf16, #tpu.memory_space<vmem>>, vector<256x384xbf16>
    %152 = vector.shape_cast %82 : vector<8x8x128xf32> to vector<64x128xf32>
    %153 = arith.truncf %152 : vector<64x128xf32> to vector<64x128xbf16>
    %154 = vector.extract_strided_slice %151 {offsets = [0, 0], sizes = [128, 384], strides = [1, 1]} : vector<256x384xbf16> to vector<128x384xbf16>
    %cst_37 = arith.constant dense<0.000000e+00> : vector<64x384xf32>
    %155 = tpu.matmul %153, %154, %cst_37 {dimension_numbers = #tpu.dot_dimension_numbers<[1], [0], [0], [1], [0, 0, 1, 1], [], []>} : vector<64x128xbf16>, vector<128x384xbf16>, vector<64x384xf32> -> vector<64x384xf32>
    %156 = vector.shape_cast %150 : vector<8x8x128xf32> to vector<64x128xf32>
    %157 = arith.truncf %156 : vector<64x128xf32> to vector<64x128xbf16>
    %158 = vector.extract_strided_slice %151 {offsets = [128, 0], sizes = [128, 384], strides = [1, 1]} : vector<256x384xbf16> to vector<128x384xbf16>
    %cst_38 = arith.constant dense<0.000000e+00> : vector<64x384xf32>
    %159 = tpu.matmul %157, %158, %cst_38 {dimension_numbers = #tpu.dot_dimension_numbers<[1], [0], [0], [1], [0, 0, 1, 1], [], []>} : vector<64x128xbf16>, vector<128x384xbf16>, vector<64x384xf32> -> vector<64x384xf32>
    %160 = arith.addf %155, %159 : vector<64x384xf32>
    %c0_39 = arith.constant 0 : index
    %c0_40 = arith.constant 0 : index
    %161 = vector.load %arg8[%c0_39, %c0_40] : memref<1x384xf32, #tpu.memory_space<vmem>>, vector<1x384xf32>
    %162 = vector.broadcast %161 : vector<1x384xf32> to vector<64x384xf32>
    %163 = arith.addf %160, %162 : vector<64x384xf32>
    %164 = arith.negf %163 : vector<64x384xf32>
    %165 = math.exp %164 : vector<64x384xf32>
    %cst_41 = arith.constant 1.000000e+00 : f32
    %166 = vector.broadcast %cst_41 : f32 to vector<64x384xf32>
    %167 = arith.addf %166, %165 : vector<64x384xf32>
    %168 = arith.divf %166, %167 : vector<64x384xf32>
    %169 = arith.mulf %163, %168 : vector<64x384xf32>
    %170 = vector.shape_cast %169 : vector<64x384xf32> to vector<8x8x384xf32>
    %171 = arith.truncf %170 : vector<8x8x384xf32> to vector<8x8x384xbf16>
    %172 = vector.extract_strided_slice %171 {offsets = [0, 0, 0], sizes = [8, 8, 128], strides = [1, 1, 1]} : vector<8x8x384xbf16> to vector<8x8x128xbf16>
    %173 = vector.extract_strided_slice %171 {offsets = [0, 0, 128], sizes = [8, 8, 128], strides = [1, 1, 1]} : vector<8x8x384xbf16> to vector<8x8x128xbf16>
    %174 = vector.extract_strided_slice %171 {offsets = [0, 0, 256], sizes = [8, 8, 128], strides = [1, 1, 1]} : vector<8x8x384xbf16> to vector<8x8x128xbf16>
    "tpu.trace_start"() <{level = 10 : i32, message = "hwc,hwd->hcd"}> : () -> ()
    %cst_42 = arith.constant dense<0.000000e+00> : vector<8x128x128xf32>
    %175 = tpu.matmul %172, %173, %cst_42 {dimension_numbers = #tpu.dot_dimension_numbers<[1], [1], [2], [2], [0, 0, 0, 2, 1, 2], [0], [0]>} : vector<8x8x128xbf16>, vector<8x8x128xbf16>, vector<8x128x128xf32> -> vector<8x128x128xf32>
    "tpu.trace_stop"() : () -> ()
    %cst_43 = arith.constant dense<0xFF800000> : vector<8x128xf32>
    %176 = vector.multi_reduction <maximumf>, %175, %cst_43 [2] : vector<8x128x128xf32> to vector<8x128xf32>
    %177 = vector.shape_cast %176 : vector<8x128xf32> to vector<8x128x1xf32>
    %178 = vector.broadcast %177 : vector<8x128x1xf32> to vector<8x128x128xf32>
    %179 = arith.subf %175, %178 : vector<8x128x128xf32>
    %180 = math.exp %179 : vector<8x128x128xf32>
    %cst_44 = arith.constant dense<0.000000e+00> : vector<8x128xf32>
    %181 = vector.multi_reduction <add>, %180, %cst_44 [2] : vector<8x128x128xf32> to vector<8x128xf32>
    %182 = vector.shape_cast %181 : vector<8x128xf32> to vector<8x128x1xf32>
    %183 = tpu.reciprocal %182 {approx = true} : vector<8x128x1xf32> -> vector<8x128x1xf32>
    %184 = vector.broadcast %183 : vector<8x128x1xf32> to vector<8x128x128xf32>
    %185 = arith.mulf %180, %184 : vector<8x128x128xf32>
    %186 = arith.truncf %185 : vector<8x128x128xf32> to vector<8x128x128xbf16>
    "tpu.trace_start"() <{level = 10 : i32, message = "hwd,hcd->hwc"}> : () -> ()
    %cst_45 = arith.constant dense<0.000000e+00> : vector<8x8x128xf32>
    %187 = tpu.matmul %174, %186, %cst_45 {dimension_numbers = #tpu.dot_dimension_numbers<[2], [2], [1], [1], [0, 0, 0, 1, 1, 1], [0], [0]>} : vector<8x8x128xbf16>, vector<8x128x128xbf16>, vector<8x8x128xf32> -> vector<8x8x128xf32>
    "tpu.trace_stop"() : () -> ()
    %c0_46 = arith.constant 0 : index
    %c0_47 = arith.constant 0 : index
    %c0_48 = arith.constant 0 : index
    %c0_49 = arith.constant 0 : index
    %188 = vector.load %arg9[%c0_46, %c0_47, %c0_48, %c0_49] : memref<1x8x8x128xf32, #tpu.memory_space<vmem>>, vector<1x8x8x128xf32>
    %189 = vector.shape_cast %188 : vector<1x8x8x128xf32> to vector<8x8x128xf32>
    %190 = vector.shape_cast %187 : vector<8x8x128xf32> to vector<1x8x8x128xf32>
    tpu.vector_store %arg9[%c0_46, %c0_47, %c0_48, %c0_49], %190 {strides = array<i32>} : memref<1x8x8x128xf32, #tpu.memory_space<vmem>>, vector<1x8x8x128xf32>,
    return
  }
  func.func @transform_0(%arg0: i32, %arg1: i32) -> (i32, i32, i32, i32) {
    %c0_i32 = arith.constant 0 : i32
    %c0_i32_0 = arith.constant 0 : i32
    %c0_i32_1 = arith.constant 0 : i32
    return %arg0, %arg1, %c0_i32, %c0_i32_0 : i32, i32, i32, i32
  }
  func.func @transform_1(%arg0: i32, %arg1: i32) -> (i32, i32, i32, i32) {
    %c1_i32 = arith.constant 1 : i32
    %0 = arith.addi %arg1, %c1_i32 : i32
    %c4_i32 = arith.constant 4 : i32
    %1 = arith.muli %0, %c4_i32 : i32
    %c0_i32 = arith.constant 0 : i32
    %c0_i32_0 = arith.constant 0 : i32
    %c0_i32_1 = arith.constant 0 : i32
    return %arg0, %1, %c0_i32, %c0_i32_0 : i32, i32, i32, i32
  }
  func.func @transform_2(%arg0: i32, %arg1: i32) -> (i32, i32, i32, i32) {
    %c0_i32 = arith.constant 0 : i32
    %c0_i32_0 = arith.constant 0 : i32
    %c0_i32_1 = arith.constant 0 : i32
    return %arg0, %arg1, %c0_i32, %c0_i32_0 : i32, i32, i32, i32
  }
  func.func @transform_3(%arg0: i32, %arg1: i32) -> (i32, i32, i32, i32) {
    %c1_i32 = arith.constant 1 : i32
    %0 = arith.addi %arg1, %c1_i32 : i32
    %c4_i32 = arith.constant 4 : i32
    %1 = arith.muli %0, %c4_i32 : i32
    %c0_i32 = arith.constant 0 : i32
    %c0_i32_0 = arith.constant 0 : i32
    %c0_i32_1 = arith.constant 0 : i32
    return %arg0, %1, %c0_i32, %c0_i32_0 : i32, i32, i32, i32
  }
  func.func @transform_4(%arg0: i32, %arg1: i32) -> (i32, i32) {
    %c0_i32 = arith.constant 0 : i32
    %c0_i32_0 = arith.constant 0 : i32
    %c0_i32_1 = arith.constant 0 : i32
    return %c0_i32, %c0_i32_0 : i32, i32
  }
  func.func @transform_5(%arg0: i32, %arg1: i32) -> (i32, i32) {
    %c0_i32 = arith.constant 0 : i32
    %c0_i32_0 = arith.constant 0 : i32
    %c0_i32_1 = arith.constant 0 : i32
    return %c0_i32, %c0_i32_0 : i32, i32
  }
  func.func @transform_6(%arg0: i32, %arg1: i32) -> (i32, i32) {
    %c0_i32 = arith.constant 0 : i32
    %c0_i32_0 = arith.constant 0 : i32
    %c0_i32_1 = arith.constant 0 : i32
    return %c0_i32, %c0_i32_0 : i32, i32
  }
  func.func @transform_7(%arg0: i32, %arg1: i32) -> (i32, i32, i32, i32) {
    %c0_i32 = arith.constant 0 : i32
    %c0_i32_0 = arith.constant 0 : i32
    %c0_i32_1 = arith.constant 0 : i32
    return %arg0, %arg1, %c0_i32, %c0_i32_0 : i32, i32, i32, i32
  }
}

</mosaic_0001>

<bundles_post_ra>
// kernel: tpu_custom_call.1
= control target key start
LH: loop header
LB: loop body
LE: loop exit
PB: predicated region body
PF: predicated region fallthrough
CT: control target
= control target key end

     0   :  { %12 = vsyncpa [#allocation5], 0  ;;  %s10318_s0 = inlined_call_operand.vmem [shape: f32[2,10,10,128], index: 0, kind: input, shape index: {}]   ;;  %s10319_s1 = inlined_call_operand.vmem [shape: f32[2,10,10,128], index: 1, kind: input, shape index: {}]   ;;  %s10320_s2 = inlined_call_operand.vmem [shape: f32[2,10,10,128], index: 2, kind: input, shape index: {}]   ;;  %s10321_s3 = inlined_call_operand.vmem [shape: f32[2,10,10,128], index: 3, kind: input, shape index: {}]   ;;  %s10322_s4 = inlined_call_operand.vmem [shape: f32[9,256], index: 4, kind: input, shape index: {}]   ;;  %s10323_s5 = inlined_call_operand.vmem [shape: bf16[256,384], index: 5, kind: input, shape index: {}]   ;;  %s10324_s6 = inlined_call_operand.vmem [shape: f32[1,384], index: 6, kind: input, shape index: {}]   ;;  %s10325_s7 = inlined_call_operand.hbm [shape: f32[2,8,8,128], index: 7, kind: output, shape index: {}]  }
   0x1   :  { %14 = vsyncpa [#allocation5 + $0x1], 0  ;;  %s6562_s24 = smov 0   ;;  %s6564_s25 = smov 0  }
   0x2   :  { %s6566_s26 = smov 0   ;;  %s6568_s27 = smov 0  }
   0x3   :  { %s6570_s28 = smov 0   ;;  %s6572_s29 = smov 0  }
   0x4 LB: > { %s5336_s30 = sadd.s32 4294967295, %s6518_s29   ;;  %s5337_s8 = sadd.s32 4294967294, %s6518_s29   ;;  %s6518_s29 = sphi %s6572_s29, %s20_s29   ;;  %s6514_s28 = sphi %s6570_s28, %s11064_s28   ;;  %s6510_s27 = sphi %s6568_s27, %s11063_s27   ;;  %s6506_s26 = sphi %s6566_s26, %s11062_s26   ;;  %s6502_s25 = sphi %s6564_s25, %s11061_s25   ;;  %s6498_s24 = sphi %s6562_s24, %s11060_s24  }
   0x5   : > { %s32_s9 = sadd.s32 1, %s6514_s28  ;;  %s224_s10 = sadd.s32 1, %s6506_s26 }
   0x6   : > { %p34_p0 = scmp.ge.s32.totalorder %s32_s9, 2  ;;  %p234_p1 = scmp.ne.s32.totalorder %s6506_s26, %s6502_s25 }
   0x7   : > { %p235_p2 = scmp.eq.s32.totalorder %s5336_s30, 1  ;;  %p240_p3 = scmp.ne.s32.totalorder %s6502_s25, %s6498_s24 }
   0x8   : > { %s11066_s9 = smov (%p34_p0, %s32_s9), 0  ;;  %p241_p5 = scmp.eq.s32.totalorder %s5337_s8, 1 }
   0x9   : > { %p6602_p4 = por %p235_p2, %p234_p1  ;;  %s219_s12 = ssub.s32 %s6514_s28, %s11066_s9 }
   0xa   : > { %p5340_p6 = scmp.ge.s32.totalorder %s6518_s29, 1  ;;  %p222_p7 = scmp.eq.s32.totalorder %s219_s12, 0 }
   0xb   : > { %p6609_p8 = por %p241_p5, %p240_p3  ;;  %p352_p9 = scmp.lt.s32.totalorder %s6518_s29, 3 }
   0xc   : > { %s6615_s14 = scalar_select %p222_p7, %s6506_s26, %s224_s10  }
   0xd   : > { %p353_p10 = pnand %p5340_p6, %p352_p9 }
   0xf   : > { %356 = sbr.rel (%p353_p10) target bundleno = 1944 (0x798), region = 48 }
  0x14   : > { %v5432_v0 = vld [vmem:[%s10323_s5 + $0x168] sm:$0xf]  ;;  %v5681_v1 = vld [vmem:[%s10323_s5 + $0x170] sm:$0xf0]  ;;  %v5680_v2 = vld [vmem:[%s10323_s5 + $0x16c] sm:$0xf] }
  0x15   : > { %v5433_v3 = vor.u32 %v5681_v1, %v5432_v0  ;;  %v5434_v4 = vld [vmem:[%s10323_s5 + $0x174] sm:$0xf0]  ;;  %v5420_v5 = vld [vmem:[%s10323_s5 + $0x150] sm:$0xf]  ;;  %v5678_v6 = vld [vmem:[%s10323_s5 + $0x158] sm:$0xf0] }
  0x16   : > { %v5437_v7 = vor.u32 %v5680_v2, %v5434_v4  ;;  %v5677_v8 = vld [vmem:[%s10323_s5 + $0x154] sm:$0xf]  ;;  %v5422_v9 = vld [vmem:[%s10323_s5 + $0x15c] sm:$0xf0]  ;;  %v5421_v10 = vor.u32 %v5678_v6, %v5420_v5  ;;  %v5408_v12 = vld [vmem:[%s10323_s5 + $0x138] sm:$0xf] }
  0x17   : > { %1813 = vmatpush.bf16.msra.mxu0 %v5433_v3  ;;  %5684 = vmatpush.bf16.msra.mxu2 %v5433_v3  ;;  %v5425_v11 = vor.u32 %v5677_v8, %v5422_v9  ;;  %v5675_v13 = vld [vmem:[%s10323_s5 + $0x140] sm:$0xf0]  ;;  %v5674_v14 = vld [vmem:[%s10323_s5 + $0x13c] sm:$0xf]  ;;  %v5410_v15 = vld [vmem:[%s10323_s5 + $0x144] sm:$0xf0] }
  0x18   : > { %5692 = vmatpush.bf16.msra.mxu3 %v5437_v7  ;;  %1842 = vmatpush.bf16.msra.mxu1 %v5437_v7  ;;  %v5409_v16 = vor.u32 %v5675_v13, %v5408_v12  ;;  %v5396_v17 = vld [vmem:[%s10323_s5 + $0x120] sm:$0xf]  ;;  %v5413_v18 = vor.u32 %v5674_v14, %v5410_v15  ;;  %v5672_v19 = vld [vmem:[%s10323_s5 + $0x128] sm:$0xf0]  ;;  %v5671_v20 = vld [vmem:[%s10323_s5 + $0x124] sm:$0xf] }
  0x19   : > { %v5398_v21 = vld [vmem:[%s10323_s5 + $0x12c] sm:$0xf0]  ;;  %v5384_v22 = vld [vmem:[%s10323_s5 + $0x108] sm:$0xf]  ;;  %v5669_v23 = vld [vmem:[%s10323_s5 + $0x110] sm:$0xf0]  ;;  %v5397_v30 = vor.u32 %v5672_v19, %v5396_v17 }
  0x1a   : > { %v5668_v24 = vld [vmem:[%s10323_s5 + $0x10c] sm:$0xf]  ;;  %v5386_v25 = vld [vmem:[%s10323_s5 + $0x114] sm:$0xf0]  ;;  %v5372_v26 = vld [vmem:[%s10323_s5 + $0xf0] sm:$0xf]  ;;  %v5401_v36 = vor.u32 %v5671_v20, %v5398_v21  ;;  %v5385_v41 = vor.u32 %v5669_v23, %v5384_v22 }
  0x1b   : > { %1814 = vmatpush.bf16.msra.mxu0 %v5421_v10  ;;  %5685 = vmatpush.bf16.msra.mxu2 %v5421_v10  ;;  %v5666_v27 = vld [vmem:[%s10323_s5 + $0xf8] sm:$0xf0]  ;;  %v5665_v28 = vld [vmem:[%s10323_s5 + $0xf4] sm:$0xf]  ;;  %v5374_v29 = vld [vmem:[%s10323_s5 + $0xfc] sm:$0xf0]  ;;  %v5389_v42 = vor.u32 %v5668_v24, %v5386_v25 }
  0x1c   : > { %5693 = vmatpush.bf16.msra.mxu3 %v5425_v11  ;;  %1843 = vmatpush.bf16.msra.mxu1 %v5425_v11  ;;  %p439_p11 = scmp.lt.s32.totalorder %s6510_s27, 1  ;;  %v5360_v31 = vld [vmem:[%s10323_s5 + $0xd8] sm:$0xf]  ;;  %v5663_v32 = vld [vmem:[%s10323_s5 + $0xe0] sm:$0xf0]  ;;  %v590_v35 = vld [vmem:[%s10322_s4 + $0x8] sm:$0xff]  ;;  %v5373_v45 = vor.u32 %v5666_v27, %v5372_v26  ;;  %v6724_v46 = vor.u32 %v5665_v28, %v5374_v29 }
  0x1d   : > { %v5662_v33 = vld [vmem:[%s10323_s5 + $0xdc] sm:$0xf]  ;;  %v5362_v34 = vld [vmem:[%s10323_s5 + $0xe4] sm:$0xf0]  ;;  %v5348_v37 = vld [vmem:[%s10323_s5 + $0xc0] sm:$0xf]  ;;  %v6730_v49 = vor.u32 %v5663_v32, %v5360_v31 }
  0x1e   : > { %v5660_v38 = vld [vmem:[%s10323_s5 + $0xc8] sm:$0xf0]  ;;  %s440_s8 = scalar_select %p439_p11, %s6510_s27, 1  ;;  %v5659_v39 = vld [vmem:[%s10323_s5 + $0xc4] sm:$0xf]  ;;  %v6720_v43 = vperm.slane %v590_v35, 0  ;;  %v6732_v50 = vor.u32 %v5662_v33, %v5362_v34 }
  0x1f   : > { %1815 = vmatpush.bf16.msra.mxu0 %v5409_v16  ;;  %5686 = vmatpush.bf16.msra.mxu2 %v5409_v16  ;;  %v5350_v40 = vld [vmem:[%s10323_s5 + $0xcc] sm:$0xf0]  ;;  %v6722_v44 = vperm.slane %v590_v35, 1  ;;  %v6726_v47 = vperm.slane %v590_v35, 2  ;;  %v6728_v48 = vperm.slane %v590_v35, 3  ;;  %v6740_v51 = vperm.slane %v590_v35, 4 }
  0x20   : > { %5694 = vmatpush.bf16.msra.mxu3 %v5413_v18  ;;  %1844 = vmatpush.bf16.msra.mxu1 %v5413_v18  ;;  %s6718_s17 = smul.u32 160, %s440_s8  ;;  %v6742_v52 = vperm.slane %v590_v35, 5  ;;  %v6744_v53 = vor.u32 %v5660_v38, %v5348_v37  ;;  %v6746_v54 = vor.u32 %v5659_v39, %v5350_v40  ;;  %v6751_v58 = vperm.slane %v590_v35, 6  ;;  %v6786_v6 = vld [vmem:[%s10322_s4 + $0x18] ss:$0 sm:$0xff]  ;;  %s430_s12 = sand.u32 1, %s6502_s25  }
  0x21   : > { %v6753_v59 = vperm.slane %v590_v35, 7  ;;  %vm663_vm0 = vcmask 1046528   ;;  %vm737_vm1 = vcmask 1045504   ;;  %vm2686_vm10 = vcmask 1043456   ;;  %s5341_s16 = sshll.u32 %s430_s12, 6  ;;  %s5683_s19 = sshll.u32 %s6510_s27, 6 }
  0x22   : > { %s6738_s20 = scalar_lea.vmem %s10320_s2, %s6718_s17  ;;  %s5632_s23 = sadd.s32 128, %s6718_s17 }
  0x23   : > { %1816 = vmatpush.bf16.msra.mxu0 %v5397_v30  ;;  %5687 = vmatpush.bf16.msra.mxu2 %v5397_v30  ;;  %v548_v55 = vld [vmem:[%s6738_s20] sm:$0xff]  ;;  %v549_v56 = vld [vmem:[%s6738_s20 + $0x8] sm:$0x3]  ;;  %v550_v57 = vld [vmem:[%s6738_s20 + $0x10] sm:$0xff]  ;;  %s6964_s10 = scalar_lea.vmem %s10321_s3, %s5632_s23  ;;  %s7131_s15 = scalar_lea.vmem %s10318_s0, %s6718_s17 }
  0x24   : > { %5695 = vmatpush.bf16.msra.mxu3 %v5401_v36  ;;  %1845 = vmatpush.bf16.msra.mxu1 %v5401_v36  ;;  %v551_v60 = vld [vmem:[%s6738_s20 + $0x18] sm:$0x3]  ;;  %v6757_v61 = vld [vmem:[%s6738_s20 + $0x20] sm:$0xff]  ;;  %v6760_v62 = vmul.f32 %v6720_v43, %v548_v55  ;;  %v6763_v63 = vmul.f32 %v6720_v43, %v550_v57  ;;  %v6766_v0 = vmul.f32 %v6722_v44, %v548_v55  ;;  %v6772_v2 = vld [vmem:[%s6738_s20 + $0x30] sm:$0xff]  ;;  %s7523_s8 = scalar_lea.vmem %s10319_s1, %s5632_s23  ;;  %s10092_s18 = scalar_lea.vmem [#allocation4], %s5341_s16 }
  0x25   : > { %v6769_v1 = vmul.f32 %v6722_v44, %v550_v57  ;;  %565 = vst [vmem:[#allocation3 + $0x38] sm:$0x3] %v549_v56  ;;  %v6775_v3 = vmul.f32 %v6726_v47, %v548_v55  ;;  %v6778_v4 = vmul.f32 %v6726_v47, %v550_v57  ;;  %v6781_v5 = vmul.f32 %v6728_v48, %v550_v57  ;;  %v553_v7 = vld [vmem:[%s6738_s20 + $0x28] sm:$0x3]  ;;  %v555_v16 = vld [vmem:[%s6738_s20 + $0x38] sm:$0x3]  ;;  %s5187_s22 = scalar_lea.hbm %s10325_s7, %s5683_s19 }
  0x26   : > { %v1174_v8 = vrot.slane %v6766_v0, 1  ;;  %v6793_v10 = vmul.f32 %v6728_v48, %v6757_v61  ;;  %v6796_v11 = vmul.f32 %v6740_v51, %v550_v57  ;;  %567 = vst [vmem:[#allocation3 + $0x18] sm:$0x3] %v551_v60  ;;  %v6802_v14 = vmul.f32 %v6740_v51, %v6757_v61  ;;  %v6822_v21 = vld [vmem:[%s6738_s20 + $0x40] sm:$0xff]  ;;  %v6835_v26 = vld [vmem:[%s6738_s20 + $0x50] sm:$0xff]  ;;  %s5190_s30 = sshll.u32 %s5187_s22, 4  ;;  %s5191_s30 = int_to_ptr.hbm [resolvable:$true] %s5190_s30 }
  0x27   : > { %1817 = vmatpush.bf16.msra.mxu0 %v5385_v41  ;;  %5688 = vmatpush.bf16.msra.mxu2 %v5385_v41  ;;  %v1177_v9 = vrot.slane %v6769_v1, 1  ;;  %v1247_v12 = vrot.slane %v6775_v3, 2  ;;  %v1250_v13 = vrot.slane %v6778_v4, 2  ;;  %v6805_v15 = vmul.f32 %v6742_v52, %v550_v57  ;;  %569 = vst [vmem:[#allocation3 + $0x30] sm:$0x3] %v553_v7  ;;  %v6856_v35 = vld [vmem:[%s6738_s20 + $0x60] sm:$0xff] }
  0x28   : > { %5696 = vmatpush.bf16.msra.mxu3 %v5389_v42  ;;  %1846 = vmatpush.bf16.msra.mxu1 %v5389_v42  ;;  %v1337_v17 = vrot.slane %v6796_v11, 1  ;;  %v6811_v18 = vmul.f32 %v6742_v52, %v6757_v61  ;;  %v6815_v19 = vmul.f32 %v6751_v58, %v6757_v61  ;;  %v6819_v20 = vmul.f32 %v6751_v58, %v6772_v2  ;;  %v557_v30 = vld [vmem:[%s6738_s20 + $0x48] sm:$0x3]  ;;  %v559_v31 = vld [vmem:[%s6738_s20 + $0x58] sm:$0x3]  ;;  %s6454_s17 = sshra.s32 %s5191_s30, 4  ;;  %s6455_s17 = int_to_ptr.hbm [resolvable:$true] %s6454_s17 }
  0x29   : > { %v6828_v24 = vmul.f32 %v6753_v59, %v6757_v61  ;;  %v6832_v25 = vmul.f32 %v6753_v59, %v6772_v2  ;;  %v6841_v28 = vmul.f32 %v6786_v6, %v6757_v61  ;;  %v6845_v29 = vmul.f32 %v6786_v6, %v6772_v2  ;;  %571 = vst [vmem:[#allocation3 + $0x20] sm:$0x3] %v555_v16  ;;  %v563_v27 = vld [vmem:[%s6738_s20 + $0x78] sm:$0x3]  ;;  %s6456_s23 = scalar_lea.hbm %s6455_s17, 64  ;;  %s6460_s16 = scalar_lea.hbm %s10325_s7, 128 }
  0x2a   : > { %v6851_v32 = vmul.f32 %v6720_v43, %v6822_v21  ;;  %v6860_v36 = vmul.f32 %v6720_v43, %v6835_v26  ;;  %v6864_v37 = vmul.f32 %v6722_v44, %v6822_v21  ;;  %v6871_v41 = vmul.f32 %v6722_v44, %v6835_v26  ;;  %573 = vst [vmem:[#allocation3 + $0x90] sm:$0x3] %v557_v30  ;;  %p6457_p12 = scmp.ne.s32.totalorder %s6455_s17, %s6456_s23  ;;  %p6461_p1 = scmp.lt.s32.totalorder %s6455_s17, %s10325_s7 }
  0x2b   : > { %1818 = vmatpush.bf16.msra.mxu0 %v5373_v45  ;;  %5689 = vmatpush.bf16.msra.mxu2 %v5373_v45  ;;  %v6875_v42 = vmul.f32 %v6726_v47, %v6822_v21  ;;  %v6884_v57 = vmul.f32 %v6726_v47, %v6835_v26  ;;  %v6891_v40 = vmul.f32 %v6728_v48, %v6835_v26  ;;  %v10495_v4 = vrot.slane %v6805_v15, 2  ;;  %p6462_p2 = scmp.lt.s32.totalorder %s6460_s16, %s6456_s23 }
  0x2c   : > { %5697 = vmatpush.bf16.msra.mxu3 %v6724_v46  ;;  %1847 = vmatpush.bf16.msra.mxu1 %v6724_v46  ;;  %v1105_v38 = vld [vmem:[#allocation3 + $0x38] sm:$0x3]  ;;  %v561_v46 = vld [vmem:[%s6738_s20 + $0x68] sm:$0x3]  ;;  %v6895_v30 = vmul.f32 %v6728_v48, %v6856_v35  ;;  %575 = vst [vmem:[#allocation3 + $0x8] sm:$0x3] %v559_v31  ;;  %p6458_p13 = pnand %p6457_p12, %p6602_p4 }
  0x2d   : > { %v1143_v45 = vmul.f32 %v6722_v44, %v1105_v38  ;;  %v1216_v55 = vmul.f32 %v6726_v47, %v1105_v38  ;;  %v1107_v60 = vld [vmem:[#allocation3 + $0x18] sm:$0x3]  ;;  %577 = vst [vmem:[#allocation3 + $0x78] sm:$0x3] %v561_v46  ;;  %v10496_v11 = vrot.slane %v6802_v14, 1  ;;  %v10498_v14 = vrot.slane %v6828_v24, 1  ;;  %p6463_p3 = por %p6462_p2, %p6461_p1 }
  0x2e   : > { %v1145_v38 = vmul.f32 %v6722_v44, %v1107_v60  ;;  %v1218_v39 = vmul.f32 %v6726_v47, %v1107_v60  ;;  %v6901_v16 = vld [vmem:[#allocation3 + $0x30] sm:$0x3]  ;;  %v1306_v7 = vmul.f32 %v6740_v51, %v1107_v60  ;;  %v1379_v33 = vmul.f32 %v6742_v52, %v1107_v60  ;;  %579 = vst [vmem:[#allocation3 + $0x10] sm:$0x3] %v563_v27  ;;  %p6459_p0 = pneg %p6458_p13 }
  0x2f   : > { %1819 = vmatpush.bf16.msra.mxu0 %v6730_v49  ;;  %5690 = vmatpush.bf16.msra.mxu2 %v6730_v49  ;;  %v1175_v56 = vrot.slane %v1143_v45, 1  ;;  %v1248_v34 = vrot.slane %v1216_v55, 2  ;;  %v6909_v49 = vmul.f32 %v6740_v51, %v6835_v26  ;;  %v6919_v60 = vld [vmem:[%s6738_s20 + $0x70] sm:$0xff]  ;;  %v1308_v0 = vmul.f32 %v6740_v51, %v6901_v16 }
  0x30   : > { %5698 = vmatpush.bf16.msra.mxu3 %v6732_v50  ;;  %1848 = vmatpush.bf16.msra.mxu1 %v6732_v50  ;;  %v1178_v50 = vrot.slane %v1145_v38, 1  ;;  %v1251_v55 = vrot.slane %v1218_v39, 2  ;;  %v6922_v22 = vld [vmem:[#allocation3 + $0x20] sm:$0x3]  ;;  %v1381_v3 = vmul.f32 %v6742_v52, %v6901_v16  ;;  %v1411_v39 = vrot.slane %v1379_v33, 2  ;;  %p6464_p5 = pnand %p6463_p3, %p6459_p0 }
  0x31   : > { %v1176_v31 = vsel %vm663_vm0, %v1174_v8, %v1175_v56  ;;  %v1249_v45 = vsel %vm737_vm1, %v1247_v12, %v1248_v34  ;;  %v1338_v8 = vrot.slane %v1306_v7, 1  ;;  %v1469_v46 = vmul.f32 %v6753_v59, %v6901_v16  ;;  %v6949_v7 = vld [vmem:[#allocation3 + $0x90] sm:$0x3] }
  0x32   : > { %v1206_v23 = vadd.f32 %v1176_v31, %v6760_v62  ;;  %v1179_v12 = vsel %vm663_vm0, %v1177_v9, %v1178_v50  ;;  %v1252_v34 = vsel %vm737_vm1, %v1250_v13, %v1251_v55  ;;  %v1341_v9 = vrot.slane %v1308_v0, 1 }
  0x33   : > { %1820 = vmatpush.bf16.msra.mxu0 %v6744_v53  ;;  %v1207_v62 = vadd.f32 %v1179_v12, %v6763_v63  ;;  %v1339_v1 = vsel %vm663_vm0, %v1337_v17, %v1338_v8  ;;  %5691 = vmatpush.bf16.msra.mxu2 %v6744_v53  ;;  %v1412_v13 = vsel %vm737_vm1, %v10495_v4, %v1411_v39  ;;  %v1414_v33 = vrot.slane %v1381_v3, 2  ;;  %v6957_v15 = vld [vmem:[#allocation3 + $0x8] sm:$0x3] }
  0x34   : > { %5699 = vmatpush.bf16.msra.mxu3 %v6746_v54  ;;  %1849 = vmatpush.bf16.msra.mxu1 %v6746_v54  ;;  %v1279_v56 = vadd.f32 %v1249_v45, %v1206_v23  ;;  %v1471_v27 = vmul.f32 %v6753_v59, %v6922_v22  ;;  %v1501_v54 = vrot.slane %v1469_v46, 1  ;;  %v1342_v17 = vsel %vm663_vm0, %v10496_v11, %v1341_v9 }
  0x35   : > { %v1280_v63 = vadd.f32 %v1252_v34, %v1207_v62  ;;  %v1542_v53 = vmul.f32 %v6786_v6, %v6901_v16  ;;  %v10497_v38 = vrot.slane %v6811_v18, 2  ;;  %v1544_v45 = vmul.f32 %v6786_v6, %v6922_v22  ;;  %v6978_v18 = vld [vmem:[%s6964_s10] sm:$0xff] }
  0x36   : > { %v1296_v23 = vadd.f32 %v6781_v5, %v1279_v56  ;;  %v1502_v31 = vsel %vm663_vm0, %v10498_v14, %v1501_v54  ;;  %v1504_v50 = vrot.slane %v1471_v27, 1  ;;  %v1151_v3 = vmul.f32 %v6722_v44, %v6949_v7 }
  0x37   : > { %v1415_v5 = vsel %vm737_vm1, %v10497_v38, %v1414_v33  ;;  %v1297_v55 = vadd.f32 %v6793_v10, %v1280_v63  ;;  %v1574_v8 = vrot.slane %v1542_v53, 2  ;;  %v10499_v12 = vrot.slane %v6832_v25, 1  ;;  %v581_v10 = vld [vmem:[%s6964_s10 + $0x8] sm:$0x3]  ;;  %v583_v53 = vld [vmem:[%s6964_s10 + $0x18] sm:$0x3] }
  0x38   : > { %v1369_v0 = vadd.f32 %v1339_v1, %v1296_v23  ;;  %v1577_v24 = vrot.slane %v1544_v45, 2  ;;  %v1153_v39 = vmul.f32 %v6722_v44, %v6957_v15  ;;  %v1224_v46 = vmul.f32 %v6726_v47, %v6949_v7  ;;  %586 = vst [vmem:[#allocation3 + $0x58] sm:$0x3] %v581_v10 }
  0x39   : > { %v1505_v34 = vsel %vm663_vm0, %v10499_v12, %v1504_v50  ;;  %v1370_v62 = vadd.f32 %v1342_v17, %v1297_v55  ;;  %v10500_v1 = vrot.slane %v6841_v28, 2  ;;  %v1187_v4 = vrot.slane %v1151_v3, 1  ;;  %v6997_v17 = vld [vmem:[#allocation3 + $0x78] sm:$0x3]  ;;  %588 = vst [vmem:[#allocation3 + $0x48] sm:$0x3] %v583_v53 }
  0x3a   : > { %v1442_v56 = vadd.f32 %v1412_v13, %v1369_v0  ;;  %v10501_v25 = vrot.slane %v6845_v29, 2  ;;  %v1190_v27 = vrot.slane %v1153_v39, 1  ;;  %v1226_v54 = vmul.f32 %v6726_v47, %v6957_v15  ;;  %v7017_v3 = vld [vmem:[%s6964_s10 + $0x10] sm:$0xff] }
  0x3b   : > { %v1575_v9 = vsel %vm737_vm1, %v10500_v1, %v1574_v8  ;;  %v1260_v63 = vrot.slane %v1224_v46, 2  ;;  %v1443_v23 = vadd.f32 %v1415_v5, %v1370_v62  ;;  %v10502_v28 = vrot.slane %v6864_v37, 1 }
  0x3c   : > { %v1578_v33 = vsel %vm737_vm1, %v10501_v25, %v1577_v24  ;;  %v1459_v11 = vadd.f32 %v6815_v19, %v1442_v56  ;;  %v1314_v29 = vmul.f32 %v6740_v51, %v6957_v15  ;;  %v10503_v38 = vrot.slane %v6871_v41, 1 }
  0x3d   : > { %v1188_v13 = vsel %vm663_vm0, %v10502_v28, %v1187_v4  ;;  %v10504_v50 = vrot.slane %v6875_v42, 2  ;;  %v1263_v45 = vrot.slane %v1226_v54, 2  ;;  %v1460_v37 = vadd.f32 %v6819_v20, %v1443_v23  ;;  %v7039_v54 = vld [vmem:[#allocation3 + $0x10] sm:$0x3] }
  0x3e   : > { %v1191_v14 = vsel %vm663_vm0, %v10503_v38, %v1190_v27  ;;  %v1210_v5 = vadd.f32 %v1188_v13, %v6851_v32  ;;  %v1532_v55 = vadd.f32 %v1502_v31, %v1459_v11  ;;  %v1315_v8 = vmul.f32 %v6740_v51, %v6856_v35 }
  0x3f   : > { %v1261_v19 = vsel %vm737_vm1, %v10504_v50, %v1260_v63  ;;  %v1211_v0 = vadd.f32 %v1191_v14, %v6860_v36  ;;  %v10505_v41 = vrot.slane %v6884_v57, 2  ;;  %v1316_v42 = vmul.f32 %v6740_v51, %v6997_v17 }
  0x40   : > { %v1283_v12 = vadd.f32 %v1261_v19, %v1210_v5  ;;  %v1349_v24 = vrot.slane %v6909_v49, 1  ;;  %v1533_v39 = vadd.f32 %v1505_v34, %v1460_v37  ;;  %v1605_v20 = vadd.f32 %v1575_v9, %v1532_v55  ;;  %v5528_v37 = vld [vmem:[%s10323_s5 + $0xa8] sm:$0xf]  ;;  %v5657_v55 = vld [vmem:[%s10323_s5 + $0xb0] sm:$0xf0] }
  0x41   : > { %v1264_v32 = vsel %vm737_vm1, %v10505_v41, %v1263_v45  ;;  %v1350_v46 = vrot.slane %v1314_v29, 1  ;;  %v1352_v10 = vrot.slane %v1315_v8, 1  ;;  %v1353_v62 = vrot.slane %v1316_v42, 1  ;;  %v5530_v8 = vld [vmem:[%s10323_s5 + $0xb4] sm:$0xf0] }
  0x42   : > { %v1284_v31 = vadd.f32 %v1264_v32, %v1211_v0  ;;  %v1300_v36 = vadd.f32 %v6891_v40, %v1283_v12  ;;  %v1386_v56 = vmul.f32 %v6742_v52, %v6835_v26  ;;  %v1606_v57 = vadd.f32 %v1578_v33, %v1533_v39  ;;  %v5656_v0 = vld [vmem:[%s10323_s5 + $0xac] sm:$0xf]  ;;  %v5654_v39 = vld [vmem:[%s10323_s5 + $0x98] sm:$0xf0] }
  0x43   : > { %v1351_v4 = vsel %vm663_vm0, %v1349_v24, %v1350_v46  ;;  %v1387_v25 = vmul.f32 %v6742_v52, %v6957_v15  ;;  %v1354_v49 = vsel %vm663_vm0, %v1352_v10, %v1353_v62  ;;  %v1388_v9 = vmul.f32 %v6742_v52, %v6856_v35  ;;  %v5516_v24 = vld [vmem:[%s10323_s5 + $0x90] sm:$0xf] }
  0x44   : > { %v1301_v1 = vadd.f32 %v6895_v30, %v1284_v31  ;;  %v1373_v34 = vadd.f32 %v1351_v4, %v1300_v36  ;;  %v1389_v40 = vmul.f32 %v6742_v52, %v6997_v17  ;;  %v7037_v27 = vpack.c.bf16 %v1606_v57, %v1605_v20  ;;  %v5653_v20 = vld [vmem:[%s10323_s5 + $0x94] sm:$0xf]  ;;  %v5518_v31 = vld [vmem:[%s10323_s5 + $0x9c] sm:$0xf0]  ;;  %v7095_v57 = vld [vmem:[%s10323_s5 + $0x80] sm:$0xf0] }
  0x45   : > { %v1422_v30 = vrot.slane %v1386_v56, 2  ;;  %v1423_v63 = vrot.slane %v1387_v25, 2  ;;  %v1425_v23 = vrot.slane %v1388_v9, 2  ;;  %v1455_v28 = vmul.f32 %v6751_v58, %v6856_v35  ;;  %v7090_v56 = vld [vmem:[%s10323_s5 + $0x78] sm:$0xf] }
  0x46   : > { %v1374_v33 = vadd.f32 %v1354_v49, %v1301_v1  ;;  %v1426_v11 = vrot.slane %v1389_v40, 2  ;;  %v1456_v13 = vmul.f32 %v6751_v58, %v6919_v60  ;;  %1821 = vmatmul.bf16.vlgmr.msra.gmra.mxu0 %v7037_v27  ;;  %v1476_v53 = vmul.f32 %v6753_v59, %v6856_v35  ;;  %1850 = vmatmul.bf16.vlgmr.msra.gmra.mxu1 %v7037_v27  ;;  %v5506_v9 = vld [vmem:[%s10323_s5 + $0x84] sm:$0xf0] }
  0x47   : > { %v1424_v29 = vsel %vm737_vm1, %v1422_v30, %v1423_v63  ;;  %v1477_v38 = vmul.f32 %v6753_v59, %v6997_v17  ;;  %v1478_v14 = vmul.f32 %v6753_v59, %v6919_v60  ;;  %v1479_v19 = vmul.f32 %v6753_v59, %v7039_v54 }
  0x48   : > { %v1427_v5 = vsel %vm737_vm1, %v1425_v23, %v1426_v11  ;;  %v1446_v50 = vadd.f32 %v1424_v29, %v1373_v34  ;;  %v1549_v45 = vmul.f32 %v6786_v6, %v6856_v35  ;;  %v1512_v32 = vrot.slane %v1476_v53, 1  ;;  %v5650_v34 = vld [vmem:[%s10323_s5 + $0x7c] sm:$0xf]  ;;  %v7110_v23 = vld [vmem:[%s10323_s5 + $0x60] sm:$0xf] }
  0x49   : > { %v1447_v41 = vadd.f32 %v1427_v5, %v1374_v33  ;;  %v1513_v12 = vrot.slane %v1477_v38, 1  ;;  %v1515_v42 = vrot.slane %v1478_v14, 1  ;;  %v1516_v36 = vrot.slane %v1479_v19, 1  ;;  %v7115_v11 = vld [vmem:[%s10323_s5 + $0x68] sm:$0xf0] }
  0x4a   : > { %v1463_v46 = vadd.f32 %v1455_v28, %v1446_v50  ;;  %v1550_v10 = vmul.f32 %v6786_v6, %v6997_v17  ;;  %v1551_v62 = vmul.f32 %v6786_v6, %v6919_v60  ;;  %v1552_v25 = vmul.f32 %v6786_v6, %v7039_v54  ;;  %v7120_v38 = vld [vmem:[%s10323_s5 + $0x64] sm:$0xf]  ;;  %v7125_v14 = vld [vmem:[%s10323_s5 + $0x6c] sm:$0xf0] }
  0x4b   : > { %v1464_v1 = vadd.f32 %v1456_v13, %v1447_v41  ;;  %v1514_v4 = vsel %vm663_vm0, %v1512_v32, %v1513_v12  ;;  %v1585_v49 = vrot.slane %v1549_v45, 2  ;;  %v1517_v40 = vsel %vm663_vm0, %v1515_v42, %v1516_v36  ;;  %v508_v42 = vld [vmem:[%s7131_s15 + $0x8] sm:$0x3] }
  0x4c   : > { %v1536_v33 = vadd.f32 %v1514_v4, %v1463_v46  ;;  %v1586_v30 = vrot.slane %v1550_v10, 2  ;;  %v1588_v63 = vrot.slane %v1551_v62, 2  ;;  %v1589_v13 = vrot.slane %v1552_v25, 2  ;;  %524 = vst [vmem:[#allocation2 + $0x38] sm:$0x3] %v508_v42 }
  0x4d   : > { %v1537_v28 = vadd.f32 %v1517_v40, %v1464_v1  ;;  %v5529_v29 = vor.u32 %v5657_v55, %v5528_v37  ;;  %v5533_v53 = vor.u32 %v5656_v0, %v5530_v8  ;;  %v5517_v50 = vor.u32 %v5654_v39, %v5516_v24  ;;  %v510_v24 = vld [vmem:[%s7131_s15 + $0x18] sm:$0x3] }
  0x4e   : > { %v1587_v5 = vsel %vm737_vm1, %v1585_v49, %v1586_v30  ;;  %v5521_v19 = vor.u32 %v5653_v20, %v5518_v31  ;;  %v5505_v45 = vor.u32 %v7095_v57, %v7090_v56  ;;  %v1590_v37 = vsel %vm737_vm1, %v1588_v63, %v1589_v13  ;;  %526 = vst [vmem:[#allocation2 + $0x18] sm:$0x3] %v510_v24  ;;  %v512_v13 = vld [vmem:[%s7131_s15 + $0x28] sm:$0x3] }
  0x4f   : > { %v1609_v55 = vadd.f32 %v1587_v5, %v1536_v33  ;;  %2028 = vmatpush.bf16.msrb.mxu3 %v5529_v29  ;;  %2057 = vmatpush.bf16.msrb.mxu0 %v5533_v53  ;;  %v5509_v0 = vor.u32 %v5650_v34, %v5506_v9  ;;  %v1610_v8 = vadd.f32 %v1590_v37, %v1537_v28  ;;  %v7185_v37 = vld [vmem:[%s7131_s15] sm:$0xff] }
  0x50   : > { %v5493_v41 = vor.u32 %v7115_v11, %v7110_v23  ;;  %v5497_v32 = vor.u32 %v7120_v38, %v7125_v14  ;;  %v1127_v12 = vmul.f32 %v6720_v43, %v6757_v61  ;;  %v1128_v39 = vmul.f32 %v6720_v43, %v6772_v2  ;;  %528 = vst [vmem:[#allocation2 + $0x68] sm:$0x3] %v512_v13 }
  0x51   : > { %v1146_v20 = vmul.f32 %v6722_v44, %v6757_v61  ;;  %v1147_v31 = vmul.f32 %v6722_v44, %v6901_v16  ;;  %v1148_v46 = vmul.f32 %v6722_v44, %v6772_v2  ;;  %v7153_v36 = vpack.c.bf16 %v1610_v8, %v1609_v55 }
  0x52   : > { %v1149_v10 = vmul.f32 %v6722_v44, %v6922_v22  ;;  %v1219_v62 = vmul.f32 %v6726_v47, %v6757_v61  ;;  %v1220_v56 = vmul.f32 %v6726_v47, %v6901_v16  ;;  %v1221_v25 = vmul.f32 %v6726_v47, %v6772_v2 }
  0x53   : > { %2029 = vmatpush.bf16.msrb.mxu3 %v5517_v50  ;;  %2058 = vmatpush.bf16.msrb.mxu0 %v5521_v19  ;;  %v1180_v57 = vrot.slane %v1146_v20, 1  ;;  %v1181_v1 = vrot.slane %v1147_v31, 1  ;;  %v1183_v4 = vrot.slane %v1148_v46, 1  ;;  %v1222_v34 = vmul.f32 %v6726_v47, %v6922_v22 }
  0x54   : > { %1860 = vmatmul.bf16.vlgmr.msra.gmra.mxu3 %v7153_v36  ;;  %v1184_v49 = vrot.slane %v1149_v10, 1  ;;  %v1253_v61 = vrot.slane %v1219_v62, 2  ;;  %v1254_v9 = vrot.slane %v1220_v56, 2  ;;  %1831 = vmatmul.bf16.vlgmr.msra.gmra.mxu2 %v7153_v36  ;;  %v1256_v40 = vrot.slane %v1221_v25, 2 }
  0x55   : > { %v1182_v16 = vsel %vm663_vm0, %v1180_v57, %v1181_v1  ;;  %v1290_v33 = vmul.f32 %v6728_v48, %v6772_v2  ;;  %v1291_v30 = vmul.f32 %v6728_v48, %v6822_v21  ;;  %v1257_v28 = vrot.slane %v1222_v34, 2 }
  0x56   : > { %v1185_v63 = vsel %vm663_vm0, %v1183_v4, %v1184_v49  ;;  %v1208_v23 = vadd.f32 %v1182_v16, %v1127_v12  ;;  %v1255_v11 = vsel %vm737_vm1, %v1253_v61, %v1254_v9  ;;  %v1309_v53 = vmul.f32 %v6740_v51, %v6772_v2  ;;  %v7190_v12 = vld [vmem:[%s7131_s15 + $0x10] sm:$0xff]  ;;  %v514_v4 = vld [vmem:[%s7131_s15 + $0x38] sm:$0x3]  ;;  %v7211_v16 = vld [vmem:[%s7131_s15 + $0x20] sm:$0xff] }
  0x57   : > { %2030 = vmatpush.bf16.msrb.mxu3 %v5505_v45  ;;  %2059 = vmatpush.bf16.msrb.mxu0 %v5509_v0  ;;  %v1209_v29 = vadd.f32 %v1185_v63, %v1128_v39  ;;  %v1310_v38 = vmul.f32 %v6740_v51, %v6922_v22  ;;  %v1258_v14 = vsel %vm737_vm1, %v1256_v40, %v1257_v28 }
  0x58   : > { %v1281_v5 = vadd.f32 %v1255_v11, %v1208_v23  ;;  %v1311_v50 = vmul.f32 %v6740_v51, %v6822_v21  ;;  %v1312_v19 = vmul.f32 %v6740_v51, %v6949_v7  ;;  %v1343_v55 = vrot.slane %v1309_v53, 1  ;;  %530 = vst [vmem:[#allocation2 + $0x80] sm:$0x3] %v514_v4 }
  0x59   : > { %v1282_v45 = vadd.f32 %v1258_v14, %v1209_v29  ;;  %v1344_v0 = vrot.slane %v1310_v38, 1  ;;  %v1382_v8 = vmul.f32 %v6742_v52, %v6772_v2  ;;  %v1383_v20 = vmul.f32 %v6742_v52, %v6922_v22 }
  0x5a   : > { %v1298_v42 = vadd.f32 %v1290_v33, %v1281_v5  ;;  %v1346_v24 = vrot.slane %v1311_v50, 1  ;;  %v1347_v39 = vrot.slane %v1312_v19, 1  ;;  %v1384_v10 = vmul.f32 %v6742_v52, %v6822_v21 }
  0x5b   : > { %2031 = vmatpush.bf16.msrb.mxu3 %v5493_v41  ;;  %2060 = vmatpush.bf16.msrb.mxu0 %v5497_v32  ;;  %v1299_v31 = vadd.f32 %v1291_v30, %v1282_v45  ;;  %v1345_v46 = vsel %vm663_vm0, %v1343_v55, %v1344_v0  ;;  %v1416_v62 = vrot.slane %v1382_v8, 2  ;;  %v1385_v57 = vmul.f32 %v6742_v52, %v6949_v7 }
  0x5c   : > { %v1348_v2 = vsel %vm663_vm0, %v1346_v24, %v1347_v39  ;;  %v1371_v56 = vadd.f32 %v1345_v46, %v1298_v42  ;;  %v1417_v1 = vrot.slane %v1383_v20, 2  ;;  %v1419_v22 = vrot.slane %v1384_v10, 2  ;;  %v7238_v46 = vld [vmem:[%s7131_s15 + $0x30] sm:$0xff] }
  0x5d   : > { %v1372_v25 = vadd.f32 %v1348_v2, %v1299_v31  ;;  %v1453_v41 = vmul.f32 %v6751_v58, %v6822_v21  ;;  %v1454_v32 = vmul.f32 %v6751_v58, %v6835_v26  ;;  %v1420_v34 = vrot.slane %v1385_v57, 2 }
  0x5e   : > { %v1418_v49 = vsel %vm737_vm1, %v1416_v62, %v1417_v1  ;;  %v1472_v61 = vmul.f32 %v6753_v59, %v6822_v21  ;;  %v1473_v9 = vmul.f32 %v6753_v59, %v6949_v7  ;;  %v1474_v33 = vmul.f32 %v6753_v59, %v6835_v26 }
  0x5f   : > { %v1444_v40 = vadd.f32 %v1418_v49, %v1371_v56  ;;  %v1475_v30 = vmul.f32 %v6753_v59, %v6957_v15  ;;  %v1545_v63 = vmul.f32 %v6786_v6, %v6822_v21  ;;  %v1421_v23 = vsel %vm737_vm1, %v1419_v22, %v1420_v34 }
  0x60   : > { %v1506_v11 = vrot.slane %v1472_v61, 1  ;;  %v1507_v28 = vrot.slane %v1473_v9, 1  ;;  %v1546_v13 = vmul.f32 %v6786_v6, %v6949_v7  ;;  %v1445_v29 = vadd.f32 %v1421_v23, %v1372_v25  ;;  %v7256_v9 = vld [vmem:[#allocation3 + $0x58] sm:$0x3] }
  0x61   : > { %v1461_v53 = vadd.f32 %v1453_v41, %v1444_v40  ;;  %v1509_v38 = vrot.slane %v1474_v33, 1  ;;  %v1510_v14 = vrot.slane %v1475_v30, 1  ;;  %v1547_v50 = vmul.f32 %v6786_v6, %v6835_v26 }
  0x62   : > { %v1508_v5 = vsel %vm663_vm0, %v1506_v11, %v1507_v28  ;;  %v1548_v21 = vmul.f32 %v6786_v6, %v6957_v15  ;;  %v1579_v19 = vrot.slane %v1545_v63, 2  ;;  %v1462_v45 = vadd.f32 %v1454_v32, %v1445_v29 }
  0x63   : > { %v1511_v55 = vsel %vm663_vm0, %v1509_v38, %v1510_v14  ;;  %v1534_v0 = vadd.f32 %v1508_v5, %v1461_v53  ;;  %v1580_v8 = vrot.slane %v1546_v13, 2  ;;  %v1582_v7 = vrot.slane %v1547_v50, 2 }
  0x64   : > { %v1583_v42 = vrot.slane %v1548_v21, 2  ;;  %v1131_v24 = vmul.f32 %v6720_v43, %v6856_v35  ;;  %v1132_v39 = vmul.f32 %v6720_v43, %v6919_v60  ;;  %v1535_v20 = vadd.f32 %v1511_v55, %v1462_v45 }
  0x65   : > { %v1581_v26 = vsel %vm737_vm1, %v1579_v19, %v1580_v8  ;;  %v1154_v15 = vmul.f32 %v6722_v44, %v6856_v35  ;;  %v1155_v31 = vmul.f32 %v6722_v44, %v6997_v17  ;;  %v1156_v2 = vmul.f32 %v6722_v44, %v6919_v60 }
  0x66   : > { %v1584_v10 = vsel %vm737_vm1, %v1582_v7, %v1583_v42  ;;  %v1607_v62 = vadd.f32 %v1581_v26, %v1534_v0  ;;  %v1157_v43 = vmul.f32 %v6722_v44, %v7039_v54  ;;  %v1227_v4 = vmul.f32 %v6726_v47, %v6856_v35  ;;  %v516_v7 = vld [vmem:[%s7131_s15 + $0x48] sm:$0x3] }
  0x67   : > { %v1608_v56 = vadd.f32 %v1584_v10, %v1535_v20  ;;  %v1192_v57 = vrot.slane %v1154_v15, 1  ;;  %v1193_v1 = vrot.slane %v1155_v31, 1  ;;  %v1195_v25 = vrot.slane %v1156_v2, 1  ;;  %532 = vst [vmem:[#allocation2 + $0x88] sm:$0x3] %v516_v7 }
  0x68   : > { %v1196_v22 = vrot.slane %v1157_v43, 1  ;;  %v1228_v41 = vmul.f32 %v6726_v47, %v6997_v17  ;;  %v1229_v32 = vmul.f32 %v6726_v47, %v6919_v60  ;;  %v1230_v44 = vmul.f32 %v6726_v47, %v7039_v54 }
  0x69   : > { %v7251_v49 = vpack.c.bf16 %v1608_v56, %v1607_v62  ;;  %v1194_v34 = vsel %vm663_vm0, %v1192_v57, %v1193_v1  ;;  %v1265_v61 = vrot.slane %v1227_v4, 2  ;;  %v1294_v23 = vmul.f32 %v6728_v48, %v6919_v60 }
  0x6a   : > { %v1197_v35 = vsel %vm663_vm0, %v1195_v25, %v1196_v22  ;;  %v1212_v40 = vadd.f32 %v1194_v34, %v1131_v24  ;;  %v1266_v33 = vrot.slane %v1228_v41, 2  ;;  %v1268_v30 = vrot.slane %v1229_v32, 2  ;;  %v5480_v22 = vld [vmem:[%s10323_s5 + $0x48] sm:$0xf]  ;;  %v5645_v41 = vld [vmem:[%s10323_s5 + $0x50] sm:$0xf0] }
  0x6b   : > { %1826 = vmatmul.bf16.gmra.mxu0 %v7251_v49  ;;  %v1213_v17 = vadd.f32 %v1197_v35, %v1132_v39  ;;  %v1269_v63 = vrot.slane %v1230_v44, 2  ;;  %v1295_v11 = vmul.f32 %v6728_v48, %v6978_v18  ;;  %1855 = vmatmul.bf16.gmra.mxu1 %v7251_v49  ;;  %v1317_v28 = vmul.f32 %v6740_v51, %v6919_v60  ;;  %v1123_v39 = vld [vmem:[#allocation3 + $0x48] sm:$0x3]  ;;  %v5644_v32 = vld [vmem:[%s10323_s5 + $0x4c] sm:$0xf] }
  0x6c   : > { %v1267_v47 = vsel %vm737_vm1, %v1265_v61, %v1266_v33  ;;  %v1318_v13 = vmul.f32 %v6740_v51, %v7039_v54  ;;  %v1319_v29 = vmul.f32 %v6740_v51, %v6978_v18  ;;  %v1320_v48 = vmul.f32 %v6740_v51, %v7256_v9  ;;  %v5468_v35 = vld [vmem:[%s10323_s5 + $0x30] sm:$0xf]  ;;  %v5641_v33 = vld [vmem:[%s10323_s5 + $0x34] sm:$0xf] }
  0x6d   : > { %v1270_v53 = vsel %vm737_vm1, %v1268_v30, %v1269_v63  ;;  %v1285_v38 = vadd.f32 %v1267_v47, %v1212_v40  ;;  %v1390_v14 = vmul.f32 %v6742_v52, %v6919_v60  ;;  %v1355_v50 = vrot.slane %v1317_v28, 1  ;;  %v5642_v40 = vld [vmem:[%s10323_s5 + $0x38] sm:$0xf0]  ;;  %v5470_v30 = vld [vmem:[%s10323_s5 + $0x3c] sm:$0xf0] }
  0x6e   : > { %v1286_v5 = vadd.f32 %v1270_v53, %v1213_v17  ;;  %v1356_v21 = vrot.slane %v1318_v13, 1  ;;  %v1358_v19 = vrot.slane %v1319_v29, 1  ;;  %v1359_v55 = vrot.slane %v1320_v48, 1  ;;  %v7328_v17 = vld [vmem:[%s10323_s5 + $0x18] sm:$0xf] }
  0x6f   : > { %v1302_v45 = vadd.f32 %v1294_v23, %v1285_v38  ;;  %v1391_v0 = vmul.f32 %v6742_v52, %v7039_v54  ;;  %v1392_v8 = vmul.f32 %v6742_v52, %v6978_v18  ;;  %v1393_v51 = vmul.f32 %v6742_v52, %v7256_v9  ;;  %v7333_v63 = vld [vmem:[%s10323_s5 + $0x20] sm:$0xf0]  ;;  %v518_v23 = vld [vmem:[%s7131_s15 + $0x58] sm:$0x3]  ;;  %v7343_v29 = vld [vmem:[%s10323_s5 + $0x1c] sm:$0xf] }
  0x70   : > { %v1303_v42 = vadd.f32 %v1295_v11, %v1286_v5  ;;  %v1357_v24 = vsel %vm663_vm0, %v1355_v50, %v1356_v21  ;;  %v1428_v60 = vrot.slane %v1390_v14, 2  ;;  %v1360_v20 = vsel %vm663_vm0, %v1358_v19, %v1359_v55  ;;  %534 = vst [vmem:[#allocation2 + $0x40] sm:$0x3] %v518_v23  ;;  %v7356_v5 = vld [vmem:[%s7131_s15 + $0x40] sm:$0xff] }
  0x71   : > { %v1375_v26 = vadd.f32 %v1357_v24, %v1302_v45  ;;  %v1429_v15 = vrot.slane %v1391_v0, 2  ;;  %v1431_v31 = vrot.slane %v1392_v8, 2  ;;  %v1432_v54 = vrot.slane %v1393_v51, 2  ;;  %v7367_v55 = vld [vmem:[%s10322_s4] sm:$0xff]  ;;  %v7377_v51 = vld [vmem:[%s10323_s5 + $0xc] sm:$0xf0] }
  0x72   : > { %v1376_v10 = vadd.f32 %v1360_v20, %v1303_v42  ;;  %v1457_v62 = vmul.f32 %v6751_v58, %v6978_v18  ;;  %v1458_v2 = vmul.f32 %v6751_v58, %v7017_v3  ;;  %v1480_v52 = vmul.f32 %v6753_v59, %v6978_v18  ;;  %v7372_v24 = vld [vmem:[%s10323_s5 + $0x4] sm:$0xf] }
  0x73   : > { %v1430_v43 = vsel %vm737_vm1, %v1428_v60, %v1429_v15  ;;  %v1481_v56 = vmul.f32 %v6753_v59, %v7256_v9  ;;  %v1482_v57 = vmul.f32 %v6753_v59, %v7017_v3  ;;  %v1433_v1 = vsel %vm737_vm1, %v1431_v31, %v1432_v54  ;;  %v7380_v60 = vld [vmem:[%s7131_s15 + $0x50] sm:$0xff] }
  0x74   : > { %v1448_v4 = vadd.f32 %v1430_v43, %v1375_v26  ;;  %v1483_v25 = vmul.f32 %v6753_v59, %v1123_v39  ;;  %v1553_v58 = vmul.f32 %v6786_v6, %v6978_v18  ;;  %v5482_v59 = vld [vmem:[%s10323_s5 + $0x54] sm:$0xf0]  ;;  %v1449_v34 = vadd.f32 %v1433_v1, %v1376_v10 }
  0x75   : > { %v1518_v44 = vrot.slane %v1480_v52, 1  ;;  %v1519_v61 = vrot.slane %v1481_v56, 1  ;;  %v1521_v18 = vrot.slane %v1482_v57, 1  ;;  %v1554_v28 = vmul.f32 %v6786_v6, %v7256_v9  ;;  %v5458_v9 = vld [vmem:[%s10323_s5 + $0x24] sm:$0xf0] }
  0x76   : > { %v1465_v11 = vadd.f32 %v1457_v62, %v1448_v4  ;;  %v1522_v47 = vrot.slane %v1483_v25, 1  ;;  %v1555_v13 = vmul.f32 %v6786_v6, %v7017_v3  ;;  %v1466_v53 = vadd.f32 %v1458_v2, %v1449_v34  ;;  %v7353_v3 = vld [vmem:[%s10323_s5] sm:$0xf]  ;;  %v594_v62 = vld [vmem:[#allocation2 + $0x38] sm:$0x3] }
  0x77   : > { %v1520_v38 = vsel %vm663_vm0, %v1518_v44, %v1519_v61  ;;  %v1556_v48 = vmul.f32 %v6786_v6, %v1123_v39  ;;  %v1591_v14 = vrot.slane %v1553_v58, 2  ;;  %v1592_v19 = vrot.slane %v1554_v28, 2  ;;  %v7362_v6 = vld [vmem:[%s10323_s5 + $0x8] sm:$0xf0]  ;;  %v596_v57 = vld [vmem:[#allocation2 + $0x18] sm:$0x3] }
  0x78   : > { %v1523_v50 = vsel %vm663_vm0, %v1521_v18, %v1522_v47  ;;  %v1538_v21 = vadd.f32 %v1520_v38, %v1465_v11  ;;  %v1594_v45 = vrot.slane %v1555_v13, 2  ;;  %v5481_v7 = vor.u32 %v5645_v41, %v5480_v22  ;;  %v7426_v47 = vld [vmem:[#allocation2 + $0x68] sm:$0x3] }
  0x79   : > { %v1539_v0 = vadd.f32 %v1523_v50, %v1466_v53  ;;  %v1595_v8 = vrot.slane %v1556_v48, 2  ;;  %v5485_v42 = vor.u32 %v5644_v32, %v5482_v59  ;;  %v1593_v39 = vsel %vm737_vm1, %v1591_v14, %v1592_v19 }
  0x7a   : > { %v5469_v20 = vor.u32 %v5642_v40, %v5468_v35  ;;  %v5473_v26 = vor.u32 %v5641_v33, %v5470_v30  ;;  %v5457_v15 = vor.u32 %v7333_v63, %v7328_v17  ;;  %v1611_v10 = vadd.f32 %v1593_v39, %v1538_v21  ;;  %2032 = vmatpush.bf16.msrb.mxu3 %v5481_v7 }
  0x7b   : > { %v1596_v31 = vsel %vm737_vm1, %v1594_v45, %v1595_v8  ;;  %2061 = vmatpush.bf16.msrb.mxu0 %v5485_v42  ;;  %v5461_v54 = vor.u32 %v7343_v29, %v5458_v9  ;;  %v7388_v2 = vperm.slane %v7367_v55, 0  ;;  %v5445_v52 = vor.u32 %v7362_v6, %v7353_v3  ;;  %v520_v3 = vld [vmem:[%s7131_s15 + $0x68] sm:$0x3] }
  0x7c   : > { %v1612_v43 = vadd.f32 %v1596_v31, %v1539_v0  ;;  %v5449_v56 = vor.u32 %v7372_v24, %v7377_v51  ;;  %v7395_v1 = vperm.slane %v7367_v55, 1  ;;  %v7402_v58 = vperm.slane %v7367_v55, 2  ;;  %536 = vst [vmem:[#allocation2 + $0x10] sm:$0x3] %v520_v3 }
  0x7d   : > { %v614_v4 = vmul.f32 %v7388_v2, %v7185_v37  ;;  %v615_v25 = vmul.f32 %v7388_v2, %v7190_v12  ;;  %v7405_v22 = vperm.slane %v7367_v55, 3  ;;  %v7419_v35 = vperm.slane %v7367_v55, 4 }
  0x7e   : > { %v7407_v41 = vpack.c.bf16 %v1612_v43, %v1611_v10  ;;  %v631_v32 = vmul.f32 %v7395_v1, %v7185_v37  ;;  %v632_v59 = vmul.f32 %v7395_v1, %v594_v62  ;;  %v633_v34 = vmul.f32 %v7395_v1, %v7190_v12  ;;  %2033 = vmatpush.bf16.msrb.mxu3 %v5469_v20  ;;  %v7453_v10 = vld [vmem:[%s10322_s4 + $0x10] ss:$0 sm:$0xff] }
  0x7f   : > { %2062 = vmatpush.bf16.msrb.mxu0 %v5473_v26  ;;  %v634_v44 = vmul.f32 %v7395_v1, %v596_v57  ;;  %v705_v61 = vmul.f32 %v7402_v58, %v7185_v37  ;;  %v706_v18 = vmul.f32 %v7402_v58, %v594_v62  ;;  %v707_v17 = vmul.f32 %v7402_v58, %v7190_v12 }
  0x80   : > { %1865 = vmatmul.bf16.gmra.mxu3 %v7407_v41  ;;  %v664_v40 = vrot.slane %v631_v32, 1  ;;  %v665_v33 = vrot.slane %v632_v59, 1  ;;  %v667_v30 = vrot.slane %v633_v34, 1  ;;  %1836 = vmatmul.bf16.gmra.mxu2 %v7407_v41  ;;  %v708_v23 = vmul.f32 %v7402_v58, %v596_v57 }
  0x81   : > { %v668_v63 = vrot.slane %v634_v44, 1  ;;  %v738_v37 = vrot.slane %v705_v61, 2  ;;  %v739_v11 = vrot.slane %v706_v18, 2  ;;  %v741_v13 = vrot.slane %v707_v17, 2  ;;  %v7465_v61 = vld [vmem:[#allocation2 + $0x80] sm:$0x3] }
  0x82   : > { %v666_v28 = vsel %vm663_vm0, %v664_v40, %v665_v33  ;;  %v779_v29 = vmul.f32 %v7405_v22, %v7190_v12  ;;  %v780_v53 = vmul.f32 %v7405_v22, %v7211_v16  ;;  %2034 = vmatpush.bf16.msrb.mxu3 %v5457_v15  ;;  %v742_v9 = vrot.slane %v708_v23, 2  ;;  %v7476_v17 = vld [vmem:[%s7131_s15 + $0x60] sm:$0xff] }
  0x83   : > { %2063 = vmatpush.bf16.msrb.mxu0 %v5461_v54  ;;  %v669_v38 = vsel %vm663_vm0, %v667_v30, %v668_v63  ;;  %v696_v48 = vadd.f32 %v666_v28, %v614_v4  ;;  %v740_v14 = vsel %vm737_vm1, %v738_v37, %v739_v11  ;;  %v796_v21 = vmul.f32 %v7419_v35, %v7190_v12 }
  0x84   : > { %v697_v50 = vadd.f32 %v669_v38, %v615_v25  ;;  %v797_v19 = vmul.f32 %v7419_v35, %v596_v57  ;;  %v798_v45 = vmul.f32 %v7419_v35, %v7211_v16  ;;  %v743_v6 = vsel %vm737_vm1, %v741_v13, %v742_v9  ;;  %v522_v25 = vld [vmem:[%s7131_s15 + $0x78] sm:$0x3] }
  0x85   : > { %v770_v0 = vadd.f32 %v740_v14, %v696_v48  ;;  %v799_v8 = vmul.f32 %v7419_v35, %v7426_v47  ;;  %v7445_v7 = vperm.slane %v7367_v55, 5  ;;  %v828_v24 = vrot.slane %v796_v21, 1  ;;  %538 = vst [vmem:[#allocation2 + $0x60] sm:$0x3] %v522_v25 }
  0x86   : > { %v771_v42 = vadd.f32 %v743_v6, %v697_v50  ;;  %v829_v51 = vrot.slane %v797_v19, 1  ;;  %v831_v39 = vrot.slane %v798_v45, 1  ;;  %2035 = vmatpush.bf16.msrb.mxu3 %v5445_v52  ;;  %v7463_v44 = vperm.slane %v7367_v55, 6 }
  0x87   : > { %2064 = vmatpush.bf16.msrb.mxu0 %v5449_v56  ;;  %v787_v20 = vadd.f32 %v779_v29, %v770_v0  ;;  %v832_v26 = vrot.slane %v799_v8, 1  ;;  %v869_v15 = vmul.f32 %v7445_v7, %v7190_v12  ;;  %v870_v31 = vmul.f32 %v7445_v7, %v596_v57 }
  0x88   : > { %v788_v54 = vadd.f32 %v780_v53, %v771_v42  ;;  %v830_v62 = vsel %vm663_vm0, %v828_v24, %v829_v51  ;;  %v871_v43 = vmul.f32 %v7445_v7, %v7211_v16  ;;  %v872_v52 = vmul.f32 %v7445_v7, %v7426_v47  ;;  %v7490_v53 = vld [vmem:[%s7131_s15 + $0x70] sm:$0xff]  ;;  %s5188_s15 = sshll.u32 %s10092_s18, 4  ;;  %s5189_s15 = int_to_ptr.vmem [resolvable:$true] %s5188_s15 }
  0x89   : > { %v833_v56 = vsel %vm663_vm0, %v831_v39, %v832_v26  ;;  %v860_v12 = vadd.f32 %v830_v62, %v787_v20  ;;  %v901_v4 = vrot.slane %v869_v15, 2  ;;  %v902_v57 = vrot.slane %v870_v31, 2 }
  0x8a   : > { %v861_v32 = vadd.f32 %v833_v56, %v788_v54  ;;  %v904_v59 = vrot.slane %v871_v43, 2  ;;  %v905_v34 = vrot.slane %v872_v52, 2  ;;  %v7469_v40 = vperm.slane %v7367_v55, 7 }
  0x8b   : > { %v903_v18 = vsel %vm737_vm1, %v901_v4, %v902_v57  ;;  %v1032_v33 = vmul.f32 %v7453_v10, %v7211_v16  ;;  %v1033_v30 = vmul.f32 %v7453_v10, %v7426_v47  ;;  %v942_v37 = vmul.f32 %v7463_v44, %v7211_v16 }
  0x8c   : > { %v906_v63 = vsel %vm737_vm1, %v904_v59, %v905_v34  ;;  %v933_v23 = vadd.f32 %v903_v18, %v860_v12  ;;  %v943_v11 = vmul.f32 %v7463_v44, %v7238_v46  ;;  %v959_v55 = vmul.f32 %v7469_v40, %v7211_v16 }
  0x8d   : > { %v934_v28 = vadd.f32 %v906_v63, %v861_v32  ;;  %v960_v13 = vmul.f32 %v7469_v40, %v7426_v47  ;;  %v961_v29 = vmul.f32 %v7469_v40, %v7238_v46  ;;  %v962_v48 = vmul.f32 %v7469_v40, %v7465_v61 }
  0x8e   : > { %v950_v38 = vadd.f32 %v942_v37, %v933_v23  ;;  %v1034_v14 = vmul.f32 %v7453_v10, %v7238_v46  ;;  %v1035_v9 = vmul.f32 %v7453_v10, %v7465_v61  ;;  %v991_v50 = vrot.slane %v959_v55, 1 }
  0x8f   : > { %v951_v3 = vadd.f32 %v943_v11, %v934_v28  ;;  %v992_v21 = vrot.slane %v960_v13, 1  ;;  %v994_v19 = vrot.slane %v961_v29, 1  ;;  %v995_v45 = vrot.slane %v962_v48, 1  ;;  %v7534_v11 = vld [vmem:[#allocation2 + $0x88] sm:$0x3] }
  0x90   : > { %v1064_v6 = vrot.slane %v1032_v33, 2  ;;  %v1065_v0 = vrot.slane %v1033_v30, 2  ;;  %v1067_v8 = vrot.slane %v1034_v14, 2  ;;  %v1068_v24 = vrot.slane %v1035_v9, 2 }
  0x91   : > { %v993_v42 = vsel %vm663_vm0, %v991_v50, %v992_v21  ;;  %v616_v51 = vmul.f32 %v7388_v2, %v7211_v16  ;;  %v617_v39 = vmul.f32 %v7388_v2, %v7238_v46  ;;  %v996_v20 = vsel %vm663_vm0, %v994_v19, %v995_v45 }
  0x92   : > { %v1023_v26 = vadd.f32 %v993_v42, %v950_v38  ;;  %v1066_v15 = vsel %vm737_vm1, %v1064_v6, %v1065_v0  ;;  %v635_v31 = vmul.f32 %v7395_v1, %v7211_v16  ;;  %v1024_v54 = vadd.f32 %v996_v20, %v951_v3  ;;  %v540_v38 = vld [vmem:[%s7523_s8 + $0x8] sm:$0x3] }
  0x93   : > { %v1069_v62 = vsel %vm737_vm1, %v1067_v8, %v1068_v24  ;;  %v636_v43 = vmul.f32 %v7395_v1, %v7426_v47  ;;  %v637_v52 = vmul.f32 %v7395_v1, %v7238_v46  ;;  %v638_v12 = vmul.f32 %v7395_v1, %v7465_v61  ;;  %545 = vst [vmem:[#allocation2 + $0x48] sm:$0x3] %v540_v38 }
  0x94   : > { %v1096_v56 = vadd.f32 %v1066_v15, %v1023_v26  ;;  %v670_v4 = vrot.slane %v635_v31, 1  ;;  %v709_v57 = vmul.f32 %v7402_v58, %v7211_v16  ;;  %v1097_v25 = vadd.f32 %v1069_v62, %v1024_v54 }
  0x95   : > { %v671_v32 = vrot.slane %v636_v43, 1  ;;  %v673_v59 = vrot.slane %v637_v52, 1  ;;  %v710_v34 = vmul.f32 %v7402_v58, %v7426_v47  ;;  %v674_v18 = vrot.slane %v638_v12, 1  ;;  %v542_v52 = vld [vmem:[%s7523_s8 + $0x18] sm:$0x3] }
  0x96   : > { %v711_v33 = vmul.f32 %v7402_v58, %v7238_v46  ;;  %v712_v16 = vmul.f32 %v7402_v58, %v7465_v61  ;;  %v744_v30 = vrot.slane %v709_v57, 2  ;;  %v7529_v63 = vpack.c.bf16 %v1097_v25, %v1096_v56  ;;  %v7562_v56 = vld [vmem:[#allocation2 + $0x40] sm:$0x3]  ;;  %547 = vst [vmem:[#allocation2 + $0x90] sm:$0x3] %v542_v52 }
  0x97   : > { %v672_v23 = vsel %vm663_vm0, %v670_v4, %v671_v32  ;;  %v745_v47 = vrot.slane %v710_v34, 2  ;;  %v781_v37 = vmul.f32 %v7405_v22, %v7238_v46  ;;  %v675_v28 = vsel %vm663_vm0, %v673_v59, %v674_v18  ;;  %v7571_v18 = vld [vmem:[%s7523_s8] sm:$0xff] }
  0x98   : > { %v698_v55 = vadd.f32 %v672_v23, %v616_v51  ;;  %v747_v13 = vrot.slane %v711_v33, 2  ;;  %v748_v29 = vrot.slane %v712_v16, 2  ;;  %2036 = vmatmul.bf16.vlgmr.msrb.gmra.mxu3 %v7529_v63  ;;  %2065 = vmatmul.bf16.vlgmr.msrb.gmra.mxu0 %v7529_v63  ;;  %v699_v48 = vadd.f32 %v675_v28, %v617_v39 }
  0x99   : > { %v746_v14 = vsel %vm737_vm1, %v744_v30, %v745_v47  ;;  %v782_v9 = vmul.f32 %v7405_v22, %v7356_v5  ;;  %v800_v21 = vmul.f32 %v7419_v35, %v7238_v46  ;;  %v801_v19 = vmul.f32 %v7419_v35, %v7465_v61 }
  0x9a   : > { %v749_v3 = vsel %vm737_vm1, %v747_v13, %v748_v29  ;;  %v772_v50 = vadd.f32 %v746_v14, %v698_v55  ;;  %v802_v6 = vmul.f32 %v7419_v35, %v7356_v5  ;;  %v803_v0 = vmul.f32 %v7419_v35, %v7534_v11  ;;  %v7587_v13 = vld [vmem:[%s7523_s8 + $0x10] sm:$0xff]  ;;  %s5174_s8 = scalar_lea.sflag [#allocation5], %s430_s12 }
  0x9b   : > { %v773_v45 = vadd.f32 %v749_v3, %v699_v48  ;;  %v873_v8 = vmul.f32 %v7445_v7, %v7238_v46  ;;  %v834_v24 = vrot.slane %v800_v21, 1  ;;  %v835_v51 = vrot.slane %v801_v19, 1 }
  0x9c   : > { %v789_v42 = vadd.f32 %v781_v37, %v772_v50  ;;  %v874_v39 = vmul.f32 %v7445_v7, %v7465_v61  ;;  %v837_v26 = vrot.slane %v802_v6, 1  ;;  %v838_v15 = vrot.slane %v803_v0, 1 }
  0x9d   : > { %v790_v20 = vadd.f32 %v782_v9, %v773_v45  ;;  %v875_v31 = vmul.f32 %v7445_v7, %v7356_v5  ;;  %v836_v54 = vsel %vm663_vm0, %v834_v24, %v835_v51  ;;  %v876_v62 = vmul.f32 %v7445_v7, %v7534_v11 }
  0x9e   : > { %v907_v43 = vrot.slane %v873_v8, 2  ;;  %v908_v46 = vrot.slane %v874_v39, 2  ;;  %v839_v12 = vsel %vm663_vm0, %v837_v26, %v838_v15  ;;  %v862_v61 = vadd.f32 %v836_v54, %v789_v42 }
  0x9f   : > { %v910_v4 = vrot.slane %v875_v31, 2  ;;  %v944_v57 = vmul.f32 %v7463_v44, %v7356_v5  ;;  %v863_v25 = vadd.f32 %v839_v12, %v790_v20  ;;  %v911_v59 = vrot.slane %v876_v62, 2 }
  0xa0   : > { %v909_v32 = vsel %vm737_vm1, %v907_v43, %v908_v46  ;;  %v945_v34 = vmul.f32 %v7463_v44, %v7380_v60  ;;  %v963_v16 = vmul.f32 %v7469_v40, %v7356_v5  ;;  %v964_v30 = vmul.f32 %v7469_v40, %v7534_v11 }
  0xa1   : > { %v935_v33 = vadd.f32 %v909_v32, %v862_v61  ;;  %v965_v23 = vmul.f32 %v7469_v40, %v7380_v60  ;;  %v912_v47 = vsel %vm737_vm1, %v910_v4, %v911_v59  ;;  %v966_v37 = vmul.f32 %v7469_v40, %v7562_v56 }
  0xa2   : > { %v1036_v28 = vmul.f32 %v7453_v10, %v7356_v5  ;;  %v1037_v55 = vmul.f32 %v7453_v10, %v7534_v11  ;;  %v936_v29 = vadd.f32 %v912_v47, %v863_v25  ;;  %v997_v48 = vrot.slane %v963_v16, 1 }
  0xa3   : > { %v952_v38 = vadd.f32 %v944_v57, %v935_v33  ;;  %v998_v14 = vrot.slane %v964_v30, 1  ;;  %v1000_v9 = vrot.slane %v965_v23, 1  ;;  %v1001_v3 = vrot.slane %v966_v37, 1 }
  0xa4   : > { %v1038_v50 = vmul.f32 %v7453_v10, %v7380_v60  ;;  %v1039_v21 = vmul.f32 %v7453_v10, %v7562_v56  ;;  %v953_v19 = vadd.f32 %v945_v34, %v936_v29  ;;  %v1070_v6 = vrot.slane %v1036_v28, 2 }
  0xa5   : > { %v999_v45 = vsel %vm663_vm0, %v997_v48, %v998_v14  ;;  %v1071_v0 = vrot.slane %v1037_v55, 2  ;;  %v1002_v8 = vsel %vm663_vm0, %v1000_v9, %v1001_v3  ;;  %v618_v26 = vmul.f32 %v7388_v2, %v7356_v5 }
  0xa6   : > { %v1025_v42 = vadd.f32 %v999_v45, %v952_v38  ;;  %v1073_v24 = vrot.slane %v1038_v50, 2  ;;  %v1074_v51 = vrot.slane %v1039_v21, 2  ;;  %v1026_v39 = vadd.f32 %v1002_v8, %v953_v19 }
  0xa7   : > { %v1072_v20 = vsel %vm737_vm1, %v1070_v6, %v1071_v0  ;;  %v619_v15 = vmul.f32 %v7388_v2, %v7380_v60  ;;  %v639_v62 = vmul.f32 %v7395_v1, %v7356_v5  ;;  %v640_v43 = vmul.f32 %v7395_v1, %v7534_v11 }
  0xa8   : > { %v1075_v31 = vsel %vm737_vm1, %v1073_v24, %v1074_v51  ;;  %v1098_v54 = vadd.f32 %v1072_v20, %v1025_v42  ;;  %v641_v52 = vmul.f32 %v7395_v1, %v7380_v60  ;;  %v642_v12 = vmul.f32 %v7395_v1, %v7562_v56 }
  0xa9   : > { %v1099_v46 = vadd.f32 %v1075_v31, %v1026_v39  ;;  %v713_v61 = vmul.f32 %v7402_v58, %v7356_v5  ;;  %v676_v4 = vrot.slane %v639_v62, 1  ;;  %v677_v57 = vrot.slane %v640_v43, 1 }
  0xaa   : > { %v714_v25 = vmul.f32 %v7402_v58, %v7534_v11  ;;  %v715_v32 = vmul.f32 %v7402_v58, %v7380_v60  ;;  %v679_v34 = vrot.slane %v641_v52, 1  ;;  %v680_v33 = vrot.slane %v642_v12, 1  ;;  %v7622_v11 = vld [vmem:[#allocation2 + $0x10] sm:$0x3] }
  0xab   : > { %v7615_v59 = vpack.c.bf16 %v1099_v46, %v1098_v54  ;;  %v716_v16 = vmul.f32 %v7402_v58, %v7562_v56  ;;  %v678_v30 = vsel %vm663_vm0, %v676_v4, %v677_v57  ;;  %v750_v23 = vrot.slane %v713_v61, 2  ;;  %v7650_v46 = vld [vmem:[#allocation2 + $0x60] sm:$0x3] }
  0xac   : > { %v751_v47 = vrot.slane %v714_v25, 2  ;;  %v753_v5 = vrot.slane %v715_v32, 2  ;;  %v681_v37 = vsel %vm663_vm0, %v679_v34, %v680_v33  ;;  %v700_v28 = vadd.f32 %v678_v30, %v618_v26 }
  0xad   : > { %2041 = vmatmul.bf16.gmra.mxu3 %v7615_v59  ;;  %2070 = vmatmul.bf16.gmra.mxu0 %v7615_v59  ;;  %v754_v55 = vrot.slane %v716_v16, 2  ;;  %v783_v29 = vmul.f32 %v7405_v22, %v7380_v60  ;;  %v701_v38 = vadd.f32 %v681_v37, %v619_v15  ;;  %v784_v14 = vmul.f32 %v7405_v22, %v7476_v17 }
  0xae   : > { %v752_v48 = vsel %vm737_vm1, %v750_v23, %v751_v47  ;;  %v804_v9 = vmul.f32 %v7419_v35, %v7380_v60  ;;  %v805_v21 = vmul.f32 %v7419_v35, %v7562_v56  ;;  %v806_v19 = vmul.f32 %v7419_v35, %v7476_v17 }
  0xaf   : > { %v755_v3 = vsel %vm737_vm1, %v753_v5, %v754_v55  ;;  %v774_v50 = vadd.f32 %v752_v48, %v700_v28  ;;  %v807_v6 = vmul.f32 %v7419_v35, %v7622_v11  ;;  %v877_v8 = vmul.f32 %v7445_v7, %v7380_v60 }
  0xb0   : > { %v775_v45 = vadd.f32 %v755_v3, %v701_v38  ;;  %v840_v0 = vrot.slane %v804_v9, 1  ;;  %v841_v24 = vrot.slane %v805_v21, 1  ;;  %v843_v51 = vrot.slane %v806_v19, 1 }
  0xb1   : > { %v791_v42 = vadd.f32 %v783_v29, %v774_v50  ;;  %v878_v39 = vmul.f32 %v7445_v7, %v7562_v56  ;;  %v844_v26 = vrot.slane %v807_v6, 1  ;;  %v879_v15 = vmul.f32 %v7445_v7, %v7476_v17 }
  0xb2   : > { %v792_v20 = vadd.f32 %v784_v14, %v775_v45  ;;  %v880_v31 = vmul.f32 %v7445_v7, %v7622_v11  ;;  %v842_v54 = vsel %vm663_vm0, %v840_v0, %v841_v24  ;;  %v913_v62 = vrot.slane %v877_v8, 2 }
  0xb3   : > { %v914_v43 = vrot.slane %v878_v39, 2  ;;  %v946_v60 = vmul.f32 %v7463_v44, %v7476_v17  ;;  %v845_v52 = vsel %vm663_vm0, %v843_v51, %v844_v26  ;;  %v864_v56 = vadd.f32 %v842_v54, %v791_v42 }
  0xb4   : > { %v916_v12 = vrot.slane %v879_v15, 2  ;;  %v917_v61 = vrot.slane %v880_v31, 2  ;;  %v865_v4 = vadd.f32 %v845_v52, %v792_v20  ;;  %v947_v25 = vmul.f32 %v7463_v44, %v7490_v53 }
  0xb5   : > { %v915_v57 = vsel %vm737_vm1, %v913_v62, %v914_v43  ;;  %v967_v32 = vmul.f32 %v7469_v40, %v7476_v17  ;;  %v968_v16 = vmul.f32 %v7469_v40, %v7622_v11  ;;  %v969_v30 = vmul.f32 %v7469_v40, %v7490_v53 }
  0xb6   : > { %v918_v34 = vsel %vm737_vm1, %v916_v12, %v917_v61  ;;  %v937_v33 = vadd.f32 %v915_v57, %v864_v56  ;;  %v970_v47 = vmul.f32 %v7469_v40, %v7650_v46  ;;  %v1040_v37 = vmul.f32 %v7453_v10, %v7476_v17 }
  0xb7   : > { %v938_v23 = vadd.f32 %v918_v34, %v865_v4  ;;  %v1003_v5 = vrot.slane %v967_v32, 1  ;;  %v1004_v55 = vrot.slane %v968_v16, 1  ;;  %v1006_v29 = vrot.slane %v969_v30, 1 }
  0xb8   : > { %v954_v28 = vadd.f32 %v946_v60, %v937_v33  ;;  %v1041_v38 = vmul.f32 %v7453_v10, %v7622_v11  ;;  %v1007_v14 = vrot.slane %v970_v47, 1  ;;  %v1042_v9 = vmul.f32 %v7453_v10, %v7490_v53 }
  0xb9   : > { %v955_v48 = vadd.f32 %v947_v25, %v938_v23  ;;  %v1043_v3 = vmul.f32 %v7453_v10, %v7650_v46  ;;  %v1005_v50 = vsel %vm663_vm0, %v1003_v5, %v1004_v55  ;;  %v1076_v21 = vrot.slane %v1040_v37, 2 }
  0xba   : > { %v1077_v19 = vrot.slane %v1041_v38, 2  ;;  %v620_v45 = vmul.f32 %v7388_v2, %v7476_v17  ;;  %v1008_v6 = vsel %vm663_vm0, %v1006_v29, %v1007_v14  ;;  %v1027_v0 = vadd.f32 %v1005_v50, %v954_v28 }
  0xbb   : > { %v1079_v8 = vrot.slane %v1042_v9, 2  ;;  %v1080_v42 = vrot.slane %v1043_v3, 2  ;;  %v1028_v24 = vadd.f32 %v1008_v6, %v955_v48  ;;  %v621_v39 = vmul.f32 %v7388_v2, %v7490_v53 }
  0xbc   : > { %v1078_v51 = vsel %vm737_vm1, %v1076_v21, %v1077_v19  ;;  %v643_v20 = vmul.f32 %v7395_v1, %v7476_v17  ;;  %v644_v31 = vmul.f32 %v7395_v1, %v7622_v11  ;;  %v645_v54 = vmul.f32 %v7395_v1, %v7490_v53 }
  0xbd   : > { %v1081_v26 = vsel %vm737_vm1, %v1079_v8, %v1080_v42  ;;  %v1100_v15 = vadd.f32 %v1078_v51, %v1027_v0  ;;  %v646_v43 = vmul.f32 %v7395_v1, %v7650_v46  ;;  %v717_v2 = vmul.f32 %v7402_v58, %v7476_v17  ;;  %v610_v1 = vld [vmem:[#allocation2 + $0x48] sm:$0x3]  ;;  %v612_v42 = vld [vmem:[#allocation2 + $0x90] sm:$0x3] }
  0xbe   : > { %v1101_v62 = vadd.f32 %v1081_v26, %v1028_v24  ;;  %v682_v60 = vrot.slane %v643_v20, 1  ;;  %v683_v52 = vrot.slane %v644_v31, 1  ;;  %v685_v56 = vrot.slane %v645_v54, 1 }
  0xbf   : > { %v718_v12 = vmul.f32 %v7402_v58, %v7622_v11  ;;  %v719_v61 = vmul.f32 %v7402_v58, %v7490_v53  ;;  %v686_v57 = vrot.slane %v646_v43, 1  ;;  %v720_v25 = vmul.f32 %v7402_v58, %v7650_v46 }
  0xc0   : > { %v7695_v4 = vpack.c.bf16 %v1101_v62, %v1100_v15  ;;  %v756_v32 = vrot.slane %v717_v2, 2  ;;  %v684_v34 = vsel %vm663_vm0, %v682_v60, %v683_v52  ;;  %v785_v16 = vmul.f32 %v7405_v22, %v7490_v53 }
  0xc1   : > { %v757_v33 = vrot.slane %v718_v12, 2  ;;  %v759_v17 = vrot.slane %v719_v61, 2  ;;  %v687_v11 = vsel %vm663_vm0, %v685_v56, %v686_v57  ;;  %v702_v30 = vadd.f32 %v684_v34, %v620_v45 }
  0xc2   : > { %2046 = vmatmul.bf16.gmra.mxu3 %v7695_v4  ;;  %2075 = vmatmul.bf16.gmra.mxu0 %v7695_v4  ;;  %v760_v23 = vrot.slane %v720_v25, 2  ;;  %v786_v58 = vmul.f32 %v7405_v22, %v7571_v18  ;;  %v703_v47 = vadd.f32 %v687_v11, %v621_v39  ;;  %v808_v37 = vmul.f32 %v7419_v35, %v7490_v53 }
  0xc3   : > { %v758_v5 = vsel %vm737_vm1, %v756_v32, %v757_v33  ;;  %v809_v28 = vmul.f32 %v7419_v35, %v7650_v46  ;;  %v810_v38 = vmul.f32 %v7419_v35, %v7571_v18  ;;  %v811_v48 = vmul.f32 %v7419_v35, %v610_v1 }
  0xc4   : > { %v761_v55 = vsel %vm737_vm1, %v759_v17, %v760_v23  ;;  %v776_v29 = vadd.f32 %v758_v5, %v702_v30  ;;  %v846_v9 = vrot.slane %v808_v37, 1  ;;  %v881_v3 = vmul.f32 %v7445_v7, %v7490_v53 }
  0xc5   : > { %v777_v14 = vadd.f32 %v761_v55, %v703_v47  ;;  %v847_v22 = vrot.slane %v809_v28, 1  ;;  %v849_v21 = vrot.slane %v810_v38, 1  ;;  %v850_v19 = vrot.slane %v811_v48, 1 }
  0xc6   : > { %v793_v50 = vadd.f32 %v785_v16, %v776_v29  ;;  %v882_v45 = vmul.f32 %v7445_v7, %v7650_v46  ;;  %v883_v8 = vmul.f32 %v7445_v7, %v7571_v18  ;;  %v884_v35 = vmul.f32 %v7445_v7, %v610_v1 }
  0xc7   : > { %v794_v6 = vadd.f32 %v786_v58, %v777_v14  ;;  %v848_v0 = vsel %vm663_vm0, %v846_v9, %v847_v22  ;;  %v851_v24 = vsel %vm663_vm0, %v849_v21, %v850_v19  ;;  %v919_v39 = vrot.slane %v881_v3, 2  ;;  %v5440_v21 = vld [vmem:[%s10323_s5 + $0x170] sm:$0xf]  ;;  %v5682_v19 = vld [vmem:[%s10323_s5 + $0x178] sm:$0xf0] }
  0xc8   : > { %v866_v51 = vadd.f32 %v848_v0, %v793_v50  ;;  %v920_v53 = vrot.slane %v882_v45, 2  ;;  %v922_v26 = vrot.slane %v883_v8, 2  ;;  %v923_v15 = vrot.slane %v884_v35, 2  ;;  %v2115_v50 = vld [vmem:[%s10324_s6] sm:$0x7] }
  0xc9   : > { %v867_v20 = vadd.f32 %v851_v24, %v794_v6  ;;  %v948_v46 = vmul.f32 %v7463_v44, %v7571_v18  ;;  %v949_v54 = vmul.f32 %v7463_v44, %v7587_v13  ;;  %v971_v7 = vmul.f32 %v7469_v40, %v7571_v18  ;;  %v1851_v6 = vpop.f32.mrf.mxu1  ;;  %v5428_v35 = vld [vmem:[%s10323_s5 + $0x158] sm:$0xf] }
  0xca   : > { %v921_v31 = vsel %vm737_vm1, %v919_v39, %v920_v53  ;;  %v972_v62 = vmul.f32 %v7469_v40, %v610_v1  ;;  %v924_v43 = vsel %vm737_vm1, %v922_v26, %v923_v15  ;;  %v973_v2 = vmul.f32 %v7469_v40, %v7587_v13  ;;  %v5416_v53 = vld [vmem:[%s10323_s5 + $0x140] sm:$0xf] }
  0xcb   : > { %v939_v60 = vadd.f32 %v921_v31, %v866_v51  ;;  %v974_v52 = vmul.f32 %v7469_v40, %v612_v42  ;;  %v940_v56 = vadd.f32 %v924_v43, %v867_v20  ;;  %v1009_v12 = vrot.slane %v971_v7, 1  ;;  %v5676_v20 = vld [vmem:[%s10323_s5 + $0x148] sm:$0xf0]  ;;  %v5404_v43 = vld [vmem:[%s10323_s5 + $0x128] sm:$0xf] }
  0xcc   : > { %v1010_v61 = vrot.slane %v972_v62, 1  ;;  %v1044_v57 = vmul.f32 %v7453_v10, %v7571_v18  ;;  %v1012_v25 = vrot.slane %v973_v2, 1  ;;  %v1045_v34 = vmul.f32 %v7453_v10, %v610_v1 }
  0xcd   : > { %v956_v44 = vadd.f32 %v948_v46, %v939_v60  ;;  %v1013_v32 = vrot.slane %v974_v52, 1  ;;  %v957_v33 = vadd.f32 %v949_v54, %v940_v56  ;;  %v1046_v16 = vmul.f32 %v7453_v10, %v7587_v13  ;;  %v5673_v60 = vld [vmem:[%s10323_s5 + $0x130] sm:$0xf0] }
  0xce   : > { %v1011_v17 = vsel %vm663_vm0, %v1009_v12, %v1010_v61  ;;  %v1047_v11 = vmul.f32 %v7453_v10, %v612_v42  ;;  %v1082_v23 = vrot.slane %v1044_v57, 2  ;;  %v1083_v58 = vrot.slane %v1045_v34, 2  ;;  %v1822_v10 = vpop.f32.mrf.mxu0  ;;  %v5679_v42 = vld [vmem:[%s10323_s5 + $0x160] sm:$0xf0]  ;;  %v5392_v57 = vld [vmem:[%s10323_s5 + $0x110] sm:$0xf] }
  0xcf   : > { %v1014_v40 = vsel %vm663_vm0, %v1012_v25, %v1013_v32  ;;  %v1029_v30 = vadd.f32 %v1011_v17, %v956_v44  ;;  %v1085_v18 = vrot.slane %v1046_v16, 2  ;;  %v5441_v45 = vor.u32 %v5682_v19, %v5440_v21  ;;  %v5670_v44 = vld [vmem:[%s10323_s5 + $0x118] sm:$0xf0] }
  0xd0   : > { %v1030_v47 = vadd.f32 %v1014_v40, %v957_v33  ;;  %v1086_v5 = vrot.slane %v1047_v11, 2  ;;  %v1084_v37 = vsel %vm737_vm1, %v1082_v23, %v1083_v58  ;;  %v7772_v0 = vperm.slane %v2115_v50, 1  ;;  %v5380_v11 = vld [vmem:[%s10323_s5 + $0xf8] sm:$0xf]  ;;  %v5667_v23 = vld [vmem:[%s10323_s5 + $0x100] sm:$0xf0] }
  0xd1   : > { %v1102_v28 = vadd.f32 %v1084_v37, %v1029_v30  ;;  %1871 = vmatpush.bf16.msrb.mxu2 %v5441_v45  ;;  %v5429_v51 = vor.u32 %v5679_v42, %v5428_v35  ;;  %v7790_v15 = vperm.slane %v2115_v50, 0  ;;  %v5417_v46 = vor.u32 %v5676_v20, %v5416_v53  ;;  %v1853_v7 = vpop.f32.mrf.mxu1  ;;  %v5536_v50 = vld [vmem:[%s10323_s5 + $0xb0] sm:$0xf]  ;;  %v5658_v21 = vld [vmem:[%s10323_s5 + $0xb8] sm:$0xf0] }
  0xd2   : > { %v1087_v1 = vsel %vm737_vm1, %v1085_v18, %v1086_v5  ;;  %v5405_v56 = vor.u32 %v5673_v60, %v5404_v43  ;;  %v5393_v34 = vor.u32 %v5670_v44, %v5392_v57  ;;  %v5381_v58 = vor.u32 %v5667_v23, %v5380_v11  ;;  %v5356_v42 = vld [vmem:[%s10323_s5 + $0xc8] sm:$0xf] }
  0xd3   : > { %v1103_v55 = vadd.f32 %v1087_v1, %v1030_v47  ;;  %v5368_v1 = vld [vmem:[%s10323_s5 + $0xe0] sm:$0xf]  ;;  %v5537_v35 = vor.u32 %v5658_v21, %v5536_v50 }
  0xd5   : > { %v7747_v29 = vpack.c.bf16 %v1103_v55, %v1102_v28  ;;  %1872 = vmatpush.bf16.msrb.mxu2 %v5429_v51  ;;  %v5664_v28 = vld [vmem:[%s10323_s5 + $0xe8] sm:$0xf0]  ;;  %2086 = vmatpush.bf16.msrb.mxu1 %v5537_v35 }
  0xd6   : > { %v1824_v38 = vpop.f32.mrf.mxu0 }
  0xd7   : > { %2051 = vmatmul.bf16.gmra.mxu3 %v7747_v29  ;;  %2080 = vmatmul.bf16.gmra.mxu0 %v7747_v29  ;;  %v7751_v13 = vpop.f32.mrf.mxu3 }
  0xd9   : > { %1873 = vmatpush.bf16.msrb.mxu2 %v5417_v46 }
  0xdd   : > { %1874 = vmatpush.bf16.msrb.mxu2 %v5405_v56 }
  0xdf   : > { %v7753_v48 = vpop.f32.mrf.mxu3 }
  0xe1   : > { %1875 = vmatpush.bf16.msrb.mxu2 %v5393_v34 }
  0xe5   : > { %1876 = vmatpush.bf16.msrb.mxu2 %v5381_v58 }
  0xe8   : > { %v7755_v14 = vpop.f32.mrf.mxu0  ;;  %v1856_v30 = vpop.f32.mrf.mxu1 }
  0xf0   : > { %v7759_v22 = vpop.f32.mrf.mxu0 }
 0x103   : > { %v7757_v9 = vpop.f32.mrf.mxu3 }
 0x10b   : > { %v7761_v3 = vpop.f32.mrf.mxu3 }
 0x115   : > { %v2066_v8 = vpop.f32.mrf.mxu0 }
 0x116   : > { %v2067_v24 = vadd.f32 %v2066_v8, %v1851_v6 }
 0x118   : > { %v7781_v39 = vadd.f32 %v7772_v0, %v2067_v24  ;;  %v5661_v24 = vld [vmem:[%s10323_s5 + $0xd0] sm:$0xf0] }
 0x119   : > { %v5357_v20 = vor.u32 %v5661_v24, %v5356_v42 }
 0x11a   : > { %v5539_v26 = vmul.f32 -1.442695, %v7781_v39 }
 0x11b   : > { %v2037_v31 = vpop.f32.mrf.mxu3 }
 0x11c   : > { %5831 = vpow2.f32 %v5539_v26  ;;  %v2038_v54 = vadd.f32 %v2037_v31, %v1822_v10  ;;  %v5524_v26 = vld [vmem:[%s10323_s5 + $0x98] sm:$0xf] }
 0x11d   : > { %v2068_v62 = vpop.f32.mrf.mxu0 }
 0x11e   : > { %v7799_v2 = vadd.f32 %v7790_v15, %v2038_v54  ;;  %v2069_v52 = vadd.f32 %v2068_v62, %v1853_v7  ;;  %v5655_v7 = vld [vmem:[%s10323_s5 + $0xa0] sm:$0xf0] }
 0x11f   : > { %v5525_v56 = vor.u32 %v5655_v7, %v5524_v26 }
 0x120   : > { %v5538_v12 = vmul.f32 -1.442695, %v7799_v2  ;;  %v7803_v61 = vadd.f32 %v7772_v0, %v2069_v52  ;;  %v1858_v52 = vpop.f32.mrf.mxu1 }
 0x121   : > { %2087 = vmatpush.bf16.msrb.mxu1 %v5525_v56 }
 0x122   : > { %v5832_v25 = vpop.eup %5831  ;;  %5833 = vpow2.f32 %v5538_v12  ;;  %v5542_v32 = vmul.f32 -1.442695, %v7803_v61 }
 0x123   : > { %v7812_v33 = vadd.f32 1.0, %v5832_v25  ;;  %v2039_v17 = vpop.f32.mrf.mxu3 }
 0x124   : > { %5835 = vpow2.f32 %v5542_v32  ;;  %v2040_v16 = vadd.f32 %v2039_v17, %v1824_v38  ;;  %v5369_v38 = vor.u32 %v5664_v28, %v5368_v1 }
 0x125   : > { %5837 = vrcp.f32 %v7812_v33  ;;  %v2267_v46 = vand.u32 2147483647, %v7812_v33  ;;  %v2269_v31 = vand.u32 2147483648, %v7812_v33  ;;  %vm2263_vm2 = vweird.f32 %v7812_v33 }
 0x126   : > { %v7819_v40 = vadd.f32 %v7790_v15, %v2040_v16  ;;  %1877 = vmatpush.bf16.msrb.mxu2 %v5369_v38 }
 0x127   : > { %vm7877_vm4 = vcmp.eq.f32.partialorder %v2267_v46, 8.507059e+37  ;;  %v2270_v58 = vor.u32 1.1754944e-38, %v2269_v31 }
 0x128   : > { %v5834_v47 = vpop.eup %5833  ;;  %v5541_v18 = vmul.f32 -1.442695, %v7819_v40 }
 0x129   : > { %v7825_v5 = vadd.f32 1.0, %v5834_v47 }
 0x12a   : > { %v2071_v37 = vpop.f32.mrf.mxu0  ;;  %v5836_v55 = vpop.eup %5835  ;;  %5839 = vpow2.f32 %v5541_v18  ;;  %1878 = vmatpush.bf16.msrb.mxu2 %v5357_v20 }
 0x12b   : > { %v2072_v10 = vadd.f32 %v2071_v37, %v1856_v30  ;;  %v7839_v19 = vpop.eup %5837  ;;  %5841 = vrcp.f32 %v7825_v5  ;;  %v7844_v6 = vadd.f32 1.0, %v5836_v55  ;;  %v2252_v57 = vand.u32 2147483647, %v7825_v5  ;;  %v5512_v37 = vld [vmem:[%s10323_s5 + $0x80] sm:$0xf] }
 0x12c   : > { %v2259_v45 = vmul.f32 %v7839_v19, %v7812_v33  ;;  %vm2264_vm3 = vweird.f32 %v7839_v19  ;;  %v2254_v16 = vand.u32 2147483648, %v7825_v5  ;;  %vm2248_vm6 = vweird.f32 %v7825_v5  ;;  %v5652_v55 = vld [vmem:[%s10323_s5 + $0x88] sm:$0xf0] }
 0x12d   : > { %v7847_v8 = vadd.f32 %v7772_v0, %v2072_v10  ;;  %5843 = vrcp.f32 %v7844_v6  ;;  %vm7887_vm5 = vmor %vm2263_vm2, %vm2264_vm3  ;;  %1879 = vmatmul.bf16.vlgmr.msrb.gmra.mxu2 %v7037_v27  ;;  %vm7900_vm7 = vcmp.eq.f32.partialorder %v2252_v57, 8.507059e+37  ;;  %v5513_v50 = vor.u32 %v5652_v55, %v5512_v37  ;;  %v1832_v55 = vpop.f32.mrf.mxu2 }
 0x12e   : > { %v2260_v51 = vsub.f32 1.0, %v2259_v45  ;;  %v2255_v21 = vor.u32 1.1754944e-38, %v2254_v16  ;;  %v2314_v42 = vand.u32 2147483648, %v7844_v6  ;;  %v2312_v31 = vand.u32 2147483647, %v7844_v6 }
 0x12f   : > { %v5545_v53 = vmul.f32 -1.442695, %v7847_v8  ;;  %2088 = vmatpush.bf16.msrb.mxu1 %v5513_v50  ;;  %vm2308_vm11 = vweird.f32 %v7844_v6 }
 0x130   : > { %v2042_v54 = vpop.f32.mrf.mxu3  ;;  %v5840_v62 = vpop.eup %5839  ;;  %v2261_v43 = vmul.f32 %v7839_v19, %v2260_v51  ;;  %v7942_v56 = vor.u32 1.1754944e-38, %v2314_v42  ;;  %vm7966_vm0 = vcmp.eq.f32.partialorder %v2312_v31, 8.507059e+37 }
 0x131   : > { %5845 = vpow2.f32 %v5545_v53  ;;  %v2043_v60 = vadd.f32 %v2042_v54, %v7755_v14  ;;  %v5842_v12 = vpop.eup %5841  ;;  %v7870_v44 = vadd.f32 1.0, %v5840_v62  ;;  %v5649_v62 = vld [vmem:[%s10323_s5 + $0x70] sm:$0xf0] }
 0x132   : > { %v2262_v25 = vadd.f32 %v7839_v19, %v2261_v43  ;;  %v2244_v32 = vmul.f32 %v5842_v12, %v7825_v5  ;;  %v2073_v14 = vpop.f32.mrf.mxu0  ;;  %vm2249_vm8 = vweird.f32 %v5842_v12  ;;  %v5500_v5 = vld [vmem:[%s10323_s5 + $0x68] sm:$0xf] }
 0x133   : > { %v7875_v34 = vadd.f32 %v7790_v15, %v2043_v60  ;;  %5847 = vrcp.f32 %v7870_v44  ;;  %v2074_v11 = vadd.f32 %v2073_v14, %v1858_v52  ;;  %v7883_v30 = vpop.eup %5843  ;;  %vm2250_vm9 = vmor %vm2248_vm6, %vm2249_vm8  ;;  %v2299_v46 = vand.u32 2147483648, %v7870_v44 }
 0x134   : > { %v2245_v47 = vsub.f32 1.0, %v2244_v32  ;;  %v2266_v33 = vsel %vm7887_vm5, %v7839_v19, %v2262_v25  ;;  %v2304_v10 = vmul.f32 %v7883_v30, %v7844_v6  ;;  %v2297_v52 = vand.u32 2147483647, %v7870_v44 }
 0x135   : > { %v5544_v18 = vmul.f32 -1.442695, %v7875_v34  ;;  %v7905_v28 = vadd.f32 %v7772_v0, %v2074_v11  ;;  %v2271_v24 = vsel %vm7877_vm4, %v2270_v58, %v2266_v33  ;;  %vm2293_vm12 = vweird.f32 %v7870_v44 }
 0x136   : > { %v2246_v27 = vmul.f32 %v5842_v12, %v2245_v47  ;;  %v2305_v20 = vsub.f32 1.0, %v2304_v10  ;;  %v2604_v43 = vmul.f32 %v2271_v24, %v7781_v39  ;;  %v5501_v39 = vor.u32 %v5649_v62, %v5500_v5 }
 0x137   : > { %v5846_v38 = vpop.eup %5845  ;;  %5849 = vpow2.f32 %v5544_v18  ;;  %v5548_v45 = vmul.f32 -1.442695, %v7905_v28  ;;  %v2300_v47 = vor.u32 1.1754944e-38, %v2299_v46  ;;  %vm2309_vm14 = vweird.f32 %v7883_v30 }
 0x138   : > { %v7912_v19 = vadd.f32 1.0, %v5846_v38  ;;  %v2044_v35 = vpop.f32.mrf.mxu3  ;;  %v2247_v51 = vadd.f32 %v5842_v12, %v2246_v27  ;;  %v2306_v14 = vmul.f32 %v7883_v30, %v2305_v20  ;;  %2089 = vmatpush.bf16.msrb.mxu1 %v5501_v39  ;;  %vm7961_vm15 = vcmp.eq.f32.partialorder %v2297_v52, 8.507059e+37  ;;  %vm7989_vm4 = vmor %vm2308_vm11, %vm2309_vm14  ;;  %v1834_v38 = vpop.f32.mrf.mxu2 }
 0x139   : > { %v2045_v53 = vadd.f32 %v2044_v35, %v7759_v22  ;;  %v7919_v26 = vpop.eup %5847 }
 0x13a   : > { %5851 = vrcp.f32 %v7912_v19  ;;  %v2251_v54 = vsel %vm2250_vm9, %v5842_v12, %v2247_v51  ;;  %v2289_v22 = vmul.f32 %v7919_v26, %v7870_v44  ;;  %v2357_v17 = vand.u32 2147483647, %v7912_v19 }
 0x13b   : > { %5853 = vpow2.f32 %v5548_v45  ;;  %v7927_v7 = vadd.f32 %v7790_v15, %v2045_v53  ;;  %v2256_v60 = vsel %vm7900_vm7, %v2255_v21, %v2251_v54  ;;  %vm2353_vm13 = vweird.f32 %v7912_v19  ;;  %v5476_v21 = vld [vmem:[%s10323_s5 + $0x38] sm:$0xf] }
 0x13c   : > { %v2603_v57 = vmul.f32 %v2256_v60, %v7799_v2  ;;  %v2290_v32 = vsub.f32 1.0, %v2289_v22  ;;  %v2359_v18 = vand.u32 2147483648, %v7912_v19  ;;  %v2307_v27 = vadd.f32 %v7883_v30, %v2306_v14 }
 0x13d   : > { %v5850_v12 = vpop.eup %5849  ;;  %v5547_v25 = vmul.f32 -1.442695, %v7927_v7  ;;  %vm7970_vm2 = vcmp.eq.f32.partialorder %v2357_v17, 8.507059e+37  ;;  %vm2294_vm3 = vweird.f32 %v7919_v26  ;;  %1884 = vmatmul.bf16.gmra.mxu2 %v7251_v49 }
 0x13e   : > { %v7948_v16 = vadd.f32 1.0, %v5850_v12  ;;  %v7951_v11 = vpack.c.bf16 %v2604_v43, %v2603_v57  ;;  %v2291_v58 = vmul.f32 %v7919_v26, %v2290_v32  ;;  %v2360_v51 = vor.u32 1.1754944e-38, %v2359_v18  ;;  %vm7999_vm6 = vmor %vm2293_vm12, %vm2294_vm3 }
 0x13f   : > { %5855 = vpow2.f32 %v5547_v25  ;;  %v2076_v23 = vpop.f32.mrf.mxu0  ;;  %v2311_v6 = vsel %vm7989_vm4, %v7883_v30, %v2307_v27 }
 0x140   : > { %v5852_v2 = vpop.eup %5851  ;;  %5857 = vrcp.f32 %v7948_v16  ;;  %v2077_v1 = vadd.f32 %v2076_v23, %v7751_v13  ;;  %v2644_v10 = vrot.slane %v7951_v11, 4  ;;  %v2292_v24 = vadd.f32 %v7919_v26, %v2291_v58 }
 0x141   : > { %v5854_v37 = vpop.eup %5853  ;;  %v2349_v33 = vmul.f32 %v5852_v2, %v7912_v19  ;;  %vm2354_vm1 = vweird.f32 %v5852_v2  ;;  %v2342_v53 = vand.u32 2147483647, %v7948_v16  ;;  %v2344_v20 = vand.u32 2147483648, %v7948_v16 }
 0x142   : > { %v7974_v45 = vadd.f32 1.0, %v5854_v37  ;;  %v7978_v35 = vadd.f32 %v7772_v0, %v2077_v1  ;;  %v2688_v42 = vsel %vm2686_vm10, %v2644_v10, 0  ;;  %vm2338_vm5 = vweird.f32 %v7948_v16  ;;  %vm8010_vm7 = vmor %vm2353_vm13, %vm2354_vm1  ;;  %v5646_v1 = vld [vmem:[%s10323_s5 + $0x58] sm:$0xf0] }
 0x143   : > { %v2350_v13 = vsub.f32 1.0, %v2349_v33  ;;  %2697 = vmatpush.bf16.msra.mxu2 %v2688_v42  ;;  %v2296_v19 = vsel %vm7999_vm6, %v7919_v26, %v2292_v24  ;;  %vm8022_vm8 = vcmp.eq.f32.partialorder %v2342_v53, 8.507059e+37  ;;  %v2345_v14 = vor.u32 1.1754944e-38, %v2344_v20 }
 0x144   : > { %5859 = vrcp.f32 %v7974_v45  ;;  %v5551_v22 = vmul.f32 -1.442695, %v7978_v35  ;;  %v2402_v44 = vand.u32 2147483647, %v7974_v45  ;;  %v2404_v52 = vand.u32 2147483648, %v7974_v45 }
 0x145   : > { %v5856_v31 = vpop.eup %5855  ;;  %v2351_v54 = vmul.f32 %v5852_v2, %v2350_v13  ;;  %v2047_v5 = vpop.f32.mrf.mxu3  ;;  %vm2398_vm9 = vweird.f32 %v7974_v45  ;;  %v2301_v33 = vsel %vm7961_vm15, %v2300_v47, %v2296_v19  ;;  %v5643_v13 = vld [vmem:[%s10323_s5 + $0x40] sm:$0xf0] }
 0x146   : > { %v5858_v43 = vpop.eup %5857  ;;  %v8016_v12 = vadd.f32 1.0, %v5856_v31  ;;  %v2048_v57 = vadd.f32 %v2047_v5, %v1832_v55  ;;  %5861 = vpow2.f32 %v5551_v22  ;;  %vm8038_vm11 = vcmp.eq.f32.partialorder %v2402_v44, 8.507059e+37 }
 0x147   : > { %v2352_v25 = vadd.f32 %v5852_v2, %v2351_v54  ;;  %v2334_v30 = vmul.f32 %v5858_v43, %v7948_v16  ;;  %v2078_v49 = vpop.f32.mrf.mxu0  ;;  %vm2339_vm12 = vweird.f32 %v5858_v43  ;;  %v2405_v27 = vor.u32 1.1754944e-38, %v2404_v52 }
 0x148   : > { %5863 = vrcp.f32 %v8016_v12  ;;  %v8031_v23 = vadd.f32 %v7790_v15, %v2048_v57  ;;  %v2079_v58 = vadd.f32 %v2078_v49, %v7753_v48  ;;  %v5488_v48 = vld [vmem:[%s10323_s5 + $0x50] sm:$0xf]  ;;  %vm2340_vm14 = vmor %vm2338_vm5, %vm2339_vm12  ;;  %v5477_v60 = vor.u32 %v5643_v13, %v5476_v21 }
 0x149   : > { %v2356_v17 = vsel %vm8010_vm7, %v5852_v2, %v2352_v25  ;;  %v2335_v39 = vsub.f32 1.0, %v2334_v30  ;;  %v2316_v2 = vsel %vm7966_vm0, %v7942_v56, %v2311_v6  ;;  %v5489_v20 = vor.u32 %v5646_v1, %v5488_v48  ;;  %v5640_v30 = vld [vmem:[%s10323_s5 + $0x28] sm:$0xf0] }
 0x14a   : > { %v8034_v18 = vpop.eup %5859  ;;  %v2361_v26 = vsel %vm7970_vm2, %v2360_v51, %v2356_v17  ;;  %v5550_v56 = vmul.f32 -1.442695, %v8031_v23  ;;  %v8059_v50 = vadd.f32 %v7772_v0, %v2079_v58  ;;  %v2387_v44 = vand.u32 2147483647, %v8016_v12  ;;  %v5452_v17 = vld [vmem:[%s10323_s5 + $0x8] sm:$0xf] }
 0x14b   : > { %v2336_v55 = vmul.f32 %v5858_v43, %v2335_v39  ;;  %v2394_v10 = vmul.f32 %v8034_v18, %v7974_v45  ;;  %v2610_v47 = vmul.f32 %v2361_v26, %v7847_v8  ;;  %vm2399_vm13 = vweird.f32 %v8034_v18  ;;  %2090 = vmatpush.bf16.msrb.mxu1 %v5489_v20  ;;  %v5464_v45 = vld [vmem:[%s10323_s5 + $0x20] sm:$0xf] }
 0x14c   : > { %v5862_v42 = vpop.eup %5861  ;;  %v2606_v8 = vmul.f32 %v2301_v33, %v7819_v40  ;;  %5865 = vpow2.f32 %v5550_v56  ;;  %v5554_v54 = vmul.f32 -1.442695, %v8059_v50  ;;  %vm8082_vm15 = vmor %vm2398_vm9, %vm2399_vm13  ;;  %vm2383_vm0 = vweird.f32 %v8016_v12  ;;  %v1837_v56 = vpop.f32.mrf.mxu2 }
 0x14d   : > { %v2337_v24 = vadd.f32 %v5858_v43, %v2336_v55  ;;  %v2395_v51 = vsub.f32 1.0, %v2394_v10  ;;  %v2049_v53 = vpop.f32.mrf.mxu3  ;;  %v8071_v31 = vadd.f32 1.0, %v5862_v42  ;;  %v2389_v49 = vand.u32 2147483648, %v8016_v12  ;;  %1889 = vmatmul.bf16.gmra.mxu2 %v7153_v36 }
 0x14e   : > { %v5864_v46 = vpop.eup %5863  ;;  %v2050_v22 = vadd.f32 %v2049_v53, %v1834_v38  ;;  %vm8110_vm2 = vcmp.eq.f32.partialorder %v2387_v44, 8.507059e+37  ;;  %v5465_v48 = vor.u32 %v5640_v30, %v5464_v45 }
 0x14f   : > { %v2341_v5 = vsel %vm2340_vm14, %v5858_v43, %v2337_v24  ;;  %v2396_v62 = vmul.f32 %v8034_v18, %v2395_v51  ;;  %v2379_v6 = vmul.f32 %v5864_v46, %v8016_v12  ;;  %5867 = vrcp.f32 %v8071_v31  ;;  %2091 = vmatpush.bf16.msrb.mxu1 %v5477_v60 }
 0x150   : > { %v2346_v40 = vsel %vm8022_vm8, %v2345_v14, %v2341_v5  ;;  %v2607_v43 = vmul.f32 %v2316_v2, %v7803_v61  ;;  %5869 = vpow2.f32 %v5554_v54  ;;  %v8100_v61 = vadd.f32 %v7790_v15, %v2050_v22 }
 0x151   : > { %v2609_v52 = vmul.f32 %v2346_v40, %v7875_v34  ;;  %v2397_v57 = vadd.f32 %v8034_v18, %v2396_v62  ;;  %v2380_v25 = vsub.f32 1.0, %v2379_v6  ;;  %vm2384_vm1 = vweird.f32 %v5864_v46 }
 0x152   : > { %v2629_v34 = vpack.c.bf16 %v2607_v43, %v2606_v8  ;;  %v5866_v39 = vpop.eup %5865  ;;  %v5553_v26 = vmul.f32 -1.442695, %v8100_v61  ;;  %vm2385_vm3 = vmor %vm2383_vm0, %vm2384_vm1  ;;  %vm2443_vm4 = vweird.f32 %v8071_v31  ;;  %v2447_v5 = vand.u32 2147483647, %v8071_v31 }
 0x153   : > { %v8102_v19 = vpack.c.bf16 %v2610_v47, %v2609_v52  ;;  %v2401_v32 = vsel %vm8082_vm15, %v8034_v18, %v2397_v57  ;;  %v2381_v14 = vmul.f32 %v5864_v46, %v2380_v25  ;;  %v5637_v18 = vld [vmem:[%s10323_s5 + $0x10] sm:$0xf0]  ;;  %v8121_v10 = vadd.f32 1.0, %v5866_v39  ;;  %2092 = vmatpush.bf16.msrb.mxu1 %v5465_v48 }
 0x154   : > { %v2081_v33 = vpop.f32.mrf.mxu0  ;;  %v2740_v2 = vrot.slane %v2629_v34, 4  ;;  %5761 = vxpose.binary.xlu0.c.b16.start.end [1/2] (short) %v2629_v34, %v7951_v11, 128  ;;  %v2406_v1 = vsel %vm8038_vm11, %v2405_v27, %v2401_v32  ;;  %v2390_v11 = vor.u32 1.1754944e-38, %v2389_v49  ;;  %5871 = vpow2.f32 %v5553_v26 }
 0x155   : > { %v2382_v55 = vadd.f32 %v5864_v46, %v2381_v14  ;;  %v2082_v38 = vadd.f32 %v2081_v33, %v7757_v9  ;;  %v8125_v47 = vpop.eup %5867  ;;  %v2834_v37 = vrot.slane %v8102_v19, 4  ;;  %5873 = vrcp.f32 %v8121_v10  ;;  %v1839_v14 = vpop.f32.mrf.mxu2 }
 0x156   : > { %v2782_v21 = vsel %vm2686_vm10, %v2740_v2, 0  ;;  %v2439_v13 = vmul.f32 %v8125_v47, %v8071_v31  ;;  %v5453_v36 = vor.u32 %v5637_v18, %v5452_v17  ;;  %v5870_v9 = vpop.eup %5869  ;;  %v2613_v12 = vmul.f32 %v2406_v1, %v7905_v28 }
 0x157   : > { %v2386_v27 = vsel %vm2385_vm3, %v5864_v46, %v2382_v55  ;;  %2791 = vmatpush.bf16.msra.mxu3 %v2782_v21  ;;  %v8139_v53 = vadd.f32 1.0, %v5870_v9  ;;  %v8142_v8 = vadd.f32 %v7772_v0, %v2082_v38  ;;  %v2876_v46 = vsel %vm2686_vm10, %v2834_v37, 0 }
 0x158   : > { %v2391_v42 = vsel %vm8110_vm2, %v2390_v11, %v2386_v27  ;;  %v2440_v51 = vsub.f32 1.0, %v2439_v13  ;;  %2885 = vmatpush.bf16.msra.mxu0 %v2876_v46  ;;  %2093 = vmatpush.bf16.msrb.mxu1 %v5453_v36  ;;  %vm2444_vm5 = vweird.f32 %v8125_v47  ;;  %v2449_v62 = vand.u32 2147483648, %v8071_v31 }
 0x159   : > { %v2612_v24 = vmul.f32 %v2391_v42, %v7927_v7  ;;  %5875 = vrcp.f32 %v8139_v53  ;;  %v5557_v28 = vmul.f32 -1.442695, %v8142_v8  ;;  %vm2428_vm6 = vweird.f32 %v8121_v10  ;;  %vm8179_vm8 = vmor %vm2443_vm4, %vm2444_vm5 }
 0x15a   : > { %v2052_v20 = vpop.f32.mrf.mxu3  ;;  %v2441_v54 = vmul.f32 %v8125_v47, %v2440_v51  ;;  %v5872_v7 = vpop.eup %5871  ;;  %v2432_v45 = vand.u32 2147483647, %v8121_v10  ;;  %v2434_v30 = vand.u32 2147483648, %v8121_v10  ;;  %vm2448_vm9 = vcmp.eq.f32.partialorder %v2447_v5, 8.507059e+37 }
 0x15b   : > { %v2053_v22 = vadd.f32 %v2052_v20, %v1837_v56  ;;  %v8152_v60 = vpack.c.bf16 %v2613_v12, %v2612_v24  ;;  %v5874_v40 = vpop.eup %5873  ;;  %v8155_v16 = vadd.f32 1.0, %v5872_v7  ;;  %5877 = vpow2.f32 %v5557_v28  ;;  %2094 = vmatmul.bf16.vlgmr.msrb.gmra.mxu1 %v7529_v63 }
 0x15c   : > { %v2083_v6 = vpop.f32.mrf.mxu0  ;;  %v2442_v43 = vadd.f32 %v8125_v47, %v2441_v54  ;;  %v2424_v52 = vmul.f32 %v5874_v40, %v8121_v10  ;;  %vm2429_vm7 = vweird.f32 %v5874_v40  ;;  %v2450_v31 = vor.u32 1.1754944e-38, %v2449_v62 }
 0x15d   : > { %v8158_v44 = vadd.f32 %v7790_v15, %v2053_v22  ;;  %v2084_v57 = vadd.f32 %v2083_v6, %v7761_v3  ;;  %v2928_v25 = vrot.slane %v8152_v60, 4  ;;  %5879 = vrcp.f32 %v8155_v16  ;;  %vm8192_vm11 = vmor %vm2428_vm6, %vm2429_vm7  ;;  %1894 = vmatmul.bf16.gmra.mxu2 %v7407_v41 }
 0x15e   : > { %v2425_v34 = vsub.f32 1.0, %v2424_v52  ;;  %v2435_v18 = vor.u32 1.1754944e-38, %v2434_v30  ;;  %vm2433_vm12 = vcmp.eq.f32.partialorder %v2432_v45, 8.507059e+37  ;;  %v2492_v37 = vand.u32 2147483647, %v8139_v53 }
 0x15f   : > { %v5556_v49 = vmul.f32 -1.442695, %v8158_v44  ;;  %v8170_v32 = vadd.f32 %v7772_v0, %v2084_v57  ;;  %v2970_v3 = vsel %vm2686_vm10, %v2928_v25, 0  ;;  %v8173_v17 = vpop.eup %5875  ;;  %v2446_v0 = vsel %vm8179_vm8, %v8125_v47, %v2442_v43 }
 0x160   : > { %2979 = vmatpush.bf16.msra.mxu1 %v2970_v3  ;;  %v2426_v39 = vmul.f32 %v5874_v40, %v2425_v34  ;;  %v2484_v33 = vmul.f32 %v8173_v17, %v8139_v53  ;;  %v2451_v11 = vsel %vm2448_vm9, %v2450_v31, %v2446_v0  ;;  %vm2473_vm13 = vweird.f32 %v8155_v16 }
 0x161   : > { %5881 = vpow2.f32 %v5556_v49  ;;  %v5560_v58 = vmul.f32 -1.442695, %v8170_v32  ;;  %v5878_v2 = vpop.eup %5877  ;;  %v2616_v12 = vmul.f32 %v2451_v11, %v7978_v35  ;;  %v2477_v51 = vand.u32 2147483647, %v8155_v16 }
 0x162   : > { %v2054_v26 = vpop.f32.mrf.mxu3  ;;  %v2427_v55 = vadd.f32 %v5874_v40, %v2426_v39  ;;  %v8196_v38 = vadd.f32 1.0, %v5878_v2  ;;  %v2485_v21 = vsub.f32 1.0, %v2484_v33  ;;  %v2479_v28 = vand.u32 2147483648, %v8155_v16 }
 0x163   : > { %v2055_v1 = vadd.f32 %v2054_v26, %v1839_v14  ;;  %5883 = vpow2.f32 %v5560_v58  ;;  %v8198_v47 = vpop.eup %5879  ;;  %vm2489_vm14 = vweird.f32 %v8173_v17  ;;  %vm2488_vm0 = vweird.f32 %v8139_v53 }
 0x164   : > { %v2431_v10 = vsel %vm8192_vm11, %v5874_v40, %v2427_v55  ;;  %5885 = vrcp.f32 %v8196_v38  ;;  %v2469_v9 = vmul.f32 %v8198_v47, %v8155_v16  ;;  %v2486_v20 = vmul.f32 %v8173_v17, %v2485_v21  ;;  %vm8234_vm2 = vmor %vm2488_vm0, %vm2489_vm14 }
 0x165   : > { %v8201_v56 = vadd.f32 %v7790_v15, %v2055_v1  ;;  %v2436_v13 = vsel %vm2433_vm12, %v2435_v18, %v2431_v10  ;;  %v2494_v15 = vand.u32 2147483648, %v8139_v53  ;;  %vm2474_vm15 = vweird.f32 %v8198_v47 }
 0x166   : > { %v2615_v41 = vmul.f32 %v2436_v13, %v8031_v23  ;;  %v2470_v24 = vsub.f32 1.0, %v2469_v9  ;;  %v2487_v22 = vadd.f32 %v8173_v17, %v2486_v20  ;;  %vm8230_vm1 = vcmp.eq.f32.partialorder %v2477_v51, 8.507059e+37  ;;  %vm8241_vm3 = vmor %vm2473_vm13, %vm2474_vm15 }
 0x167   : > { %v5882_v27 = vpop.eup %5881  ;;  %v5559_v36 = vmul.f32 -1.442695, %v8201_v56  ;;  %v2480_v53 = vor.u32 1.1754944e-38, %v2479_v28  ;;  %vm8245_vm4 = vcmp.eq.f32.partialorder %v2492_v37, 8.507059e+37  ;;  %v2495_v25 = vor.u32 1.1754944e-38, %v2494_v15 }
 0x168   : > { %v2237_v42 = vadd.f32 1.0, %v5882_v27  ;;  %v8217_v54 = vpack.c.bf16 %v2616_v12, %v2615_v41  ;;  %v2471_v23 = vmul.f32 %v8198_v47, %v2470_v24  ;;  %vm2533_vm5 = vweird.f32 %v8196_v38 }
 0x169   : > { %5887 = vpow2.f32 %v5559_v36  ;;  %v5884_v46 = vpop.eup %5883  ;;  %v2491_v16 = vsel %vm8234_vm2, %v8173_v17, %v2487_v22  ;;  %v2537_v14 = vand.u32 2147483647, %v8196_v38  ;;  %v2539_v3 = vand.u32 2147483648, %v8196_v38 }
 0x16a   : > { %5889 = vrcp.f32 %v2237_v42  ;;  %v8221_v35 = vadd.f32 1.0, %v5884_v46  ;;  %v5886_v7 = vpop.eup %5885  ;;  %v3022_v5 = vrot.slane %v8217_v54, 4  ;;  %v2472_v49 = vadd.f32 %v8198_v47, %v2471_v23 }
 0x16b   : > { %v2529_v62 = vmul.f32 %v5886_v7, %v8196_v38  ;;  %2099 = vmatmul.bf16.gmra.mxu1 %v7615_v59  ;;  %vm2518_vm6 = vweird.f32 %v2237_v42  ;;  %vm2534_vm7 = vweird.f32 %v5886_v7  ;;  %v2522_v58 = vand.u32 2147483647, %v2237_v42 }
 0x16c   : > { %5891 = vrcp.f32 %v8221_v35  ;;  %v3064_v43 = vsel %vm2686_vm10, %v3022_v5, 0  ;;  %v2476_v39 = vsel %vm8241_vm3, %v8198_v47, %v2472_v49  ;;  %v2524_v26 = vand.u32 2147483648, %v2237_v42  ;;  %vm2535_vm9 = vmor %vm2533_vm5, %vm2534_vm7 }
 0x16d   : > { %v2530_v30 = vsub.f32 1.0, %v2529_v62  ;;  %3073 = vmatpush.bf16.msrb.mxu2 %v3064_v43  ;;  %v2496_v17 = vsel %vm8245_vm4, %v2495_v25, %v2491_v16  ;;  %v2481_v48 = vsel %vm8230_vm1, %v2480_v53, %v2476_v39  ;;  %vm2538_vm11 = vcmp.eq.f32.partialorder %v2537_v14, 8.507059e+37 }
 0x16e   : > { %v2540_v18 = vor.u32 1.1754944e-38, %v2539_v3  ;;  %v2618_v11 = vmul.f32 %v2481_v48, %v8100_v61  ;;  %v2619_v21 = vmul.f32 %v2496_v17, %v8059_v50  ;;  %vm8274_vm13 = vcmp.eq.f32.partialorder %v2522_v58, 8.507059e+37 }
 0x16f   : > { %v5888_v45 = vpop.eup %5887  ;;  %v2531_v0 = vmul.f32 %v5886_v7, %v2530_v30  ;;  %v2525_v38 = vor.u32 1.1754944e-38, %v2524_v26  ;;  %vm2578_vm14 = vweird.f32 %v8221_v35  ;;  %v2582_v9 = vand.u32 2147483647, %v8221_v35 }
 0x170   : > { %v5890_v34 = vpop.eup %5889  ;;  %v2240_v63 = vadd.f32 1.0, %v5888_v45  ;;  %v2637_v61 = vpack.c.bf16 %v2619_v21, %v2618_v11  ;;  %v2584_v12 = vand.u32 2147483648, %v8221_v35 }
 0x171   : > { %v2514_v59 = vmul.f32 %v5890_v34, %v2237_v42  ;;  %v2532_v2 = vadd.f32 %v5886_v7, %v2531_v0  ;;  %vm2519_vm8 = vweird.f32 %v5890_v34  ;;  %vm2583_vm4 = vcmp.eq.f32.partialorder %v2582_v9, 8.507059e+37 }
 0x172   : > { %5893 = vrcp.f32 %v2240_v63  ;;  %v5892_v33 = vpop.eup %5891  ;;  %vm8270_vm12 = vmor %vm2518_vm6, %vm2519_vm8  ;;  %vm2563_vm15 = vweird.f32 %v2240_v63  ;;  %v2567_v41 = vand.u32 2147483647, %v2240_v63  ;;  %v3116_v51 = vrot.slane %v2637_v61, 4  ;;  %5795 = vxpose.binary.xlu1.c.b16.start.end [1/2] (short) %v2637_v61, %v8217_v54, 128 }
 0x173   : > { %v2515_v31 = vsub.f32 1.0, %v2514_v59  ;;  %v2574_v1 = vmul.f32 %v5892_v33, %v8221_v35  ;;  %v2536_v55 = vsel %vm2535_vm9, %v5886_v7, %v2532_v2  ;;  %vm2579_vm0 = vweird.f32 %v5892_v33 }
 0x174   : > { %v2541_v13 = vsel %vm2538_vm11, %v2540_v18, %v2536_v55  ;;  %v2569_v23 = vand.u32 2147483648, %v2240_v63  ;;  %v3158_v5 = vsel %vm2686_vm10, %v3116_v51, 0  ;;  %vm2580_vm2 = vmor %vm2578_vm14, %vm2579_vm0  ;;  %v2585_v40 = vor.u32 1.1754944e-38, %v2584_v12 }
 0x175   : > { %v2516_v47 = vmul.f32 %v5890_v34, %v2515_v31  ;;  %v2575_v27 = vsub.f32 1.0, %v2574_v1  ;;  %v2622_v20 = vmul.f32 %v2541_v13, %v8142_v8  ;;  %3167 = vmatpush.bf16.msrb.mxu3 %v3158_v5  ;;  %vm2568_vm5 = vcmp.eq.f32.partialorder %v2567_v41, 8.507059e+37 }
 0x176   : > { %v2570_v8 = vor.u32 1.1754944e-38, %v2569_v23  ;;  %vm2661_vm6 = vcmask 64512  }
 0x177   : > { %v2517_v36 = vadd.f32 %v5890_v34, %v2516_v47  ;;  %v2576_v50 = vmul.f32 %v5892_v33, %v2575_v27 }
 0x178   : > { %v5894_v15 = vpop.eup %5893 }
 0x179   : > { %v2521_v42 = vsel %vm8270_vm12, %v5890_v34, %v2517_v36  ;;  %v2559_v24 = vmul.f32 %v5894_v15, %v2240_v63  ;;  %v2577_v28 = vadd.f32 %v5892_v33, %v2576_v50  ;;  %vm2564_vm1 = vweird.f32 %v5894_v15 }
 0x17a   : > { %v2526_v46 = vsel %vm8274_vm13, %v2525_v38, %v2521_v42  ;;  %vm2565_vm3 = vmor %vm2563_vm15, %vm2564_vm1 }
 0x17b   : > { %v2621_v22 = vmul.f32 %v2526_v46, %v8158_v44  ;;  %v2560_v7 = vsub.f32 1.0, %v2559_v24  ;;  %v2581_v6 = vsel %vm2580_vm2, %v5892_v33, %v2577_v28  ;;  %2104 = vmatmul.bf16.gmra.mxu1 %v7695_v4  ;;  %v6439_v24 = vld [vmem:[%s10324_s6] sm:$0x7] }
 0x17c   : > { %v2586_v52 = vsel %vm2583_vm4, %v2585_v40, %v2581_v6  ;;  %v8335_v51 = vperm.slane %v6439_v24, 2 }
 0x17d   : > { %v2639_v62 = vpack.c.bf16 %v2622_v20, %v2621_v22  ;;  %v2561_v54 = vmul.f32 %v5894_v15, %v2560_v7  ;;  %v2625_v25 = vmul.f32 %v2586_v52, %v8170_v32 }
 0x17e   : > { %10555 = vst [vmem:[#allocation14_spill] sm:$0xff] %v8335_v51 }
 0x17f   : > { %v2562_v43 = vadd.f32 %v5894_v15, %v2561_v54  ;;  %v3210_v44 = vrot.slane %v2639_v62, 4 }
 0x181   : > { %v2566_v53 = vsel %vm2565_vm3, %v5894_v15, %v2562_v43  ;;  %v3252_v57 = vsel %vm2686_vm10, %v3210_v44, 0 }
 0x182   : > { %v2571_v35 = vsel %vm2568_vm5, %v2570_v8, %v2566_v53  ;;  %3261 = vmatpush.bf16.msrb.mxu0 %v3252_v57 }
 0x183   : > { %v2624_v45 = vmul.f32 %v2571_v35, %v8201_v56 }
 0x185   : > { %v2641_v30 = vpack.c.bf16 %v2625_v25, %v2624_v45 }
 0x187   : > { %v3304_v49 = vrot.slane %v2641_v30, 4 }
 0x189   : > { %v3346_v16 = vsel %vm2686_vm10, %v3304_v49, 0 }
 0x18a   : > { %3355 = vmatpush.bf16.msrb.mxu1 %v3346_v16 }
 0x18b   : > { %2109 = vmatmul.bf16.gmra.mxu1 %v7747_v29 }
 0x1d4   : > { %5778 = vxpose.binary.xlu0.c.b16.start.end [1/2] (short) %v8152_v60, %v8102_v19, 128  ;;  %v1880_v60 = vpop.f32.mrf.mxu2 }
 0x1d8   : > { %v2095_v55 = vpop.f32.mrf.mxu1 }
 0x1d9   : > { %v8317_v47 = vadd.f32 %v2095_v55, %v1880_v60 }
 0x1db   : > { %10550 = vst [vmem:[#allocation9_spill] sm:$0xff] %v8317_v47 }
 0x1dc   : > { %v8308_v63 = vpop.f32.mrf.mxu2 }
 0x1dd   : > { %10548 = vst [vmem:[#allocation7_spill] sm:$0xff] %v8308_v63 }
 0x1e0   : > { %v8322_v37 = vpop.f32.mrf.mxu1 }
 0x1e1   : > { %10552 = vst [vmem:[#allocation11_spill] sm:$0xff] %v8322_v37 }
 0x1e4   : > { %v1885_v58 = vpop.f32.mrf.mxu2 }
 0x1e8   : > { %v2100_v13 = vpop.f32.mrf.mxu1 }
 0x1e9   : > { %v8325_v36 = vadd.f32 %v2100_v13, %v1885_v58 }
 0x1eb   : > { %10553 = vst [vmem:[#allocation12_spill] sm:$0xff] %v8325_v36 }
 0x1ec   : > { %v8313_v33 = vpop.f32.mrf.mxu2 }
 0x1ed   : > { %10549 = vst [vmem:[#allocation8_spill] sm:$0xff] %v8313_v33 }
 0x1f0   : > { %v8328_v15 = vpop.f32.mrf.mxu1 }
 0x1f1   : > { %10554 = vst [vmem:[#allocation13_spill] sm:$0xff] %v8328_v15 }
 0x1f2   : > { %5812 = vxpose.binary.xlu1.c.b16.start.end [1/2] (short) %v2641_v30, %v2639_v62, 128 }
 0x1f4   : > { %v1890_v48 = vpop.f32.mrf.mxu2 }
 0x1f8   : > { %v2105_v42 = vpop.f32.mrf.mxu1 }
 0x1f9   : > { %v2106_v20 = vadd.f32 %v2105_v42, %v1890_v48 }
 0x1fb   : > { %v8340_v28 = vadd.f32 %v8335_v51, %v2106_v20 }
 0x1fc   : > { %v8319_v11 = vpop.f32.mrf.mxu2 }
 0x1fd   : > { %10551 = vst [vmem:[#allocation10_spill] sm:$0xff] %v8319_v11 }
 0x1fe   : > { %10556 = vst [vmem:[#allocation15_spill] sm:$0xff] %v8340_v28 }
 0x200   : > { %v5762_v4 = vpop.trf.xlu0  ;;  %v8344_v7 = vpop.f32.mrf.mxu1 }
 0x201   : > { %5562 = vmatmul.msk.bf16.vlgmr.msra.gmra.mxu2 %vm2661_vm6, %v5762_v4  ;;  %10557 = vst [vmem:[#allocation16_spill] sm:$0xff] %v8344_v7 }
 0x204   : > { %v1895_v27 = vpop.f32.mrf.mxu2 }
 0x208   : > { %v5763_v34 = vpop.trf.xlu0  ;;  %v2110_v54 = vpop.f32.mrf.mxu1 }
 0x209   : > { %5570 = vmatmul.msk.bf16.vlgmr.msra.gmra.mxu3 %vm2661_vm6, %v5763_v34  ;;  %v2111_v40 = vadd.f32 %v2110_v54, %v1895_v27 }
 0x20b   : > { %v8355_v43 = vadd.f32 %v8335_v51, %v2111_v40 }
 0x20c   : > { %v1897_v50 = vpop.f32.mrf.mxu2 }
 0x20d   : > { %10558 = vst [vmem:[#allocation17_spill] sm:$0xff] %v8355_v43 }
 0x210   : > { %v5764_v32 = vpop.trf.xlu0  ;;  %v2112_v52 = vpop.f32.mrf.mxu1 }
 0x211   : > { %5563 = vmatmul.msk.bf16.gmra.mxu2 %vm2661_vm6, %v5764_v32  ;;  %v2113_v53 = vadd.f32 %v2112_v52, %v1897_v50 }
 0x213   : > { %v8361_v35 = vadd.f32 %v8335_v51, %v2113_v53 }
 0x215   : > { %10559 = vst [vmem:[#allocation18_spill] sm:$0xff] %v8361_v35 }
 0x218   : > { %v5765_v56 = vpop.trf.xlu0 }
 0x219   : > { %5571 = vmatmul.msk.bf16.gmra.mxu3 %vm2661_vm6, %v5765_v56 }
 0x21e   : > { %v5796_v59 = vpop.trf.xlu1 }
 0x220   : > { %v5766_v14 = vpop.trf.xlu0 }
 0x221   : > { %5564 = vmatmul.msk.bf16.gmra.mxu2 %vm2661_vm6, %v5766_v14 }
 0x226   : > { %v5797_v26 = vpop.trf.xlu1 }
 0x228   : > { %v5767_v29 = vpop.trf.xlu0 }
 0x229   : > { %5572 = vmatmul.msk.bf16.gmra.mxu3 %vm2661_vm6, %v5767_v29 }
 0x22e   : > { %v5798_v2 = vpop.trf.xlu1 }
 0x230   : > { %v5768_v19 = vpop.trf.xlu0 }
 0x231   : > { %5565 = vmatmul.msk.bf16.gmra.mxu2 %vm2661_vm6, %v5768_v19 }
 0x236   : > { %v5799_v18 = vpop.trf.xlu1 }
 0x238   : > { %v5769_v3 = vpop.trf.xlu0 }
 0x239   : > { %5573 = vmatmul.msk.bf16.gmra.mxu3 %vm2661_vm6, %v5769_v3 }
 0x23e   : > { %v5800_v10 = vpop.trf.xlu1 }
 0x240   : > { %v5770_v0 = vpop.trf.xlu0 }
 0x241   : > { %5566 = vmatmul.msk.bf16.gmra.mxu2 %vm2661_vm6, %v5770_v0 }
 0x246   : > { %v5801_v9 = vpop.trf.xlu1 }
 0x248   : > { %v5771_v39 = vpop.trf.xlu0 }
 0x249   : > { %5574 = vmatmul.msk.bf16.gmra.mxu3 %vm2661_vm6, %v5771_v39 }
 0x24e   : > { %v5802_v12 = vpop.trf.xlu1 }
 0x250   : > { %v5772_v17 = vpop.trf.xlu0 }
 0x251   : > { %5567 = vmatmul.msk.bf16.gmra.mxu2 %vm2661_vm6, %v5772_v17 }
 0x256   : > { %v5803_v23 = vpop.trf.xlu1 }
 0x258   : > { %v5773_v31 = vpop.trf.xlu0 }
 0x259   : > { %5575 = vmatmul.msk.bf16.gmra.mxu3 %vm2661_vm6, %v5773_v31 }
 0x25e   : > { %v5804_v6 = vpop.trf.xlu1 }
 0x260   : > { %v5774_v1 = vpop.trf.xlu0 }
 0x261   : > { %5568 = vmatmul.msk.bf16.gmra.mxu2 %vm2661_vm6, %v5774_v1 }
 0x266   : > { %v5805_v57 = vpop.trf.xlu1 }
 0x268   : > { %v5775_v21 = vpop.trf.xlu0 }
 0x269   : > { %5576 = vmatmul.msk.bf16.gmra.mxu3 %vm2661_vm6, %v5775_v21 }
 0x26e   : > { %v5806_v45 = vpop.trf.xlu1 }
 0x270   : > { %v5776_v38 = vpop.trf.xlu0 }
 0x271   : > { %5569 = vmatmul.msk.bf16.gmra.mxu2 %vm2661_vm6, %v5776_v38 }
 0x276   : > { %v5807_v49 = vpop.trf.xlu1 }
 0x278   : > { %v5777_v61 = vpop.trf.xlu0 }
 0x279   : > { %5577 = vmatmul.msk.bf16.gmra.mxu3 %vm2661_vm6, %v5777_v61 }
 0x27e   : > { %v5808_v32 = vpop.trf.xlu1 }
 0x280   : > { %v5779_v41 = vpop.trf.xlu0 }
 0x281   : > { %5578 = vmatmul.msk.bf16.vlgmr.msra.gmra.mxu0 %vm2661_vm6, %v5779_v41  ;;  %5594 = vmatmul.msk.bf16.vlgmr.msrb.gmra.mxu2 %vm2661_vm6, %v5796_v59 }
 0x284   : > { %v8337_v46 = vpop.f32.mrf.mxu2 }
 0x285   : > { %3397 = vmax.xlane.f32.xlu2 %v8337_v46 }
 0x286   : > { %v5809_v29 = vpop.trf.xlu1 }
 0x288   : > { %v5780_v22 = vpop.trf.xlu0 }
 0x289   : > { %5586 = vmatmul.msk.bf16.vlgmr.msra.gmra.mxu1 %vm2661_vm6, %v5780_v22  ;;  %5602 = vmatmul.msk.bf16.vlgmr.msrb.gmra.mxu3 %vm2661_vm6, %v5797_v26 }
 0x28c   : > { %v8347_v5 = vpop.f32.mrf.mxu2  ;;  %v8352_v8 = vpop.f32.mrf.mxu3 }
 0x28d   : > { %3399 = vmax.xlane.f32.xlu2 %v8347_v5 }
 0x28e   : > { %v5810_v0 = vpop.trf.xlu1 }
 0x290   : > { %v5781_v62 = vpop.trf.xlu0 }
 0x291   : > { %5579 = vmatmul.msk.bf16.gmra.mxu0 %vm2661_vm6, %v5781_v62  ;;  %5595 = vmatmul.msk.bf16.gmra.mxu2 %vm2661_vm6, %v5798_v2 }
 0x294   : > { %v8369_v4 = vpop.f32.mrf.mxu3  ;;  %v8374_v56 = vpop.f32.mrf.mxu2 }
 0x295   : > { %3429 = vmax.xlane.f32.xlu2 %v8352_v8 }
 0x296   : > { %v5811_v26 = vpop.trf.xlu1 }
 0x298   : > { %v5782_v44 = vpop.trf.xlu0 }
 0x299   : > { %5587 = vmatmul.msk.bf16.gmra.mxu1 %vm2661_vm6, %v5782_v44  ;;  %5603 = vmatmul.msk.bf16.gmra.mxu3 %vm2661_vm6, %v5799_v18 }
 0x29c   : > { %v8378_v19 = vpop.f32.mrf.mxu3  ;;  %v8380_v3 = vpop.f32.mrf.mxu2 }
 0x29e   : > { %v5813_v18 = vpop.trf.xlu1 }
 0x2a0   : > { %v5783_v25 = vpop.trf.xlu0 }
 0x2a1   : > { %5580 = vmatmul.msk.bf16.gmra.mxu0 %vm2661_vm6, %v5783_v25  ;;  %5596 = vmatmul.msk.bf16.gmra.mxu2 %vm2661_vm6, %v5800_v10 }
 0x2a4   : > { %v8387_v39 = vpop.f32.mrf.mxu3  ;;  %v8389_v58 = vpop.f32.mrf.mxu2 }
 0x2a6   : > { %v5814_v10 = vpop.trf.xlu1 }
 0x2a8   : > { %v5784_v30 = vpop.trf.xlu0 }
 0x2a9   : > { %5588 = vmatmul.msk.bf16.gmra.mxu1 %vm2661_vm6, %v5784_v30  ;;  %5604 = vmatmul.msk.bf16.gmra.mxu3 %vm2661_vm6, %v5801_v9 }
 0x2ac   : > { %v8393_v2 = vpop.f32.mrf.mxu3  ;;  %v8395_v31 = vpop.f32.mrf.mxu2 }
 0x2ae   : > { %v5815_v9 = vpop.trf.xlu1 }
 0x2b0   : > { %v5785_v16 = vpop.trf.xlu0 }
 0x2b1   : > { %5581 = vmatmul.msk.bf16.gmra.mxu0 %vm2661_vm6, %v5785_v16  ;;  %5597 = vmatmul.msk.bf16.gmra.mxu2 %vm2661_vm6, %v5802_v12 }
 0x2b4   : > { %v8399_v1 = vpop.f32.mrf.mxu3  ;;  %v8401_v55 = vpop.f32.mrf.mxu2 }
 0x2b5   : > { %3431 = vmax.xlane.f32.xlu0 %v8369_v4 }
 0x2b6   : > { %v5816_v41 = vpop.trf.xlu1 }
 0x2b8   : > { %v5786_v34 = vpop.trf.xlu0 }
 0x2b9   : > { %5589 = vmatmul.msk.bf16.gmra.mxu1 %vm2661_vm6, %v5786_v34  ;;  %5605 = vmatmul.msk.bf16.gmra.mxu3 %vm2661_vm6, %v5803_v23 }
 0x2bc   : > { %v8405_v38 = vpop.f32.mrf.mxu3  ;;  %v8407_v13 = vpop.f32.mrf.mxu2 }
 0x2be   : > { %v5817_v20 = vpop.trf.xlu1 }
 0x2c0   : > { %v5787_v14 = vpop.trf.xlu0 }
 0x2c1   : > { %5582 = vmatmul.msk.bf16.gmra.mxu0 %vm2661_vm6, %v5787_v14  ;;  %5598 = vmatmul.msk.bf16.gmra.mxu2 %vm2661_vm6, %v5804_v6 }
 0x2c2   : > { %3433 = vmax.xlane.f32.xlu1 %v8378_v19 }
 0x2c4   : > { %v8412_v50 = vpop.f32.mrf.mxu3  ;;  %v8445_v53 = vpop.f32.mrf.mxu2 }
 0x2c6   : > { %v5818_v62 = vpop.trf.xlu1 }
 0x2c8   : > { %v5788_v60 = vpop.trf.xlu0 }
 0x2c9   : > { %5590 = vmatmul.msk.bf16.gmra.mxu1 %vm2661_vm6, %v5788_v60  ;;  %5606 = vmatmul.msk.bf16.gmra.mxu3 %vm2661_vm6, %v5805_v57 }
 0x2cc   : > { %v8458_v16 = vpop.f32.mrf.mxu2  ;;  %v8471_v60 = vpop.f32.mrf.mxu3 }
 0x2ce   : > { %v5819_v40 = vpop.trf.xlu1 }
 0x2d0   : > { %v5789_v59 = vpop.trf.xlu0 }
 0x2d1   : > { %5583 = vmatmul.msk.bf16.gmra.mxu0 %vm2661_vm6, %v5789_v59  ;;  %5599 = vmatmul.msk.bf16.gmra.mxu2 %vm2661_vm6, %v5806_v45 }
 0x2d6   : > { %v5820_v45 = vpop.trf.xlu1 }
 0x2d8   : > { %v5790_v17 = vpop.trf.xlu0 }
 0x2d9   : > { %5591 = vmatmul.msk.bf16.gmra.mxu1 %vm2661_vm6, %v5790_v17  ;;  %5607 = vmatmul.msk.bf16.gmra.mxu3 %vm2661_vm6, %v5807_v49 }
 0x2de   : > { %v5821_v34 = vpop.trf.xlu1 }
 0x2e0   : > { %v5791_v48 = vpop.trf.xlu0 }
 0x2e1   : > { %5584 = vmatmul.msk.bf16.gmra.mxu0 %vm2661_vm6, %v5791_v48  ;;  %5600 = vmatmul.msk.bf16.gmra.mxu2 %vm2661_vm6, %v5808_v32  ;;  %v8482_v48 = vpop.f32.mrf.mxu3 }
 0x2e8   : > { %v5792_v21 = vpop.trf.xlu0 }
 0x2e9   : > { %5592 = vmatmul.msk.bf16.gmra.mxu1 %vm2661_vm6, %v5792_v21  ;;  %5608 = vmatmul.msk.bf16.gmra.mxu3 %vm2661_vm6, %v5809_v29  ;;  %v8468_v29 = vpop.f32.mrf.mxu2 }
 0x2f0   : > { %v5793_v27 = vpop.trf.xlu0 }
 0x2f1   : > { %5585 = vmatmul.msk.bf16.gmra.mxu0 %vm2661_vm6, %v5793_v27  ;;  %5601 = vmatmul.msk.bf16.gmra.mxu2 %vm2661_vm6, %v5810_v0  ;;  %v5822_v0 = vpop.trf.xlu1  ;;  %v8480_v17 = vpop.f32.mrf.mxu2 }
 0x2f8   : > { %v5794_v61 = vpop.trf.xlu0 }
 0x2f9   : > { %5593 = vmatmul.msk.bf16.gmra.mxu1 %vm2661_vm6, %v5794_v61  ;;  %5609 = vmatmul.msk.bf16.gmra.mxu3 %vm2661_vm6, %v5811_v26  ;;  %v8490_v27 = vpop.f32.mrf.mxu2 }
 0x2fa   : > { %10571 = vst [vmem:[#allocation30_spill] sm:$0xff] %v8490_v27 }
 0x2fe   : > { %v8415_v12 = vpop.f32.mrf.mxu0 }
 0x2ff   : > { %3461 = vmax.xlane.f32.xlu2 %v8415_v12 }
 0x301   : > { %5610 = vmatmul.msk.bf16.vlgmr.msrb.gmra.mxu0 %vm2661_vm6, %v5813_v18  ;;  %v5823_v18 = vpop.trf.xlu1 }
 0x306   : > { %v8419_v42 = vpop.f32.mrf.mxu0  ;;  %v8421_v24 = vpop.f32.mrf.mxu1 }
 0x307   : > { %10560 = vst [vmem:[#allocation19_spill] sm:$0xff] %v8421_v24  ;;  %3401 = vmax.xlane.f32.xlu2 %v8374_v56 }
 0x309   : > { %5618 = vmatmul.msk.bf16.vlgmr.msrb.gmra.mxu1 %vm2661_vm6, %v5814_v10 }
 0x30e   : > { %v8425_v23 = vpop.f32.mrf.mxu0  ;;  %v8427_v22 = vpop.f32.mrf.mxu1 }
 0x30f   : > { %10561 = vst [vmem:[#allocation20_spill] sm:$0xff] %v8427_v22  ;;  %3495 = vmax.xlane.f32.xlu1 %v8427_v22  ;;  %3463 = vmax.xlane.f32.xlu2 %v8419_v42 }
 0x311   : > { %5611 = vmatmul.msk.bf16.gmra.mxu0 %vm2661_vm6, %v5815_v9 }
 0x316   : > { %v8432_v6 = vpop.f32.mrf.mxu0  ;;  %v8434_v54 = vpop.f32.mrf.mxu1 }
 0x317   : > { %10562 = vst [vmem:[#allocation21_spill] sm:$0xff] %v8434_v54  ;;  %3493 = vmax.xlane.f32.xlu2 %v8421_v24 }
 0x319   : > { %5619 = vmatmul.msk.bf16.gmra.mxu1 %vm2661_vm6, %v5816_v41  ;;  %v8496_v41 = vpop.f32.mrf.mxu3 }
 0x31e   : > { %v8438_v44 = vpop.f32.mrf.mxu0  ;;  %v8440_v52 = vpop.f32.mrf.mxu1 }
 0x31f   : > { %10563 = vst [vmem:[#allocation22_spill] sm:$0xff] %v8440_v52  ;;  %3499 = vmax.xlane.f32.xlu0 %v8440_v52  ;;  %3403 = vmax.xlane.f32.xlu2 %v8380_v3 }
 0x321   : > { %5612 = vmatmul.msk.bf16.gmra.mxu0 %vm2661_vm6, %v5817_v20  ;;  %v5824_v20 = vpop.trf.xlu1 }
 0x326   : > { %v8447_v57 = vpop.f32.mrf.mxu0  ;;  %v8449_v25 = vpop.f32.mrf.mxu1 }
 0x327   : > { %10564 = vst [vmem:[#allocation23_spill] sm:$0xff] %v8449_v25  ;;  %3501 = vmax.xlane.f32.xlu1 %v8449_v25  ;;  %3465 = vmax.xlane.f32.xlu2 %v8425_v23 }
 0x329   : > { %5620 = vmatmul.msk.bf16.gmra.mxu1 %vm2661_vm6, %v5818_v62  ;;  %v8500_v62 = vpop.xlane.xlu2 %3397  ;;  %v5825_v35 = vpop.trf.xlu1 }
 0x32e   : > { %v8454_v30 = vpop.f32.mrf.mxu0  ;;  %v8456_v49 = vpop.f32.mrf.mxu1 }
 0x32f   : > { %10565 = vst [vmem:[#allocation24_spill] sm:$0xff] %v8456_v49  ;;  %3405 = vmax.xlane.f32.xlu2 %v8389_v58 }
 0x331   : > { %5613 = vmatmul.msk.bf16.gmra.mxu0 %vm2661_vm6, %v5819_v40  ;;  %v3400_v43 = vpop.xlane.xlu2 %3399  ;;  %v5826_v22 = vpop.trf.xlu1 }
 0x336   : > { %v8462_v32 = vpop.f32.mrf.mxu0  ;;  %v8464_v14 = vpop.f32.mrf.mxu1 }
 0x337   : > { %10566 = vst [vmem:[#allocation25_spill] sm:$0xff] %v8462_v32  ;;  %3435 = vmax.xlane.f32.xlu2 %v8387_v39  ;;  %3505 = vmax.xlane.f32.xlu0 %v8464_v14 }
 0x338   : > { %10567 = vst [vmem:[#allocation26_spill] sm:$0xff] %v8464_v14 }
 0x339   : > { %5621 = vmatmul.msk.bf16.gmra.mxu1 %vm2661_vm6, %v5820_v45  ;;  %v3430_v24 = vpop.xlane.xlu2 %3429  ;;  %v5827_v36 = vpop.trf.xlu1 }
 0x33e   : > { %v8473_v59 = vpop.f32.mrf.mxu0  ;;  %v8475_v26 = vpop.f32.mrf.mxu1 }
 0x33f   : > { %10568 = vst [vmem:[#allocation27_spill] sm:$0xff] %v8473_v59  ;;  %3467 = vmax.xlane.f32.xlu2 %v8432_v6  ;;  %3507 = vmax.xlane.f32.xlu1 %v8475_v26 }
 0x340   : > { %10569 = vst [vmem:[#allocation28_spill] sm:$0xff] %v8475_v26 }
 0x341   : > { %5614 = vmatmul.msk.bf16.gmra.mxu0 %vm2661_vm6, %v5821_v34  ;;  %v8509_v34 = vpop.f32.mrf.mxu2 }
 0x346   : > { %v8484_v21 = vpop.f32.mrf.mxu0  ;;  %v8486_v10 = vpop.f32.mrf.mxu1 }
 0x347   : > { %10570 = vst [vmem:[#allocation29_spill] sm:$0xff] %v8484_v21  ;;  %3497 = vmax.xlane.f32.xlu2 %v8434_v54 }
 0x349   : > { %5622 = vmatmul.msk.bf16.gmra.mxu1 %vm2661_vm6, %v5822_v0  ;;  %v8511_v0 = vpop.f32.mrf.mxu3  ;;  %v8521_v28 = vpop.f32.mrf.mxu2 }
 0x34a   : > { %10574 = vst [vmem:[#allocation33_spill] sm:$0xff] %v8511_v0 }
 0x34e   : > { %v8492_v9 = vpop.f32.mrf.mxu0  ;;  %v8494_v61 = vpop.f32.mrf.mxu1 }
 0x34f   : > { %10572 = vst [vmem:[#allocation31_spill] sm:$0xff] %v8492_v9  ;;  %3407 = vmax.xlane.f32.xlu2 %v8395_v31  ;;  %3511 = vmax.xlane.f32.xlu0 %v8494_v61 }
 0x350   : > { %10573 = vst [vmem:[#allocation32_spill] sm:$0xff] %v8494_v61 }
 0x351   : > { %5615 = vmatmul.msk.bf16.gmra.mxu0 %vm2661_vm6, %v5823_v18  ;;  %v3654_v18 = vsub.f32 %v8347_v5, %v3400_v43  ;;  %v8523_v15 = vpop.f32.mrf.mxu3  ;;  %v3669_v5 = vsub.f32 %v8352_v8, %v3430_v24  ;;  %v8534_v43 = vpop.f32.mrf.mxu2 }
 0x352   : > { %10577 = vst [vmem:[#allocation36_spill] sm:$0xff] %v8534_v43 }
 0x353   : > { %v3783_v33 = vmul.f32 1.442695, %v3654_v18 }
 0x355   : > { %5895 = vpow2.f32 %v3783_v33 }
 0x356   : > { %v8503_v40 = vpop.f32.mrf.mxu0  ;;  %v8505_v45 = vpop.f32.mrf.mxu1 }
 0x357   : > { %3437 = vmax.xlane.f32.xlu2 %v8393_v2  ;;  %3513 = vmax.xlane.f32.xlu1 %v8505_v45 }
 0x359   : > { %5623 = vmatmul.msk.bf16.gmra.mxu1 %vm2661_vm6, %v5824_v20  ;;  %v8536_v18 = vpop.f32.mrf.mxu3  ;;  %v8548_v24 = vpop.f32.mrf.mxu2 }
 0x35a   : > { %10580 = vst [vmem:[#allocation39_spill] sm:$0xff] %v8548_v24 }
 0x35b   : > { %v8538_v52 = vpop.eup %5895 }
 0x35c   : > { %10578 = vst [vmem:[#allocation37_spill] sm:$0xff] %v8538_v52 }
 0x35e   : > { %v8514_v7 = vpop.f32.mrf.mxu0  ;;  %v8516_v11 = vpop.f32.mrf.mxu1 }
 0x35f   : > { %10575 = vst [vmem:[#allocation34_spill] sm:$0xff] %v8516_v11  ;;  %3469 = vmax.xlane.f32.xlu2 %v8438_v44 }
 0x361   : > { %5616 = vmatmul.msk.bf16.gmra.mxu0 %vm2661_vm6, %v5825_v35  ;;  %v3813_v35 = vmul.f32 1.442695, %v3669_v5  ;;  %v8554_v63 = vpop.f32.mrf.mxu3 }
 0x362   : > { %10582 = vst [vmem:[#allocation41_spill] sm:$0xff] %v8554_v63 }
 0x363   : > { %5897 = vpow2.f32 %v3813_v35  ;;  %v5828_v35 = vpop.trf.xlu1 }
 0x366   : > { %v8525_v20 = vpop.f32.mrf.mxu0  ;;  %v8527_v54 = vpop.f32.mrf.mxu1 }
 0x367   : > { %10576 = vst [vmem:[#allocation35_spill] sm:$0xff] %v8527_v54  ;;  %3487 = vmax.xlane.f32.xlu1 %v8525_v20  ;;  %3517 = vmax.xlane.f32.xlu0 %v8527_v54  ;;  %v3432_v54 = vpop.xlane.xlu0 %3431 }
 0x368   : > { %3409 = vmax.xlane.f32.xlu2 %v8401_v55 }
 0x369   : > { %5624 = vmatmul.msk.bf16.gmra.mxu1 %vm2661_vm6, %v5826_v22  ;;  %v8550_v22 = vpop.eup %5897 }
 0x36a   : > { %10581 = vst [vmem:[#allocation40_spill] sm:$0xff] %v8550_v22 }
 0x36e   : > { %v8540_v37 = vpop.f32.mrf.mxu1  ;;  %v8546_v8 = vpop.f32.mrf.mxu0 }
 0x36f   : > { %3519 = vmax.xlane.f32.xlu1 %v8540_v37  ;;  %4039 = vadd.xlane.f32.xlu0 %v8538_v52  ;;  %10579 = vst [vmem:[#allocation38_spill] sm:$0xff] %v8546_v8 }
 0x370   : > { %3439 = vmax.xlane.f32.xlu2 %v8399_v1 }
 0x371   : > { %5617 = vmatmul.msk.bf16.gmra.mxu0 %vm2661_vm6, %v5827_v36 }
 0x372   : > { %v3462_v33 = vpop.xlane.xlu2 %3461 }
 0x373   : > { %v3685_v52 = vsub.f32 %v8415_v12, %v3462_v33  ;;  %v8569_v12 = vpop.f32.mrf.mxu3 }
 0x375   : > { %v3845_v51 = vmul.f32 1.442695, %v3685_v52 }
 0x376   : > { %v8552_v5 = vpop.f32.mrf.mxu1  ;;  %v8561_v47 = vpop.f32.mrf.mxu0 }
 0x377   : > { %4069 = vadd.xlane.f32.xlu0 %v8550_v22  ;;  %3525 = vmax.xlane.f32.xlu1 %v8548_v24  ;;  %5899 = vpow2.f32 %v3845_v51  ;;  %v3670_v51 = vsub.f32 %v8369_v4, %v3432_v54 }
 0x378   : > { %3471 = vmax.xlane.f32.xlu2 %v8447_v57 }
 0x379   : > { %5625 = vmatmul.msk.bf16.gmra.mxu1 %vm2661_vm6, %v5828_v35  ;;  %v8573_v35 = vpop.f32.mrf.mxu2 }
 0x37a   : > { %v3402_v36 = vpop.xlane.xlu2 %3401  ;;  %10584 = vst [vmem:[#allocation43_spill] sm:$0xff] %v8573_v35 }
 0x37b   : > { %v3655_v24 = vsub.f32 %v8374_v56, %v3402_v36  ;;  %v8585_v36 = vpop.f32.mrf.mxu3 }
 0x37c   : > { %10588 = vst [vmem:[#allocation47_spill] sm:$0xff] %v8585_v36 }
 0x37d   : > { %v3785_v52 = vmul.f32 1.442695, %v3655_v24  ;;  %v8577_v14 = vpop.eup %5899 }
 0x37e   : > { %v8563_v61 = vpop.f32.mrf.mxu1  ;;  %v8575_v22 = vpop.f32.mrf.mxu0  ;;  %10586 = vst [vmem:[#allocation45_spill] sm:$0xff] %v8577_v14 }
 0x37f   : > { %10583 = vst [vmem:[#allocation42_spill] sm:$0xff] %v8563_v61  ;;  %3491 = vmax.xlane.f32.xlu1 %v8561_v47  ;;  %3523 = vmax.xlane.f32.xlu0 %v8563_v61  ;;  %5901 = vpow2.f32 %v3785_v52  ;;  %v3815_v61 = vmul.f32 1.442695, %v3670_v51 }
 0x380   : > { %3411 = vmax.xlane.f32.xlu2 %v8407_v13  ;;  %10585 = vst [vmem:[#allocation44_spill] sm:$0xff] %v8575_v22 }
 0x381   : > { %v8587_v24 = vpop.f32.mrf.mxu2  ;;  %5903 = vpow2.f32 %v3815_v61 }
 0x382   : > { %v8571_v33 = vpop.xlane.xlu2 %3463  ;;  %10589 = vst [vmem:[#allocation48_spill] sm:$0xff] %v8587_v24 }
 0x383   : > { %v8596_v54 = vpop.f32.mrf.mxu3 }
 0x384   : > { %10591 = vst [vmem:[#allocation50_spill] sm:$0xff] %v8596_v54 }
 0x385   : > { %v8589_v25 = vpop.eup %5901 }
 0x386   : > { %10590 = vst [vmem:[#allocation49_spill] sm:$0xff] %v8589_v25 }
 0x387   : > { %4101 = vadd.xlane.f32.xlu1 %v8577_v14  ;;  %3589 = vmax.xlane.f32.xlu0 %v8575_v22  ;;  %v8598_v52 = vpop.eup %5903  ;;  %v8604_v14 = vpop.f32.mrf.mxu0 }
 0x388   : > { %3441 = vmax.xlane.f32.xlu2 %v8405_v38  ;;  %10592 = vst [vmem:[#allocation51_spill] sm:$0xff] %v8598_v52 }
 0x389   : > { %10593 = vst [vmem:[#allocation52_spill] sm:$0xff] %v8604_v14 }
 0x38a   : > { %v8583_v56 = vpop.xlane.xlu2 %3493 }
 0x38b   : > { %10587 = vst [vmem:[#allocation46_spill] sm:$0xff] %v8583_v56 }
 0x38f   : > { %4041 = vadd.xlane.f32.xlu1 %v8589_v25  ;;  %3529 = vmax.xlane.f32.xlu0 %v8587_v24  ;;  %v8609_v25 = vpop.f32.mrf.mxu1 }
 0x390   : > { %3473 = vmax.xlane.f32.xlu2 %v8454_v30  ;;  %10594 = vst [vmem:[#allocation53_spill] sm:$0xff] %v8609_v25 }
 0x392   : > { %v8594_v4 = vpop.xlane.xlu2 %3403 }
 0x397   : > { %4071 = vadd.xlane.f32.xlu1 %v8598_v52  ;;  %3559 = vmax.xlane.f32.xlu0 %v8596_v54 }
 0x398   : > { %3503 = vmax.xlane.f32.xlu2 %v8456_v49 }
 0x39a   : > { %v3466_v51 = vpop.xlane.xlu2 %3465 }
 0x39b   : > { %v3687_v22 = vsub.f32 %v8425_v23, %v3466_v51  ;;  %v8617_v51 = vpop.f32.mrf.mxu2 }
 0x39c   : > { %10596 = vst [vmem:[#allocation55_spill] sm:$0xff] %v8617_v51 }
 0x39d   : > { %v3849_v61 = vmul.f32 1.442695, %v3687_v22 }
 0x39f   : > { %3591 = vmax.xlane.f32.xlu1 %v8604_v14  ;;  %5905 = vpow2.f32 %v3849_v61  ;;  %v8627_v14 = vpop.f32.mrf.mxu3 }
 0x3a0   : > { %3413 = vmax.xlane.f32.xlu2 %v8445_v53  ;;  %10599 = vst [vmem:[#allocation58_spill] sm:$0xff] %v8627_v14 }
 0x3a2   : > { %v3406_v24 = vpop.xlane.xlu2 %3405 }
 0x3a3   : > { %v3657_v56 = vsub.f32 %v8389_v58, %v3406_v24  ;;  %v8624_v24 = vpop.f32.mrf.mxu0 }
 0x3a4   : > { %10598 = vst [vmem:[#allocation57_spill] sm:$0xff] %v8624_v24 }
 0x3a5   : > { %v3789_v52 = vmul.f32 1.442695, %v3657_v56  ;;  %v8611_v54 = vpop.eup %5905 }
 0x3a6   : > { %10595 = vst [vmem:[#allocation54_spill] sm:$0xff] %v8611_v54  ;;  %4105 = vadd.xlane.f32.xlu0 %v8611_v54 }
 0x3a7   : > { %5907 = vpow2.f32 %v3789_v52  ;;  %3621 = vmax.xlane.f32.xlu1 %v8609_v25 }
 0x3a8   : > { %3443 = vmax.xlane.f32.xlu2 %v8412_v50 }
 0x3aa   : > { %v3436_v23 = vpop.xlane.xlu2 %3435 }
 0x3ab   : > { %v3672_v22 = vsub.f32 %v8387_v39, %v3436_v23  ;;  %v8638_v25 = vpop.f32.mrf.mxu0 }
 0x3ac   : > { %10603 = vst [vmem:[#allocation62_spill] sm:$0xff] %v8638_v25 }
 0x3ad   : > { %v8619_v61 = vpop.eup %5907  ;;  %v3819_v58 = vmul.f32 1.442695, %v3672_v22 }
 0x3ae   : > { %10597 = vst [vmem:[#allocation56_spill] sm:$0xff] %v8619_v61  ;;  %4045 = vadd.xlane.f32.xlu0 %v8619_v61 }
 0x3af   : > { %5909 = vpow2.f32 %v3819_v58  ;;  %3531 = vmax.xlane.f32.xlu1 %v8617_v51  ;;  %v8636_v58 = vpop.f32.mrf.mxu1 }
 0x3b0   : > { %3475 = vmax.xlane.f32.xlu2 %v8462_v32  ;;  %10602 = vst [vmem:[#allocation61_spill] sm:$0xff] %v8636_v58 }
 0x3b2   : > { %v3468_v56 = vpop.xlane.xlu2 %3467 }
 0x3b3   : > { %v3688_v52 = vsub.f32 %v8432_v6, %v3468_v56  ;;  %v8645_v56 = vpop.f32.mrf.mxu2 }
 0x3b4   : > { %10605 = vst [vmem:[#allocation64_spill] sm:$0xff] %v8645_v56 }
 0x3b5   : > { %v8629_v39 = vpop.eup %5909  ;;  %v3851_v23 = vmul.f32 1.442695, %v3688_v52 }
 0x3b6   : > { %10600 = vst [vmem:[#allocation59_spill] sm:$0xff] %v8629_v39  ;;  %4075 = vadd.xlane.f32.xlu0 %v8629_v39  ;;  %v8654_v39 = vpop.f32.mrf.mxu3 }
 0x3b7   : > { %5911 = vpow2.f32 %v3851_v23  ;;  %3561 = vmax.xlane.f32.xlu1 %v8627_v14  ;;  %v8648_v23 = vpop.f32.mrf.mxu1  ;;  %v8650_v14 = vpop.xlane.xlu1 %3433  ;;  %10607 = vst [vmem:[#allocation66_spill] sm:$0xff] %v8654_v39 }
 0x3b8   : > { %3415 = vmax.xlane.f32.xlu2 %v8458_v16  ;;  %10606 = vst [vmem:[#allocation65_spill] sm:$0xff] %v8648_v23 }
 0x3ba   : > { %v8634_v22 = vpop.xlane.xlu2 %3497 }
 0x3bb   : > { %10601 = vst [vmem:[#allocation60_spill] sm:$0xff] %v8634_v22  ;;  %v8657_v61 = vpop.f32.mrf.mxu2 }
 0x3bc   : > { %10608 = vst [vmem:[#allocation67_spill] sm:$0xff] %v8657_v61 }
 0x3bd   : > { %v8640_v54 = vpop.eup %5911 }
 0x3be   : > { %10604 = vst [vmem:[#allocation63_spill] sm:$0xff] %v8640_v54  ;;  %3595 = vmax.xlane.f32.xlu0 %v8638_v25 }
 0x3bf   : > { %4107 = vadd.xlane.f32.xlu1 %v8640_v54 }
 0x3c0   : > { %3445 = vmax.xlane.f32.xlu2 %v8471_v60 }
 0x3c2   : > { %v3408_v6 = vpop.xlane.xlu2 %3407 }
 0x3c3   : > { %v3658_v52 = vsub.f32 %v8395_v31, %v3408_v6  ;;  %v8661_v6 = vpop.xlane.xlu1 %3495 }
 0x3c4   : > { %10610 = vst [vmem:[#allocation69_spill] sm:$0xff] %v8661_v6 }
 0x3c5   : > { %v3791_v51 = vmul.f32 1.442695, %v3658_v52  ;;  %v8668_v52 = vpop.f32.mrf.mxu3 }
 0x3c6   : > { %3625 = vmax.xlane.f32.xlu0 %v8648_v23  ;;  %10611 = vst [vmem:[#allocation70_spill] sm:$0xff] %v8668_v52 }
 0x3c7   : > { %5913 = vpow2.f32 %v3791_v51 }
 0x3c8   : > { %3477 = vmax.xlane.f32.xlu2 %v8473_v59  ;;  %v8700_v59 = vpop.xlane.xlu0 %3499 }
 0x3c9   : > { %10618 = vst [vmem:[#allocation77_spill] sm:$0xff] %v8700_v59 }
 0x3ca   : > { %v3438_v25 = vpop.xlane.xlu2 %3437 }
 0x3cb   : > { %v3673_v54 = vsub.f32 %v8393_v2, %v3438_v25  ;;  %v8672_v2 = vpop.xlane.xlu1 %3501 }
 0x3cc   : > { %10613 = vst [vmem:[#allocation72_spill] sm:$0xff] %v8672_v2 }
 0x3cd   : > { %v8659_v22 = vpop.eup %5913  ;;  %v3821_v31 = vmul.f32 1.442695, %v3673_v54  ;;  %v8679_v54 = vpop.f32.mrf.mxu0 }
 0x3ce   : > { %10609 = vst [vmem:[#allocation68_spill] sm:$0xff] %v8659_v22  ;;  %4047 = vadd.xlane.f32.xlu1 %v8659_v22  ;;  %3535 = vmax.xlane.f32.xlu0 %v8657_v61  ;;  %v8687_v61 = vpop.f32.mrf.mxu1 }
 0x3cf   : > { %5915 = vpow2.f32 %v3821_v31  ;;  %10614 = vst [vmem:[#allocation73_spill] sm:$0xff] %v8679_v54 }
 0x3d0   : > { %3417 = vmax.xlane.f32.xlu2 %v8468_v29  ;;  %10616 = vst [vmem:[#allocation75_spill] sm:$0xff] %v8687_v61 }
 0x3d2   : > { %v8666_v51 = vpop.xlane.xlu2 %3469 }
 0x3d3   : > { %v8681_v31 = vpop.xlane.xlu1 %3507 }
 0x3d4   : > { %10615 = vst [vmem:[#allocation74_spill] sm:$0xff] %v8681_v31 }
 0x3d5   : > { %v8670_v23 = vpop.eup %5915 }
 0x3d6   : > { %10612 = vst [vmem:[#allocation71_spill] sm:$0xff] %v8670_v23  ;;  %4077 = vadd.xlane.f32.xlu1 %v8670_v23  ;;  %3565 = vmax.xlane.f32.xlu0 %v8668_v52  ;;  %v8693_v23 = vpop.f32.mrf.mxu2 }
 0x3d7   : > { %10617 = vst [vmem:[#allocation76_spill] sm:$0xff] %v8693_v23 }
 0x3d8   : > { %3447 = vmax.xlane.f32.xlu2 %v8482_v48 }
 0x3db   : > { %v8677_v25 = vpop.xlane.xlu2 %3409  ;;  %v8689_v22 = vpop.xlane.xlu1 %3513 }
 0x3de   : > { %3597 = vmax.xlane.f32.xlu1 %v8679_v54 }
 0x3e0   : > { %3479 = vmax.xlane.f32.xlu2 %v8484_v21  ;;  %v8702_v21 = vpop.f32.mrf.mxu3 }
 0x3e1   : > { %10619 = vst [vmem:[#allocation78_spill] sm:$0xff] %v8702_v21 }
 0x3e3   : > { %v8685_v6 = vpop.xlane.xlu2 %3439  ;;  %v8697_v54 = vpop.xlane.xlu1 %3487 }
 0x3e6   : > { %3627 = vmax.xlane.f32.xlu1 %v8687_v61 }
 0x3e8   : > { %3509 = vmax.xlane.f32.xlu2 %v8486_v10 }
 0x3eb   : > { %v3472_v52 = vpop.xlane.xlu2 %3471 }
 0x3ec   : > { %v3690_v49 = vsub.f32 %v8447_v57, %v3472_v52  ;;  %v8710_v57 = vpop.xlane.xlu1 %3519 }
 0x3ee   : > { %v3855_v32 = vmul.f32 1.442695, %v3690_v49  ;;  %3537 = vmax.xlane.f32.xlu1 %v8693_v23  ;;  %v8712_v49 = vpop.xlane.xlu0 %3505 }
 0x3f0   : > { %5917 = vpow2.f32 %v3855_v32  ;;  %3419 = vmax.xlane.f32.xlu2 %v8480_v17 }
 0x3f3   : > { %v3412_v2 = vpop.xlane.xlu2 %3411 }
 0x3f4   : > { %v3660_v61 = vsub.f32 %v8407_v13, %v3412_v2 }
 0x3f6   : > { %v8705_v26 = vpop.eup %5917  ;;  %v3795_v31 = vmul.f32 1.442695, %v3660_v61  ;;  %3567 = vmax.xlane.f32.xlu1 %v8702_v21  ;;  %v8719_v61 = vpop.f32.mrf.mxu0 }
 0x3f7   : > { %10620 = vst [vmem:[#allocation79_spill] sm:$0xff] %v8705_v26  ;;  %4111 = vadd.xlane.f32.xlu0 %v8705_v26  ;;  %v8721_v2 = vpop.xlane.xlu0 %3511  ;;  %v8723_v26 = vpop.xlane.xlu1 %3525 }
 0x3f8   : > { %5919 = vpow2.f32 %v3795_v31  ;;  %3449 = vmax.xlane.f32.xlu2 %v8496_v41  ;;  %10622 = vst [vmem:[#allocation81_spill] sm:$0xff] %v8719_v61 }
 0x3f9   : > { %10623 = vst [vmem:[#allocation82_spill] sm:$0xff] %v8721_v2 }
 0x3fa   : > { %10624 = vst [vmem:[#allocation83_spill] sm:$0xff] %v8723_v26 }
 0x3fb   : > { %v3442_v32 = vpop.xlane.xlu2 %3441 }
 0x3fc   : > { %v3675_v52 = vsub.f32 %v8405_v38, %v3442_v32  ;;  %v8730_v32 = vpop.f32.mrf.mxu1 }
 0x3fd   : > { %10626 = vst [vmem:[#allocation85_spill] sm:$0xff] %v8730_v32 }
 0x3fe   : > { %v8715_v59 = vpop.eup %5919  ;;  %v3825_v13 = vmul.f32 1.442695, %v3675_v52 }
 0x3ff   : > { %10621 = vst [vmem:[#allocation80_spill] sm:$0xff] %v8715_v59  ;;  %4051 = vadd.xlane.f32.xlu0 %v8715_v59  ;;  %v8736_v59 = vpop.xlane.xlu0 %3517  ;;  %v8740_v26 = vpop.xlane.xlu1 %3491 }
 0x400   : > { %5921 = vpow2.f32 %v3825_v13  ;;  %3481 = vmax.xlane.f32.xlu2 %v8492_v9  ;;  %v8734_v13 = vpop.f32.mrf.mxu0  ;;  %10629 = vst [vmem:[#allocation88_spill] sm:$0xff] %v8736_v59 }
 0x401   : > { %10628 = vst [vmem:[#allocation87_spill] sm:$0xff] %v8734_v13 }
 0x403   : > { %v3474_v31 = vpop.xlane.xlu2 %3473 }
 0x404   : > { %v3691_v21 = vsub.f32 %v8454_v30, %v3474_v31  ;;  %v8745_v30 = vpop.f32.mrf.mxu2 }
 0x406   : > { %v8726_v23 = vpop.eup %5921  ;;  %v3857_v38 = vmul.f32 1.442695, %v3691_v21 }
 0x407   : > { %10625 = vst [vmem:[#allocation84_spill] sm:$0xff] %v8726_v23  ;;  %4081 = vadd.xlane.f32.xlu0 %v8726_v23  ;;  %v8753_v59 = vpop.xlane.xlu1 %4101 }
 0x408   : > { %5923 = vpow2.f32 %v3857_v38  ;;  %3421 = vmax.xlane.f32.xlu2 %v8490_v27  ;;  %v8748_v38 = vpop.f32.mrf.mxu1  ;;  %10633 = vst [vmem:[#allocation92_spill] sm:$0xff] %v8753_v59 }
 0x409   : > { %10631 = vst [vmem:[#allocation90_spill] sm:$0xff] %v8748_v38 }
 0x40b   : > { %v8732_v52 = vpop.xlane.xlu2 %3503 }
 0x40c   : > { %10627 = vst [vmem:[#allocation86_spill] sm:$0xff] %v8732_v52  ;;  %v8750_v52 = vpop.xlane.xlu0 %4039  ;;  %v8759_v27 = vpop.f32.mrf.mxu2 }
 0x40d   : > { %10632 = vst [vmem:[#allocation91_spill] sm:$0xff] %v8750_v52 }
 0x40e   : > { %v8738_v2 = vpop.eup %5923 }
 0x40f   : > { %10630 = vst [vmem:[#allocation89_spill] sm:$0xff] %v8738_v2  ;;  %3601 = vmax.xlane.f32.xlu0 %v8734_v13  ;;  %4113 = vadd.xlane.f32.xlu1 %v8738_v2  ;;  %v8756_v2 = vpop.f32.mrf.mxu3 }
 0x410   : > { %3451 = vmax.xlane.f32.xlu2 %v8511_v0 }
 0x413   : > { %v3414_v21 = vpop.xlane.xlu2 %3413 }
 0x414   : > { %v3661_v31 = vsub.f32 %v8445_v53, %v3414_v21 }
 0x416   : > { %v3797_v23 = vmul.f32 1.442695, %v3661_v31  ;;  %v8768_v31 = vpop.xlane.xlu1 %4041 }
 0x417   : > { %3631 = vmax.xlane.f32.xlu0 %v8748_v38  ;;  %10636 = vst [vmem:[#allocation95_spill] sm:$0xff] %v8768_v31  ;;  %v8772_v38 = vpop.f32.mrf.mxu3 }
 0x418   : > { %5925 = vpow2.f32 %v3797_v23  ;;  %3483 = vmax.xlane.f32.xlu2 %v8503_v40  ;;  %v8766_v23 = vpop.xlane.xlu0 %4069  ;;  %10638 = vst [vmem:[#allocation97_spill] sm:$0xff] %v8772_v38 }
 0x419   : > { %10635 = vst [vmem:[#allocation94_spill] sm:$0xff] %v8766_v23  ;;  %v8785_v23 = vpop.f32.mrf.mxu0 }
 0x41a   : > { %10642 = vst [vmem:[#allocation101_spill] sm:$0xff] %v8785_v23 }
 0x41b   : > { %v3444_v13 = vpop.xlane.xlu2 %3443 }
 0x41c   : > { %v3676_v0 = vsub.f32 %v8412_v50, %v3444_v13 }
 0x41e   : > { %v8761_v53 = vpop.eup %5925  ;;  %v3827_v21 = vmul.f32 1.442695, %v3676_v0 }
 0x41f   : > { %10634 = vst [vmem:[#allocation93_spill] sm:$0xff] %v8761_v53  ;;  %4053 = vadd.xlane.f32.xlu1 %v8761_v53  ;;  %3541 = vmax.xlane.f32.xlu0 %v8759_v27 }
 0x420   : > { %5927 = vpow2.f32 %v3827_v21  ;;  %3423 = vmax.xlane.f32.xlu2 %v8509_v34  ;;  %v8779_v0 = vpop.xlane.xlu0 %3523  ;;  %v8783_v21 = vpop.xlane.xlu1 %4071 }
 0x421   : > { %10640 = vst [vmem:[#allocation99_spill] sm:$0xff] %v8779_v0 }
 0x422   : > { %10641 = vst [vmem:[#allocation100_spill] sm:$0xff] %v8783_v21  ;;  %v8801_v21 = vpop.f32.mrf.mxu2 }
 0x423   : > { %v8770_v59 = vpop.xlane.xlu2 %3475  ;;  %10647 = vst [vmem:[#allocation106_spill] sm:$0xff] %v8801_v21 }
 0x424   : > { %10637 = vst [vmem:[#allocation96_spill] sm:$0xff] %v8770_v59 }
 0x426   : > { %v8774_v50 = vpop.eup %5927 }
 0x427   : > { %10639 = vst [vmem:[#allocation98_spill] sm:$0xff] %v8774_v50  ;;  %4083 = vadd.xlane.f32.xlu1 %v8774_v50  ;;  %3571 = vmax.xlane.f32.xlu0 %v8772_v38  ;;  %v8793_v50 = vpop.f32.mrf.mxu1 }
 0x428   : > { %3453 = vmax.xlane.f32.xlu2 %v8523_v15  ;;  %v8789_v31 = vpop.xlane.xlu0 %3589  ;;  %10644 = vst [vmem:[#allocation103_spill] sm:$0xff] %v8793_v50  ;;  %v8795_v38 = vpop.xlane.xlu1 %3591 }
 0x429   : > { %10643 = vst [vmem:[#allocation102_spill] sm:$0xff] %v8789_v31 }
 0x42a   : > { %10645 = vst [vmem:[#allocation104_spill] sm:$0xff] %v8795_v38  ;;  %v8810_v38 = vpop.f32.mrf.mxu3 }
 0x42b   : > { %v8781_v13 = vpop.xlane.xlu2 %3415  ;;  %10650 = vst [vmem:[#allocation109_spill] sm:$0xff] %v8810_v38 }
 0x42f   : > { %3603 = vmax.xlane.f32.xlu1 %v8785_v23 }
 0x430   : > { %3485 = vmax.xlane.f32.xlu2 %v8514_v7  ;;  %v8803_v0 = vpop.xlane.xlu0 %3529  ;;  %v8806_v23 = vpop.xlane.xlu1 %3621 }
 0x431   : > { %10648 = vst [vmem:[#allocation107_spill] sm:$0xff] %v8803_v0 }
 0x432   : > { %10649 = vst [vmem:[#allocation108_spill] sm:$0xff] %v8806_v23 }
 0x433   : > { %v8791_v52 = vpop.xlane.xlu2 %3445 }
 0x437   : > { %3633 = vmax.xlane.f32.xlu1 %v8793_v50 }
 0x438   : > { %3515 = vmax.xlane.f32.xlu2 %v8516_v11  ;;  %v8812_v9 = vpop.xlane.xlu0 %3559  ;;  %v8816_v0 = vpop.xlane.xlu1 %3531 }
 0x439   : > { %10651 = vst [vmem:[#allocation110_spill] sm:$0xff] %v8812_v9 }
 0x43a   : > { %10652 = vst [vmem:[#allocation111_spill] sm:$0xff] %v8816_v0 }
 0x43b   : > { %v8799_v59 = vpop.xlane.xlu2 %3477 }
 0x43c   : > { %10646 = vst [vmem:[#allocation105_spill] sm:$0xff] %v8799_v59 }
 0x43f   : > { %3543 = vmax.xlane.f32.xlu1 %v8801_v21 }
 0x440   : > { %3425 = vmax.xlane.f32.xlu2 %v8521_v28 }
 0x443   : > { %v3418_v31 = vpop.xlane.xlu2 %3417 }
 0x444   : > { %v3663_v53 = vsub.f32 %v8468_v29, %v3418_v31  ;;  %v8823_v29 = vpop.xlane.xlu0 %4105 }
 0x445   : > { %10653 = vst [vmem:[#allocation112_spill] sm:$0xff] %v8823_v29 }
 0x446   : > { %v3801_v50 = vmul.f32 1.442695, %v3663_v53  ;;  %v8825_v53 = vpop.f32.mrf.mxu0 }
 0x447   : > { %3573 = vmax.xlane.f32.xlu1 %v8810_v38 }
 0x448   : > { %5929 = vpow2.f32 %v3801_v50  ;;  %3455 = vmax.xlane.f32.xlu2 %v8536_v18  ;;  %v8829_v50 = vpop.xlane.xlu1 %3561 }
 0x449   : > { %10654 = vst [vmem:[#allocation113_spill] sm:$0xff] %v8829_v50 }
 0x44b   : > { %v3448_v59 = vpop.xlane.xlu2 %3447 }
 0x44c   : > { %v3678_v23 = vsub.f32 %v8482_v48, %v3448_v59  ;;  %v3653_v59 = vsub.f32 %v8337_v46, %v8500_v62  ;;  %v8837_v48 = vpop.f32.mrf.mxu1 }
 0x44d   : > { %10656 = vst [vmem:[#allocation115_spill] sm:$0xff] %v8837_v48 }
 0x44e   : > { %v8819_v11 = vpop.eup %5929  ;;  %v3831_v21 = vmul.f32 1.442695, %v3678_v23  ;;  %v8839_v23 = vpop.xlane.xlu0 %4045  ;;  %v3781_v29 = vmul.f32 1.442695, %v3653_v59 }
 0x44f   : > { %4057 = vadd.xlane.f32.xlu0 %v8819_v11  ;;  %10657 = vst [vmem:[#allocation116_spill] sm:$0xff] %v8839_v23  ;;  %v8843_v0 = vpop.f32.mrf.mxu0 }
 0x450   : > { %5931 = vpow2.f32 %v3831_v21  ;;  %3427 = vmax.xlane.f32.xlu2 %v8534_v43  ;;  %10658 = vst [vmem:[#allocation117_spill] sm:$0xff] %v8843_v0  ;;  %v8845_v38 = vpop.xlane.xlu1 %4107 }
 0x451   : > { %10659 = vst [vmem:[#allocation118_spill] sm:$0xff] %v8845_v38  ;;  %5933 = vpow2.f32 %v3781_v29  ;;  %v8862_v38 = vpop.f32.mrf.mxu3 }
 0x453   : > { %v8827_v31 = vpop.xlane.xlu2 %3479 }
 0x454   : > { %v8852_v62 = vpop.f32.mrf.mxu1 }
 0x455   : > { %10660 = vst [vmem:[#allocation119_spill] sm:$0xff] %v8852_v62 }
 0x456   : > { %v8831_v9 = vpop.eup %5931  ;;  %v8854_v23 = vpop.xlane.xlu0 %4075 }
 0x457   : > { %10655 = vst [vmem:[#allocation114_spill] sm:$0xff] %v8831_v9  ;;  %4087 = vadd.xlane.f32.xlu0 %v8831_v9  ;;  %v8849_v9 = vpop.f32.mrf.mxu2  ;;  %v8858_v59 = vpop.eup %5933 }
 0x458   : > { %3457 = vmax.xlane.f32.xlu2 %v8554_v63  ;;  %10661 = vst [vmem:[#allocation120_spill] sm:$0xff] %v8854_v23  ;;  %v8856_v63 = vpop.xlane.xlu1 %4047 }
 0x459   : > { %10662 = vst [vmem:[#allocation121_spill] sm:$0xff] %v8856_v63 }
 0x45a   : > { %10663 = vst [vmem:[#allocation122_spill] sm:$0xff] %v8858_v59 }
 0x45b   : > { %v8841_v21 = vpop.xlane.xlu2 %3509 }
 0x45f   : > { %3607 = vmax.xlane.f32.xlu0 %v8843_v0 }
 0x460   : > { %3489 = vmax.xlane.f32.xlu2 %v8546_v8  ;;  %v8869_v8 = vpop.xlane.xlu0 %3595 }
 0x461   : > { %10665 = vst [vmem:[#allocation124_spill] sm:$0xff] %v8869_v8 }
 0x463   : > { %v3420_v50 = vpop.xlane.xlu2 %3419 }
 0x464   : > { %v3664_v46 = vsub.f32 %v8480_v17, %v3420_v50  ;;  %v8867_v50 = vpop.f32.mrf.mxu2 }
 0x465   : > { %10664 = vst [vmem:[#allocation123_spill] sm:$0xff] %v8867_v50 }
 0x466   : > { %v3803_v43 = vmul.f32 1.442695, %v3664_v46  ;;  %v8873_v46 = vpop.xlane.xlu1 %4077 }
 0x467   : > { %3637 = vmax.xlane.f32.xlu0 %v8852_v62  ;;  %10666 = vst [vmem:[#allocation125_spill] sm:$0xff] %v8873_v46  ;;  %v3686_v46 = vsub.f32 %v8419_v42, %v8571_v33 }
 0x468   : > { %5935 = vpow2.f32 %v3803_v43  ;;  %4037 = vadd.xlane.f32.xlu2 %v8858_v59 }
 0x46b   : > { %v3450_v29 = vpop.xlane.xlu2 %3449 }
 0x46c   : > { %v3679_v0 = vsub.f32 %v8496_v41, %v3450_v29  ;;  %v8880_v41 = vpop.f32.mrf.mxu3 }
 0x46e   : > { %v8865_v17 = vpop.eup %5935  ;;  %v3833_v23 = vmul.f32 1.442695, %v3679_v0  ;;  %v8885_v0 = vpop.xlane.xlu0 %3625 }
 0x46f   : > { %4059 = vadd.xlane.f32.xlu1 %v8865_v17  ;;  %3547 = vmax.xlane.f32.xlu0 %v8867_v50  ;;  %10668 = vst [vmem:[#allocation127_spill] sm:$0xff] %v8885_v0  ;;  %v8887_v29 = vpop.xlane.xlu1 %3597  ;;  %v8903_v0 = vpop.f32.mrf.mxu1 }
 0x470   : > { %5937 = vpow2.f32 %v3833_v23  ;;  %3459 = vmax.xlane.f32.xlu2 %v8569_v12  ;;  %10669 = vst [vmem:[#allocation128_spill] sm:$0xff] %v8887_v29  ;;  %v8891_v23 = vpop.f32.mrf.mxu0  ;;  %v3847_v29 = vmul.f32 1.442695, %v3686_v46  ;;  %v3671_v46 = vsub.f32 %v8378_v19, %v8650_v14 }
 0x471   : > { %10670 = vst [vmem:[#allocation129_spill] sm:$0xff] %v8891_v23 }
 0x472   : > { %10673 = vst [vmem:[#allocation132_spill] sm:$0xff] %v8903_v0  ;;  %5939 = vpow2.f32 %v3847_v29 }
 0x473   : > { %v8876_v43 = vpop.xlane.xlu2 %3481 }
 0x476   : > { %v8878_v59 = vpop.eup %5937  ;;  %v8897_v63 = vpop.xlane.xlu0 %3535 }
 0x477   : > { %10667 = vst [vmem:[#allocation126_spill] sm:$0xff] %v8878_v59  ;;  %4089 = vadd.xlane.f32.xlu1 %v8878_v59  ;;  %3577 = vmax.xlane.f32.xlu0 %v8880_v41  ;;  %v8901_v62 = vpop.xlane.xlu1 %3627  ;;  %v8915_v59 = vpop.f32.mrf.mxu2 }
 0x478   : > { %3521 = vmax.xlane.f32.xlu2 %v8552_v5  ;;  %10671 = vst [vmem:[#allocation130_spill] sm:$0xff] %v8897_v63 }
 0x479   : > { %10672 = vst [vmem:[#allocation131_spill] sm:$0xff] %v8901_v62  ;;  %v8917_v62 = vpop.eup %5939 }
 0x47a   : > { %10675 = vst [vmem:[#allocation134_spill] sm:$0xff] %v8915_v59 }
 0x47b   : > { %v8889_v8 = vpop.xlane.xlu2 %3421  ;;  %10676 = vst [vmem:[#allocation135_spill] sm:$0xff] %v8917_v62 }
 0x47e   : > { %v8911_v33 = vpop.xlane.xlu0 %3565 }
 0x47f   : > { %3609 = vmax.xlane.f32.xlu1 %v8891_v23  ;;  %10674 = vst [vmem:[#allocation133_spill] sm:$0xff] %v8911_v33  ;;  %v8913_v63 = vpop.xlane.xlu1 %3537 }
 0x480   : > { %3527 = vmax.xlane.f32.xlu2 %v8573_v35  ;;  %v3656_v35 = vsub.f32 %v8380_v3, %v8594_v4 }
 0x482   : > { %v3787_v42 = vmul.f32 1.442695, %v3656_v35  ;;  %v3817_v35 = vmul.f32 1.442695, %v3671_v46 }
 0x483   : > { %v8899_v50 = vpop.xlane.xlu2 %3451 }
 0x484   : > { %5941 = vpow2.f32 %v3787_v42 }
 0x486   : > { %v8924_v29 = vpop.xlane.xlu0 %4111 }
 0x487   : > { %3639 = vmax.xlane.f32.xlu1 %v8903_v0  ;;  %10677 = vst [vmem:[#allocation136_spill] sm:$0xff] %v8924_v29  ;;  %v8954_v29 = vpop.f32.mrf.mxu0 }
 0x488   : > { %3557 = vmax.xlane.f32.xlu2 %v8585_v36  ;;  %v8926_v36 = vpop.f32.mrf.mxu3 }
 0x48a   : > { %v8928_v0 = vpop.eup %5941 }
 0x48b   : > { %v8909_v23 = vpop.xlane.xlu2 %3483  ;;  %10678 = vst [vmem:[#allocation137_spill] sm:$0xff] %v8928_v0 }
 0x48f   : > { %3549 = vmax.xlane.f32.xlu1 %v8915_v59  ;;  %v8931_v59 = vpop.xlane.xlu1 %3567 }
 0x490   : > { %4103 = vadd.xlane.f32.xlu2 %v8917_v62  ;;  %10679 = vst [vmem:[#allocation138_spill] sm:$0xff] %v8931_v59  ;;  %v8969_v59 = vpop.f32.mrf.mxu0 }
 0x493   : > { %v3424_v3 = vpop.xlane.xlu2 %3423 }
 0x494   : > { %v3666_v4 = vsub.f32 %v8509_v34, %v3424_v3  ;;  %v8940_v3 = vpop.xlane.xlu0 %4051 }
 0x495   : > { %10681 = vst [vmem:[#allocation140_spill] sm:$0xff] %v8940_v3 }
 0x496   : > { %v3807_v33 = vmul.f32 1.442695, %v3666_v4 }
 0x497   : > { %3579 = vmax.xlane.f32.xlu1 %v8926_v36  ;;  %v8942_v4 = vpop.xlane.xlu1 %4113 }
 0x498   : > { %5943 = vpow2.f32 %v3807_v33  ;;  %4043 = vadd.xlane.f32.xlu2 %v8928_v0  ;;  %10682 = vst [vmem:[#allocation141_spill] sm:$0xff] %v8942_v4  ;;  %v8975_v0 = vpop.f32.mrf.mxu2 }
 0x499   : > { %5945 = vpow2.f32 %v3817_v35 }
 0x49b   : > { %v3454_v19 = vpop.xlane.xlu2 %3453 }
 0x49c   : > { %v3681_v14 = vsub.f32 %v8523_v15, %v3454_v19 }
 0x49e   : > { %v8935_v34 = vpop.eup %5943  ;;  %v3837_v42 = vmul.f32 1.442695, %v3681_v14  ;;  %v8952_v14 = vpop.xlane.xlu0 %4081 }
 0x49f   : > { %v8937_v46 = vpop.eup %5945  ;;  %4063 = vadd.xlane.f32.xlu0 %v8935_v34  ;;  %v8949_v19 = vpop.xlane.xlu1 %4053  ;;  %10684 = vst [vmem:[#allocation143_spill] sm:$0xff] %v8952_v14 }
 0x4a0   : > { %10680 = vst [vmem:[#allocation139_spill] sm:$0xff] %v8937_v46  ;;  %5947 = vpow2.f32 %v3837_v42  ;;  %4073 = vadd.xlane.f32.xlu2 %v8937_v46 }
 0x4a3   : > { %v3486_v33 = vpop.xlane.xlu2 %3485 }
 0x4a4   : > { %v3697_v35 = vsub.f32 %v8514_v7, %v3486_v33  ;;  %v8964_v33 = vpop.f32.mrf.mxu1 }
 0x4a6   : > { %v8946_v62 = vpop.eup %5947  ;;  %v3869_v15 = vmul.f32 1.442695, %v3697_v35 }
 0x4a7   : > { %10683 = vst [vmem:[#allocation142_spill] sm:$0xff] %v8946_v62  ;;  %4093 = vadd.xlane.f32.xlu0 %v8946_v62  ;;  %v8962_v7 = vpop.xlane.xlu1 %4083 }
 0x4a8   : > { %5949 = vpow2.f32 %v3869_v15  ;;  %3593 = vmax.xlane.f32.xlu2 %v8624_v24  ;;  %10686 = vst [vmem:[#allocation145_spill] sm:$0xff] %v8962_v7  ;;  %v8966_v15 = vpop.xlane.xlu0 %3601 }
 0x4a9   : > { %10687 = vst [vmem:[#allocation146_spill] sm:$0xff] %v8966_v15 }
 0x4ab   : > { %v8956_v42 = vpop.xlane.xlu2 %3515 }
 0x4ae   : > { %v8958_v4 = vpop.eup %5949 }
 0x4af   : > { %10685 = vst [vmem:[#allocation144_spill] sm:$0xff] %v8958_v4  ;;  %4125 = vadd.xlane.f32.xlu0 %v8958_v4  ;;  %v8977_v7 = vpop.xlane.xlu1 %3603  ;;  %v8980_v4 = vpop.f32.mrf.mxu1 }
 0x4b0   : > { %3623 = vmax.xlane.f32.xlu2 %v8636_v58  ;;  %v3689_v58 = vsub.f32 %v8438_v44, %v8666_v51  ;;  %10688 = vst [vmem:[#allocation147_spill] sm:$0xff] %v8977_v7  ;;  %v3698_v44 = vsub.f32 %v8525_v20, %v8697_v54  ;;  %v3674_v54 = vsub.f32 %v8399_v1, %v8685_v6 }
 0x4b2   : > { %v3871_v51 = vmul.f32 1.442695, %v3698_v44  ;;  %v3823_v44 = vmul.f32 1.442695, %v3674_v54 }
 0x4b3   : > { %v3426_v35 = vpop.xlane.xlu2 %3425 }
 0x4b4   : > { %v3667_v24 = vsub.f32 %v8521_v28, %v3426_v35  ;;  %v3853_v28 = vmul.f32 1.442695, %v3689_v58 }
 0x4b6   : > { %v3809_v46 = vmul.f32 1.442695, %v3667_v24  ;;  %v8984_v24 = vpop.xlane.xlu0 %3631 }
 0x4b7   : > { %3613 = vmax.xlane.f32.xlu0 %v8969_v59  ;;  %10689 = vst [vmem:[#allocation148_spill] sm:$0xff] %v8984_v24  ;;  %v9001_v7 = vpop.xlane.xlu1 %3633 }
 0x4b8   : > { %5951 = vpow2.f32 %v3809_v46  ;;  %3533 = vmax.xlane.f32.xlu2 %v8645_v56  ;;  %v8999_v56 = vpop.f32.mrf.mxu2  ;;  %10691 = vst [vmem:[#allocation150_spill] sm:$0xff] %v9001_v7 }
 0x4bb   : > { %v3456_v14 = vpop.xlane.xlu2 %3455 }
 0x4bc   : > { %v3682_v15 = vsub.f32 %v8536_v18, %v3456_v14  ;;  %v3659_v18 = vsub.f32 %v8401_v55, %v8677_v25  ;;  %v8995_v14 = vpop.f32.mrf.mxu3  ;;  %v3714_v55 = vsub.f32 %v8540_v37, %v8710_v57  ;;  %v9031_v57 = vpop.f32.mrf.mxu0 }
 0x4be   : > { %v8982_v35 = vpop.eup %5951  ;;  %v3839_v46 = vmul.f32 1.442695, %v3682_v15  ;;  %v3793_v15 = vmul.f32 1.442695, %v3659_v18  ;;  %v9009_v25 = vpop.xlane.xlu0 %3541 }
 0x4bf   : > { %3643 = vmax.xlane.f32.xlu0 %v8980_v4  ;;  %4065 = vadd.xlane.f32.xlu1 %v8982_v35  ;;  %v9024_v37 = vpop.xlane.xlu1 %3543 }
 0x4c0   : > { %5953 = vpow2.f32 %v3839_v46  ;;  %3563 = vmax.xlane.f32.xlu2 %v8654_v39  ;;  %v3903_v46 = vmul.f32 1.442695, %v3714_v55  ;;  %v9049_v3 = vpop.f32.mrf.mxu2 }
 0x4c1   : > { %5955 = vpow2.f32 %v3853_v28 }
 0x4c2   : > { %5957 = vpow2.f32 %v3871_v51 }
 0x4c3   : > { %v8993_v58 = vpop.xlane.xlu2 %3427  ;;  %5959 = vpow2.f32 %v3793_v15 }
 0x4c4   : > { %v9018_v39 = vpop.f32.mrf.mxu3  ;;  %5961 = vpow2.f32 %v3903_v46 }
 0x4c5   : > { %5963 = vpow2.f32 %v3823_v44 }
 0x4c6   : > { %v8997_v24 = vpop.eup %5953  ;;  %v9027_v1 = vpop.xlane.xlu0 %3571 }
 0x4c7   : > { %10690 = vst [vmem:[#allocation149_spill] sm:$0xff] %v8997_v24  ;;  %v9003_v20 = vpop.eup %5955  ;;  %4095 = vadd.xlane.f32.xlu1 %v8997_v24  ;;  %3553 = vmax.xlane.f32.xlu0 %v8999_v56  ;;  %v9040_v54 = vpop.xlane.xlu1 %3573 }
 0x4c8   : > { %10692 = vst [vmem:[#allocation151_spill] sm:$0xff] %v9003_v20  ;;  %4109 = vadd.xlane.f32.xlu2 %v9003_v20  ;;  %v9016_v18 = vpop.eup %5957  ;;  %v9044_v20 = vpop.f32.mrf.mxu1 }
 0x4c9   : > { %10693 = vst [vmem:[#allocation152_spill] sm:$0xff] %v9016_v18  ;;  %v9020_v51 = vpop.eup %5959 }
 0x4ca   : > { %10694 = vst [vmem:[#allocation153_spill] sm:$0xff] %v9020_v51  ;;  %v9033_v15 = vpop.eup %5961 }
 0x4cb   : > { %v9014_v28 = vpop.xlane.xlu2 %3457  ;;  %10695 = vst [vmem:[#allocation154_spill] sm:$0xff] %v9027_v1  ;;  %v9035_v55 = vpop.eup %5963 }
 0x4cc   : > { %10696 = vst [vmem:[#allocation155_spill] sm:$0xff] %v9035_v55 }
 0x4cd   : > { %10698 = vst [vmem:[#allocation157_spill] sm:$0xff] %v9044_v20 }
 0x4ce   : > { %v4058_v46 = vpop.xlane.xlu0 %4057 }
 0x4cf   : > { %4127 = vadd.xlane.f32.xlu1 %v9016_v18  ;;  %3583 = vmax.xlane.f32.xlu0 %v9018_v39  ;;  %5965 = vrcp.f32 %v4058_v46 }
 0x4d0   : > { %4049 = vadd.xlane.f32.xlu2 %v9020_v51 }
 0x4d3   : > { %v9029_v6 = vpop.xlane.xlu2 %3489 }
 0x4d5   : > { %v5966_v1 = vpop.eup %5965 }
 0x4d6   : > { %v4431_v62 = vmul.f32 %v5966_v1, %v8819_v11  ;;  %v9060_v11 = vpop.f32.mrf.mxu3 }
 0x4d7   : > { %3615 = vmax.xlane.f32.xlu1 %v9031_v57  ;;  %4159 = vadd.xlane.f32.xlu0 %v9033_v15 }
 0x4d8   : > { %4079 = vadd.xlane.f32.xlu2 %v9035_v55 }
 0x4db   : > { %v9042_v44 = vpop.xlane.xlu2 %4037 }
 0x4dc   : > { %10697 = vst [vmem:[#allocation156_spill] sm:$0xff] %v9042_v44  ;;  %v3700_v44 = vsub.f32 %v8561_v47, %v8740_v26 }
 0x4de   : > { %v3875_v24 = vmul.f32 1.442695, %v3700_v44 }
 0x4df   : > { %3645 = vmax.xlane.f32.xlu1 %v9044_v20 }
 0x4e0   : > { %3599 = vmax.xlane.f32.xlu2 %v8719_v61 }
 0x4e2   : > { %v4060_v7 = vpop.xlane.xlu1 %4059 }
 0x4e3   : > { %5967 = vrcp.f32 %v4060_v7  ;;  %v3460_v51 = vpop.xlane.xlu2 %3459  ;;  %v4559_v7 = vpack.c.bf16 %v4431_v62, %v4431_v62  ;;  %v3711_v62 = vsub.f32 %v8505_v45, %v8689_v22 }
 0x4e4   : > { %v3684_v18 = vsub.f32 %v8569_v12, %v3460_v51 }
 0x4e5   : > { %v9062_v47 = vunpack.c.l.b16 %v4559_v7 }
 0x4e6   : > { %v3843_v55 = vmul.f32 1.442695, %v3684_v18 }
 0x4e7   : > { %3555 = vmax.xlane.f32.xlu1 %v9049_v3  ;;  %10699 = vst [vmem:[#allocation158_spill] sm:$0xff] %v9062_v47 }
 0x4e8   : > { %5969 = vpow2.f32 %v3843_v55  ;;  %3629 = vmax.xlane.f32.xlu2 %v8730_v32  ;;  %v3897_v55 = vmul.f32 1.442695, %v3711_v62  ;;  %v3709_v62 = vsub.f32 %v8486_v10, %v8841_v21  ;;  %v10711_v10 = vld [vmem:[#allocation28_spill] sm:$0xff] }
 0x4e9   : > { %v5968_v46 = vpop.eup %5967  ;;  %5971 = vpow2.f32 %v3875_v24 }
 0x4ea   : > { %v4432_v61 = vmul.f32 %v5968_v46, %v8865_v17  ;;  %v3662_v17 = vsub.f32 %v8458_v16, %v8781_v13  ;;  %v3677_v16 = vsub.f32 %v8471_v60, %v8791_v52  ;;  %v3696_v60 = vsub.f32 %v8503_v40, %v8909_v23  ;;  %v10712_v40 = vld [vmem:[#allocation29_spill] sm:$0xff] }
 0x4eb   : > { %v3522_v20 = vpop.xlane.xlu2 %3521  ;;  %v3893_v52 = vmul.f32 1.442695, %v3709_v62  ;;  %v3694_v23 = vsub.f32 %v10712_v40, %v8827_v31  ;;  %v10718_v31 = vld [vmem:[#allocation26_spill] sm:$0xff] }
 0x4ec   : > { %v3715_v12 = vsub.f32 %v8552_v5, %v3522_v20  ;;  %v4560_v51 = vpack.c.bf16 %v4432_v61, %v4432_v61  ;;  %v9071_v5 = vpop.f32.mrf.mxu1  ;;  %v9077_v20 = vpop.f32.mrf.mxu0  ;;  %v3799_v46 = vmul.f32 1.442695, %v3662_v17  ;;  %v10710_v61 = vld [vmem:[#allocation74_spill] sm:$0xff] }
 0x4ed   : > { %10701 = vst [vmem:[#allocation160_spill] sm:$0xff] %v9071_v5  ;;  %v3708_v21 = vsub.f32 %v10711_v10, %v10710_v61  ;;  %v10716_v61 = vld [vmem:[#allocation72_spill] sm:$0xff] }
 0x4ee   : > { %v9058_v18 = vpop.eup %5969  ;;  %v3905_v1 = vmul.f32 1.442695, %v3715_v12  ;;  %v9064_v26 = vunpack.c.l.b16 %v4560_v51  ;;  %v3829_v12 = vmul.f32 1.442695, %v3677_v16 }
 0x4ef   : > { %4099 = vadd.xlane.f32.xlu0 %v9058_v18  ;;  %3585 = vmax.xlane.f32.xlu1 %v9060_v11  ;;  %v9081_v44 = vpop.eup %5971 }
 0x4f0   : > { %10700 = vst [vmem:[#allocation159_spill] sm:$0xff] %v9064_v26  ;;  %5973 = vpow2.f32 %v3905_v1  ;;  %3539 = vmax.xlane.f32.xlu2 %v8745_v30 }
 0x4f1   : > { %5975 = vpow2.f32 %v3897_v55  ;;  %v3867_v55 = vmul.f32 1.442695, %v3696_v60  ;;  %v3863_v60 = vmul.f32 1.442695, %v3694_v23 }
 0x4f2   : > { %5977 = vpow2.f32 %v3799_v46 }
 0x4f3   : > { %v9079_v24 = vpop.xlane.xlu2 %3527  ;;  %5979 = vpow2.f32 %v3829_v12  ;;  %v3891_v12 = vmul.f32 1.442695, %v3708_v21 }
 0x4f4   : > { %10702 = vst [vmem:[#allocation161_spill] sm:$0xff] %v9079_v24  ;;  %v9090_v22 = vpop.f32.mrf.mxu1  ;;  %v9094_v7 = vpop.f32.mrf.mxu0  ;;  %5981 = vpow2.f32 %v3893_v52  ;;  %v10717_v52 = vld [vmem:[#allocation23_spill] sm:$0xff] }
 0x4f5   : > { %10704 = vst [vmem:[#allocation163_spill] sm:$0xff] %v9090_v22  ;;  %5983 = vpow2.f32 %v3867_v55  ;;  %v3705_v10 = vsub.f32 %v10717_v52, %v10716_v61  ;;  %v3707_v55 = vsub.f32 %v10718_v31, %v8712_v49  ;;  %v3725_v49 = vsub.f32 %v8759_v27, %v9009_v25  ;;  %v10727_v27 = vld [vmem:[#allocation31_spill] sm:$0xff] }
 0x4f6   : > { %v9083_v45 = vpop.eup %5973  ;;  %10706 = vst [vmem:[#allocation165_spill] sm:$0xff] %v9094_v7  ;;  %5985 = vpow2.f32 %v3891_v12  ;;  %v10722_v12 = vld [vmem:[#allocation76_spill] sm:$0xff]  ;;  %v3695_v25 = vsub.f32 %v10727_v27, %v8876_v43 }
 0x4f7   : > { %10703 = vst [vmem:[#allocation162_spill] sm:$0xff] %v9083_v45  ;;  %4131 = vadd.xlane.f32.xlu0 %v9081_v44  ;;  %4161 = vadd.xlane.f32.xlu1 %v9083_v45  ;;  %v9096_v51 = vpop.eup %5975  ;;  %5987 = vpow2.f32 %v3863_v60  ;;  %v3885_v21 = vmul.f32 1.442695, %v3705_v10  ;;  %v3889_v23 = vmul.f32 1.442695, %v3707_v55  ;;  %v3723_v61 = vsub.f32 %v10722_v12, %v8913_v63  ;;  %v10726_v63 = vld [vmem:[#allocation106_spill] sm:$0xff] }
 0x4f8   : > { %3569 = vmax.xlane.f32.xlu2 %v8756_v2  ;;  %10707 = vst [vmem:[#allocation166_spill] sm:$0xff] %v9096_v51  ;;  %v9098_v1 = vpop.eup %5977  ;;  %v3925_v10 = vmul.f32 1.442695, %v3725_v49  ;;  %v3865_v49 = vmul.f32 1.442695, %v3695_v25  ;;  %v10735_v25 = vld [vmem:[#allocation33_spill] sm:$0xff] }
 0x4f9   : > { %v9111_v16 = vpop.eup %5979  ;;  %5989 = vpow2.f32 %v3885_v21  ;;  %v3921_v60 = vmul.f32 1.442695, %v3723_v61  ;;  %v3726_v21 = vsub.f32 %v10726_v63, %v9024_v37  ;;  %v10731_v37 = vld [vmem:[#allocation30_spill] sm:$0xff] }
 0x4fa   : > { %5991 = vpow2.f32 %v3889_v23 }
 0x4fb   : > { %v9092_v13 = vpop.xlane.xlu2 %3557  ;;  %5993 = vpow2.f32 %v3921_v60  ;;  %v3927_v12 = vmul.f32 1.442695, %v3726_v21 }
 0x4fc   : > { %10705 = vst [vmem:[#allocation164_spill] sm:$0xff] %v9092_v13  ;;  %v9109_v46 = vpop.f32.mrf.mxu1  ;;  %v9122_v13 = vpop.eup %5981  ;;  %5995 = vpow2.f32 %v3925_v10  ;;  %v3665_v10 = vsub.f32 %v10731_v37, %v8889_v8 }
 0x4fd   : > { %10709 = vst [vmem:[#allocation168_spill] sm:$0xff] %v9109_v46  ;;  %v9124_v24 = vpop.eup %5983  ;;  %5997 = vpow2.f32 %v3927_v12  ;;  %v3680_v12 = vsub.f32 %v10735_v25, %v8899_v50  ;;  %v9195_v25 = vpop.xlane.xlu1 %4089 }
 0x4fe   : > { %10714 = vst [vmem:[#allocation28_spill] sm:$0xff] %v9122_v13  ;;  %5999 = vpow2.f32 %v3865_v49  ;;  %v3805_v63 = vmul.f32 1.442695, %v3665_v10 }
 0x4ff   : > { %3619 = vmax.xlane.f32.xlu0 %v9094_v7  ;;  %4153 = vadd.xlane.f32.xlu1 %v9096_v51  ;;  %10715 = vst [vmem:[#allocation29_spill] sm:$0xff] %v9124_v24  ;;  %v3835_v49 = vmul.f32 1.442695, %v3680_v12 }
 0x500   : > { %4055 = vadd.xlane.f32.xlu2 %v9098_v1  ;;  %6001 = vpow2.f32 %v3805_v63  ;;  %v4088_v63 = vpop.xlane.xlu0 %4087 }
 0x501   : > { %6003 = vpow2.f32 %v3835_v49 }
 0x503   : > { %v9107_v17 = vpop.xlane.xlu2 %4103 }
 0x504   : > { %10708 = vst [vmem:[#allocation167_spill] sm:$0xff] %v9107_v17  ;;  %v9135_v17 = vpop.eup %5985 }
 0x505   : > { %10720 = vst [vmem:[#allocation23_spill] sm:$0xff] %v9135_v17  ;;  %v9137_v32 = vpop.eup %5987 }
 0x506   : > { %10721 = vst [vmem:[#allocation26_spill] sm:$0xff] %v9137_v32  ;;  %v9148_v31 = vpop.eup %5989 }
 0x507   : > { %3649 = vmax.xlane.f32.xlu0 %v9090_v22  ;;  %3651 = vmax.xlane.f32.xlu1 %v9109_v46  ;;  %10724 = vst [vmem:[#allocation169_spill] sm:$0xff] %v9148_v31  ;;  %v9150_v55 = vpop.eup %5991  ;;  %v10746_v46 = vld [vmem:[#allocation93_spill] sm:$0xff] }
 0x508   : > { %4085 = vadd.xlane.f32.xlu2 %v9111_v16  ;;  %10725 = vst [vmem:[#allocation170_spill] sm:$0xff] %v9150_v55  ;;  %v9161_v61 = vpop.eup %5993  ;;  %v9198_v12 = vpop.xlane.xlu0 %3607 }
 0x509   : > { %10729 = vst [vmem:[#allocation31_spill] sm:$0xff] %v9161_v61  ;;  %v9163_v60 = vpop.eup %5995 }
 0x50a   : > { %10730 = vst [vmem:[#allocation171_spill] sm:$0xff] %v9163_v60  ;;  %v9172_v21 = vpop.eup %5997 }
 0x50b   : > { %v9120_v62 = vpop.xlane.xlu2 %4043  ;;  %10733 = vst [vmem:[#allocation172_spill] sm:$0xff] %v9172_v21  ;;  %v9174_v27 = vpop.eup %5999 }
 0x50c   : > { %10713 = vst [vmem:[#allocation74_spill] sm:$0xff] %v9120_v62 }
 0x50d   : > { %10734 = vst [vmem:[#allocation173_spill] sm:$0xff] %v9174_v27 }
 0x50f   : > { %4123 = vadd.xlane.f32.xlu0 %v9124_v24  ;;  %4149 = vadd.xlane.f32.xlu1 %v9122_v13 }
 0x510   : > { %3605 = vmax.xlane.f32.xlu2 %v8825_v53 }
 0x513   : > { %v9133_v40 = vpop.xlane.xlu2 %4073 }
 0x514   : > { %10719 = vst [vmem:[#allocation72_spill] sm:$0xff] %v9133_v40 }
 0x517   : > { %4119 = vadd.xlane.f32.xlu0 %v9137_v32  ;;  %4147 = vadd.xlane.f32.xlu1 %v9135_v17 }
 0x518   : > { %3635 = vmax.xlane.f32.xlu2 %v8837_v48 }
 0x51b   : > { %v9146_v52 = vpop.xlane.xlu2 %3593 }
 0x51c   : > { %10723 = vst [vmem:[#allocation76_spill] sm:$0xff] %v9146_v52  ;;  %v10741_v52 = vld [vmem:[#allocation35_spill] sm:$0xff] }
 0x51f   : > { %4145 = vadd.xlane.f32.xlu0 %v9150_v55  ;;  %4141 = vadd.xlane.f32.xlu1 %v9148_v31 }
 0x520   : > { %3545 = vmax.xlane.f32.xlu2 %v8849_v9 }
 0x523   : > { %v9159_v23 = vpop.xlane.xlu2 %3623 }
 0x524   : > { %10728 = vst [vmem:[#allocation106_spill] sm:$0xff] %v9159_v23  ;;  %v10740_v23 = vld [vmem:[#allocation88_spill] sm:$0xff] }
 0x525   : > { %v3713_v31 = vsub.f32 %v10741_v52, %v10740_v23  ;;  %v10744_v52 = vld [vmem:[#allocation41_spill] sm:$0xff] }
 0x527   : > { %4181 = vadd.xlane.f32.xlu0 %v9163_v60  ;;  %4177 = vadd.xlane.f32.xlu1 %v9161_v61  ;;  %v9182_v60 = vpop.eup %6001  ;;  %v3901_v55 = vmul.f32 1.442695, %v3713_v31  ;;  %v3683_v31 = vsub.f32 %v10744_v52, %v9014_v28 }
 0x528   : > { %3575 = vmax.xlane.f32.xlu2 %v8862_v38  ;;  %v9187_v37 = vpop.eup %6003 }
 0x529   : > { %6005 = vpow2.f32 %v3901_v55 }
 0x52b   : > { %v9170_v43 = vpop.xlane.xlu2 %3533 }
 0x52c   : > { %10732 = vst [vmem:[#allocation30_spill] sm:$0xff] %v9170_v43 }
 0x52f   : > { %4183 = vadd.xlane.f32.xlu1 %v9172_v21  ;;  %v9202_v21 = vpop.xlane.xlu1 %3609  ;;  %v9220_v43 = vpop.eup %6005 }
 0x530   : > { %4121 = vadd.xlane.f32.xlu2 %v9174_v27 }
 0x533   : > { %v9180_v61 = vpop.xlane.xlu2 %3563 }
 0x534   : > { %10736 = vst [vmem:[#allocation33_spill] sm:$0xff] %v9180_v61  ;;  %v9207_v61 = vpop.xlane.xlu0 %3637 }
 0x537   : > { %v9214_v32 = vpop.xlane.xlu1 %3639 }
 0x538   : > { %4061 = vadd.xlane.f32.xlu2 %v9182_v60 }
 0x53b   : > { %v9185_v8 = vpop.xlane.xlu2 %4109 }
 0x53c   : > { %10737 = vst [vmem:[#allocation174_spill] sm:$0xff] %v9185_v8  ;;  %v10743_v8 = vld [vmem:[#allocation36_spill] sm:$0xff]  ;;  %v9218_v51 = vpop.xlane.xlu0 %3547 }
 0x53d   : > { %v3668_v13 = vsub.f32 %v10743_v8, %v8993_v58  ;;  %v3841_v58 = vmul.f32 1.442695, %v3683_v31 }
 0x53f   : > { %v3811_v48 = vmul.f32 1.442695, %v3668_v13  ;;  %v9227_v55 = vpop.xlane.xlu1 %3549 }
 0x540   : > { %4091 = vadd.xlane.f32.xlu2 %v9187_v37 }
 0x541   : > { %6007 = vpow2.f32 %v3811_v48 }
 0x542   : > { %6009 = vrcp.f32 %v8949_v19 }
 0x543   : > { %v9190_v10 = vpop.xlane.xlu2 %4049  ;;  %6011 = vpow2.f32 %v3841_v58 }
 0x544   : > { %v9232_v13 = vpop.xlane.xlu0 %3577 }
 0x547   : > { %v9230_v8 = vpop.eup %6007  ;;  %v9237_v52 = vpop.xlane.xlu1 %3579 }
 0x548   : > { %3611 = vmax.xlane.f32.xlu2 %v8954_v29  ;;  %v6010_v40 = vpop.eup %6009 }
 0x549   : > { %v9239_v31 = vpop.eup %6011  ;;  %v4429_v7 = vmul.f32 %v6010_v40, %v10746_v46  ;;  %v10749_v46 = vld [vmem:[#allocation114_spill] sm:$0xff] }
 0x54b   : > { %v9193_v50 = vpop.xlane.xlu2 %4079 }
 0x54c   : > { %10738 = vst [vmem:[#allocation175_spill] sm:$0xff] %v9193_v50  ;;  %v9241_v19 = vpop.xlane.xlu0 %4063 }
 0x550   : > { %3641 = vmax.xlane.f32.xlu2 %v8964_v33 }
 0x553   : > { %v9200_v49 = vpop.xlane.xlu2 %3599 }
 0x554   : > { %10739 = vst [vmem:[#allocation176_spill] sm:$0xff] %v9200_v49 }
 0x558   : > { %3551 = vmax.xlane.f32.xlu2 %v8975_v0 }
 0x55b   : > { %v9209_v17 = vpop.xlane.xlu2 %3629 }
 0x55c   : > { %10742 = vst [vmem:[#allocation88_spill] sm:$0xff] %v9209_v17  ;;  %v10745_v17 = vld [vmem:[#allocation38_spill] sm:$0xff] }
 0x55d   : > { %v3699_v48 = vsub.f32 %v10745_v17, %v9029_v6  ;;  %v4557_v17 = vpack.c.bf16 %v4429_v7, %v4429_v7 }
 0x55f   : > { %v3873_v28 = vmul.f32 1.442695, %v3699_v48  ;;  %v9250_v22 = vunpack.c.l.b16 %v4557_v17 }
 0x560   : > { %3581 = vmax.xlane.f32.xlu2 %v8995_v14 }
 0x561   : > { %10747 = vst [vmem:[#allocation35_spill] sm:$0xff] %v9250_v22 }
 0x563   : > { %v9216_v49 = vpop.xlane.xlu2 %3539 }
 0x568   : > { %4157 = vadd.xlane.f32.xlu2 %v9220_v43 }
 0x56b   : > { %v9225_v23 = vpop.xlane.xlu2 %3569 }
 0x570   : > { %4067 = vadd.xlane.f32.xlu2 %v9230_v8 }
 0x573   : > { %v4056_v45 = vpop.xlane.xlu2 %4055 }
 0x574   : > { %6013 = vrcp.f32 %v4056_v45 }
 0x575   : > { %6015 = vrcp.f32 %v4088_v63  ;;  %v9246_v63 = vpop.xlane.xlu1 %4065 }
 0x576   : > { %6017 = vpow2.f32 %v3873_v28  ;;  %v9256_v28 = vpop.xlane.xlu0 %4093 }
 0x578   : > { %4097 = vadd.xlane.f32.xlu2 %v9239_v31 }
 0x57a   : > { %v6014_v58 = vpop.eup %6013 }
 0x57b   : > { %v4086_v50 = vpop.xlane.xlu2 %4085  ;;  %v4430_v6 = vmul.f32 %v6014_v58, %v9098_v1  ;;  %v6016_v62 = vpop.eup %6015 }
 0x57c   : > { %6019 = vrcp.f32 %v4086_v50  ;;  %v9248_v48 = vpop.eup %6017  ;;  %v4446_v40 = vmul.f32 %v6016_v62, %v10749_v46 }
 0x57d   : > { %v4558_v45 = vpack.c.bf16 %v4430_v6, %v4430_v6  ;;  %v9266_v62 = vpop.xlane.xlu1 %4095 }
 0x57e   : > { %v4574_v6 = vpack.c.bf16 %v4446_v40, %v4446_v40  ;;  %v9271_v7 = vpop.xlane.xlu0 %4125 }
 0x57f   : > { %v9252_v24 = vunpack.c.l.b16 %v4558_v45 }
 0x580   : > { %4129 = vadd.xlane.f32.xlu2 %v9248_v48  ;;  %v9264_v26 = vunpack.c.l.b16 %v4574_v6 }
 0x581   : > { %10748 = vst [vmem:[#allocation36_spill] sm:$0xff] %v9252_v24 }
 0x582   : > { %v6020_v1 = vpop.eup %6019  ;;  %10751 = vst [vmem:[#allocation38_spill] sm:$0xff] %v9264_v26 }
 0x583   : > { %v3606_v50 = vpop.xlane.xlu2 %3605  ;;  %v4445_v58 = vmul.f32 %v6020_v1, %v9111_v16 }
 0x584   : > { %v3757_v27 = vsub.f32 %v8825_v53, %v3606_v50  ;;  %v10754_v53 = vld [vmem:[#allocation99_spill] sm:$0xff] }
 0x585   : > { %v4573_v17 = vpack.c.bf16 %v4445_v58, %v4445_v58  ;;  %v9281_v50 = vpop.xlane.xlu1 %4127 }
 0x586   : > { %v3989_v47 = vmul.f32 1.442695, %v3757_v27  ;;  %v10755_v27 = vld [vmem:[#allocation42_spill] sm:$0xff] }
 0x587   : > { %v9262_v45 = vunpack.c.l.b16 %v4573_v17  ;;  %v3716_v1 = vsub.f32 %v10755_v27, %v10754_v53  ;;  %v9284_v17 = vpop.xlane.xlu0 %3613  ;;  %v10757_v53 = vld [vmem:[#allocation34_spill] sm:$0xff] }
 0x588   : > { %6021 = vpow2.f32 %v3989_v47  ;;  %3617 = vmax.xlane.f32.xlu2 %v9077_v20  ;;  %v3712_v27 = vsub.f32 %v10757_v53, %v8956_v42  ;;  %v10759_v42 = vld [vmem:[#allocation134_spill] sm:$0xff] }
 0x589   : > { %10750 = vst [vmem:[#allocation41_spill] sm:$0xff] %v9262_v45  ;;  %v3907_v6 = vmul.f32 1.442695, %v3716_v1  ;;  %v9286_v45 = vpop.f32.mrf.mxu3 }
 0x58a   : > { %v3899_v1 = vmul.f32 1.442695, %v3712_v27 }
 0x58b   : > { %v9273_v16 = vpop.xlane.xlu2 %3635 }
 0x58c   : > { %10752 = vst [vmem:[#allocation93_spill] sm:$0xff] %v9273_v16  ;;  %v10756_v16 = vld [vmem:[#allocation117_spill] sm:$0xff] }
 0x58d   : > { %v3758_v26 = vsub.f32 %v10756_v16, %v9198_v12  ;;  %v9293_v24 = vpop.xlane.xlu1 %3615  ;;  %v3743_v12 = vsub.f32 %v8880_v41, %v9232_v13 }
 0x58e   : > { %v9275_v40 = vpop.eup %6021 }
 0x58f   : > { %10753 = vst [vmem:[#allocation114_spill] sm:$0xff] %v9275_v40  ;;  %4245 = vadd.xlane.f32.xlu0 %v9275_v40  ;;  %v3991_v40 = vmul.f32 1.442695, %v3758_v26  ;;  %v3729_v26 = vsub.f32 %v10759_v42, %v9227_v55 }
 0x590   : > { %3647 = vmax.xlane.f32.xlu2 %v9071_v5 }
 0x593   : > { %v3546_v47 = vpop.xlane.xlu2 %3545 }
 0x594   : > { %v3727_v58 = vsub.f32 %v8849_v9, %v3546_v47 }
 0x596   : > { %v3929_v46 = vmul.f32 1.442695, %v3727_v58 }
 0x598   : > { %6023 = vpow2.f32 %v3929_v46  ;;  %3587 = vmax.xlane.f32.xlu2 %v9286_v45  ;;  %v9302_v46 = vpop.xlane.xlu0 %3643 }
 0x599   : > { %6025 = vpow2.f32 %v3907_v6  ;;  %v3961_v6 = vmul.f32 1.442695, %v3743_v12  ;;  %v10766_v12 = vld [vmem:[#allocation82_spill] sm:$0xff] }
 0x59a   : > { %6027 = vpow2.f32 %v3991_v40  ;;  %v3933_v40 = vmul.f32 1.442695, %v3729_v26 }
 0x59b   : > { %v3576_v22 = vpop.xlane.xlu2 %3575 }
 0x59c   : > { %v3742_v9 = vsub.f32 %v8862_v38, %v3576_v22  ;;  %v10760_v38 = vld [vmem:[#allocation105_spill] sm:$0xff]  ;;  %v10761_v22 = vld [vmem:[#allocation27_spill] sm:$0xff] }
 0x59d   : > { %v3693_v16 = vsub.f32 %v10761_v22, %v10760_v38 }
 0x59e   : > { %v9296_v47 = vpop.eup %6023  ;;  %v3959_v58 = vmul.f32 1.442695, %v3742_v9  ;;  %v9317_v9 = vpop.xlane.xlu1 %3645 }
 0x59f   : > { %10758 = vst [vmem:[#allocation99_spill] sm:$0xff] %v9296_v47  ;;  %v9298_v5 = vpop.eup %6025  ;;  %4185 = vadd.xlane.f32.xlu1 %v9296_v47  ;;  %v3861_v41 = vmul.f32 1.442695, %v3693_v16 }
 0x5a0   : > { %6029 = vpow2.f32 %v3959_v58  ;;  %4163 = vadd.xlane.f32.xlu2 %v9298_v5  ;;  %v9312_v27 = vpop.eup %6027  ;;  %v10765_v58 = vld [vmem:[#allocation132_spill] sm:$0xff]  ;;  %v9330_v38 = vpop.xlane.xlu0 %3553 }
 0x5a1   : > { %6031 = vpow2.f32 %v3899_v1  ;;  %10762 = vst [vmem:[#allocation42_spill] sm:$0xff] %v9312_v27  ;;  %v3774_v42 = vsub.f32 %v10765_v58, %v9214_v32  ;;  %v3744_v1 = vsub.f32 %v8926_v36, %v9237_v52 }
 0x5a2   : > { %6033 = vrcp.f32 %v9241_v19  ;;  %v10767_v19 = vld [vmem:[#allocation32_spill] sm:$0xff] }
 0x5a3   : > { %v9310_v53 = vpop.xlane.xlu2 %4121  ;;  %6035 = vpow2.f32 %v3961_v6  ;;  %v3710_v26 = vsub.f32 %v10767_v19, %v10766_v12  ;;  %v4023_v22 = vmul.f32 1.442695, %v3774_v42  ;;  %v3963_v32 = vmul.f32 1.442695, %v3744_v1  ;;  %v10771_v42 = vld [vmem:[#allocation96_spill] sm:$0xff]  ;;  %v10772_v1 = vld [vmem:[#allocation25_spill] sm:$0xff] }
 0x5a4   : > { %6037 = vpow2.f32 %v3933_v40  ;;  %v3692_v12 = vsub.f32 %v10772_v1, %v10771_v42  ;;  %v10777_v1 = vld [vmem:[#allocation86_spill] sm:$0xff] }
 0x5a5   : > { %6039 = vpow2.f32 %v3861_v41  ;;  %v3895_v47 = vmul.f32 1.442695, %v3710_v26 }
 0x5a6   : > { %v9314_v13 = vpop.eup %6029  ;;  %v9342_v41 = vpop.xlane.xlu1 %3555 }
 0x5a7   : > { %10763 = vst [vmem:[#allocation117_spill] sm:$0xff] %v9314_v13  ;;  %v9319_v55 = vpop.eup %6031  ;;  %4215 = vadd.xlane.f32.xlu0 %v9314_v13  ;;  %4247 = vadd.xlane.f32.xlu1 %v9312_v27 }
 0x5a8   : > { %10764 = vst [vmem:[#allocation34_spill] sm:$0xff] %v9319_v55  ;;  %4155 = vadd.xlane.f32.xlu2 %v9319_v55  ;;  %v6034_v6 = vpop.eup %6033 }
 0x5a9   : > { %v9332_v58 = vpop.eup %6035  ;;  %v4434_v52 = vmul.f32 %v6034_v6, %v8935_v34  ;;  %v3859_v34 = vmul.f32 1.442695, %v3692_v12 }
 0x5aa   : > { %10768 = vst [vmem:[#allocation134_spill] sm:$0xff] %v9332_v58  ;;  %v9334_v40 = vpop.eup %6037 }
 0x5ab   : > { %v4062_v16 = vpop.xlane.xlu2 %4061  ;;  %10769 = vst [vmem:[#allocation105_spill] sm:$0xff] %v9334_v40  ;;  %v9337_v36 = vpop.eup %6039 }
 0x5ac   : > { %6041 = vrcp.f32 %v4062_v16  ;;  %10770 = vst [vmem:[#allocation27_spill] sm:$0xff] %v9337_v36  ;;  %v4562_v16 = vpack.c.bf16 %v4434_v52, %v4434_v52 }
 0x5ad   : > { %6043 = vrcp.f32 %v9195_v25  ;;  %v9347_v25 = vpop.xlane.xlu0 %3583 }
 0x5ae   : > { %6045 = vpow2.f32 %v4023_v22  ;;  %v9360_v42 = vunpack.c.l.b16 %v4562_v16 }
 0x5af   : > { %4217 = vadd.xlane.f32.xlu0 %v9332_v58  ;;  %4189 = vadd.xlane.f32.xlu1 %v9334_v40  ;;  %6047 = vpow2.f32 %v3963_v32 }
 0x5b0   : > { %4117 = vadd.xlane.f32.xlu2 %v9337_v36  ;;  %6049 = vpow2.f32 %v3895_v47  ;;  %v9368_v36 = vpop.xlane.xlu1 %3585 }
 0x5b2   : > { %v6042_v19 = vpop.eup %6041 }
 0x5b3   : > { %v4092_v26 = vpop.xlane.xlu2 %4091  ;;  %v4433_v22 = vmul.f32 %v6042_v19, %v9182_v60  ;;  %v6044_v58 = vpop.eup %6043  ;;  %v10776_v60 = vld [vmem:[#allocation126_spill] sm:$0xff]  ;;  %v10778_v19 = vld [vmem:[#allocation24_spill] sm:$0xff] }
 0x5b4   : > { %6051 = vrcp.f32 %v4092_v26  ;;  %v9350_v40 = vpop.eup %6045  ;;  %v4447_v52 = vmul.f32 %v6044_v58, %v10776_v60  ;;  %v3706_v12 = vsub.f32 %v10778_v19, %v10777_v1  ;;  %v10779_v19 = vld [vmem:[#allocation109_spill] sm:$0xff]  ;;  %v10785_v26 = vld [vmem:[#allocation14_spill] sm:$0xff] }
 0x5b5   : > { %10773 = vst [vmem:[#allocation132_spill] sm:$0xff] %v9350_v40  ;;  %v4561_v6 = vpack.c.bf16 %v4433_v22, %v4433_v22  ;;  %v9352_v32 = vpop.eup %6047  ;;  %6053 = vpow2.f32 %v3859_v34  ;;  %v4160_v58 = vpop.xlane.xlu0 %4159 }
 0x5b6   : > { %10774 = vst [vmem:[#allocation82_spill] sm:$0xff] %v9352_v32  ;;  %v9354_v13 = vpop.eup %6049  ;;  %v3887_v55 = vmul.f32 1.442695, %v3706_v12 }
 0x5b7   : > { %10775 = vst [vmem:[#allocation32_spill] sm:$0xff] %v9354_v13  ;;  %4279 = vadd.xlane.f32.xlu0 %v9350_v40  ;;  %4219 = vadd.xlane.f32.xlu1 %v9352_v32  ;;  %v9358_v47 = vunpack.c.l.b16 %v4561_v6  ;;  %v4575_v32 = vpack.c.bf16 %v4447_v52, %v4447_v52 }
 0x5b8   : > { %4151 = vadd.xlane.f32.xlu2 %v9354_v13  ;;  %v9383_v52 = vpop.xlane.xlu1 %4161 }
 0x5b9   : > { %v9374_v1 = vunpack.c.l.b16 %v4575_v32 }
 0x5ba   : > { %v6052_v22 = vpop.eup %6051 }
 0x5bb   : > { %v3612_v40 = vpop.xlane.xlu2 %3611  ;;  %v4448_v6 = vmul.f32 %v6052_v22, %v9187_v37  ;;  %v9372_v27 = vpop.eup %6053  ;;  %v3741_v37 = vsub.f32 %v10779_v19, %v9040_v54  ;;  %v3731_v54 = vsub.f32 %v8999_v56, %v9330_v38  ;;  %v3746_v56 = vsub.f32 %v9018_v39, %v9347_v25 }
 0x5bc   : > { %v3760_v16 = vsub.f32 %v8954_v29, %v3612_v40 }
 0x5bd   : > { %v4576_v60 = vpack.c.bf16 %v4448_v6, %v4448_v6  ;;  %v3957_v22 = vmul.f32 1.442695, %v3741_v37  ;;  %v9386_v32 = vpop.xlane.xlu0 %4099  ;;  %v3937_v19 = vmul.f32 1.442695, %v3731_v54 }
 0x5be   : > { %v3995_v13 = vmul.f32 1.442695, %v3760_v16 }
 0x5bf   : > { %v9376_v34 = vunpack.c.l.b16 %v4576_v60 }
 0x5c0   : > { %6055 = vpow2.f32 %v3995_v13  ;;  %4115 = vadd.xlane.f32.xlu2 %v9372_v27 }
 0x5c1   : > { %6057 = vpow2.f32 %v3887_v55  ;;  %v10781_v55 = vld [vmem:[#allocation119_spill] sm:$0xff] }
 0x5c3   : > { %v3642_v40 = vpop.xlane.xlu2 %3641 }
 0x5c4   : > { %v3775_v12 = vsub.f32 %v8964_v33, %v3642_v40  ;;  %v3773_v33 = vsub.f32 %v10781_v55, %v9207_v61  ;;  %v10783_v61 = vld [vmem:[#allocation123_spill] sm:$0xff] }
 0x5c5   : > { %v9408_v38 = vpop.xlane.xlu0 %4131 }
 0x5c6   : > { %v9388_v6 = vpop.eup %6055  ;;  %v4025_v13 = vmul.f32 1.442695, %v3775_v12  ;;  %v4021_v37 = vmul.f32 1.442695, %v3773_v33  ;;  %v9402_v12 = vpop.xlane.xlu1 %4153  ;;  %v10784_v33 = vld [vmem:[#allocation9_spill] sm:$0xff] }
 0x5c7   : > { %10780 = vst [vmem:[#allocation96_spill] sm:$0xff] %v9388_v6  ;;  %v9390_v16 = vpop.eup %6057  ;;  %4251 = vadd.xlane.f32.xlu0 %v9388_v6  ;;  %v9417_v6 = vadd.f32 %v10785_v26, %v10784_v33 }
 0x5c8   : > { %6059 = vpow2.f32 %v4025_v13  ;;  %4143 = vadd.xlane.f32.xlu2 %v9390_v16  ;;  %v3967_v13 = vmul.f32 1.442695, %v3746_v56 }
 0x5c9   : > { %6061 = vpow2.f32 %v3957_v22  ;;  %v3728_v22 = vsub.f32 %v10783_v61, %v9218_v51  ;;  %v5540_v56 = vmul.f32 -1.442695, %v9417_v6 }
 0x5ca   : > { %6063 = vpow2.f32 %v3937_v19 }
 0x5cb   : > { %v9398_v60 = vpop.xlane.xlu2 %3551  ;;  %6065 = vpow2.f32 %v4021_v37  ;;  %v3931_v39 = vmul.f32 1.442695, %v3728_v22  ;;  %v3761_v37 = vsub.f32 %v8969_v59, %v9284_v17  ;;  %v10788_v59 = vld [vmem:[#allocation7_spill] sm:$0xff] }
 0x5cc   : > { %6067 = vrcp.f32 %v4160_v58  ;;  %v10787_v58 = vld [vmem:[#allocation129_spill] sm:$0xff]  ;;  %v10789_v17 = vld [vmem:[#allocation11_spill] sm:$0xff] }
 0x5cd   : > { %6069 = vpow2.f32 %v3967_v13  ;;  %v3759_v61 = vsub.f32 %v10787_v58, %v9202_v21  ;;  %v9434_v22 = vpop.xlane.xlu0 %3619  ;;  %v2098_v13 = vadd.f32 %v10789_v17, %v10788_v59 }
 0x5ce   : > { %v9400_v40 = vpop.eup %6059  ;;  %v9428_v51 = vpop.xlane.xlu1 %3651 }
 0x5cf   : > { %10782 = vst [vmem:[#allocation25_spill] sm:$0xff] %v9400_v40  ;;  %v9404_v29 = vpop.eup %6061  ;;  %4281 = vadd.xlane.f32.xlu1 %v9400_v40  ;;  %v9446_v21 = vadd.f32 %v10785_v26, %v2098_v13 }
 0x5d0   : > { %4213 = vadd.xlane.f32.xlu2 %v9404_v29  ;;  %v9419_v25 = vpop.eup %6063 }
 0x5d1   : > { %10786 = vst [vmem:[#allocation126_spill] sm:$0xff] %v9419_v25  ;;  %v9421_v19 = vpop.eup %6065  ;;  %v5543_v59 = vmul.f32 -1.442695, %v9446_v21 }
 0x5d2   : > { %v6068_v33 = vpop.eup %6067 }
 0x5d3   : > { %v3582_v54 = vpop.xlane.xlu2 %3581 }
 0x5d4   : > { %v3745_v55 = vsub.f32 %v8995_v14, %v3582_v54  ;;  %v3762_v14 = vsub.f32 %v9031_v57, %v9293_v24  ;;  %v3997_v54 = vmul.f32 1.442695, %v3761_v37  ;;  %v9438_v24 = vpop.eup %6069  ;;  %v4482_v37 = vmul.f32 %v6068_v33, %v9033_v15 }
 0x5d5   : > { %10790 = vst [vmem:[#allocation86_spill] sm:$0xff] %v9438_v24  ;;  %v9459_v17 = vpop.xlane.xlu0 %3649 }
 0x5d6   : > { %v3965_v40 = vmul.f32 1.442695, %v3745_v55  ;;  %v3999_v57 = vmul.f32 1.442695, %v3762_v14  ;;  %v3739_v14 = vsub.f32 %v8756_v2, %v9225_v23  ;;  %v9456_v58 = vpop.xlane.xlu1 %4149 }
 0x5d7   : > { %4193 = vadd.xlane.f32.xlu1 %v9419_v25 }
 0x5d8   : > { %6071 = vpow2.f32 %v3965_v40  ;;  %4277 = vadd.xlane.f32.xlu2 %v9421_v19  ;;  %v3993_v40 = vmul.f32 1.442695, %v3759_v61  ;;  %v3953_v2 = vmul.f32 1.442695, %v3739_v14  ;;  %v3747_v14 = vsub.f32 %v9060_v11, %v9368_v36 }
 0x5d9   : > { %6073 = vpow2.f32 %v3931_v39 }
 0x5da   : > { %v3969_v36 = vmul.f32 1.442695, %v3747_v14 }
 0x5db   : > { %v4158_v55 = vpop.xlane.xlu2 %4157 }
 0x5dc   : > { %6075 = vrcp.f32 %v4158_v55 }
 0x5dd   : > { %6077 = vpow2.f32 %v5540_v56 }
 0x5de   : > { %v9440_v25 = vpop.eup %6071  ;;  %6079 = vrcp.f32 %v9246_v63  ;;  %v3730_v63 = vsub.f32 %v8975_v0, %v9398_v60 }
 0x5df   : > { %10791 = vst [vmem:[#allocation24_spill] sm:$0xff] %v9440_v25  ;;  %v9443_v39 = vpop.eup %6073  ;;  %6081 = vpow2.f32 %v3997_v54  ;;  %4221 = vadd.xlane.f32.xlu0 %v9440_v25  ;;  %4223 = vadd.xlane.f32.xlu1 %v9438_v24  ;;  %v4610_v54 = vpack.c.bf16 %v4482_v37, %v4482_v37 }
 0x5e0   : > { %6083 = vpow2.f32 %v3999_v57  ;;  %4187 = vadd.xlane.f32.xlu2 %v9443_v39  ;;  %v3935_v33 = vmul.f32 1.442695, %v3730_v63 }
 0x5e1   : > { %6085 = vpow2.f32 %v3993_v40  ;;  %v9476_v37 = vunpack.c.l.b16 %v4610_v54 }
 0x5e2   : > { %v6076_v56 = vpop.eup %6075 }
 0x5e3   : > { %v6078_v61 = vpop.eup %6077  ;;  %v4068_v13 = vpop.xlane.xlu2 %4067  ;;  %v4481_v15 = vmul.f32 %v6076_v56, %v9220_v43 }
 0x5e4   : > { %v6080_v55 = vpop.eup %6079  ;;  %6087 = vrcp.f32 %v4068_v13  ;;  %v9466_v60 = vadd.f32 1.0, %v6078_v61  ;;  %v9488_v13 = vpop.xlane.xlu1 %4147 }
 0x5e5   : > { %v9462_v23 = vpop.eup %6081  ;;  %v4609_v57 = vpack.c.bf16 %v4481_v15, %v4481_v15  ;;  %6089 = vrcp.f32 %v9386_v32  ;;  %v4435_v24 = vmul.f32 %v6080_v55, %v8982_v35  ;;  %v3776_v32 = vsub.f32 %v8980_v4, %v9302_v46  ;;  %v9491_v46 = vpop.xlane.xlu0 %4123 }
 0x5e6   : > { %10792 = vst [vmem:[#allocation109_spill] sm:$0xff] %v9462_v23  ;;  %v9464_v0 = vpop.eup %6083  ;;  %6091 = vpow2.f32 %v5543_v59  ;;  %vm2278_vm10 = vweird.f32 %v9466_v60 }
 0x5e7   : > { %10793 = vst [vmem:[#allocation119_spill] sm:$0xff] %v9464_v0  ;;  %v9469_v40 = vpop.eup %6085  ;;  %4253 = vadd.xlane.f32.xlu0 %v9462_v23  ;;  %4255 = vadd.xlane.f32.xlu1 %v9464_v0  ;;  %v9474_v43 = vunpack.c.l.b16 %v4609_v57  ;;  %6093 = vpow2.f32 %v3953_v2  ;;  %v4563_v56 = vpack.c.bf16 %v4435_v24, %v4435_v24  ;;  %v4027_v4 = vmul.f32 1.442695, %v3776_v32  ;;  %v10795_v57 = vld [vmem:[#allocation12_spill] sm:$0xff] }
 0x5e8   : > { %4249 = vadd.xlane.f32.xlu2 %v9469_v40  ;;  %6095 = vpow2.f32 %v3935_v33 }
 0x5e9   : > { %6097 = vrcp.f32 %v9466_v60 }
 0x5ea   : > { %v6088_v63 = vpop.eup %6087  ;;  %6099 = vrcp.f32 %v9266_v62 }
 0x5eb   : > { %v4436_v61 = vmul.f32 %v6088_v63, %v9230_v8  ;;  %v4098_v59 = vpop.xlane.xlu2 %4097  ;;  %v6090_v11 = vpop.eup %6089  ;;  %v4707_v8 = vunpack.c.l.b16 %v4563_v56 }
 0x5ec   : > { %6101 = vrcp.f32 %v4098_v59  ;;  %v6092_v15 = vpop.eup %6091  ;;  %v4452_v24 = vmul.f32 %v6090_v11, %v9058_v18  ;;  %v10797_v18 = vld [vmem:[#allocation77_spill] sm:$0xff] }
 0x5ed   : > { %6103 = vrcp.f32 %v9256_v28  ;;  %v4564_v54 = vpack.c.bf16 %v4436_v61, %v4436_v61  ;;  %v9493_v55 = vpop.eup %6093  ;;  %v9504_v28 = vadd.f32 %v10785_v26, %v10795_v57  ;;  %v10798_v61 = vld [vmem:[#allocation22_spill] sm:$0xff] }
 0x5ee   : > { %10794 = vst [vmem:[#allocation123_spill] sm:$0xff] %v9493_v55  ;;  %6105 = vrcp.f32 %v9408_v38  ;;  %v9496_v62 = vpop.eup %6095  ;;  %v10796_v38 = vld [vmem:[#allocation157_spill] sm:$0xff]  ;;  %v3704_v59 = vsub.f32 %v10798_v61, %v10797_v18 }
 0x5ef   : > { %v4708_v2 = vunpack.c.l.b16 %v4564_v54  ;;  %4209 = vadd.xlane.f32.xlu0 %v9493_v55  ;;  %v9500_v33 = vpop.eup %6097  ;;  %6107 = vpow2.f32 %v3969_v36  ;;  %v3777_v32 = vsub.f32 %v10796_v38, %v9317_v9  ;;  %v4580_v54 = vpack.c.bf16 %v4452_v24, %v4452_v24 }
 0x5f0   : > { %4191 = vadd.xlane.f32.xlu2 %v9496_v62  ;;  %v6100_v14 = vpop.eup %6099  ;;  %6109 = vpow2.f32 %v4027_v4  ;;  %v2274_v36 = vmul.f32 %v9500_v33, %v9466_v60  ;;  %v5546_v4 = vmul.f32 -1.442695, %v9504_v28  ;;  %v9519_v24 = vadd.f32 1.0, %v6092_v15 }
 0x5f1   : > { %v4716_v63 = vpack.c.b16 %v4708_v2, %v4707_v8  ;;  %v4029_v9 = vmul.f32 1.442695, %v3777_v32  ;;  %v10799_v2 = vld [vmem:[#allocation149_spill] sm:$0xff]  ;;  %v9528_v32 = vpop.xlane.xlu0 %4119  ;;  %v3732_v15 = vsub.f32 %v9049_v3, %v9342_v41  ;;  %vm2279_vm7 = vweird.f32 %v9500_v33 }
 0x5f2   : > { %v6102_v56 = vpop.eup %6101  ;;  %v4450_v38 = vmul.f32 %v6100_v14, %v10799_v2  ;;  %v2275_v14 = vsub.f32 1.0, %v2274_v36  ;;  %v10802_v36 = vpack.c.b16 %v9360_v42, %v9358_v47  ;;  %v10803_v47 = vld [vmem:[#allocation140_spill] sm:$0xff]  ;;  %vm9569_vm8 = vmor %vm2278_vm10, %vm2279_vm7  ;;  %vm2323_vm11 = vweird.f32 %v9519_v24 }
 0x5f3   : > { %v6104_v11 = vpop.eup %6103  ;;  %v4451_v35 = vmul.f32 %v6102_v56, %v9239_v31  ;;  %4725 = vmatpush.bf16.xpose.msra.mxu2 %v4716_v63  ;;  %v4130_v57 = vpop.xlane.xlu2 %4129  ;;  %v3883_v31 = vmul.f32 1.442695, %v3704_v59  ;;  %v10801_v56 = vld [vmem:[#allocation142_spill] sm:$0xff] }
 0x5f4   : > { %v6106_v55 = vpop.eup %6105  ;;  %6111 = vrcp.f32 %v4130_v57  ;;  %v9521_v63 = vpop.xlane.xlu1 %4141  ;;  %v4449_v61 = vmul.f32 %v6104_v11, %v10801_v56  ;;  %v4769_v57 = vunpack.c.l.b16 %v4580_v54  ;;  %v4578_v11 = vpack.c.bf16 %v4450_v38, %v4450_v38 }
 0x5f5   : > { %6113 = vrcp.f32 %v9281_v50  ;;  %v4579_v8 = vpack.c.bf16 %v4451_v35, %v4451_v35  ;;  %v9517_v18 = vpop.eup %6107  ;;  %v4468_v50 = vmul.f32 %v6106_v55, %v9081_v44  ;;  %v2282_v44 = vand.u32 2147483647, %v9466_v60 }
 0x5f6   : > { %10800 = vst [vmem:[#allocation9_spill] sm:$0xff] %v9517_v18  ;;  %v9524_v0 = vpop.eup %6109  ;;  %6115 = vrcp.f32 %v9271_v7  ;;  %v4577_v3 = vpack.c.bf16 %v4449_v61, %v4449_v61  ;;  %v2276_v41 = vmul.f32 %v9500_v33, %v2275_v14  ;;  %v4767_v56 = vunpack.c.l.b16 %v4578_v11  ;;  %v10804_v61 = vld [vmem:[#allocation152_spill] sm:$0xff]  ;;  %v10806_v11 = vld [vmem:[#allocation21_spill] sm:$0xff] }
 0x5f7   : > { %v4768_v35 = vunpack.c.l.b16 %v4579_v8  ;;  %4225 = vadd.xlane.f32.xlu0 %v9517_v18  ;;  %6117 = vpow2.f32 %v5546_v4  ;;  %v4596_v55 = vpack.c.bf16 %v4468_v50, %v4468_v50  ;;  %vm9577_vm9 = vcmp.eq.f32.partialorder %v2282_v44, 8.507059e+37 }
 0x5f8   : > { %4283 = vadd.xlane.f32.xlu2 %v9524_v0  ;;  %6119 = vpow2.f32 %v4029_v9  ;;  %v2284_v9 = vand.u32 2147483648, %v9466_v60  ;;  %v4766_v14 = vunpack.c.l.b16 %v4577_v3 }
 0x5f9   : > { %v4777_v59 = vpack.c.b16 %v4769_v57, %v4768_v35  ;;  %6121 = vrcp.f32 %v9519_v24  ;;  %v9575_v3 = vpop.xlane.xlu0 %4145 }
 0x5fa   : > { %v6112_v2 = vpop.eup %6111  ;;  %6123 = vpow2.f32 %v3883_v31  ;;  %v3939_v31 = vmul.f32 1.442695, %v3732_v15 }
 0x5fb   : > { %v6114_v7 = vpop.eup %6113  ;;  %v4467_v54 = vmul.f32 %v6112_v2, %v9248_v48  ;;  %4726 = vmatpush.bf16.xpose.msra.mxu2 %v10802_v36  ;;  %v3618_v4 = vpop.xlane.xlu2 %3617  ;;  %4786 = vmatpush.bf16.xpose.msra.mxu3 %v4777_v59  ;;  %6125 = vrcp.f32 %v9190_v10  ;;  %v4830_v10 = vunpack.c.l.b16 %v4596_v55  ;;  %v10805_v59 = vld [vmem:[#allocation60_spill] sm:$0xff]  ;;  %v3724_v55 = vsub.f32 %v8745_v30, %v9216_v49  ;;  %v10814_v49 = vld [vmem:[#allocation121_spill] sm:$0xff] }
 0x5fc   : > { %v3763_v8 = vsub.f32 %v9077_v20, %v3618_v4  ;;  %v6116_v38 = vpop.eup %6115  ;;  %6127 = vrcp.f32 %v9310_v53  ;;  %v4466_v50 = vmul.f32 %v6114_v7, %v10804_v61  ;;  %v2277_v53 = vadd.f32 %v9500_v33, %v2276_v41  ;;  %v10807_v7 = vld [vmem:[#allocation144_spill] sm:$0xff] }
 0x5fd   : > { %v4595_v48 = vpack.c.bf16 %v4467_v54, %v4467_v54  ;;  %v9546_v57 = vpop.eup %6117  ;;  %6129 = vrcp.f32 %v10803_v47  ;;  %v3703_v2 = vsub.f32 %v10806_v11, %v10805_v59  ;;  %v9559_v54 = vpop.xlane.xlu1 %4177  ;;  %v4465_v36 = vmul.f32 %v6116_v38, %v10807_v7  ;;  %v10819_v11 = vld [vmem:[#allocation160_spill] sm:$0xff] }
 0x5fe   : > { %v4001_v42 = vmul.f32 1.442695, %v3763_v8  ;;  %v9551_v35 = vpop.eup %6119  ;;  %6131 = vrcp.f32 %v9491_v46  ;;  %v4776_v41 = vpack.c.b16 %v4767_v56, %v4766_v14  ;;  %v2285_v47 = vor.u32 1.1754944e-38, %v2284_v9  ;;  %v10815_v56 = vld [vmem:[#allocation159_spill] sm:$0xff]  ;;  %v10818_v14 = vld [vmem:[#allocation145_spill] sm:$0xff] }
 0x5ff   : > { %v4829_v20 = vunpack.c.l.b16 %v4595_v48  ;;  %v9554_v15 = vpop.eup %6121  ;;  %v4594_v60 = vpack.c.bf16 %v4466_v50, %v4466_v50  ;;  %v2329_v30 = vand.u32 2147483648, %v9519_v24  ;;  %v2281_v50 = vsel %vm9569_vm8, %v9500_v33, %v2277_v53  ;;  %v10824_v33 = vld [vmem:[#allocation173_spill] sm:$0xff] }
 0x600   : > { %6133 = vpow2.f32 %v4001_v42  ;;  %4285 = vadd.xlane.f32.xlu2 %v9551_v35  ;;  %v9563_v4 = vpop.eup %6123  ;;  %v10813_v42 = vld [vmem:[#allocation91_spill] sm:$0xff]  ;;  %v3881_v23 = vmul.f32 1.442695, %v3703_v2  ;;  %v3923_v26 = vmul.f32 1.442695, %v3724_v55  ;;  %v10826_v55 = vld [vmem:[#allocation80_spill] sm:$0xff]  ;;  %vm2324_vm12 = vweird.f32 %v9554_v15 }
 0x601   : > { %10808 = vst [vmem:[#allocation129_spill] sm:$0xff] %v9563_v4  ;;  %6135 = vpow2.f32 %v3939_v31  ;;  %v4838_v8 = vpack.c.b16 %v4830_v10, %v4829_v20  ;;  %v6126_v48 = vpop.eup %6125  ;;  %v2319_v31 = vmul.f32 %v9554_v15, %v9519_v24  ;;  %v10816_v10 = vld [vmem:[#allocation158_spill] sm:$0xff]  ;;  %v4828_v46 = vunpack.c.l.b16 %v4594_v60  ;;  %v10825_v2 = vld [vmem:[#allocation95_spill] sm:$0xff]  ;;  %vm9716_vm13 = vmor %vm2323_vm11, %vm2324_vm12 }
 0x602   : > { %6137 = vrcp.f32 %v10813_v42  ;;  %v6128_v61 = vpop.eup %6127  ;;  %v10817_v44 = vpack.c.b16 %v10815_v56, %v10816_v10  ;;  %v4593_v42 = vpack.c.bf16 %v4465_v36, %v4465_v36  ;;  %v10821_v56 = vld [vmem:[#allocation153_spill] sm:$0xff]  ;;  %v2286_v36 = vsel %vm9577_vm9, %v2285_v47, %v2281_v50  ;;  %v10828_v47 = vld [vmem:[#allocation163_spill] sm:$0xff] }
 0x603   : > { %6139 = vrcp.f32 %v10814_v49  ;;  %v3648_v20 = vpop.xlane.xlu2 %3647  ;;  %4787 = vmatpush.bf16.xpose.msra.mxu3 %v4776_v41  ;;  %v6130_v9 = vpop.eup %6129  ;;  %4847 = vmatpush.bf16.xpose.msra.mxu0 %v4838_v8  ;;  %v10820_v49 = vld [vmem:[#allocation116_spill] sm:$0xff]  ;;  %v4427_v10 = vmul.f32 %v6126_v48, %v10821_v56  ;;  %v10823_v41 = vld [vmem:[#allocation143_spill] sm:$0xff]  ;;  %v4463_v53 = vmul.f32 %v6128_v61, %v10824_v33  ;;  %v2320_v8 = vsub.f32 1.0, %v2319_v31  ;;  %v10827_v61 = vld [vmem:[#allocation29_spill] sm:$0xff] }
 0x604   : > { %4727 = vmatpush.bf16.xpose.msra.mxu2 %v10817_v44  ;;  %6141 = vrcp.f32 %v10818_v14  ;;  %v3778_v7 = vsub.f32 %v10819_v11, %v3648_v20  ;;  %v6132_v59 = vpop.eup %6131  ;;  %v4428_v48 = vmul.f32 %v6130_v9, %v10826_v55  ;;  %v9608_v11 = vor.u32 1.1754944e-38, %v2329_v30  ;;  %v10830_v33 = vld [vmem:[#allocation36_spill] sm:$0xff] }
 0x605   : > { %6143 = vrcp.f32 %v10820_v49  ;;  %v4827_v60 = vunpack.c.l.b16 %v4593_v42  ;;  %v9613_v38 = vadd.f32 1.0, %v9546_v57  ;;  %v3779_v31 = vsub.f32 %v10828_v47, %v9459_v17  ;;  %v10829_v57 = vld [vmem:[#allocation74_spill] sm:$0xff]  ;;  %v10831_v17 = vld [vmem:[#allocation35_spill] sm:$0xff] }
 0x606   : > { %v9597_v44 = vpop.eup %6133  ;;  %6145 = vrcp.f32 %v10823_v41  ;;  %v4031_v25 = vmul.f32 1.442695, %v3778_v7  ;;  %v4464_v7 = vmul.f32 %v6132_v59, %v10827_v61  ;;  %v4555_v50 = vpack.c.bf16 %v4427_v10, %v4427_v10  ;;  %v10836_v61 = vld [vmem:[#allocation68_spill] sm:$0xff] }
 0x607   : > { %10822 = vst [vmem:[#allocation7_spill] sm:$0xff] %v9597_v44  ;;  %v9601_v14 = vpop.eup %6135  ;;  %6147 = vrcp.f32 %v10825_v2  ;;  %4257 = vadd.xlane.f32.xlu0 %v9597_v44  ;;  %v9618_v9 = vmul.f32 %v2286_v36, %v9417_v6  ;;  %v4837_v30 = vpack.c.b16 %v4828_v46, %v4827_v60  ;;  %v4591_v42 = vpack.c.bf16 %v4463_v53, %v4463_v53  ;;  %v10834_v46 = vld [vmem:[#allocation37_spill] sm:$0xff] }
 0x608   : > { %v6138_v20 = vpop.eup %6137  ;;  %6149 = vpow2.f32 %v4031_v25  ;;  %4195 = vadd.xlane.f32.xlu2 %v9601_v14  ;;  %v9620_v25 = vpop.xlane.xlu1 %4183  ;;  %v9623_v59 = vmul.f32 %v9554_v15, %v2320_v8  ;;  %v10832_v10 = vpack.c.b16 %v10830_v33, %v10831_v17  ;;  %v10833_v6 = vpack.c.b16 %v9376_v34, %v9374_v1  ;;  %v10835_v8 = vld [vmem:[#allocation175_spill] sm:$0xff]  ;;  %v10837_v33 = vld [vmem:[#allocation125_spill] sm:$0xff]  ;;  %v10838_v1 = vld [vmem:[#allocation98_spill] sm:$0xff] }
 0x609   : > { %v6140_v49 = vpop.eup %6139  ;;  %6151 = vpow2.f32 %v3923_v26  ;;  %v9626_v26 = vpop.xlane.xlu0 %4181  ;;  %v9635_v53 = vmul.f32 %v6138_v20, %v10834_v46  ;;  %v4592_v60 = vpack.c.bf16 %v4464_v7, %v4464_v7  ;;  %v4033_v17 = vmul.f32 1.442695, %v3779_v31  ;;  %v10839_v46 = vld [vmem:[#allocation56_spill] sm:$0xff]  ;;  %v10841_v7 = vld [vmem:[#allocation94_spill] sm:$0xff] }
 0x60a   : > { %v6142_v56 = vpop.eup %6141  ;;  %6153 = vpow2.f32 %v3881_v23  ;;  %v4556_v23 = vpack.c.bf16 %v4428_v48, %v4428_v48  ;;  %v4426_v47 = vmul.f32 %v6140_v49, %v10836_v61  ;;  %v10842_v49 = vld [vmem:[#allocation165_spill] sm:$0xff]  ;;  %vm2368_vm15 = vweird.f32 %v9613_v38 }
 0x60b   : > { %v6144_v41 = vpop.eup %6143  ;;  %6155 = vrcp.f32 %v10829_v57  ;;  %v3588_v2 = vpop.xlane.xlu2 %3587  ;;  %4788 = vmatpush.bf16.xpose.msra.mxu3 %v10833_v6  ;;  %4848 = vmatpush.bf16.xpose.msra.mxu0 %v4837_v30  ;;  %v4444_v34 = vmul.f32 %v6142_v56, %v10838_v1  ;;  %v4825_v6 = vunpack.c.l.b16 %v4591_v42  ;;  %v3764_v30 = vsub.f32 %v10842_v49, %v9434_v22 }
 0x60c   : > { %4728 = vmatpush.bf16.xpose.msra.mxu2 %v10832_v10  ;;  %v6146_v36 = vpop.eup %6145  ;;  %6157 = vrcp.f32 %v10835_v8  ;;  %v3748_v55 = vsub.f32 %v9286_v45, %v3588_v2  ;;  %v4699_v10 = vunpack.c.l.b16 %v4555_v50  ;;  %v4425_v8 = vmul.f32 %v6144_v41, %v10839_v46  ;;  %v10843_v50 = vld [vmem:[#allocation84_spill] sm:$0xff]  ;;  %v10846_v41 = vld [vmem:[#allocation49_spill] sm:$0xff] }
 0x60d   : > { %v6148_v57 = vpop.eup %6147  ;;  %6159 = vrcp.f32 %v10837_v33  ;;  %v4700_v31 = vunpack.c.l.b16 %v4556_v23  ;;  %v4443_v56 = vmul.f32 %v6146_v36, %v10843_v50  ;;  %v4826_v42 = vunpack.c.l.b16 %v4592_v60  ;;  %v10848_v36 = vld [vmem:[#allocation97_spill] sm:$0xff]  ;;  %v10849_v50 = vld [vmem:[#allocation156_spill] sm:$0xff]  ;;  %v10850_v60 = vld [vmem:[#allocation147_spill] sm:$0xff] }
 0x60e   : > { %v9642_v48 = vpop.eup %6149  ;;  %6161 = vrcp.f32 %v9383_v52  ;;  %v3971_v20 = vmul.f32 1.442695, %v3748_v55  ;;  %v10845_v52 = vld [vmem:[#allocation168_spill] sm:$0xff]  ;;  %v9659_v61 = vmul.f32 %v6148_v57, %v10846_v41  ;;  %v4554_v1 = vpack.c.bf16 %v4426_v47, %v4426_v47 }
 0x60f   : > { %v9646_v45 = vpop.eup %6151  ;;  %6163 = vrcp.f32 %v10841_v7  ;;  %4287 = vadd.xlane.f32.xlu0 %v9642_v48  ;;  %v3780_v55 = vsub.f32 %v10845_v52, %v9428_v51  ;;  %v4712_v22 = vpack.c.b16 %v4700_v31, %v4699_v10  ;;  %v4572_v46 = vpack.c.bf16 %v4444_v34, %v4444_v34  ;;  %v10847_v7 = vld [vmem:[#allocation154_spill] sm:$0xff]  ;;  %v10852_v41 = vld [vmem:[#allocation72_spill] sm:$0xff]  ;;  %v10854_v31 = vld [vmem:[#allocation41_spill] sm:$0xff] }
 0x610   : > { %10840 = vst [vmem:[#allocation11_spill] sm:$0xff] %v9646_v45  ;;  %v9653_v2 = vpop.eup %6153  ;;  %6165 = vpow2.f32 %v3971_v20  ;;  %4179 = vadd.xlane.f32.xlu2 %v9646_v45  ;;  %v3740_v49 = vsub.f32 %v10848_v36, %v10847_v7  ;;  %v4836_v51 = vpack.c.b16 %v4826_v42, %v4825_v6  ;;  %v4553_v20 = vpack.c.bf16 %v4425_v8, %v4425_v8  ;;  %v10851_v45 = vld [vmem:[#allocation101_spill] sm:$0xff]  ;;  %v10853_v34 = vld [vmem:[#allocation38_spill] sm:$0xff] }
 0x611   : > { %10844 = vst [vmem:[#allocation12_spill] sm:$0xff] %v9653_v2  ;;  %v6156_v33 = vpop.eup %6155  ;;  %6167 = vpow2.f32 %v4033_v17  ;;  %v3756_v57 = vsub.f32 %v10851_v45, %v10850_v60  ;;  %v4003_v17 = vmul.f32 1.442695, %v3764_v30  ;;  %v4246_v10 = vpop.xlane.xlu0 %4245  ;;  %v10855_v18 = vpack.c.b16 %v10853_v34, %v10854_v31  ;;  %v10856_v8 = vld [vmem:[#allocation137_spill] sm:$0xff] }
 0x612   : > { %v6158_v23 = vpop.eup %6157  ;;  %6169 = vrcp.f32 %v10849_v50  ;;  %v9664_v44 = vpop.xlane.xlu1 %4185  ;;  %v4571_v7 = vpack.c.bf16 %v4443_v56, %v4443_v56  ;;  %v4035_v6 = vmul.f32 1.442695, %v3780_v55  ;;  %v4424_v45 = vmul.f32 %v6156_v33, %v10856_v8  ;;  %v10858_v56 = vld [vmem:[#allocation155_spill] sm:$0xff]  ;;  %v10862_v8 = vld [vmem:[#allocation162_spill] sm:$0xff] }
 0x613   : > { %v6160_v52 = vpop.eup %6159  ;;  %6171 = vrcp.f32 %v10852_v41  ;;  %v4164_v47 = vpop.xlane.xlu2 %4163  ;;  %4789 = vmatpush.bf16.xpose.msra.mxu3 %v10855_v18  ;;  %4849 = vmatpush.bf16.xpose.msra.mxu0 %v4836_v51  ;;  %v4551_v30 = vpack.c.bf16 %v9659_v61, %v9659_v61  ;;  %v4698_v50 = vunpack.c.l.b16 %v4554_v1  ;;  %v4761_v18 = vunpack.c.l.b16 %v4572_v46 }
 0x614   : > { %4729 = vmatpush.bf16.xpose.msra.mxu2 %v4712_v22  ;;  %v6162_v36 = vpop.eup %6161  ;;  %6173 = vrcp.f32 %v4164_v47  ;;  %v10857_v22 = vld [vmem:[#allocation120_spill] sm:$0xff]  ;;  %v4442_v60 = vmul.f32 %v6158_v23, %v10858_v56  ;;  %v3955_v34 = vmul.f32 1.442695, %v3740_v49  ;;  %v4697_v55 = vunpack.c.l.b16 %v4553_v20  ;;  %v10860_v47 = vld [vmem:[#allocation71_spill] sm:$0xff]  ;;  %v10863_v49 = vld [vmem:[#allocation150_spill] sm:$0xff] }
 0x615   : > { %v9677_v42 = vpop.eup %6163  ;;  %6175 = vrcp.f32 %v10857_v22  ;;  %v4441_v51 = vmul.f32 %v6160_v52, %v10860_v47  ;;  %v3987_v33 = vmul.f32 1.442695, %v3756_v57  ;;  %v4483_v61 = vmul.f32 %v6162_v36, %v10862_v8  ;;  %v10864_v20 = vld [vmem:[#allocation103_spill] sm:$0xff]  ;;  %v10865_v36 = vld [vmem:[#allocation100_spill] sm:$0xff] }
 0x616   : > { %v9681_v41 = vpop.eup %6165  ;;  %6177 = vrcp.f32 %v4246_v10  ;;  %v4760_v1 = vunpack.c.l.b16 %v4571_v7  ;;  %v9691_v23 = vadd.f32 %v9554_v15, %v9623_v59  ;;  %v3771_v10 = vsub.f32 %v10864_v20, %v10863_v49  ;;  %v10866_v7 = vld [vmem:[#allocation46_spill] sm:$0xff]  ;;  %v10867_v8 = vld [vmem:[#allocation19_spill] sm:$0xff] }
 0x617   : > { %10859 = vst [vmem:[#allocation157_spill] sm:$0xff] %v9681_v41  ;;  %v9684_v31 = vpop.eup %6167  ;;  %6179 = vpow2.f32 %v4003_v17  ;;  %4227 = vadd.xlane.f32.xlu1 %v9681_v41  ;;  %4139 = vadd.xlane.f32.xlu0 %v9563_v4  ;;  %v4552_v52 = vpack.c.bf16 %v4424_v45, %v4424_v45  ;;  %v4711_v17 = vpack.c.b16 %v4698_v50, %v4697_v55  ;;  %v4695_v50 = vunpack.c.l.b16 %v4551_v30 }
 0x618   : > { %10861 = vst [vmem:[#allocation77_spill] sm:$0xff] %v9684_v31  ;;  %v6170_v46 = vpop.eup %6169  ;;  %6181 = vpow2.f32 %v4035_v6  ;;  %4289 = vadd.xlane.f32.xlu2 %v9684_v31  ;;  %v4773_v22 = vpack.c.b16 %v4761_v18, %v4760_v1  ;;  %v4570_v56 = vpack.c.bf16 %v4442_v60, %v4442_v60  ;;  %v3701_v4 = vsub.f32 %v10867_v8, %v10866_v7  ;;  %v10868_v1 = vld [vmem:[#allocation122_spill] sm:$0xff]  ;;  %v10870_v8 = vld [vmem:[#allocation139_spill] sm:$0xff] }
 0x619   : > { %v6172_v57 = vpop.eup %6171  ;;  %6183 = vrcp.f32 %v10865_v36  ;;  %v4569_v41 = vpack.c.bf16 %v4441_v51, %v4441_v51  ;;  %v4550_v49 = vpack.c.bf16 %v9635_v53, %v9635_v53  ;;  %v4611_v20 = vpack.c.bf16 %v4483_v61, %v4483_v61 }
 0x61a   : > { %v6174_v47 = vpop.eup %6173  ;;  %6185 = vpow2.f32 %v3955_v34  ;;  %v4248_v59 = vpop.xlane.xlu1 %4247  ;;  %v4017_v60 = vmul.f32 1.442695, %v3771_v10  ;;  %v4696_v55 = vunpack.c.l.b16 %v4552_v52  ;;  %v4421_v34 = vmul.f32 %v6170_v46, %v10868_v1  ;;  %v10874_v10 = vld [vmem:[#allocation59_spill] sm:$0xff] }
 0x61b   : > { %v6176_v6 = vpop.eup %6175  ;;  %6187 = vpow2.f32 %v3987_v33  ;;  %v4484_v45 = vmul.f32 %v6174_v47, %v9298_v5  ;;  %v4156_v36 = vpop.xlane.xlu2 %4155  ;;  %4790 = vmatpush.bf16.xpose.msra.mxu3 %v4773_v22  ;;  %v4759_v53 = vunpack.c.l.b16 %v4570_v56  ;;  %v4439_v33 = vmul.f32 %v6172_v57, %v10870_v8  ;;  %v10872_v5 = vld [vmem:[#allocation130_spill] sm:$0xff]  ;;  %v10882_v1 = vld [vmem:[#allocation87_spill] sm:$0xff] }
 0x61c   : > { %4730 = vmatpush.bf16.xpose.msra.mxu2 %v4711_v17  ;;  %v6178_v18 = vpop.eup %6177  ;;  %6189 = vrcp.f32 %v4248_v59  ;;  %v10873_v17 = vld [vmem:[#allocation67_spill] sm:$0xff]  ;;  %v4758_v30 = vunpack.c.l.b16 %v4569_v41  ;;  %v4440_v22 = vmul.f32 %v6176_v6, %v10874_v10  ;;  %v4890_v57 = vunpack.c.l.b16 %v4611_v20 }
 0x61d   : > { %v9703_v7 = vpop.eup %6179  ;;  %v4612_v51 = vpack.c.bf16 %v4484_v45, %v4484_v45  ;;  %6191 = vrcp.f32 %v4156_v36  ;;  %v3722_v47 = vsub.f32 %v10873_v17, %v10872_v5  ;;  %v10878_v6 = vand.u32 2147483647, %v9519_v24  ;;  %v10881_v36 = vld [vmem:[#allocation146_spill] sm:$0xff] }
 0x61e   : > { %10869 = vst [vmem:[#allocation22_spill] sm:$0xff] %v9703_v7  ;;  %v9706_v61 = vpop.eup %6181  ;;  %6193 = vrcp.f32 %v9402_v12  ;;  %v10877_v12 = vld [vmem:[#allocation114_spill] sm:$0xff]  ;;  %v3755_v20 = vsub.f32 %v10882_v1, %v10881_v36  ;;  %v4772_v10 = vpack.c.b16 %v4759_v53, %v4758_v30  ;;  %v4567_v24 = vpack.c.bf16 %v4439_v33, %v4439_v33  ;;  %v10885_v1 = vld [vmem:[#allocation51_spill] sm:$0xff] }
 0x61f   : > { %10871 = vst [vmem:[#allocation149_spill] sm:$0xff] %v9706_v61  ;;  %v6184_v52 = vpop.eup %6183  ;;  %6195 = vrcp.f32 %v9528_v32  ;;  %v4891_v56 = vunpack.c.l.b16 %v4612_v51  ;;  %4259 = vadd.xlane.f32.xlu1 %v9703_v7  ;;  %4291 = vadd.xlane.f32.xlu0 %v9706_v61  ;;  %v4525_v41 = vmul.f32 %v6178_v18, %v10877_v12  ;;  %vm9728_vm14 = vcmp.eq.f32.partialorder %v10878_v6, 8.507059e+37  ;;  %v10883_v5 = vld [vmem:[#allocation30_spill] sm:$0xff]  ;;  %v10884_v18 = vld [vmem:[#allocation64_spill] sm:$0xff] }
 0x620   : > { %v9724_v59 = vpop.eup %6185  ;;  %6197 = vpow2.f32 %v4017_v60  ;;  %4137 = vadd.xlane.f32.xlu2 %v9653_v2  ;;  %v4710_v32 = vpack.c.b16 %v4696_v55, %v4695_v50  ;;  %v4549_v51 = vpack.c.bf16 %v4421_v34, %v4421_v34  ;;  %v3721_v17 = vsub.f32 %v10884_v18, %v10883_v5  ;;  %v10886_v55 = vld [vmem:[#allocation69_spill] sm:$0xff]  ;;  %v10887_v34 = vld [vmem:[#allocation20_spill] sm:$0xff]  ;;  %v10888_v53 = vld [vmem:[#allocation42_spill] sm:$0xff] }
 0x621   : > { %v9735_v8 = vpop.eup %6187  ;;  %v4899_v12 = vpack.c.b16 %v4891_v56, %v4890_v57  ;;  %v2326_v31 = vsel %vm9716_vm13, %v9554_v15, %v9691_v23  ;;  %v3919_v36 = vmul.f32 1.442695, %v3722_v47  ;;  %v4568_v60 = vpack.c.bf16 %v4440_v22, %v4440_v22  ;;  %v10889_v23 = vld [vmem:[#allocation40_spill] sm:$0xff] }
 0x622   : > { %v6190_v6 = vpop.eup %6189  ;;  %v4438_v61 = vmul.f32 %v6184_v52, %v10885_v1  ;;  %v3702_v2 = vsub.f32 %v10887_v34, %v10886_v55  ;;  %v3877_v7 = vmul.f32 1.442695, %v3701_v4  ;;  %v4653_v30 = vpack.c.bf16 %v4525_v41, %v4525_v41 }
 0x623   : > { %v6192_v50 = vpop.eup %6191  ;;  %v4118_v5 = vpop.xlane.xlu2 %4117  ;;  %4791 = vmatpush.bf16.xpose.msra.mxu3 %v4772_v10  ;;  %v4526_v33 = vmul.f32 %v6190_v6, %v10888_v53  ;;  %v3985_v56 = vmul.f32 1.442695, %v3755_v20  ;;  %4908 = vmatpush.bf16.xpose.msra.mxu1 %v4899_v12  ;;  %v4693_v46 = vunpack.c.l.b16 %v4549_v51  ;;  %v4694_v15 = vunpack.c.l.b16 %v4550_v49  ;;  %v10891_v6 = vld [vmem:[#allocation34_spill] sm:$0xff] }
 0x624   : > { %4731 = vmatpush.bf16.xpose.msra.mxu2 %v4710_v32  ;;  %v6194_v57 = vpop.eup %6193  ;;  %v4437_v47 = vmul.f32 %v9677_v42, %v10889_v23  ;;  %v3917_v52 = vmul.f32 1.442695, %v3721_v17  ;;  %6199 = vrcp.f32 %v4118_v5  ;;  %v4756_v18 = vunpack.c.l.b16 %v4567_v24  ;;  %v10892_v49 = vld [vmem:[#allocation166_spill] sm:$0xff] }
 0x625   : > { %v6196_v22 = vpop.eup %6195  ;;  %v4654_v1 = vpack.c.bf16 %v4526_v33, %v4526_v33  ;;  %6201 = vpow2.f32 %v3919_v36  ;;  %v4757_v32 = vunpack.c.l.b16 %v4568_v60  ;;  %v4566_v10 = vpack.c.bf16 %v4438_v61, %v4438_v61  ;;  %v10893_v17 = vld [vmem:[#allocation138_spill] sm:$0xff]  ;;  %v10895_v36 = vld [vmem:[#allocation93_spill] sm:$0xff]  ;;  %v10896_v61 = vld [vmem:[#allocation115_spill] sm:$0xff] }
 0x626   : > { %v9749_v4 = vpop.eup %6197  ;;  %v4480_v41 = vmul.f32 %v6192_v50, %v10891_v6  ;;  %6203 = vrcp.f32 %v9456_v58  ;;  %v4479_v42 = vmul.f32 %v6194_v57, %v10892_v49  ;;  %v9756_v20 = vunpack.c.l.b16 %v4653_v30  ;;  %v10894_v12 = vld [vmem:[#allocation78_spill] sm:$0xff] }
 0x627   : > { %10890 = vst [vmem:[#allocation142_spill] sm:$0xff] %v9749_v4  ;;  %4211 = vadd.xlane.f32.xlu1 %v9724_v59  ;;  %4273 = vadd.xlane.f32.xlu0 %v9749_v4  ;;  %v9758_v51 = vunpack.c.l.b16 %v4654_v1  ;;  %v3738_v24 = vsub.f32 %v10894_v12, %v10893_v17  ;;  %6205 = vpow2.f32 %v3985_v56  ;;  %v3772_v60 = vsub.f32 %v10896_v61, %v10895_v36  ;;  %v10897_v58 = vld [vmem:[#allocation26_spill] sm:$0xff]  ;;  %v10903_v17 = vld [vmem:[#allocation176_spill] sm:$0xff]  ;;  %v10904_v12 = vld [vmem:[#allocation81_spill] sm:$0xff] }
 0x628   : > { %4243 = vadd.xlane.f32.xlu2 %v9735_v8  ;;  %v4462_v50 = vmul.f32 %v6196_v22, %v10897_v58  ;;  %6207 = vpow2.f32 %v3917_v52  ;;  %v4709_v55 = vpack.c.b16 %v4694_v15, %v4693_v46  ;;  %v4771_v34 = vpack.c.b16 %v4757_v32, %v4756_v18  ;;  %v10899_v52 = vld [vmem:[#allocation27_spill] sm:$0xff]  ;;  %v10900_v32 = vld [vmem:[#allocation141_spill] sm:$0xff]  ;;  %v10905_v58 = vld [vmem:[#allocation28_spill] sm:$0xff] }
 0x629   : > { %6209 = vrcp.f32 %v9613_v38  ;;  %v4565_v53 = vpack.c.bf16 %v4437_v47, %v4437_v47  ;;  %v4608_v33 = vpack.c.bf16 %v4480_v41, %v4480_v41  ;;  %v2628_v57 = vpack.c.bf16 %v9618_v9, %v9618_v9  ;;  %v11002_v4 = vld [vmem:[#allocation129_spill] sm:$0xff] }
 0x62a   : > { %v6200_v30 = vpop.eup %6199  ;;  %v2331_v56 = vsel %vm9728_vm14, %v9608_v11, %v2326_v31  ;;  %6211 = vpow2.f32 %v3877_v7  ;;  %v4607_v46 = vpack.c.bf16 %v4479_v42, %v4479_v42  ;;  %v4019_v22 = vmul.f32 1.442695, %v3772_v60  ;;  %v10901_v42 = vld [vmem:[#allocation133_spill] sm:$0xff] }
 0x62b   : > { %v4152_v23 = vpop.xlane.xlu2 %4151  ;;  %4792 = vmatpush.bf16.xpose.msra.mxu3 %v4771_v34  ;;  %v9774_v15 = vpop.eup %6201  ;;  %6213 = vrcp.f32 %v9575_v3  ;;  %v10898_v47 = vpack.c.b16 %v9476_v37, %v9474_v43  ;;  %v4461_v9 = vmul.f32 %v6200_v30, %v10899_v52  ;;  %v4590_v18 = vpack.c.bf16 %v4462_v50, %v4462_v50  ;;  %v10902_v43 = vld [vmem:[#allocation70_spill] sm:$0xff]  ;;  %v10906_v34 = vld [vmem:[#allocation128_spill] sm:$0xff] }
 0x62c   : > { %4732 = vmatpush.bf16.xpose.msra.mxu2 %v4709_v55  ;;  %v6204_v1 = vpop.eup %6203  ;;  %v3879_v45 = vmul.f32 1.442695, %v3702_v2  ;;  %v3951_v11 = vmul.f32 1.442695, %v3738_v24  ;;  %6215 = vrcp.f32 %v4152_v23  ;;  %v4755_v31 = vunpack.c.l.b16 %v4566_v10  ;;  %v9791_v2 = vpop.xlane.xlu0 %4215 }
 0x62d   : > { %4909 = vmatpush.bf16.xpose.msra.mxu1 %v10898_v47  ;;  %v9781_v7 = vpop.eup %6205  ;;  %6217 = vrcp.f32 %v10900_v32  ;;  %v4754_v6 = vunpack.c.l.b16 %v4565_v53  ;;  %v4589_v41 = vpack.c.bf16 %v4461_v9, %v4461_v9  ;;  %v4887_v49 = vunpack.c.l.b16 %v4608_v33  ;;  %v10908_v9 = vld [vmem:[#allocation174_spill] sm:$0xff] }
 0x62e   : > { %v9784_v3 = vpop.eup %6207  ;;  %v3737_v37 = vsub.f32 %v10902_v43, %v10901_v42  ;;  %v3754_v36 = vsub.f32 %v10904_v12, %v10903_v17  ;;  %6219 = vrcp.f32 %v9488_v13  ;;  %v4886_v10 = vunpack.c.l.b16 %v4607_v46  ;;  %v10907_v13 = vld [vmem:[#allocation73_spill] sm:$0xff]  ;;  %v10913_v17 = vld [vmem:[#allocation107_spill] sm:$0xff]  ;;  %v10914_v12 = vld [vmem:[#allocation48_spill] sm:$0xff] }
 0x62f   : > { %4241 = vadd.xlane.f32.xlu1 %v9781_v7  ;;  %4175 = vadd.xlane.f32.xlu0 %v9774_v15  ;;  %v9795_v24 = vpop.eup %6209  ;;  %6221 = vpow2.f32 %v4019_v22  ;;  %v4823_v61 = vunpack.c.l.b16 %v4589_v41  ;;  %v4824_v60 = vunpack.c.l.b16 %v4590_v18  ;;  %v4477_v50 = vmul.f32 %v6204_v1, %v10905_v58  ;;  %v10910_v41 = vld [vmem:[#allocation136_spill] sm:$0xff] }
 0x630   : > { %4173 = vadd.xlane.f32.xlu2 %v9784_v3  ;;  %v9799_v55 = vpop.eup %6211  ;;  %v3753_v53 = vsub.f32 %v10907_v13, %v10906_v34  ;;  %6223 = vpow2.f32 %v3951_v11  ;;  %v4770_v33 = vpack.c.b16 %v4755_v31, %v4754_v6  ;;  %v4897_v46 = vpack.c.b16 %v4887_v49, %v4886_v10  ;;  %v10909_v11 = vld [vmem:[#allocation32_spill] sm:$0xff]  ;;  %v10915_v10 = vld [vmem:[#allocation89_spill] sm:$0xff] }
 0x631   : > { %v6214_v30 = vpop.eup %6213  ;;  %6225 = vpow2.f32 %v3879_v45  ;;  %v4835_v23 = vpack.c.b16 %v4824_v60, %v4823_v61  ;;  %v2608_v22 = vmul.f32 %v2331_v56, %v9446_v21  ;;  %v3949_v52 = vmul.f32 1.442695, %v3737_v37  ;;  %v10912_v56 = vld [vmem:[#allocation170_spill] sm:$0xff] }
 0x632   : > { %v6216_v47 = vpop.eup %6215  ;;  %6227 = vrcp.f32 %v10908_v9  ;;  %v3983_v32 = vmul.f32 1.442695, %v3754_v36  ;;  %v4605_v6 = vpack.c.bf16 %v4477_v50, %v4477_v50  ;;  %v4475_v42 = vmul.f32 %v6214_v30, %v10912_v56  ;;  %v10916_v50 = vld [vmem:[#allocation23_spill] sm:$0xff] }
 0x633   : > { %4733 = vmatmul.bf16.vlgmr.msra.gmra.mxu2 %v2628_v57  ;;  %v4116_v18 = vpop.xlane.xlu2 %4115  ;;  %4793 = vmatpush.bf16.xpose.msra.mxu3 %v4770_v33  ;;  %v6218_v1 = vpop.eup %6217  ;;  %v4478_v31 = vmul.f32 %v6216_v47, %v10909_v11  ;;  %v3981_v57 = vmul.f32 1.442695, %v3753_v53  ;;  %v2630_v37 = vpack.c.bf16 %v2608_v22, %v2608_v22  ;;  %v3719_v36 = vsub.f32 %v10914_v12, %v10913_v17  ;;  %v10917_v53 = vld [vmem:[#allocation148_spill] sm:$0xff]  ;;  %v10918_v33 = vld [vmem:[#allocation90_spill] sm:$0xff] }
 0x634   : > { %6229 = vrcp.f32 %v4116_v18  ;;  %4850 = vmatpush.bf16.xpose.msra.mxu0 %v4835_v23  ;;  %v6220_v45 = vpop.eup %6219  ;;  %v4459_v61 = vmul.f32 %v6218_v1, %v10915_v10  ;;  %v3770_v30 = vsub.f32 %v10918_v33, %v10917_v53  ;;  %v9824_v23 = vpop.xlane.xlu0 %4217  ;;  %v10919_v47 = vld [vmem:[#allocation112_spill] sm:$0xff]  ;;  %v10920_v18 = vld [vmem:[#allocation118_spill] sm:$0xff]  ;;  %vm2369_vm0 = vweird.f32 %v9795_v24 }
 0x635   : > { %4910 = vmatpush.bf16.xpose.msra.mxu1 %v4897_v46  ;;  %6231 = vrcp.f32 %v10910_v41  ;;  %v9807_v49 = vpop.eup %6221  ;;  %v4606_v21 = vpack.c.bf16 %v4478_v31, %v4478_v31  ;;  %v4476_v34 = vmul.f32 %v6220_v45, %v10916_v50  ;;  %v10921_v41 = vld [vmem:[#allocation113_spill] sm:$0xff]  ;;  %v10926_v50 = vld [vmem:[#allocation66_spill] sm:$0xff]  ;;  %vm9906_vm1 = vmor %vm2368_vm15, %vm2369_vm0 }
 0x636   : > { %10911 = vst [vmem:[#allocation140_spill] sm:$0xff] %v9807_v49  ;;  %6233 = vrcp.f32 %v9521_v63  ;;  %v9811_v43 = vpop.eup %6223  ;;  %v4884_v63 = vunpack.c.l.b16 %v4605_v6  ;;  %v4587_v11 = vpack.c.bf16 %v4459_v61, %v4459_v61  ;;  %v3913_v6 = vmul.f32 1.442695, %v3719_v36  ;;  %v10924_v61 = vld [vmem:[#allocation79_spill] sm:$0xff] }
 0x637   : > { %6235 = vpow2.f32 %v3949_v52  ;;  %4275 = vadd.xlane.f32.xlu1 %v9807_v49  ;;  %4133 = vadd.xlane.f32.xlu0 %v9799_v55  ;;  %v9818_v60 = vpop.eup %6225  ;;  %v4885_v58 = vunpack.c.l.b16 %v4606_v21  ;;  %v4603_v52 = vpack.c.bf16 %v4475_v42, %v4475_v42  ;;  %v4604_v45 = vpack.c.bf16 %v4476_v34, %v4476_v34  ;;  %v10922_v21 = vld [vmem:[#allocation58_spill] sm:$0xff]  ;;  %v10923_v42 = vld [vmem:[#allocation151_spill] sm:$0xff] }
 0x638   : > { %6237 = vpow2.f32 %v3983_v32  ;;  %4207 = vadd.xlane.f32.xlu2 %v9811_v43  ;;  %v6228_v13 = vpop.eup %6227  ;;  %v3735_v56 = vsub.f32 %v10922_v21, %v10921_v41  ;;  %v4821_v53 = vunpack.c.l.b16 %v4587_v11  ;;  %v10930_v21 = vld [vmem:[#allocation92_spill] sm:$0xff] }
 0x639   : > { %6239 = vpow2.f32 %v3981_v57  ;;  %v4896_v22 = vpack.c.b16 %v4885_v58, %v4884_v63  ;;  %v4457_v12 = vmul.f32 %v6228_v13, %v10923_v42  ;;  %v10925_v58 = vld [vmem:[#allocation33_spill] sm:$0xff]  ;;  %v10931_v42 = vld [vmem:[#allocation167_spill] sm:$0xff] }
 0x63a   : > { %v6230_v46 = vpop.eup %6229  ;;  %6241 = vrcp.f32 %v10919_v47  ;;  %4794 = vmatmul.bf16.vlgmr.msra.gmra.mxu3 %v2630_v37  ;;  %v4015_v37 = vmul.f32 1.442695, %v3770_v30  ;;  %v3736_v34 = vsub.f32 %v10926_v50, %v10925_v58  ;;  %v10927_v30 = vld [vmem:[#allocation169_spill] sm:$0xff]  ;;  %v10928_v47 = vld [vmem:[#allocation88_spill] sm:$0xff] }
 0x63b   : > { %v6232_v9 = vpop.eup %6231  ;;  %6243 = vrcp.f32 %v10920_v18  ;;  %v4144_v1 = vpop.xlane.xlu2 %4143  ;;  %v4460_v32 = vmul.f32 %v6230_v46, %v9372_v27  ;;  %v4882_v27 = vunpack.c.l.b16 %v4603_v52  ;;  %v4883_v52 = vunpack.c.l.b16 %v4604_v45 }
 0x63c   : > { %v6234_v31 = vpop.eup %6233  ;;  %6245 = vrcp.f32 %v4144_v1  ;;  %v4458_v63 = vmul.f32 %v6232_v9, %v10924_v61  ;;  %v3945_v18 = vmul.f32 1.442695, %v3735_v56  ;;  %v2364_v56 = vmul.f32 %v9795_v24, %v9613_v38 }
 0x63d   : > { %4911 = vmatpush.bf16.xpose.msra.mxu1 %v4896_v22  ;;  %v9829_v57 = vpop.eup %6235  ;;  %v4588_v17 = vpack.c.bf16 %v4460_v32, %v4460_v32  ;;  %6247 = vrcp.f32 %v9791_v2  ;;  %v4473_v13 = vmul.f32 %v6234_v31, %v10927_v30  ;;  %v10929_v2 = vld [vmem:[#allocation85_spill] sm:$0xff]  ;;  %v4585_v32 = vpack.c.bf16 %v4457_v12, %v4457_v12  ;;  %v10934_v30 = vld [vmem:[#allocation55_spill] sm:$0xff] }
 0x63e   : > { %v9834_v10 = vpop.eup %6237  ;;  %6249 = vpow2.f32 %v3913_v6  ;;  %v3769_v22 = vsub.f32 %v10929_v2, %v10928_v47  ;;  %v4895_v11 = vpack.c.b16 %v4883_v52, %v4882_v27  ;;  %v3947_v31 = vmul.f32 1.442695, %v3736_v34  ;;  %v4280_v6 = vpop.xlane.xlu0 %4279  ;;  %v10933_v34 = vld [vmem:[#allocation111_spill] sm:$0xff] }
 0x63f   : > { %v9838_v36 = vpop.eup %6239  ;;  %4205 = vadd.xlane.f32.xlu1 %v9829_v57  ;;  %4239 = vadd.xlane.f32.xlu0 %v9834_v10  ;;  %v4822_v33 = vunpack.c.l.b16 %v4588_v17  ;;  %6251 = vpow2.f32 %v4015_v37  ;;  %v4586_v17 = vpack.c.bf16 %v4458_v63, %v4458_v63  ;;  %v4601_v50 = vpack.c.bf16 %v4473_v13, %v4473_v13  ;;  %v10932_v63 = vld [vmem:[#allocation63_spill] sm:$0xff]  ;;  %v10935_v13 = vld [vmem:[#allocation54_spill] sm:$0xff] }
 0x640   : > { %v6242_v46 = vpop.eup %6241  ;;  %4237 = vadd.xlane.f32.xlu2 %v9838_v36  ;;  %6253 = vrcp.f32 %v10930_v21  ;;  %v4013_v37 = vmul.f32 1.442695, %v3769_v22  ;;  %v4819_v12 = vunpack.c.l.b16 %v4585_v32  ;;  %v3720_v47 = vsub.f32 %v10934_v30, %v10933_v34  ;;  %v10938_v21 = vld [vmem:[#allocation127_spill] sm:$0xff] }
 0x641   : > { %v6244_v9 = vpop.eup %6243  ;;  %v4834_v1 = vpack.c.b16 %v4822_v33, %v4821_v53  ;;  %6255 = vrcp.f32 %v10931_v42  ;;  %v4455_v2 = vmul.f32 %v6242_v46, %v10935_v13  ;;  %v4880_v22 = vunpack.c.l.b16 %v4601_v50 }
 0x642   : > { %v6246_v41 = vpop.eup %6245  ;;  %v4456_v53 = vmul.f32 %v6244_v9, %v10932_v63 }
 0x643   : > { %v4214_v61 = vpop.xlane.xlu2 %4213  ;;  %4851 = vmatpush.bf16.xpose.msra.mxu0 %v4834_v1  ;;  %v4474_v58 = vmul.f32 %v6246_v41, %v9390_v16  ;;  %v6248_v45 = vpop.eup %6247  ;;  %v4820_v16 = vunpack.c.l.b16 %v4586_v17  ;;  %v10937_v1 = vld [vmem:[#allocation117_spill] sm:$0xff]  ;;  %v2365_v41 = vsub.f32 1.0, %v2364_v56  ;;  %v10940_v17 = vld [vmem:[#allocation124_spill] sm:$0xff]  ;;  %v4583_v50 = vpack.c.bf16 %v4455_v2, %v4455_v2 }
 0x644   : > { %6257 = vrcp.f32 %v4214_v61  ;;  %v9854_v33 = vpop.eup %6249  ;;  %v4510_v9 = vmul.f32 %v6248_v45, %v10937_v1  ;;  %v4584_v63 = vpack.c.bf16 %v4456_v53, %v4456_v53  ;;  %v2372_v56 = vand.u32 2147483647, %v9613_v38 }
 0x645   : > { %4912 = vmatpush.bf16.xpose.msra.mxu1 %v4895_v11  ;;  %6259 = vpow2.f32 %v3945_v18  ;;  %v4602_v27 = vpack.c.bf16 %v4474_v58, %v4474_v58  ;;  %v9859_v52 = vpop.eup %6251  ;;  %v10939_v11 = vld [vmem:[#allocation65_spill] sm:$0xff]  ;;  %v4833_v61 = vpack.c.b16 %v4820_v16, %v4819_v12  ;;  %v2374_v12 = vand.u32 2147483648, %v9613_v38 }
 0x646   : > { %6261 = vrcp.f32 %v4280_v6  ;;  %10936 = vst [vmem:[#allocation152_spill] sm:$0xff] %v9859_v52  ;;  %v6254_v32 = vpop.eup %6253  ;;  %v3767_v42 = vsub.f32 %v10939_v11, %v10938_v21  ;;  %v10941_v6 = vld [vmem:[#allocation62_spill] sm:$0xff]  ;;  %v4638_v13 = vpack.c.bf16 %v4510_v9, %v4510_v9  ;;  %v2366_v21 = vmul.f32 %v9795_v24, %v2365_v41  ;;  %v4252_v16 = vpop.xlane.xlu0 %4251  ;;  %v10942_v11 = vld [vmem:[#allocation135_spill] sm:$0xff] }
 0x647   : > { %6263 = vpow2.f32 %v3947_v31  ;;  %4135 = vadd.xlane.f32.xlu1 %v9818_v60  ;;  %4169 = vadd.xlane.f32.xlu0 %v9854_v33  ;;  %v4881_v18 = vunpack.c.l.b16 %v4602_v27  ;;  %v6256_v46 = vpop.eup %6255  ;;  %v3752_v31 = vsub.f32 %v10941_v6, %v10940_v17  ;;  %v3915_v27 = vmul.f32 1.442695, %v3720_v47  ;;  %v10945_v9 = vld [vmem:[#allocation43_spill] sm:$0xff] }
 0x648   : > { %6265 = vpow2.f32 %v4013_v37  ;;  %4271 = vadd.xlane.f32.xlu2 %v9859_v52  ;;  %v4009_v53 = vmul.f32 1.442695, %v3767_v42  ;;  %v4454_v47 = vmul.f32 %v6256_v46, %v10942_v11  ;;  %v10947_v46 = vld [vmem:[#allocation132_spill] sm:$0xff]  ;;  %v10949_v11 = vld [vmem:[#allocation39_spill] sm:$0xff]  ;;  %vm9913_vm2 = vcmp.eq.f32.partialorder %v2372_v56, 8.507059e+37 }
 0x649   : > { %v4894_v58 = vpack.c.b16 %v4881_v18, %v4880_v22  ;;  %v3979_v22 = vmul.f32 1.442695, %v3752_v31  ;;  %v4818_v18 = vunpack.c.l.b16 %v4584_v63  ;;  %v10958_v56 = vld [vmem:[#allocation44_spill] sm:$0xff] }
 0x64a   : > { %v6258_v34 = vpop.eup %6257 }
 0x64b   : > { %v9870_v45 = vpop.eup %6259  ;;  %v4278_v30 = vpop.xlane.xlu2 %4277  ;;  %4852 = vmatpush.bf16.xpose.msra.mxu0 %v4833_v61  ;;  %v4509_v37 = vmul.f32 %v6258_v34, %v9404_v29  ;;  %v10944_v29 = vld [vmem:[#allocation161_spill] sm:$0xff]  ;;  %v4817_v61 = vunpack.c.l.b16 %v4583_v50  ;;  %v10950_v50 = vld [vmem:[#allocation76_spill] sm:$0xff] }
 0x64c   : > { %v6262_v1 = vpop.eup %6261  ;;  %6267 = vrcp.f32 %v4278_v30  ;;  %v3718_v41 = vsub.f32 %v10945_v9, %v10944_v29  ;;  %v10946_v34 = vld [vmem:[#allocation45_spill] sm:$0xff]  ;;  %v2367_v30 = vadd.f32 %v9795_v24, %v2366_v21  ;;  %v4582_v9 = vpack.c.bf16 %v4454_v47, %v4454_v47 }
 0x64d   : > { %4913 = vmatpush.bf16.xpose.msra.mxu1 %v4894_v58  ;;  %v9876_v2 = vpop.eup %6263  ;;  %v4637_v17 = vpack.c.bf16 %v4509_v37, %v4509_v37  ;;  %v4453_v42 = vmul.f32 %v6254_v32, %v10946_v34  ;;  %6269 = vpow2.f32 %v3915_v27  ;;  %v9889_v58 = vunpack.c.l.b16 %v4638_v13  ;;  %v10948_v37 = vld [vmem:[#allocation83_spill] sm:$0xff]  ;;  %v10951_v29 = vld [vmem:[#allocation57_spill] sm:$0xff]  ;;  %v9898_v27 = vpop.xlane.xlu1 %4189 }
 0x64e   : > { %v9879_v6 = vpop.eup %6265  ;;  %v4542_v63 = vmul.f32 %v6262_v1, %v10947_v46  ;;  %v3717_v5 = vsub.f32 %v10949_v11, %v10948_v37  ;;  %6271 = vpow2.f32 %v4009_v53  ;;  %v3751_v32 = vsub.f32 %v10951_v29, %v10950_v50 }
 0x64f   : > { %10943 = vst [vmem:[#allocation60_spill] sm:$0xff] %v9879_v6  ;;  %4269 = vadd.xlane.f32.xlu1 %v9879_v6  ;;  %4203 = vadd.xlane.f32.xlu0 %v9876_v2  ;;  %v9887_v31 = vunpack.c.l.b16 %v4637_v17  ;;  %6273 = vpow2.f32 %v3979_v22  ;;  %v4832_v17 = vpack.c.b16 %v4818_v18, %v4817_v61  ;;  %v3911_v53 = vmul.f32 1.442695, %v3718_v41 }
 0x650   : > { %4201 = vadd.xlane.f32.xlu2 %v9870_v45  ;;  %v4581_v22 = vpack.c.bf16 %v4453_v42, %v4453_v42  ;;  %v4670_v47 = vpack.c.bf16 %v4542_v63, %v4542_v63  ;;  %v2375_v46 = vor.u32 1.1754944e-38, %v2374_v12  ;;  %v3977_v37 = vmul.f32 1.442695, %v3751_v32 }
 0x651   : > { %v2371_v41 = vsel %vm9906_vm1, %v9795_v24, %v2367_v30  ;;  %v3909_v50 = vmul.f32 1.442695, %v3717_v5  ;;  %v4816_v29 = vunpack.c.l.b16 %v4582_v9  ;;  %6275 = vpow2.f32 %v3911_v53  ;;  %v10962_v30 = vld [vmem:[#allocation131_spill] sm:$0xff]  ;;  %v10965_v53 = vld [vmem:[#allocation50_spill] sm:$0xff] }
 0x652   : > { %v6268_v1 = vpop.eup %6267  ;;  %v9917_v11 = vpop.xlane.xlu0 %4221  ;;  %6277 = vrcp.f32 %v4252_v16  ;;  %v4815_v12 = vunpack.c.l.b16 %v4581_v22  ;;  %v9934_v24 = vunpack.c.l.b16 %v4670_v47  ;;  %v2376_v5 = vsel %vm9913_vm2, %v2375_v46, %v2371_v41  ;;  %v10963_v9 = vld [vmem:[#allocation75_spill] sm:$0xff]  ;;  %v10964_v16 = vld [vmem:[#allocation110_spill] sm:$0xff]  ;;  %v10975_v22 = vld [vmem:[#allocation53_spill] sm:$0xff] }
 0x653   : > { %v9910_v34 = vpop.xlane.xlu2 %4187  ;;  %4853 = vmatpush.bf16.xpose.msra.mxu0 %v4832_v17  ;;  %v4541_v18 = vmul.f32 %v6268_v1, %v9421_v19  ;;  %v9919_v38 = vpop.eup %6269  ;;  %v10957_v19 = vld [vmem:[#allocation102_spill] sm:$0xff]  ;;  %v3768_v21 = vsub.f32 %v10963_v9, %v10962_v30  ;;  %6279 = vpow2.f32 %v3977_v37  ;;  %v2611_v46 = vmul.f32 %v2376_v5, %v9504_v28  ;;  %v10972_v5 = vld [vmem:[#allocation61_spill] sm:$0xff] }
 0x654   : > { %v9924_v17 = vpop.eup %6271  ;;  %v3749_v63 = vsub.f32 %v10958_v56, %v10957_v19  ;;  %10961 = vst [vmem:[#allocation121_spill] sm:$0xff] %v9934_v24  ;;  %6281 = vpow2.f32 %v3909_v50  ;;  %v4831_v19 = vpack.c.b16 %v4816_v29, %v4815_v12  ;;  %v10970_v12 = vld [vmem:[#allocation47_spill] sm:$0xff]  ;;  %v10971_v28 = vld [vmem:[#allocation106_spill] sm:$0xff] }
 0x655   : > { %v4669_v42 = vpack.c.bf16 %v4541_v18, %v4541_v18  ;;  %10956 = vst [vmem:[#allocation21_spill] sm:$0xff] %v9924_v17  ;;  %v9928_v1 = vpop.eup %6273  ;;  %v3734_v18 = vsub.f32 %v10965_v53, %v10964_v16  ;;  %v9945_v47 = vpop.xlane.xlu1 %4219  ;;  %v4011_v37 = vmul.f32 1.442695, %v3768_v21  ;;  %v2632_v53 = vpack.c.bf16 %v2611_v46, %v2611_v46 }
 0x656   : > { %10959 = vst [vmem:[#allocation144_spill] sm:$0xff] %v9928_v1  ;;  %v3766_v21 = vsub.f32 %v10972_v5, %v10971_v28 }
 0x657   : > { %4171 = vadd.xlane.f32.xlu1 %v9919_v38  ;;  %4265 = vadd.xlane.f32.xlu0 %v9924_v17  ;;  %v9932_v32 = vunpack.c.l.b16 %v4669_v42  ;;  %v3973_v42 = vmul.f32 1.442695, %v3749_v63  ;;  %v9947_v61 = vpop.eup %6275  ;;  %v3943_v30 = vmul.f32 1.442695, %v3734_v18  ;;  %v10969_v63 = vld [vmem:[#allocation164_spill] sm:$0xff] }
 0x658   : > { %4235 = vadd.xlane.f32.xlu2 %v9928_v1  ;;  %10966 = vst [vmem:[#allocation159_spill] sm:$0xff] %v9947_v61  ;;  %v6278_v41 = vpop.eup %6277  ;;  %v3733_v16 = vsub.f32 %v10970_v12, %v10969_v63  ;;  %v10973_v18 = vld [vmem:[#allocation96_spill] sm:$0xff]  ;;  %v4007_v52 = vmul.f32 1.442695, %v3766_v21 }
 0x659   : > { %10960 = vst [vmem:[#allocation91_spill] sm:$0xff] %v9932_v32  ;;  %v9950_v50 = vpop.eup %6279 }
 0x65a   : > { %10967 = vst [vmem:[#allocation158_spill] sm:$0xff] %v9950_v50  ;;  %v9952_v9 = vpop.xlane.xlu0 %4253  ;;  %v9954_v29 = vpop.eup %6281  ;;  %v3941_v63 = vmul.f32 1.442695, %v3733_v16  ;;  %v10980_v16 = vld [vmem:[#allocation52_spill] sm:$0xff] }
 0x65b   : > { %v4250_v56 = vpop.xlane.xlu2 %4249  ;;  %4854 = vmatpush.bf16.xpose.msra.mxu0 %v4831_v19  ;;  %10968 = vst [vmem:[#allocation145_spill] sm:$0xff] %v9954_v29  ;;  %v4528_v19 = vmul.f32 %v6278_v41, %v10973_v18 }
 0x65c   : > { %6283 = vrcp.f32 %v4250_v56  ;;  %v10974_v56 = vld [vmem:[#allocation108_spill] sm:$0xff] }
 0x65d   : > { %6285 = vpow2.f32 %v3973_v42  ;;  %v3765_v42 = vsub.f32 %v10975_v22, %v10974_v56  ;;  %v4282_v12 = vpop.xlane.xlu1 %4281  ;;  %v10979_v22 = vld [vmem:[#allocation104_spill] sm:$0xff] }
 0x65e   : > { %6287 = vpow2.f32 %v4011_v37  ;;  %v4656_v37 = vpack.c.bf16 %v4528_v19, %v4528_v19 }
 0x65f   : > { %4233 = vadd.xlane.f32.xlu1 %v9950_v50  ;;  %4167 = vadd.xlane.f32.xlu0 %v9947_v61  ;;  %6289 = vpow2.f32 %v3943_v30  ;;  %v4005_v28 = vmul.f32 1.442695, %v3765_v42  ;;  %v11007_v50 = vld [vmem:[#allocation109_spill] sm:$0xff]  ;;  %v11008_v61 = vld [vmem:[#allocation119_spill] sm:$0xff] }
 0x660   : > { %4165 = vadd.xlane.f32.xlu2 %v9954_v29  ;;  %6291 = vrcp.f32 %v4282_v12  ;;  %v9982_v21 = vunpack.c.l.b16 %v4656_v37  ;;  %v10984_v37 = vld [vmem:[#allocation25_spill] sm:$0xff] }
 0x661   : > { %6293 = vpow2.f32 %v3941_v63 }
 0x662   : > { %4855 = vmatmul.bf16.vlgmr.msra.gmra.mxu0 %v2632_v53  ;;  %v6284_v13 = vpop.eup %6283  ;;  %v3750_v53 = vsub.f32 %v10980_v16, %v10979_v22  ;;  %6295 = vpow2.f32 %v4007_v52 }
 0x663   : > { %v4192_v17 = vpop.xlane.xlu2 %4191  ;;  %v4527_v46 = vmul.f32 %v6284_v13, %v9469_v40  ;;  %v9967_v6 = vpop.eup %6285  ;;  %6297 = vpow2.f32 %v4005_v28 }
 0x664   : > { %10976 = vst [vmem:[#allocation160_spill] sm:$0xff] %v9967_v6  ;;  %v9969_v5 = vpop.eup %6287  ;;  %v9977_v40 = vpop.xlane.xlu0 %4209  ;;  %v3975_v42 = vmul.f32 1.442695, %v3750_v53 }
 0x665   : > { %10977 = vst [vmem:[#allocation116_spill] sm:$0xff] %v9969_v5  ;;  %v4655_v41 = vpack.c.bf16 %v4527_v46, %v4527_v46  ;;  %v9971_v30 = vpop.eup %6289  ;;  %v4194_v52 = vpop.xlane.xlu1 %4193 }
 0x666   : > { %10978 = vst [vmem:[#allocation153_spill] sm:$0xff] %v9971_v30  ;;  %v6292_v56 = vpop.eup %6291 }
 0x667   : > { %4267 = vadd.xlane.f32.xlu1 %v9969_v5  ;;  %4229 = vadd.xlane.f32.xlu0 %v9967_v6  ;;  %v9980_v13 = vunpack.c.l.b16 %v4655_v41  ;;  %v9986_v63 = vpop.eup %6293  ;;  %v4543_v28 = vmul.f32 %v6292_v56, %v10984_v37 }
 0x668   : > { %4199 = vadd.xlane.f32.xlu2 %v9971_v30  ;;  %10981 = vst [vmem:[#allocation143_spill] sm:$0xff] %v9986_v63  ;;  %v9988_v12 = vpop.eup %6295 }
 0x669   : > { %10982 = vst [vmem:[#allocation173_spill] sm:$0xff] %v9988_v12  ;;  %v9990_v46 = vpop.eup %6297 }
 0x66a   : > { %10983 = vst [vmem:[#allocation95_spill] sm:$0xff] %v9990_v46 }
 0x66b   : > { %v4284_v19 = vpop.xlane.xlu2 %4283 }
 0x66c   : > { %6299 = vrcp.f32 %v4284_v19  ;;  %v4226_v22 = vpop.xlane.xlu0 %4225  ;;  %v4671_v19 = vpack.c.bf16 %v4543_v28, %v4543_v28 }
 0x66d   : > { %6301 = vpow2.f32 %v3975_v42  ;;  %v4224_v56 = vpop.xlane.xlu1 %4223 }
 0x66e   : > { %6303 = vrcp.f32 %v4194_v52  ;;  %v10000_v6 = vunpack.c.l.b16 %v4671_v19 }
 0x66f   : > { %4197 = vadd.xlane.f32.xlu1 %v9986_v63  ;;  %4263 = vadd.xlane.f32.xlu0 %v9988_v12  ;;  %6305 = vrcp.f32 %v4192_v17 }
 0x670   : > { %4261 = vadd.xlane.f32.xlu2 %v9990_v46  ;;  %10986 = vst [vmem:[#allocation29_spill] sm:$0xff] %v10000_v6 }
 0x672   : > { %v6300_v41 = vpop.eup %6299 }
 0x673   : > { %v4286_v16 = vpop.xlane.xlu2 %4285  ;;  %v4544_v53 = vmul.f32 %v6300_v41, %v9524_v0  ;;  %v9997_v5 = vpop.eup %6301  ;;  %v10988_v0 = vld [vmem:[#allocation126_spill] sm:$0xff] }
 0x674   : > { %10985 = vst [vmem:[#allocation80_spill] sm:$0xff] %v9997_v5  ;;  %v6304_v63 = vpop.eup %6303 }
 0x675   : > { %v4672_v18 = vpack.c.bf16 %v4544_v53, %v4544_v53  ;;  %v4499_v52 = vmul.f32 %v6304_v63, %v10988_v0  ;;  %v6306_v28 = vpop.eup %6305  ;;  %v4256_v53 = vpop.xlane.xlu1 %4255  ;;  %v10989_v0 = vld [vmem:[#allocation105_spill] sm:$0xff] }
 0x677   : > { %4231 = vadd.xlane.f32.xlu1 %v9997_v5  ;;  %v10002_v12 = vunpack.c.l.b16 %v4672_v18  ;;  %v4627_v5 = vpack.c.bf16 %v4499_v52, %v4499_v52 }
 0x679   : > { %10987 = vst [vmem:[#allocation163_spill] sm:$0xff] %v10002_v12 }
 0x67a   : > { %v4258_v37 = vpop.xlane.xlu0 %4257 }
 0x67b   : > { %v4196_v46 = vpop.xlane.xlu2 %4195 }
 0x67c   : > { %6307 = vrcp.f32 %v4196_v46  ;;  %v4951_v46 = vunpack.c.l.b16 %v4627_v5 }
 0x67d   : > { %6309 = vrcp.f32 %v4286_v16 }
 0x67e   : > { %6311 = vrcp.f32 %v9898_v27  ;;  %v4498_v27 = vmul.f32 %v6306_v28, %v9496_v62 }
 0x682   : > { %v6308_v41 = vpop.eup %6307  ;;  %v4288_v19 = vpop.xlane.xlu0 %4287 }
 0x683   : > { %v6310_v18 = vpop.eup %6309  ;;  %v4500_v30 = vmul.f32 %v6308_v41, %v9601_v14  ;;  %6313 = vrcp.f32 %v4288_v19  ;;  %v4180_v42 = vpop.xlane.xlu2 %4179  ;;  %v4626_v41 = vpack.c.bf16 %v4498_v27, %v4498_v27 }
 0x684   : > { %v6312_v32 = vpop.eup %6311  ;;  %6315 = vrcp.f32 %v9910_v34  ;;  %v4545_v63 = vmul.f32 %v6310_v18, %v9551_v35 }
 0x685   : > { %6317 = vrcp.f32 %v9664_v44  ;;  %v4628_v17 = vpack.c.bf16 %v4500_v30, %v4500_v30  ;;  %v4497_v24 = vmul.f32 %v6312_v32, %v10989_v0 }
 0x686   : > { %6319 = vrcp.f32 %v4226_v22  ;;  %v4673_v22 = vpack.c.bf16 %v4545_v63, %v4545_v63  ;;  %v10992_v63 = vld [vmem:[#allocation99_spill] sm:$0xff] }
 0x687   : > { %v4952_v16 = vunpack.c.l.b16 %v4628_v17  ;;  %6321 = vrcp.f32 %v9626_v26  ;;  %v4625_v32 = vpack.c.bf16 %v4497_v24, %v4497_v24 }
 0x688   : > { %6323 = vrcp.f32 %v9559_v54  ;;  %v4950_v54 = vunpack.c.l.b16 %v4626_v41  ;;  %v10022_v18 = vunpack.c.l.b16 %v4673_v22  ;;  %v10994_v41 = vld [vmem:[#allocation13_spill] sm:$0xff] }
 0x689   : > { %v6314_v14 = vpop.eup %6313  ;;  %v4960_v52 = vpack.c.b16 %v4952_v16, %v4951_v46  ;;  %6325 = vrcp.f32 %v9917_v11  ;;  %v4949_v24 = vunpack.c.l.b16 %v4625_v32 }
 0x68a   : > { %v6316_v34 = vpop.eup %6315  ;;  %v4140_v44 = vpop.xlane.xlu0 %4139  ;;  %v4546_v62 = vmul.f32 %v6314_v14, %v9642_v48  ;;  %6327 = vrcp.f32 %v4224_v56  ;;  %10990 = vst [vmem:[#allocation74_spill] sm:$0xff] %v10022_v18  ;;  %v10991_v56 = vld [vmem:[#allocation9_spill] sm:$0xff]  ;;  %v11011_v18 = vld [vmem:[#allocation31_spill] sm:$0xff] }
 0x68b   : > { %v4228_v30 = vpop.xlane.xlu1 %4227  ;;  %v6318_v35 = vpop.eup %6317  ;;  %4969 = vmatpush.bf16.xpose.msrb.mxu2 %v4960_v52  ;;  %v4496_v19 = vmul.f32 %v6316_v34, %v9443_v39  ;;  %v10993_v52 = vld [vmem:[#allocation8_spill] sm:$0xff] }
 0x68c   : > { %v10018_v5 = vpop.xlane.xlu2 %4289  ;;  %v6320_v26 = vpop.eup %6319  ;;  %6329 = vrcp.f32 %v4228_v30  ;;  %v4674_v28 = vpack.c.bf16 %v4546_v62, %v4546_v62  ;;  %v4495_v46 = vmul.f32 %v6318_v35, %v10992_v63  ;;  %v2103_v34 = vadd.f32 %v10994_v41, %v10993_v52  ;;  %v10998_v41 = vld [vmem:[#allocation14_spill] sm:$0xff] }
 0x68d   : > { %6331 = vrcp.f32 %v9620_v25  ;;  %v6322_v11 = vpop.eup %6321  ;;  %v4515_v27 = vmul.f32 %v6320_v26, %v10991_v56  ;;  %v4624_v0 = vpack.c.bf16 %v4496_v19, %v4496_v19 }
 0x68e   : > { %6333 = vrcp.f32 %v4258_v37  ;;  %v10024_v48 = vunpack.c.l.b16 %v4674_v28  ;;  %v10026_v17 = vpop.eup %6323  ;;  %v4959_v37 = vpack.c.b16 %v4950_v54, %v4949_v24  ;;  %v4623_v26 = vpack.c.bf16 %v4495_v46, %v4495_v46 }
 0x68f   : > { %6335 = vrcp.f32 %v4140_v44  ;;  %v6326_v16 = vpop.eup %6325  ;;  %v4643_v22 = vpack.c.bf16 %v4515_v27, %v4515_v27  ;;  %v4948_v24 = vunpack.c.l.b16 %v4624_v0  ;;  %v10042_v39 = vadd.f32 %v10998_v41, %v2103_v34 }
 0x690   : > { %6337 = vrcp.f32 %v9945_v47  ;;  %v6328_v25 = vpop.eup %6327  ;;  %v10995_v47 = vld [vmem:[#allocation157_spill] sm:$0xff] }
 0x691   : > { %6339 = vrcp.f32 %v9952_v9  ;;  %v10996_v9 = vld [vmem:[#allocation24_spill] sm:$0xff] }
 0x692   : > { %v6330_v14 = vpop.eup %6329  ;;  %6341 = vrcp.f32 %v4256_v53  ;;  %v10036_v44 = vpop.xlane.xlu0 %4291  ;;  %v4513_v54 = vmul.f32 %v6326_v16, %v10996_v9  ;;  %v10997_v53 = vld [vmem:[#allocation86_spill] sm:$0xff] }
 0x693   : > { %v4260_v30 = vpop.xlane.xlu1 %4259  ;;  %v6332_v62 = vpop.eup %6331  ;;  %6343 = vrcp.f32 %v4180_v42  ;;  %v4516_v35 = vmul.f32 %v6330_v14, %v10995_v47  ;;  %4970 = vmatpush.bf16.xpose.msrb.mxu2 %v4959_v37  ;;  %v4514_v63 = vmul.f32 %v6328_v25, %v10997_v53  ;;  %v10999_v42 = vld [vmem:[#allocation171_spill] sm:$0xff]  ;;  %v11000_v37 = vld [vmem:[#allocation172_spill] sm:$0xff] }
 0x694   : > { %v4138_v32 = vpop.xlane.xlu2 %4137  ;;  %v6334_v28 = vpop.eup %6333  ;;  %6345 = vrcp.f32 %v4260_v30  ;;  %v4493_v27 = vmul.f32 %v6322_v11, %v10999_v42  ;;  %v4494_v46 = vmul.f32 %v6332_v62, %v11000_v37  ;;  %v5012_v30 = vunpack.c.l.b16 %v4643_v22  ;;  %v11001_v47 = vld [vmem:[#allocation7_spill] sm:$0xff] }
 0x695   : > { %v6336_v19 = vpop.eup %6335  ;;  %v4644_v56 = vpack.c.bf16 %v4516_v35, %v4516_v35  ;;  %6347 = vrcp.f32 %v4138_v32  ;;  %v4531_v16 = vmul.f32 %v6334_v28, %v11001_v47  ;;  %v4947_v35 = vunpack.c.l.b16 %v4623_v26  ;;  %v11004_v28 = vld [vmem:[#allocation22_spill] sm:$0xff] }
 0x696   : > { %v6338_v52 = vpop.eup %6337  ;;  %6349 = vrcp.f32 %v9824_v23  ;;  %v4641_v0 = vpack.c.bf16 %v4513_v54, %v4513_v54  ;;  %v4472_v25 = vmul.f32 %v6336_v19, %v11002_v4  ;;  %v4642_v29 = vpack.c.bf16 %v4514_v63, %v4514_v63  ;;  %v11006_v47 = vld [vmem:[#allocation82_spill] sm:$0xff] }
 0x697   : > { %v6340_v14 = vpop.eup %6339  ;;  %v5013_v9 = vunpack.c.l.b16 %v4644_v56  ;;  %v4958_v34 = vpack.c.b16 %v4948_v24, %v4947_v35  ;;  %v5549_v23 = vmul.f32 -1.442695, %v10042_v39  ;;  %v4622_v42 = vpack.c.bf16 %v4494_v46, %v4494_v46  ;;  %v11005_v24 = vld [vmem:[#allocation12_spill] sm:$0xff] }
 0x698   : > { %v6342_v32 = vpop.eup %6341  ;;  %v4659_v37 = vpack.c.bf16 %v4531_v16, %v4531_v16  ;;  %v4621_v4 = vpack.c.bf16 %v4493_v27, %v4493_v27  ;;  %v5010_v19 = vunpack.c.l.b16 %v4641_v0  ;;  %v5011_v12 = vunpack.c.l.b16 %v4642_v29 }
 0x699   : > { %v6344_v53 = vpop.eup %6343  ;;  %v5021_v49 = vpack.c.b16 %v5013_v9, %v5012_v30  ;;  %v4600_v30 = vpack.c.bf16 %v4472_v25, %v4472_v25  ;;  %v4512_v9 = vmul.f32 %v6338_v52, %v11006_v47  ;;  %v4529_v46 = vmul.f32 %v6340_v14, %v11007_v50 }
 0x69a   : > { %v6346_v6 = vpop.eup %6345  ;;  %v10050_v11 = vpop.xlane.xlu0 %4273  ;;  %v4530_v16 = vmul.f32 %v6342_v32, %v11008_v61  ;;  %6351 = vpow2.f32 %v5549_v23  ;;  %v4491_v25 = vmul.f32 %v10026_v17, %v11011_v18 }
 0x69b   : > { %11003 = vst [vmem:[#allocation36_spill] sm:$0xff] %v10050_v11  ;;  %v4212_v62 = vpop.xlane.xlu1 %4211  ;;  %v6348_v22 = vpop.eup %6347  ;;  %v4532_v56 = vmul.f32 %v6346_v6, %v11004_v28  ;;  %5030 = vmatpush.bf16.xpose.msrb.mxu3 %v5021_v49  ;;  %4971 = vmatpush.bf16.xpose.msrb.mxu2 %v4958_v34  ;;  %v4946_v49 = vunpack.c.l.b16 %v4622_v42  ;;  %v11009_v28 = vld [vmem:[#allocation11_spill] sm:$0xff]  ;;  %v5073_v34 = vunpack.c.l.b16 %v4659_v37  ;;  %v11010_v11 = vld [vmem:[#allocation134_spill] sm:$0xff]  ;;  %v4879_v52 = vunpack.c.l.b16 %v4600_v30 }
 0x69c   : > { %v10053_v26 = vpop.xlane.xlu2 %4243  ;;  %v6350_v54 = vpop.eup %6349  ;;  %v4471_v63 = vmul.f32 %v6348_v22, %v11005_v24  ;;  %v4492_v1 = vmul.f32 %v6344_v53, %v11009_v28  ;;  %v4640_v29 = vpack.c.bf16 %v4512_v9, %v4512_v9  ;;  %v5020_v24 = vpack.c.b16 %v5011_v12, %v5010_v19 }
 0x69d   : > { %v4660_v35 = vpack.c.bf16 %v4532_v56, %v4532_v56  ;;  %v4511_v0 = vmul.f32 %v6350_v54, %v11010_v11  ;;  %v4945_v56 = vunpack.c.l.b16 %v4621_v4  ;;  %v4657_v14 = vpack.c.bf16 %v4529_v46, %v4529_v46 }
 0x69e   : > { %v4599_v6 = vpack.c.bf16 %v4471_v63, %v4471_v63  ;;  %v4658_v61 = vpack.c.bf16 %v4530_v16, %v4530_v16  ;;  %v4620_v53 = vpack.c.bf16 %v4492_v1, %v4492_v1  ;;  %v4619_v18 = vpack.c.bf16 %v4491_v25, %v4491_v25 }
 0x69f   : > { %v5074_v27 = vunpack.c.l.b16 %v4660_v35  ;;  %v4957_v63 = vpack.c.b16 %v4946_v49, %v4945_v56  ;;  %v4639_v37 = vpack.c.bf16 %v4511_v0, %v4511_v0  ;;  %v5009_v12 = vunpack.c.l.b16 %v4640_v29 }
 0x6a0   : > { %v4878_v22 = vunpack.c.l.b16 %v4599_v6  ;;  %v6352_v54 = vpop.eup %6351  ;;  %v5071_v17 = vunpack.c.l.b16 %v4657_v14  ;;  %v5072_v4 = vunpack.c.l.b16 %v4658_v61  ;;  %v4944_v19 = vunpack.c.l.b16 %v4620_v53 }
 0x6a1   : > { %v5082_v50 = vpack.c.b16 %v5074_v27, %v5073_v34  ;;  %v10064_v30 = vadd.f32 1.0, %v6352_v54  ;;  %v5008_v1 = vunpack.c.l.b16 %v4639_v37  ;;  %v4943_v47 = vunpack.c.l.b16 %v4619_v18 }
 0x6a2   : > { %v4176_v32 = vpop.xlane.xlu0 %4175  ;;  %v4893_v42 = vpack.c.b16 %v4879_v52, %v4878_v22  ;;  %v5081_v46 = vpack.c.b16 %v5072_v4, %v5071_v17  ;;  %v11012_v22 = vld [vmem:[#allocation15_spill] sm:$0xff]  ;;  %v11015_v53 = vpack.c.b16 %v9982_v21, %v9980_v13  ;;  %v11016_v4 = vld [vmem:[#allocation10_spill] sm:$0xff] }
 0x6a3   : > { %v4242_v23 = vpop.xlane.xlu1 %4241  ;;  %6353 = vrcp.f32 %v4176_v32  ;;  %5031 = vmatpush.bf16.xpose.msrb.mxu3 %v5020_v24  ;;  %5091 = vmatpush.bf16.xpose.msrb.mxu0 %v5082_v50  ;;  %v5019_v35 = vpack.c.b16 %v5009_v12, %v5008_v1  ;;  %v4956_v49 = vpack.c.b16 %v4944_v19, %v4943_v47  ;;  %v5552_v52 = vmul.f32 -1.442695, %v11012_v22  ;;  %v11013_v24 = vld [vmem:[#allocation123_spill] sm:$0xff] }
 0x6a4   : > { %v4174_v11 = vpop.xlane.xlu2 %4173  ;;  %6355 = vrcp.f32 %v4212_v62  ;;  %4914 = vmatpush.bf16.xpose.msra.mxu1 %v4893_v42  ;;  %4972 = vmatpush.bf16.xpose.msrb.mxu2 %v4957_v63  ;;  %vm2413_vm3 = vweird.f32 %v10064_v30 }
 0x6a5   : > { %6357 = vrcp.f32 %v4174_v11 }
 0x6a6   : > { %6359 = vrcp.f32 %v9977_v40 }
 0x6a7   : > { %6361 = vrcp.f32 %v10064_v30 }
 0x6a8   : > { %6363 = vrcp.f32 %v4242_v23 }
 0x6a9   : > { %v6354_v9 = vpop.eup %6353  ;;  %6365 = vrcp.f32 %v10053_v26 }
 0x6aa   : > { %v6356_v16 = vpop.eup %6355  ;;  %v4134_v6 = vpop.xlane.xlu0 %4133  ;;  %v4490_v28 = vmul.f32 %v6354_v9, %v9774_v15 }
 0x6ab   : > { %v10066_v62 = vpop.xlane.xlu1 %4275  ;;  %v6358_v34 = vpop.eup %6357  ;;  %5032 = vmatpush.bf16.xpose.msrb.mxu3 %v5019_v35  ;;  %5092 = vmatpush.bf16.xpose.msrb.mxu0 %v5081_v46  ;;  %v4508_v15 = vmul.f32 %v6356_v16, %v9724_v59  ;;  %v11014_v59 = vpack.c.b16 %v9889_v58, %v9887_v31  ;;  %v11017_v31 = vld [vmem:[#allocation16_spill] sm:$0xff] }
 0x6ac   : > { %v4208_v40 = vpop.xlane.xlu2 %4207  ;;  %v6360_v27 = vpop.eup %6359  ;;  %4973 = vmatpush.bf16.xpose.msrb.mxu2 %v4956_v49  ;;  %v4489_v0 = vmul.f32 %v6358_v34, %v9784_v3  ;;  %v4618_v25 = vpack.c.bf16 %v4490_v28, %v4490_v28  ;;  %v2108_v58 = vadd.f32 %v11017_v31, %v11016_v4 }
 0x6ad   : > { %6367 = vrcp.f32 %v4208_v40  ;;  %v4507_v50 = vmul.f32 %v6360_v27, %v11013_v24  ;;  %v10078_v61 = vpop.eup %6361  ;;  %v4636_v3 = vpack.c.bf16 %v4508_v15, %v4508_v15 }
 0x6ae   : > { %v4617_v56 = vpack.c.bf16 %v4489_v0, %v4489_v0  ;;  %v4942_v29 = vunpack.c.l.b16 %v4618_v25  ;;  %6369 = vpow2.f32 %v5552_v52  ;;  %v6364_v32 = vpop.eup %6363  ;;  %v2409_v17 = vmul.f32 %v10078_v61, %v10064_v30 }
 0x6af   : > { %6371 = vrcp.f32 %v10036_v44  ;;  %v6366_v63 = vpop.eup %6365  ;;  %v4635_v37 = vpack.c.bf16 %v4507_v50, %v4507_v50  ;;  %v5005_v18 = vunpack.c.l.b16 %v4636_v3  ;;  %v4523_v12 = vmul.f32 %v6364_v32, %v9781_v7 }
 0x6b0   : > { %v4941_v14 = vunpack.c.l.b16 %v4617_v56  ;;  %v4524_v1 = vmul.f32 %v6366_v63, %v9735_v8  ;;  %v2410_v16 = vsub.f32 1.0, %v2409_v17  ;;  %vm2414_vm4 = vweird.f32 %v10078_v61  ;;  %v11027_v17 = vld [vmem:[#allocation36_spill] sm:$0xff] }
 0x6b1   : > { %v5004_v21 = vunpack.c.l.b16 %v4635_v37  ;;  %v4651_v35 = vpack.c.bf16 %v4523_v12, %v4523_v12  ;;  %vm10128_vm5 = vmor %vm2413_vm3, %vm2414_vm4 }
 0x6b2   : > { %v4240_v23 = vpop.xlane.xlu0 %4239  ;;  %v4955_v42 = vpack.c.b16 %v4942_v29, %v4941_v14  ;;  %v4652_v27 = vpack.c.bf16 %v4524_v1, %v4524_v1 }
 0x6b3   : > { %v4206_v26 = vpop.xlane.xlu1 %4205  ;;  %6373 = vrcp.f32 %v4240_v23  ;;  %5033 = vmatpush.bf16.xpose.msrb.mxu3 %v11014_v59  ;;  %5093 = vmatpush.bf16.xpose.msrb.mxu0 %v11015_v53  ;;  %v6368_v54 = vpop.eup %6367  ;;  %v5017_v9 = vpack.c.b16 %v5005_v18, %v5004_v21  ;;  %v5065_v56 = vunpack.c.l.b16 %v4651_v35 }
 0x6b4   : > { %v4238_v11 = vpop.xlane.xlu2 %4237  ;;  %6375 = vrcp.f32 %v4206_v26  ;;  %4974 = vmatpush.bf16.xpose.msrb.mxu2 %v4955_v42  ;;  %v6370_v13 = vpop.eup %6369  ;;  %v4506_v19 = vmul.f32 %v6368_v54, %v9811_v43  ;;  %v5066_v32 = vunpack.c.l.b16 %v4652_v27 }
 0x6b5   : > { %6377 = vrcp.f32 %v4238_v11  ;;  %v6372_v7 = vpop.eup %6371  ;;  %v10117_v26 = vadd.f32 1.0, %v6370_v13 }
 0x6b6   : > { %v4734_v44 = vpop.f32.mrf.mxu2  ;;  %6379 = vrcp.f32 %v4134_v6  ;;  %v10099_v6 = vadd.f32 %v10998_v41, %v2108_v58  ;;  %v4634_v40 = vpack.c.bf16 %v4506_v19, %v4506_v19  ;;  %v5078_v59 = vpack.c.b16 %v5066_v32, %v5065_v56 }
 0x6b7   : > { %5165 = vst [vmem:[%s10092_s18] sm:$0xff] %v4734_v44  ;;  %6381 = vrcp.f32 %v10018_v5  ;;  %v11018_v5 = vpack.c.b16 %v9758_v51, %v9756_v20  ;;  %v2411_v20 = vmul.f32 %v10078_v61, %v2410_v16  ;;  %v2417_v44 = vand.u32 2147483647, %v10064_v30 }
 0x6b8   : > { %v5555_v51 = vmul.f32 -1.442695, %v10099_v6  ;;  %v5003_v3 = vunpack.c.l.b16 %v4634_v40  ;;  %vm2458_vm10 = vweird.f32 %v10117_v26 }
 0x6b9   : > { %v6374_v47 = vpop.eup %6373  ;;  %v2412_v54 = vadd.f32 %v10078_v61, %v2411_v20  ;;  %vm2418_vm6 = vcmp.eq.f32.partialorder %v2417_v44, 8.507059e+37 }
 0x6ba   : > { %v6376_v46 = vpop.eup %6375  ;;  %v4170_v49 = vpop.xlane.xlu0 %4169  ;;  %v4522_v24 = vmul.f32 %v6374_v47, %v9834_v10  ;;  %v11020_v10 = vld [vmem:[#allocation77_spill] sm:$0xff] }
 0x6bb   : > { %v4136_v28 = vpop.xlane.xlu1 %4135  ;;  %v6378_v34 = vpop.eup %6377  ;;  %5034 = vmatpush.bf16.xpose.msrb.mxu3 %v5017_v9  ;;  %5094 = vmatpush.bf16.xpose.msrb.mxu0 %v11018_v5  ;;  %v4505_v8 = vmul.f32 %v6376_v46, %v9829_v57  ;;  %v11019_v57 = vld [vmem:[#allocation149_spill] sm:$0xff]  ;;  %v2416_v47 = vsel %vm10128_vm5, %v10078_v61, %v2412_v54 }
 0x6bc   : > { %v10104_v43 = vpop.xlane.xlu2 %4271  ;;  %v6380_v0 = vpop.eup %6379  ;;  %6383 = vrcp.f32 %v4136_v28  ;;  %v4521_v29 = vmul.f32 %v6378_v34, %v9838_v36  ;;  %v4548_v50 = vmul.f32 %v6372_v7, %v11019_v57  ;;  %v2419_v36 = vand.u32 2147483648, %v10064_v30 }
 0x6bd   : > { %v6382_v25 = vpop.eup %6381  ;;  %v4795_v52 = vpop.f32.mrf.mxu3  ;;  %v4633_v15 = vpack.c.bf16 %v4505_v8, %v4505_v8  ;;  %v4469_v23 = vmul.f32 %v6380_v0, %v9799_v55  ;;  %v4650_v11 = vpack.c.bf16 %v4522_v24, %v4522_v24  ;;  %6385 = vpow2.f32 %v5555_v51 }
 0x6be   : > { %v4736_v41 = vpop.f32.mrf.mxu2  ;;  %5166 = vst [vmem:[%s10092_s18 + $0x8] sm:$0xff] %v4795_v52  ;;  %v4547_v42 = vmul.f32 %v6382_v25, %v11020_v10  ;;  %v4649_v53 = vpack.c.bf16 %v4521_v29, %v4521_v29  ;;  %v4676_v18 = vpack.c.bf16 %v4548_v50, %v4548_v50  ;;  %v2420_v13 = vor.u32 1.1754944e-38, %v2419_v36  ;;  %v11023_v52 = vld [vmem:[#allocation17_spill] sm:$0xff] }
 0x6bf   : > { %v5002_v14 = vunpack.c.l.b16 %v4633_v15  ;;  %v4597_v58 = vpack.c.bf16 %v4469_v23, %v4469_v23  ;;  %v5064_v30 = vunpack.c.l.b16 %v4650_v11  ;;  %v5558_v15 = vmul.f32 -1.442695, %v11023_v52 }
 0x6c0   : > { %v4675_v21 = vpack.c.bf16 %v4547_v42, %v4547_v42  ;;  %v5063_v7 = vunpack.c.l.b16 %v4649_v53  ;;  %v5135_v9 = vunpack.c.l.b16 %v4676_v18  ;;  %v2421_v34 = vsel %vm2418_vm6, %v2420_v13, %v2416_v47 }
 0x6c1   : > { %v5016_v63 = vpack.c.b16 %v5003_v3, %v5002_v14  ;;  %v4876_v35 = vunpack.c.l.b16 %v4597_v58  ;;  %v2614_v29 = vmul.f32 %v2421_v34, %v10042_v39 }
 0x6c2   : > { %v6384_v37 = vpop.eup %6383  ;;  %v4204_v55 = vpop.xlane.xlu0 %4203  ;;  %v5134_v16 = vunpack.c.l.b16 %v4675_v21  ;;  %v5077_v8 = vpack.c.b16 %v5064_v30, %v5063_v7  ;;  %v2464_v21 = vand.u32 2147483648, %v10117_v26 }
 0x6c3   : > { %v10122_v12 = vpop.xlane.xlu1 %4269  ;;  %6387 = vrcp.f32 %v4204_v55  ;;  %5035 = vmatpush.bf16.xpose.msrb.mxu3 %v5016_v63  ;;  %5095 = vmatpush.bf16.xpose.msrb.mxu0 %v5078_v59  ;;  %v4470_v31 = vmul.f32 %v6384_v37, %v9818_v60  ;;  %v6386_v60 = vpop.eup %6385  ;;  %v2634_v3 = vpack.c.bf16 %v2614_v29, %v2614_v29 }
 0x6c4   : > { %v4202_v4 = vpop.xlane.xlu2 %4201  ;;  %6389 = vrcp.f32 %v10117_v26  ;;  %v5143_v25 = vpack.c.b16 %v5135_v9, %v5134_v16  ;;  %v10147_v57 = vadd.f32 1.0, %v6386_v60  ;;  %v11045_v9 = vld [vmem:[#allocation153_spill] sm:$0xff] }
 0x6c5   : > { %6391 = vrcp.f32 %v4202_v4  ;;  %v4797_v19 = vpop.f32.mrf.mxu3  ;;  %v4598_v1 = vpack.c.bf16 %v4470_v31, %v4470_v31  ;;  %v11028_v31 = vld [vmem:[#allocation144_spill] sm:$0xff] }
 0x6c6   : > { %6393 = vrcp.f32 %v4170_v49  ;;  %vm2503_vm11 = vweird.f32 %v10147_v57 }
 0x6c7   : > { %v4877_v46 = vunpack.c.l.b16 %v4598_v1 }
 0x6c9   : > { %v6388_v28 = vpop.eup %6387  ;;  %v4892_v5 = vpack.c.b16 %v4877_v46, %v4876_v35  ;;  %v11031_v46 = vld [vmem:[#allocation159_spill] sm:$0xff] }
 0x6ca   : > { %v10137_v40 = vpop.eup %6389  ;;  %v10139_v27 = vpop.xlane.xlu0 %4265  ;;  %v4504_v41 = vmul.f32 %v6388_v28, %v9876_v2 }
 0x6cb   : > { %v4172_v0 = vpop.xlane.xlu1 %4171  ;;  %v6392_v61 = vpop.eup %6391  ;;  %4915 = vmatpush.bf16.xpose.msra.mxu1 %v4892_v5  ;;  %5096 = vmatpush.bf16.xpose.msrb.mxu0 %v5077_v8  ;;  %v2454_v51 = vmul.f32 %v10137_v40, %v10117_v26  ;;  %vm2459_vm7 = vweird.f32 %v10137_v40  ;;  %v11034_v5 = vld [vmem:[#allocation158_spill] sm:$0xff] }
 0x6cc   : > { %v4236_v49 = vpop.xlane.xlu2 %4235  ;;  %v6394_v56 = vpop.eup %6393  ;;  %6395 = vrcp.f32 %v4172_v0  ;;  %v4503_v24 = vmul.f32 %v6392_v61, %v9870_v45  ;;  %v4632_v20 = vpack.c.bf16 %v4504_v41, %v4504_v41  ;;  %vm10173_vm8 = vmor %vm2458_vm10, %vm2459_vm7  ;;  %v11036_v41 = vld [vmem:[#allocation29_spill] sm:$0xff] }
 0x6cd   : > { %6397 = vrcp.f32 %v4236_v49  ;;  %v4487_v14 = vmul.f32 %v6394_v56, %v9854_v33  ;;  %v2455_v23 = vsub.f32 1.0, %v2454_v51  ;;  %v11024_v33 = vld [vmem:[#allocation74_spill] sm:$0xff] }
 0x6ce   : > { %v4631_v2 = vpack.c.bf16 %v4503_v24, %v4503_v24  ;;  %v5001_v50 = vunpack.c.l.b16 %v4632_v20  ;;  %6399 = vpow2.f32 %v5558_v15  ;;  %v11025_v11 = vpack.c.b16 %v10024_v48, %v11024_v33  ;;  %v11038_v15 = vld [vmem:[#allocation145_spill] sm:$0xff] }
 0x6cf   : > { %6401 = vrcp.f32 %v10147_v57  ;;  %v4615_v59 = vpack.c.bf16 %v4487_v14, %v4487_v14  ;;  %v2456_v54 = vmul.f32 %v10137_v40, %v2455_v23  ;;  %v11039_v14 = vld [vmem:[#allocation140_spill] sm:$0xff] }
 0x6d0   : > { %v5000_v32 = vunpack.c.l.b16 %v4631_v2  ;;  %6403 = vrcp.f32 %v10066_v62  ;;  %v11026_v62 = vld [vmem:[#allocation18_spill] sm:$0xff] }
 0x6d1   : > { %v5561_v44 = vmul.f32 -1.442695, %v11026_v62  ;;  %v4939_v4 = vunpack.c.l.b16 %v4615_v59  ;;  %v2457_v7 = vadd.f32 %v10137_v40, %v2456_v54 }
 0x6d2   : > { %v6396_v39 = vpop.eup %6395  ;;  %4916 = vmatmul.bf16.vlgmr.msra.gmra.mxu1 %v2634_v3  ;;  %v4168_v45 = vpop.xlane.xlu0 %4167  ;;  %v5015_v10 = vpack.c.b16 %v5001_v50, %v5000_v32 }
 0x6d3   : > { %5152 = vmatpush.bf16.xpose.msrb.mxu1 %v5143_v25  ;;  %v4234_v36 = vpop.xlane.xlu1 %4233  ;;  %6405 = vrcp.f32 %v4168_v45  ;;  %v4488_v63 = vmul.f32 %v6396_v39, %v9919_v38  ;;  %v6398_v53 = vpop.eup %6397  ;;  %v2462_v38 = vand.u32 2147483647, %v10117_v26  ;;  %v2465_v25 = vor.u32 1.1754944e-38, %v2464_v21  ;;  %v11035_v26 = vld [vmem:[#allocation163_spill] sm:$0xff] }
 0x6d4   : > { %v4166_v42 = vpop.xlane.xlu2 %4165  ;;  %6407 = vrcp.f32 %v4234_v36  ;;  %5036 = vmatpush.bf16.xpose.msrb.mxu3 %v5015_v10  ;;  %v6400_v37 = vpop.eup %6399  ;;  %v4520_v58 = vmul.f32 %v6398_v53, %v11028_v31  ;;  %v11037_v61 = vpack.c.b16 %v11035_v26, %v11036_v41  ;;  %v2461_v24 = vsel %vm10173_vm8, %v10137_v40, %v2457_v7  ;;  %v11040_v10 = vld [vmem:[#allocation142_spill] sm:$0xff] }
 0x6d5   : > { %6409 = vrcp.f32 %v4166_v42  ;;  %v4616_v18 = vpack.c.bf16 %v4488_v63, %v4488_v63  ;;  %v10161_v55 = vpop.eup %6401  ;;  %v10166_v19 = vadd.f32 1.0, %v6400_v37  ;;  %vm10178_vm9 = vcmp.eq.f32.partialorder %v2462_v38, 8.507059e+37  ;;  %v11042_v38 = vld [vmem:[#allocation91_spill] sm:$0xff] }
 0x6d6   : > { %6411 = vrcp.f32 %v11027_v17  ;;  %v6404_v13 = vpop.eup %6403  ;;  %v4648_v0 = vpack.c.bf16 %v4520_v58, %v4520_v58  ;;  %v2499_v20 = vmul.f32 %v10161_v55, %v10147_v57  ;;  %vm2504_vm12 = vweird.f32 %v10161_v55 }
 0x6d7   : > { %v4940_v48 = vunpack.c.l.b16 %v4616_v18  ;;  %6413 = vpow2.f32 %v5561_v44  ;;  %v4540_v3 = vmul.f32 %v6404_v13, %v11039_v14  ;;  %v11041_v18 = vld [vmem:[#allocation121_spill] sm:$0xff]  ;;  %vm10225_vm13 = vmor %vm2503_vm11, %vm2504_vm12  ;;  %vm2548_vm15 = vweird.f32 %v10166_v19 }
 0x6d8   : > { %6415 = vrcp.f32 %v10166_v19  ;;  %v5062_v36 = vunpack.c.l.b16 %v4648_v0  ;;  %v2500_v53 = vsub.f32 1.0, %v2499_v20  ;;  %v11043_v17 = vpack.c.b16 %v11041_v18, %v11042_v38 }
 0x6d9   : > { %v6406_v1 = vpop.eup %6405  ;;  %v4954_v30 = vpack.c.b16 %v4940_v48, %v4939_v4  ;;  %6417 = vrcp.f32 %v10122_v12  ;;  %v2466_v12 = vsel %vm10178_vm9, %v2465_v25, %v2461_v24 }
 0x6da   : > { %v6408_v47 = vpop.eup %6407  ;;  %v4486_v60 = vmul.f32 %v6406_v1, %v11031_v46  ;;  %v4230_v23 = vpop.xlane.xlu0 %4229  ;;  %v2617_v31 = vmul.f32 %v2466_v12, %v11012_v22  ;;  %v2501_v13 = vmul.f32 %v10161_v55, %v2500_v53  ;;  %v11044_v1 = vld [vmem:[#allocation60_spill] sm:$0xff]  ;;  %v2554_v53 = vand.u32 2147483648, %v10166_v19 }
 0x6db   : > { %5153 = vmatpush.bf16.xpose.msrb.mxu1 %v11025_v11  ;;  %v4268_v35 = vpop.xlane.xlu1 %4267  ;;  %v6410_v16 = vpop.eup %6409  ;;  %4975 = vmatpush.bf16.xpose.msrb.mxu2 %v4954_v30  ;;  %v4519_v8 = vmul.f32 %v6408_v47, %v11034_v5  ;;  %v2507_v30 = vand.u32 2147483647, %v10147_v57 }
 0x6dc   : > { %v4200_v34 = vpop.xlane.xlu2 %4199  ;;  %v4485_v49 = vmul.f32 %v6410_v16, %v11038_v15  ;;  %v4614_v56 = vpack.c.bf16 %v4486_v60, %v4486_v60  ;;  %v6412_v29 = vpop.eup %6411  ;;  %v11046_v60 = vld [vmem:[#allocation152_spill] sm:$0xff]  ;;  %v2502_v25 = vadd.f32 %v10161_v55, %v2501_v13 }
 0x6dd   : > { %v4647_v51 = vpack.c.bf16 %v4519_v8, %v4519_v8  ;;  %6419 = vrcp.f32 %v4200_v34  ;;  %v6414_v32 = vpop.eup %6413  ;;  %v4539_v42 = vmul.f32 %v6412_v29, %v11040_v10  ;;  %v2636_v34 = vpack.c.bf16 %v2617_v31, %v2617_v31 }
 0x6de   : > { %v4613_v2 = vpack.c.bf16 %v4485_v49, %v4485_v49  ;;  %v4938_v50 = vunpack.c.l.b16 %v4614_v56  ;;  %6421 = vrcp.f32 %v10104_v43  ;;  %v10200_v59 = vpop.eup %6415  ;;  %v10202_v33 = vadd.f32 1.0, %v6414_v32  ;;  %v11049_v56 = vld [vmem:[#allocation143_spill] sm:$0xff]  ;;  %v11052_v32 = vld [vmem:[#allocation160_spill] sm:$0xff] }
 0x6df   : > { %v4856_v39 = vpop.f32.mrf.mxu0  ;;  %v5061_v45 = vunpack.c.l.b16 %v4647_v51  ;;  %v4668_v43 = vpack.c.bf16 %v4540_v3, %v4540_v3  ;;  %v6418_v54 = vpop.eup %6417  ;;  %6423 = vrcp.f32 %v4230_v23  ;;  %v4667_v4 = vpack.c.bf16 %v4539_v42, %v4539_v42 }
 0x6e0   : > { %5167 = vst [vmem:[%s10092_s18 + $0x10] sm:$0xff] %v4856_v39  ;;  %v4937_v40 = vunpack.c.l.b16 %v4613_v2  ;;  %v2544_v58 = vmul.f32 %v10200_v59, %v10166_v19  ;;  %v4537_v7 = vmul.f32 %v6418_v54, %v11044_v1  ;;  %vm10232_vm14 = vcmp.eq.f32.partialorder %v2507_v30, 8.507059e+37 }
 0x6e1   : > { %v5076_v63 = vpack.c.b16 %v5062_v36, %v5061_v45  ;;  %v5127_v21 = vunpack.c.l.b16 %v4668_v43  ;;  %v5126_v46 = vunpack.c.l.b16 %v4667_v4  ;;  %v2506_v39 = vsel %vm10225_vm13, %v10161_v55, %v2502_v25  ;;  %v11053_v36 = vld [vmem:[#allocation116_spill] sm:$0xff] }
 0x6e2   : > { %v4953_v37 = vpack.c.b16 %v4938_v50, %v4937_v40  ;;  %v2545_v5 = vsub.f32 1.0, %v2544_v58  ;;  %v4264_v8 = vpop.xlane.xlu0 %4263  ;;  %vm2549_vm0 = vweird.f32 %v10200_v59  ;;  %v2555_v30 = vor.u32 1.1754944e-38, %v2554_v53 }
 0x6e3   : > { %5154 = vmatpush.bf16.xpose.msrb.mxu1 %v11037_v61  ;;  %v4198_v11 = vpop.xlane.xlu1 %4197  ;;  %5097 = vmatpush.bf16.xpose.msrb.mxu0 %v5076_v63  ;;  %v6420_v44 = vpop.eup %6419  ;;  %v4665_v61 = vpack.c.bf16 %v4537_v7, %v4537_v7  ;;  %v2552_v63 = vand.u32 2147483647, %v10166_v19  ;;  %vm10254_vm1 = vmor %vm2548_vm15, %vm2549_vm0  ;;  %vm2593_vm3 = vweird.f32 %v10202_v33  ;;  %v2597_v49 = vand.u32 2147483647, %v10202_v33 }
 0x6e4   : > { %6425 = vrcp.f32 %v4198_v11  ;;  %4976 = vmatpush.bf16.xpose.msrb.mxu2 %v4953_v37  ;;  %v6422_v48 = vpop.eup %6421  ;;  %v4502_v22 = vmul.f32 %v6420_v44, %v11045_v9  ;;  %v4262_v26 = vpop.xlane.xlu2 %4261  ;;  %v2546_v14 = vmul.f32 %v10200_v59, %v2545_v5  ;;  %v11054_v37 = vld [vmem:[#allocation21_spill] sm:$0xff] }
 0x6e5   : > { %6427 = vrcp.f32 %v4268_v35  ;;  %v2509_v35 = vand.u32 2147483648, %v10147_v57  ;;  %v4538_v16 = vmul.f32 %v6422_v48, %v11046_v60  ;;  %v6424_v28 = vpop.eup %6423  ;;  %v5124_v45 = vunpack.c.l.b16 %v4665_v61  ;;  %v11057_v48 = vld [vmem:[#allocation80_spill] sm:$0xff]  ;;  %v11059_v60 = vld [vmem:[#allocation95_spill] sm:$0xff] }
 0x6e6   : > { %6429 = vrcp.f32 %v10202_v33  ;;  %v4630_v24 = vpack.c.bf16 %v4502_v22, %v4502_v22  ;;  %v4517_v23 = vmul.f32 %v6424_v28, %v11052_v32  ;;  %v2547_v44 = vadd.f32 %v10200_v59, %v2546_v14 }
 0x6e7   : > { %6431 = vrcp.f32 %v10139_v27  ;;  %v4858_v47 = vpop.f32.mrf.mxu0  ;;  %v5139_v27 = vpack.c.b16 %v5127_v21, %v5126_v46  ;;  %v2510_v2 = vor.u32 1.1754944e-38, %v2509_v35  ;;  %v4666_v50 = vpack.c.bf16 %v4538_v16, %v4538_v16  ;;  %v11058_v35 = vld [vmem:[#allocation173_spill] sm:$0xff] }
 0x6e8   : > { %v4999_v12 = vunpack.c.l.b16 %v4630_v24  ;;  %v4645_v38 = vpack.c.bf16 %v4517_v23, %v4517_v23  ;;  %v2551_v19 = vsel %vm10254_vm1, %v10200_v59, %v2547_v44  ;;  %vm2553_vm2 = vcmp.eq.f32.partialorder %v2552_v63, 8.507059e+37 }
 0x6e9   : > { %v5125_v11 = vunpack.c.l.b16 %v4666_v50  ;;  %v2511_v54 = vsel %vm10232_vm14, %v2510_v2, %v2506_v39  ;;  %v2599_v59 = vand.u32 2147483648, %v10202_v33  ;;  %vm2598_vm6 = vcmp.eq.f32.partialorder %v2597_v49, 8.507059e+37 }
 0x6ea   : > { %v6426_v0 = vpop.eup %6425  ;;  %v2620_v7 = vmul.f32 %v2511_v54, %v10099_v6  ;;  %v5059_v22 = vunpack.c.l.b16 %v4645_v38  ;;  %v2556_v6 = vsel %vm2553_vm2, %v2555_v30, %v2551_v19 }
 0x6eb   : > { %5155 = vmatpush.bf16.xpose.msrb.mxu1 %v11043_v17  ;;  %v4232_v41 = vpop.xlane.xlu1 %4231  ;;  %v6428_v15 = vpop.eup %6427  ;;  %4977 = vmatmul.bf16.vlgmr.msrb.gmra.mxu2 %v2636_v34  ;;  %v4501_v29 = vmul.f32 %v6426_v0, %v11049_v56  ;;  %v5138_v58 = vpack.c.b16 %v5125_v11, %v5124_v45  ;;  %v2623_v61 = vmul.f32 %v2556_v6, %v11023_v52  ;;  %v2600_v56 = vor.u32 1.1754944e-38, %v2599_v59 }
 0x6ec   : > { %6433 = vrcp.f32 %v4232_v41  ;;  %v10230_v20 = vpop.eup %6429  ;;  %v4536_v40 = vmul.f32 %v6428_v15, %v11053_v36 }
 0x6ed   : > { %6435 = vrcp.f32 %v4264_v8  ;;  %v6432_v57 = vpop.eup %6431  ;;  %v4629_v3 = vpack.c.bf16 %v4501_v29, %v4501_v29  ;;  %v2589_v10 = vmul.f32 %v10230_v20, %v10202_v33  ;;  %v2638_v8 = vpack.c.bf16 %v2620_v7, %v2620_v7 }
 0x6ee   : > { %6437 = vrcp.f32 %v4262_v26  ;;  %v4535_v43 = vmul.f32 %v6432_v57, %v11054_v37  ;;  %v4664_v13 = vpack.c.bf16 %v4536_v40, %v4536_v40  ;;  %vm2594_vm4 = vweird.f32 %v10230_v20 }
 0x6ef   : > { %v4998_v42 = vunpack.c.l.b16 %v4629_v3  ;;  %v2590_v1 = vsub.f32 1.0, %v2589_v10  ;;  %vm2595_vm5 = vmor %vm2593_vm3, %vm2594_vm4  ;;  %v2640_v51 = vpack.c.bf16 %v2623_v61, %v2623_v61 }
 0x6f0   : > { %v4663_v9 = vpack.c.bf16 %v4535_v43, %v4535_v43  ;;  %v5123_v34 = vunpack.c.l.b16 %v4664_v13 }
 0x6f1   : > { %v5014_v18 = vpack.c.b16 %v4999_v12, %v4998_v42  ;;  %v2591_v5 = vmul.f32 %v10230_v20, %v2590_v1 }
 0x6f2   : > { %v6434_v55 = vpop.eup %6433  ;;  %v5122_v25 = vunpack.c.l.b16 %v4663_v9 }
 0x6f3   : > { %5156 = vmatpush.bf16.xpose.msrb.mxu1 %v5139_v27  ;;  %v6436_v17 = vpop.eup %6435  ;;  %v4518_v31 = vmul.f32 %v6434_v55, %v11057_v48  ;;  %5037 = vmatpush.bf16.xpose.msrb.mxu3 %v5014_v18  ;;  %v2592_v15 = vadd.f32 %v10230_v20, %v2591_v5 }
 0x6f4   : > { %v6438_v21 = vpop.eup %6437  ;;  %v4534_v46 = vmul.f32 %v6436_v17, %v11058_v35  ;;  %v5137_v26 = vpack.c.b16 %v5123_v34, %v5122_v25 }
 0x6f5   : > { %v4646_v47 = vpack.c.bf16 %v4518_v31, %v4518_v31  ;;  %v4533_v16 = vmul.f32 %v6438_v21, %v11059_v60  ;;  %v2596_v2 = vsel %vm2595_vm5, %v10230_v20, %v2592_v15 }
 0x6f6   : > { %v4662_v27 = vpack.c.bf16 %v4534_v46, %v4534_v46  ;;  %v2601_v50 = vsel %vm2598_vm6, %v2600_v56, %v2596_v2 }
 0x6f7   : > { %v5060_v28 = vunpack.c.l.b16 %v4646_v47  ;;  %v4661_v41 = vpack.c.bf16 %v4533_v16, %v4533_v16  ;;  %v2626_v33 = vmul.f32 %v2601_v50, %v11026_v62 }
 0x6f8   : > { %v5121_v24 = vunpack.c.l.b16 %v4662_v27 }
 0x6f9   : > { %v5075_v0 = vpack.c.b16 %v5060_v28, %v5059_v22  ;;  %v5120_v29 = vunpack.c.l.b16 %v4661_v41  ;;  %v2642_v57 = vpack.c.bf16 %v2626_v33, %v2626_v33 }
 0x6fa   : > { %5038 = vmatmul.bf16.vlgmr.msrb.gmra.mxu3 %v2638_v8 }
 0x6fb   : > { %5157 = vmatpush.bf16.xpose.msrb.mxu1 %v5138_v58  ;;  %5098 = vmatpush.bf16.xpose.msrb.mxu0 %v5075_v0  ;;  %v5136_v52 = vpack.c.b16 %v5121_v24, %v5120_v29 }
 0x702   : > { %5099 = vmatmul.bf16.vlgmr.msrb.gmra.mxu0 %v2640_v51 }
 0x703   : > { %5158 = vmatpush.bf16.xpose.msrb.mxu1 %v5137_v26 }
 0x70b   : > { %5159 = vmatpush.bf16.xpose.msrb.mxu1 %v5136_v52 }
 0x712   : > { %5160 = vmatmul.bf16.vlgmr.msrb.gmra.mxu1 %v2642_v57 }
 0x74f   : > { %v4917_v14 = vpop.f32.mrf.mxu1 }
 0x750   : > { %5168 = vst [vmem:[%s10092_s18 + $0x18] sm:$0xff] %v4917_v14 }
 0x757   : > { %v4919_v3 = vpop.f32.mrf.mxu1 }
 0x76e   : > { %v4978_v32 = vpop.f32.mrf.mxu2 }
 0x76f   : > { %5169 = vst [vmem:[%s10092_s18 + $0x20] sm:$0xff] %v4978_v32 }
 0x776   : > { %v4980_v20 = vpop.f32.mrf.mxu2 }
 0x77d   : > { %v5039_v23 = vpop.f32.mrf.mxu3 }
 0x77e   : > { %5170 = vst [vmem:[%s10092_s18 + $0x28] sm:$0xff] %v5039_v23 }
 0x77f   : > { %v5100_v39 = vpop.f32.mrf.mxu0 }
 0x780   : > { %5171 = vst [vmem:[%s10092_s18 + $0x30] sm:$0xff] %v5100_v39 }
 0x785   : > { %v5041_v62 = vpop.f32.mrf.mxu3 }
 0x787   : > { %v5102_v45 = vpop.f32.mrf.mxu0 }
 0x78f   : > { %v5161_v36 = vpop.f32.mrf.mxu1 }
 0x790   : > { %5172 = vst [vmem:[%s10092_s18 + $0x38] sm:$0xff] %v5161_v36 }
 0x791   : > { %6467 = shalt.err (!%p6464_p5)
}
 0x792   : > { %s6520_s12 = smov 128   ;;  %s6521_s18 = smov 8  }
 0x793   : > { %5702 = dma.vmem_to_hbm [thread:$0]  (%p6602_p4), %s5189_s15, 1024, %s5191_s30, %s5174_s8, %s6520_s12, %s6520_s12, %s6521_s18  }
 0x797   : > { %v5163_v40 = vpop.f32.mrf.mxu1 }
 0x798 PF: > { %p5709_p6 = scmp.ge.s32.totalorder %s6518_s29, 2  ;;  %s5205_s21 = sand.u32 1, %s6498_s24  }
 0x799   : > { %s5206_s22 = scalar_lea.sflag [#allocation5], %s5205_s21 }
 0x79a   : > { %p5705_p7 = pnand %p5709_p6, %p6609_p8 }
 0x79c   : > { %p5706_p9 = pneg %p5705_p7 }
 0x79e   : > { %6493 = dma.done.wait (%p5706_p9), %s5206_s22, 1024  }
 0x79f   : > { %6495 = vsyncadd (%p5706_p9), %s5206_s22, 4294966272  ;;  %s20_s29 = sadd.s32 1, %s6518_s29   ;;  %s11060_s24 = smov %s6502_s25 }
 0x7a0   : > { %p17_p10 = scmp.ge.s32.totalorder %s20_s29, 4   ;;  %s11061_s25 = smov %s6506_s26 }
 0x7a1   : > { %s11062_s26 = smov %s6615_s14  ;;  %s11063_s27 = smov %s6514_s28 }
 0x7a2   : > { %s11064_s28 = smov %s11066_s9  ;;  %19 = sbr.rel (!%p17_p10) target bundleno = 4 (0x4), region = 94 }
 0x7a7   :  { %5212 = vsyncpa [#allocation5], 1 }
 0x7a8   :  { %5214 = vsyncpa [#allocation5 + $0x1], 1 }

</bundles_post_ra>
